<compile_context>
chip_gen: v7x
topology: tpu7x:2x2x1
jax: 0.10.0
libtpu: 0.0.40
codegen_flags: <defaults>
</compile_context>

<pallas_src>
import functools
import math

import jax
import jax.numpy as jnp
from jax.experimental import pallas as pl
from jax.experimental.pallas import tpu as pltpu


# Tap offsets of the 2x2 stride-1 window on the space-to-depth grid.
# Tap t = I*2 + J corresponds to the 2x2 block (i, j) = (2I + r, 2J + s) of the
# original 4x4 stride-2 kernel.
TAPS = ((0, 0), (0, 1), (1, 0), (1, 1))


# --------------------------------------------------------------------------
# In-kernel helpers (traced jnp code)
# --------------------------------------------------------------------------
def _leaky_relu(y):
    # max(y, 0.2*y) == leaky_relu(y, 0.2); one VALU op per element.
    return jnp.maximum(y, 0.2 * y)


def _batchnorm_train(y, gamma, beta, eps=1e-5):
    # Training-mode BatchNorm2d over the (N, H, W) rows, per channel.
    # Single-pass biased variance; max(var, 0) guards fp cancellation.
    m = y.shape[0]
    inv_m = 1.0 / m
    mean = jnp.sum(y, axis=0, keepdims=True) * inv_m
    var = jnp.sum(y * y, axis=0, keepdims=True) * inv_m - mean * mean
    var = jnp.maximum(var, 0.0)
    return (y - mean) * jax.lax.rsqrt(var + eps) * gamma + beta


def _conv_taps(z_ref, w_ref, ho, wo, ck):
    # Sum of four MXU matmuls over unit-stride 2x2 windows of the
    # space-to-depth activation: equivalent to the 4x4 stride-2 conv, but the
    # (M, 16*C) patch matrix is never materialized (not in HBM, not in VMEM).
    n = z_ref.shape[0]
    m = n * ho * wo
    acc = None
    for t, (di, dj) in enumerate(TAPS):
        a = z_ref[:, di:di + ho, dj:dj + wo, :].reshape(m, ck)   # bf16 window
        part = jnp.dot(a, w_ref[t * ck:(t + 1) * ck, :],
                       preferred_element_type=jnp.float32)
        acc = part if acc is None else acc + part
    return acc                                                    # (m, C_out) f32


# --------------------------------------------------------------------------
# Pallas kernels
# --------------------------------------------------------------------------
def conv1_lrelu_kernel(p_ref, w_ref, o_ref):
    # conv1: a single (M, 16) x (16, 128) bf16 MXU matmul + leaky_relu.
    y = jnp.dot(p_ref[...], w_ref[...], preferred_element_type=jnp.float32)
    o_ref[...] = _leaky_relu(y).astype(o_ref.dtype)


def conv_bn_lrelu_kernel(z_ref, w_ref, g_ref, b_ref, o_ref, *, ho, wo, ck):
    # conv (4 tap-matmuls) + training-mode BN + leaky_relu.
    y = _conv_taps(z_ref, w_ref, ho, wo, ck)
    y = _batchnorm_train(y, g_ref[...], b_ref[...])
    o_ref[...] = _leaky_relu(y).astype(o_ref.dtype)


def conv_bn_lrelu_fc_sigmoid_kernel(z_ref, w_ref, g_ref, b_ref, wf_ref, bf_ref,
                                    o_ref, *, ho, wo, ck):
    # conv3 + bn3 + leaky_relu, with fc_final + sigmoid fused in the epilogue.
    n = z_ref.shape[0]
    y = _conv_taps(z_ref, w_ref, ho, wo, ck)                  # (n*9, 512) f32
    y = _batchnorm_train(y, g_ref[...], b_ref[...])
    y = _leaky_relu(y)
    # fc_final: reduce the 9 spatial rows of each image directly against a
    # single (9, 512) weight (NHWC row order) — no O(batch^2) selection matmul
    # and no batch-tiled weight.
    c_out = y.shape[1]
    y3 = y.reshape(n, ho * wo, c_out)                         # (n, 9, 512)
    t = y3 * wf_ref[...]                                      # bcast (9, 512)
    s = jnp.sum(t, axis=2, keepdims=True)                     # (n, 9, 1) lane reduce
    logits = jnp.sum(s, axis=1) + bf_ref[...]                 # (n, 1)
    o_ref[...] = jax.nn.sigmoid(logits)


# --------------------------------------------------------------------------
# pallas_call wrappers (whole-batch single VMEM blocks; BN needs global stats)
# --------------------------------------------------------------------------
def _vmem_spec():
    return pl.BlockSpec(memory_space=pltpu.MemorySpace.VMEM)


def _nbytes(*xs):
    return sum(math.prod(x.shape) * jnp.dtype(x.dtype).itemsize for x in xs)


def _vmem_capacity_bytes():
    try:
        return int(pltpu.get_tpu_info().vmem_capacity_bytes)
    except Exception:
        return 64 << 20       # conservative floor (v7x per-TC VMEM)


def _compiler_params(*bufs):
    # Gridless single-block calls: no double buffering, so no 2x factor.
    # 4x headroom covers in-kernel f32 temporaries (acc, y*y, window copies);
    # clamp to physical VMEM capacity (v7x: 64 MiB) minus a small reserve.
    need = _nbytes(*bufs)
    limit = max(4 * need + (8 << 20), 32 << 20)
    limit = min(limit, _vmem_capacity_bytes() - (2 << 20))
    return pltpu.CompilerParams(vmem_limit_bytes=int(limit))


def pallas_conv1_lrelu(p, w):
    out = jax.ShapeDtypeStruct((p.shape[0], w.shape[1]), jnp.bfloat16)
    return pl.pallas_call(
        conv1_lrelu_kernel,
        out_shape=out,
        in_specs=[_vmem_spec()] * 2,
        out_specs=_vmem_spec(),
        compiler_params=_compiler_params(p, w, out),
    )(p, w)


def pallas_conv_bn_lrelu(z, w, g, b, *, ho, wo, ck):
    n = z.shape[0]
    out = jax.ShapeDtypeStruct((n * ho * wo, w.shape[1]), jnp.bfloat16)
    kern = functools.partial(conv_bn_lrelu_kernel, ho=ho, wo=wo, ck=ck)
    return pl.pallas_call(
        kern,
        out_shape=out,
        in_specs=[_vmem_spec()] * 4,
        out_specs=_vmem_spec(),
        compiler_params=_compiler_params(z, w, g, b, out),
    )(z, w, g, b)


def pallas_conv_bn_lrelu_fc_sigmoid(z, w, g, b, wf, bf, *, ho, wo, ck):
    out = jax.ShapeDtypeStruct((z.shape[0], 1), jnp.float32)
    kern = functools.partial(conv_bn_lrelu_fc_sigmoid_kernel, ho=ho, wo=wo, ck=ck)
    return pl.pallas_call(
        kern,
        out_shape=out,
        in_specs=[_vmem_spec()] * 6,
        out_specs=_vmem_spec(),
        compiler_params=_compiler_params(z, w, g, b, wf, bf, out),
    )(z, w, g, b, wf, bf)


# --------------------------------------------------------------------------
# Host-side glue: pad + 2x2 space-to-depth (pure XLA reshape/transpose).
# Channel order of the result: (r*2 + s)*C + c, with (r, s) the intra-2x2
# offsets — matches the tap weight layout built in init_params().
# --------------------------------------------------------------------------
def pad_space_to_depth(x, pad_lo=1, pad_hi=1):
    """(N, H, W, C) -> (N, (H+pads)/2, (W+pads)/2, 4*C)."""
    n, h, w, c = x.shape
    xp = jnp.pad(x, ((0, 0), (pad_lo, pad_hi), (pad_lo, pad_hi), (0, 0)))
    hp, wp = h + pad_lo + pad_hi, w + pad_lo + pad_hi
    z = xp.reshape(n, hp // 2, 2, wp // 2, 2, c)
    z = z.transpose(0, 1, 3, 2, 4, 5)
    return z.reshape(n, hp // 2, wp // 2, 4 * c)


# --------------------------------------------------------------------------
# Parameters (deterministic, mirroring _netD.init_weights / defaults)
# --------------------------------------------------------------------------
def init_params(key):
    std = 0.02
    scale = std * math.sqrt(3.0)
    k1, k2, k3, k4, k5 = jax.random.split(key, 5)
    w1 = jax.random.uniform(k1, (128, 1, 4, 4), jnp.float32, -scale, scale)
    w2 = jax.random.uniform(k2, (256, 128, 4, 4), jnp.float32, -scale, scale)
    w3 = jax.random.uniform(k3, (512, 256, 4, 4), jnp.float32, -scale, scale)
    wf = jax.random.uniform(k4, (1, 512 * 3 * 3), jnp.float32, -scale, scale)
    kb = 1.0 / math.sqrt(512 * 3 * 3)          # nn.Linear default bias init
    bf = jax.random.uniform(k5, (1,), jnp.float32, -kb, kb)

    def to_tap_weight(w):
        # (C_out, C_in, 4, 4) -> (16*C_in, C_out).  Row index =
        #   (I*2+J)*4*C_in + (r*2+s)*C_in + c_in, where the original kernel tap
        # is (i, j) = (2I + r, 2J + s) — matches the space-to-depth channel
        # order and the kernel's per-tap weight slices.
        co, ci, _, _ = w.shape
        w6 = w.reshape(co, ci, 2, 2, 2, 2)            # (co, ci, I, r, J, s)
        return w6.transpose(2, 4, 3, 5, 1, 0).reshape(16 * ci, co)

    return {
        "w1": to_tap_weight(w1).astype(jnp.bfloat16),     # (16, 128)
        "w2": to_tap_weight(w2).astype(jnp.bfloat16),     # (2048, 256)
        "w3": to_tap_weight(w3).astype(jnp.bfloat16),     # (4096, 512)
        # BatchNorm affine params: weight=1 (init_bn), bias=0 (default).
        "g2": jnp.ones((1, 256), jnp.float32),
        "b2": jnp.zeros((1, 256), jnp.float32),
        "g3": jnp.ones((1, 512), jnp.float32),
        "b3": jnp.zeros((1, 512), jnp.float32),
        # fc weight reordered from PyTorch NCHW-flatten (c, oh, ow) to NHWC
        # rows: wf_nhwc[oh*3 + ow, c] = wf[0, c*9 + oh*3 + ow].
        "wf": wf.reshape(512, 3, 3).transpose(1, 2, 0).reshape(9, 512),
        "bf": bf.reshape(1, 1),
    }


# --------------------------------------------------------------------------
# Forward pass
# --------------------------------------------------------------------------
def netd_forward(params, x):
    """x: (batch_size, 784) f32 -> (batch_size, 1) f32 (sigmoid prob)."""
    b = x.shape[0]
    x = x.reshape(b, 28, 28, 1).astype(jnp.bfloat16)          # NHWC, bf16

    # conv1 (1 -> 128, 28 -> 14) + leaky_relu    (bn1 unused in forward).
    # C_in = 1, so building the full 16-wide patch matrix on the host is tiny
    # and gives a single K=16 MXU matmul.
    z1 = pad_space_to_depth(x)                                # (b, 15, 15, 4)
    p1 = jnp.concatenate(
        [z1[:, i:i + 14, j:j + 14, :] for (i, j) in TAPS], axis=-1)  # (b,14,14,16)
    p1 = p1.reshape(b * 14 * 14, 16)
    y1 = pallas_conv1_lrelu(p1, params["w1"])                 # (b*196, 128) bf16

    # conv2 (128 -> 256, 14 -> 7) + bn2 + leaky_relu.  Window gathering is
    # done in-kernel from the compact space-to-depth block (no 16x im2col).
    z2 = pad_space_to_depth(y1.reshape(b, 14, 14, 128))       # (b, 8, 8, 512)
    y2 = pallas_conv_bn_lrelu(z2, params["w2"], params["g2"], params["b2"],
                              ho=7, wo=7, ck=512)             # (b*49, 256) bf16

    # conv3 (256 -> 512, 7 -> 3) + bn3 + leaky_relu + fc_final + sigmoid.
    # The bottom/right padding row of the 9x9 padded grid is never read by the
    # 3x3 output, so pad (1, 0) only — keeps the space-to-depth grid even.
    z3 = pad_space_to_depth(y2.reshape(b, 7, 7, 256),
                            pad_lo=1, pad_hi=0)               # (b, 4, 4, 1024)
    return pallas_conv_bn_lrelu_fc_sigmoid(
        z3, params["w3"], params["g3"], params["b3"],
        params["wf"], params["bf"], ho=3, wo=3, ck=1024)      # (b, 1) f32


# --------------------------------------------------------------------------
if __name__ == "__main__":
    key = jax.random.PRNGKey(0)
    pkey, xkey = jax.random.split(key)
    params = init_params(pkey)
    x = jax.random.normal(xkey, (2, 784), jnp.float32)        # batch=2, 28*28 pixels

    out = jax.jit(netd_forward)(params, x)
    out = jax.block_until_ready(out)
    assert out.shape == (2, 1)
    assert bool(jnp.all(jnp.isfinite(out)))
    assert bool(jnp.all((out >= 0.0) & (out <= 1.0)))
    print("KERNEL_OK")
</pallas_src>

<mosaic_0001>
module attributes {stable_mosaic.version = 11 : i64} {
  func.func @conv1_lrelu_kernel(%arg0: memref<392x16xbf16, #tpu.memory_space<vmem>>, %arg1: memref<16x128xbf16, #tpu.memory_space<vmem>>, %arg2: memref<392x128xbf16, #tpu.memory_space<vmem>>) attributes {dimension_semantics = [], scalar_prefetch = 0 : i64, scratch_operands = 0 : i64, tpu.core_type = #tpu.core_type<tc>} {
    %c0 = arith.constant 0 : index
    %c0_0 = arith.constant 0 : index
    %0 = vector.load %arg0[%c0, %c0_0] : memref<392x16xbf16, #tpu.memory_space<vmem>>, vector<392x16xbf16>
    %c0_1 = arith.constant 0 : index
    %c0_2 = arith.constant 0 : index
    %1 = vector.load %arg1[%c0_1, %c0_2] : memref<16x128xbf16, #tpu.memory_space<vmem>>, vector<16x128xbf16>
    %cst = arith.constant dense<0.000000e+00> : vector<392x128xf32>
    %2 = tpu.matmul %0, %1, %cst {dimension_numbers = #tpu.dot_dimension_numbers<[1], [0], [0], [1], [0, 0, 1, 1], [], []>} : vector<392x16xbf16>, vector<16x128xbf16>, vector<392x128xf32> -> vector<392x128xf32>
    %cst_3 = arith.constant 2.000000e-01 : f32
    %3 = vector.broadcast %cst_3 : f32 to vector<392x128xf32>
    %4 = arith.mulf %3, %2 : vector<392x128xf32>
    %5 = arith.maximumf %2, %4 : vector<392x128xf32>
    %6 = arith.truncf %5 : vector<392x128xf32> to vector<392x128xbf16>
    %c0_4 = arith.constant 0 : index
    %c0_5 = arith.constant 0 : index
    %7 = vector.load %arg2[%c0_4, %c0_5] : memref<392x128xbf16, #tpu.memory_space<vmem>>, vector<392x128xbf16>
    tpu.vector_store %arg2[%c0_4, %c0_5], %6 {strides = array<i32>} : memref<392x128xbf16, #tpu.memory_space<vmem>>, vector<392x128xbf16>,
    return
  }
}

module attributes {stable_mosaic.version = 11 : i64} {
  func.func @conv_bn_lrelu_kernel(%arg0: memref<2x8x8x512xbf16, #tpu.memory_space<vmem>>, %arg1: memref<2048x256xbf16, #tpu.memory_space<vmem>>, %arg2: memref<1x256xf32, #tpu.memory_space<vmem>>, %arg3: memref<1x256xf32, #tpu.memory_space<vmem>>, %arg4: memref<98x256xbf16, #tpu.memory_space<vmem>>) attributes {dimension_semantics = [], scalar_prefetch = 0 : i64, scratch_operands = 0 : i64, tpu.core_type = #tpu.core_type<tc>} {
    %c0 = arith.constant 0 : index
    %c0_0 = arith.constant 0 : index
    %c0_1 = arith.constant 0 : index
    %c0_2 = arith.constant 0 : index
    %0 = vector.load %arg0[%c0, %c0_0, %c0_1, %c0_2] : memref<2x8x8x512xbf16, #tpu.memory_space<vmem>>, vector<2x7x7x512xbf16>
    %1 = vector.shape_cast %0 : vector<2x7x7x512xbf16> to vector<98x512xbf16>
    %c0_3 = arith.constant 0 : index
    %c0_4 = arith.constant 0 : index
    %2 = vector.load %arg1[%c0_3, %c0_4] : memref<2048x256xbf16, #tpu.memory_space<vmem>>, vector<512x256xbf16>
    %cst = arith.constant dense<0.000000e+00> : vector<98x256xf32>
    %3 = tpu.matmul %1, %2, %cst {dimension_numbers = #tpu.dot_dimension_numbers<[1], [0], [0], [1], [0, 0, 1, 1], [], []>} : vector<98x512xbf16>, vector<512x256xbf16>, vector<98x256xf32> -> vector<98x256xf32>
    %c0_5 = arith.constant 0 : index
    %c0_6 = arith.constant 0 : index
    %c1 = arith.constant 1 : index
    %c0_7 = arith.constant 0 : index
    %4 = vector.load %arg0[%c0_5, %c0_6, %c1, %c0_7] : memref<2x8x8x512xbf16, #tpu.memory_space<vmem>>, vector<2x7x7x512xbf16>
    %5 = vector.shape_cast %4 : vector<2x7x7x512xbf16> to vector<98x512xbf16>
    %c512 = arith.constant 512 : index
    %c0_8 = arith.constant 0 : index
    %6 = vector.load %arg1[%c512, %c0_8] : memref<2048x256xbf16, #tpu.memory_space<vmem>>, vector<512x256xbf16>
    %cst_9 = arith.constant dense<0.000000e+00> : vector<98x256xf32>
    %7 = tpu.matmul %5, %6, %cst_9 {dimension_numbers = #tpu.dot_dimension_numbers<[1], [0], [0], [1], [0, 0, 1, 1], [], []>} : vector<98x512xbf16>, vector<512x256xbf16>, vector<98x256xf32> -> vector<98x256xf32>
    %8 = arith.addf %3, %7 : vector<98x256xf32>
    %c0_10 = arith.constant 0 : index
    %c1_11 = arith.constant 1 : index
    %c0_12 = arith.constant 0 : index
    %c0_13 = arith.constant 0 : index
    %9 = vector.load %arg0[%c0_10, %c1_11, %c0_12, %c0_13] : memref<2x8x8x512xbf16, #tpu.memory_space<vmem>>, vector<2x7x7x512xbf16>
    %10 = vector.shape_cast %9 : vector<2x7x7x512xbf16> to vector<98x512xbf16>
    %c1024 = arith.constant 1024 : index
    %c0_14 = arith.constant 0 : index
    %11 = vector.load %arg1[%c1024, %c0_14] : memref<2048x256xbf16, #tpu.memory_space<vmem>>, vector<512x256xbf16>
    %cst_15 = arith.constant dense<0.000000e+00> : vector<98x256xf32>
    %12 = tpu.matmul %10, %11, %cst_15 {dimension_numbers = #tpu.dot_dimension_numbers<[1], [0], [0], [1], [0, 0, 1, 1], [], []>} : vector<98x512xbf16>, vector<512x256xbf16>, vector<98x256xf32> -> vector<98x256xf32>
    %13 = arith.addf %8, %12 : vector<98x256xf32>
    %c0_16 = arith.constant 0 : index
    %c1_17 = arith.constant 1 : index
    %c1_18 = arith.constant 1 : index
    %c0_19 = arith.constant 0 : index
    %14 = vector.load %arg0[%c0_16, %c1_17, %c1_18, %c0_19] : memref<2x8x8x512xbf16, #tpu.memory_space<vmem>>, vector<2x7x7x512xbf16>
    %15 = vector.shape_cast %14 : vector<2x7x7x512xbf16> to vector<98x512xbf16>
    %c1536 = arith.constant 1536 : index
    %c0_20 = arith.constant 0 : index
    %16 = vector.load %arg1[%c1536, %c0_20] : memref<2048x256xbf16, #tpu.memory_space<vmem>>, vector<512x256xbf16>
    %cst_21 = arith.constant dense<0.000000e+00> : vector<98x256xf32>
    %17 = tpu.matmul %15, %16, %cst_21 {dimension_numbers = #tpu.dot_dimension_numbers<[1], [0], [0], [1], [0, 0, 1, 1], [], []>} : vector<98x512xbf16>, vector<512x256xbf16>, vector<98x256xf32> -> vector<98x256xf32>
    %18 = arith.addf %13, %17 : vector<98x256xf32>
    %c0_22 = arith.constant 0 : index
    %c0_23 = arith.constant 0 : index
    %19 = vector.load %arg2[%c0_22, %c0_23] : memref<1x256xf32, #tpu.memory_space<vmem>>, vector<1x256xf32>
    %c0_24 = arith.constant 0 : index
    %c0_25 = arith.constant 0 : index
    %20 = vector.load %arg3[%c0_24, %c0_25] : memref<1x256xf32, #tpu.memory_space<vmem>>, vector<1x256xf32>
    %cst_26 = arith.constant dense<0.000000e+00> : vector<256xf32>
    %21 = vector.multi_reduction <add>, %18, %cst_26 [0] : vector<98x256xf32> to vector<256xf32>
    %22 = vector.shape_cast %21 : vector<256xf32> to vector<1x256xf32>
    %cst_27 = arith.constant 0.0102040814 : f32
    %23 = vector.broadcast %cst_27 : f32 to vector<1x256xf32>
    %24 = arith.mulf %22, %23 : vector<1x256xf32>
    %25 = arith.mulf %18, %18 : vector<98x256xf32>
    %cst_28 = arith.constant dense<0.000000e+00> : vector<256xf32>
    %26 = vector.multi_reduction <add>, %25, %cst_28 [0] : vector<98x256xf32> to vector<256xf32>
    %27 = vector.shape_cast %26 : vector<256xf32> to vector<1x256xf32>
    %cst_29 = arith.constant 0.0102040814 : f32
    %28 = vector.broadcast %cst_29 : f32 to vector<1x256xf32>
    %29 = arith.mulf %27, %28 : vector<1x256xf32>
    %30 = arith.mulf %24, %24 : vector<1x256xf32>
    %31 = arith.subf %29, %30 : vector<1x256xf32>
    %cst_30 = arith.constant 0.000000e+00 : f32
    %32 = vector.broadcast %cst_30 : f32 to vector<1x256xf32>
    %33 = arith.maximumf %31, %32 : vector<1x256xf32>
    %34 = vector.broadcast %24 : vector<1x256xf32> to vector<98x256xf32>
    %35 = arith.subf %18, %34 : vector<98x256xf32>
    %cst_31 = arith.constant 9.99999974E-6 : f32
    %36 = vector.broadcast %cst_31 : f32 to vector<1x256xf32>
    %37 = arith.addf %33, %36 : vector<1x256xf32>
    %38 = math.rsqrt %37 : vector<1x256xf32>
    %39 = vector.broadcast %38 : vector<1x256xf32> to vector<98x256xf32>
    %40 = arith.mulf %35, %39 : vector<98x256xf32>
    %41 = vector.broadcast %19 : vector<1x256xf32> to vector<98x256xf32>
    %42 = arith.mulf %40, %41 : vector<98x256xf32>
    %43 = vector.broadcast %20 : vector<1x256xf32> to vector<98x256xf32>
    %44 = arith.addf %42, %43 : vector<98x256xf32>
    %cst_32 = arith.constant 2.000000e-01 : f32
    %45 = vector.broadcast %cst_32 : f32 to vector<98x256xf32>
    %46 = arith.mulf %45, %44 : vector<98x256xf32>
    %47 = arith.maximumf %44, %46 : vector<98x256xf32>
    %48 = arith.truncf %47 : vector<98x256xf32> to vector<98x256xbf16>
    %c0_33 = arith.constant 0 : index
    %c0_34 = arith.constant 0 : index
    %49 = vector.load %arg4[%c0_33, %c0_34] : memref<98x256xbf16, #tpu.memory_space<vmem>>, vector<98x256xbf16>
    tpu.vector_store %arg4[%c0_33, %c0_34], %48 {strides = array<i32>} : memref<98x256xbf16, #tpu.memory_space<vmem>>, vector<98x256xbf16>,
    return
  }
}

module attributes {stable_mosaic.version = 11 : i64} {
  func.func @conv_bn_lrelu_fc_sigmoid_kernel(%arg0: memref<2x4x4x1024xbf16, #tpu.memory_space<vmem>>, %arg1: memref<4096x512xbf16, #tpu.memory_space<vmem>>, %arg2: memref<1x512xf32, #tpu.memory_space<vmem>>, %arg3: memref<1x512xf32, #tpu.memory_space<vmem>>, %arg4: memref<9x512xf32, #tpu.memory_space<vmem>>, %arg5: memref<1x1xf32, #tpu.memory_space<vmem>>, %arg6: memref<2x1xf32, #tpu.memory_space<vmem>>) attributes {dimension_semantics = [], scalar_prefetch = 0 : i64, scratch_operands = 0 : i64, tpu.core_type = #tpu.core_type<tc>} {
    %c0 = arith.constant 0 : index
    %c0_0 = arith.constant 0 : index
    %c0_1 = arith.constant 0 : index
    %c0_2 = arith.constant 0 : index
    %0 = vector.load %arg0[%c0, %c0_0, %c0_1, %c0_2] : memref<2x4x4x1024xbf16, #tpu.memory_space<vmem>>, vector<2x3x3x1024xbf16>
    %1 = vector.shape_cast %0 : vector<2x3x3x1024xbf16> to vector<18x1024xbf16>
    %c0_3 = arith.constant 0 : index
    %c0_4 = arith.constant 0 : index
    %2 = vector.load %arg1[%c0_3, %c0_4] : memref<4096x512xbf16, #tpu.memory_space<vmem>>, vector<1024x512xbf16>
    %cst = arith.constant dense<0.000000e+00> : vector<18x512xf32>
    %3 = tpu.matmul %1, %2, %cst {dimension_numbers = #tpu.dot_dimension_numbers<[1], [0], [0], [1], [0, 0, 1, 1], [], []>} : vector<18x1024xbf16>, vector<1024x512xbf16>, vector<18x512xf32> -> vector<18x512xf32>
    %c0_5 = arith.constant 0 : index
    %c0_6 = arith.constant 0 : index
    %c1 = arith.constant 1 : index
    %c0_7 = arith.constant 0 : index
    %4 = vector.load %arg0[%c0_5, %c0_6, %c1, %c0_7] : memref<2x4x4x1024xbf16, #tpu.memory_space<vmem>>, vector<2x3x3x1024xbf16>
    %5 = vector.shape_cast %4 : vector<2x3x3x1024xbf16> to vector<18x1024xbf16>
    %c1024 = arith.constant 1024 : index
    %c0_8 = arith.constant 0 : index
    %6 = vector.load %arg1[%c1024, %c0_8] : memref<4096x512xbf16, #tpu.memory_space<vmem>>, vector<1024x512xbf16>
    %cst_9 = arith.constant dense<0.000000e+00> : vector<18x512xf32>
    %7 = tpu.matmul %5, %6, %cst_9 {dimension_numbers = #tpu.dot_dimension_numbers<[1], [0], [0], [1], [0, 0, 1, 1], [], []>} : vector<18x1024xbf16>, vector<1024x512xbf16>, vector<18x512xf32> -> vector<18x512xf32>
    %8 = arith.addf %3, %7 : vector<18x512xf32>
    %c0_10 = arith.constant 0 : index
    %c1_11 = arith.constant 1 : index
    %c0_12 = arith.constant 0 : index
    %c0_13 = arith.constant 0 : index
    %9 = vector.load %arg0[%c0_10, %c1_11, %c0_12, %c0_13] : memref<2x4x4x1024xbf16, #tpu.memory_space<vmem>>, vector<2x3x3x1024xbf16>
    %10 = vector.shape_cast %9 : vector<2x3x3x1024xbf16> to vector<18x1024xbf16>
    %c2048 = arith.constant 2048 : index
    %c0_14 = arith.constant 0 : index
    %11 = vector.load %arg1[%c2048, %c0_14] : memref<4096x512xbf16, #tpu.memory_space<vmem>>, vector<1024x512xbf16>
    %cst_15 = arith.constant dense<0.000000e+00> : vector<18x512xf32>
    %12 = tpu.matmul %10, %11, %cst_15 {dimension_numbers = #tpu.dot_dimension_numbers<[1], [0], [0], [1], [0, 0, 1, 1], [], []>} : vector<18x1024xbf16>, vector<1024x512xbf16>, vector<18x512xf32> -> vector<18x512xf32>
    %13 = arith.addf %8, %12 : vector<18x512xf32>
    %c0_16 = arith.constant 0 : index
    %c1_17 = arith.constant 1 : index
    %c1_18 = arith.constant 1 : index
    %c0_19 = arith.constant 0 : index
    %14 = vector.load %arg0[%c0_16, %c1_17, %c1_18, %c0_19] : memref<2x4x4x1024xbf16, #tpu.memory_space<vmem>>, vector<2x3x3x1024xbf16>
    %15 = vector.shape_cast %14 : vector<2x3x3x1024xbf16> to vector<18x1024xbf16>
    %c3072 = arith.constant 3072 : index
    %c0_20 = arith.constant 0 : index
    %16 = vector.load %arg1[%c3072, %c0_20] : memref<4096x512xbf16, #tpu.memory_space<vmem>>, vector<1024x512xbf16>
    %cst_21 = arith.constant dense<0.000000e+00> : vector<18x512xf32>
    %17 = tpu.matmul %15, %16, %cst_21 {dimension_numbers = #tpu.dot_dimension_numbers<[1], [0], [0], [1], [0, 0, 1, 1], [], []>} : vector<18x1024xbf16>, vector<1024x512xbf16>, vector<18x512xf32> -> vector<18x512xf32>
    %18 = arith.addf %13, %17 : vector<18x512xf32>
    %c0_22 = arith.constant 0 : index
    %c0_23 = arith.constant 0 : index
    %19 = vector.load %arg2[%c0_22, %c0_23] : memref<1x512xf32, #tpu.memory_space<vmem>>, vector<1x512xf32>
    %c0_24 = arith.constant 0 : index
    %c0_25 = arith.constant 0 : index
    %20 = vector.load %arg3[%c0_24, %c0_25] : memref<1x512xf32, #tpu.memory_space<vmem>>, vector<1x512xf32>
    %cst_26 = arith.constant dense<0.000000e+00> : vector<512xf32>
    %21 = vector.multi_reduction <add>, %18, %cst_26 [0] : vector<18x512xf32> to vector<512xf32>
    %22 = vector.shape_cast %21 : vector<512xf32> to vector<1x512xf32>
    %cst_27 = arith.constant 0.055555556 : f32
    %23 = vector.broadcast %cst_27 : f32 to vector<1x512xf32>
    %24 = arith.mulf %22, %23 : vector<1x512xf32>
    %25 = arith.mulf %18, %18 : vector<18x512xf32>
    %cst_28 = arith.constant dense<0.000000e+00> : vector<512xf32>
    %26 = vector.multi_reduction <add>, %25, %cst_28 [0] : vector<18x512xf32> to vector<512xf32>
    %27 = vector.shape_cast %26 : vector<512xf32> to vector<1x512xf32>
    %cst_29 = arith.constant 0.055555556 : f32
    %28 = vector.broadcast %cst_29 : f32 to vector<1x512xf32>
    %29 = arith.mulf %27, %28 : vector<1x512xf32>
    %30 = arith.mulf %24, %24 : vector<1x512xf32>
    %31 = arith.subf %29, %30 : vector<1x512xf32>
    %cst_30 = arith.constant 0.000000e+00 : f32
    %32 = vector.broadcast %cst_30 : f32 to vector<1x512xf32>
    %33 = arith.maximumf %31, %32 : vector<1x512xf32>
    %34 = vector.broadcast %24 : vector<1x512xf32> to vector<18x512xf32>
    %35 = arith.subf %18, %34 : vector<18x512xf32>
    %cst_31 = arith.constant 9.99999974E-6 : f32
    %36 = vector.broadcast %cst_31 : f32 to vector<1x512xf32>
    %37 = arith.addf %33, %36 : vector<1x512xf32>
    %38 = math.rsqrt %37 : vector<1x512xf32>
    %39 = vector.broadcast %38 : vector<1x512xf32> to vector<18x512xf32>
    %40 = arith.mulf %35, %39 : vector<18x512xf32>
    %41 = vector.broadcast %19 : vector<1x512xf32> to vector<18x512xf32>
    %42 = arith.mulf %40, %41 : vector<18x512xf32>
    %43 = vector.broadcast %20 : vector<1x512xf32> to vector<18x512xf32>
    %44 = arith.addf %42, %43 : vector<18x512xf32>
    %cst_32 = arith.constant 2.000000e-01 : f32
    %45 = vector.broadcast %cst_32 : f32 to vector<18x512xf32>
    %46 = arith.mulf %45, %44 : vector<18x512xf32>
    %47 = arith.maximumf %44, %46 : vector<18x512xf32>
    %48 = vector.shape_cast %47 : vector<18x512xf32> to vector<2x9x512xf32>
    %c0_33 = arith.constant 0 : index
    %c0_34 = arith.constant 0 : index
    %49 = vector.load %arg4[%c0_33, %c0_34] : memref<9x512xf32, #tpu.memory_space<vmem>>, vector<9x512xf32>
    %50 = vector.shape_cast %49 : vector<9x512xf32> to vector<1x9x512xf32>
    %51 = vector.broadcast %50 : vector<1x9x512xf32> to vector<2x9x512xf32>
    %52 = arith.mulf %48, %51 : vector<2x9x512xf32>
    %cst_35 = arith.constant dense<0.000000e+00> : vector<2x9xf32>
    %53 = vector.multi_reduction <add>, %52, %cst_35 [2] : vector<2x9x512xf32> to vector<2x9xf32>
    %54 = vector.shape_cast %53 : vector<2x9xf32> to vector<2x9x1xf32>
    %cst_36 = arith.constant dense<0.000000e+00> : vector<2x1xf32>
    %55 = vector.multi_reduction <add>, %54, %cst_36 [1] : vector<2x9x1xf32> to vector<2x1xf32>
    %c0_37 = arith.constant 0 : index
    %c0_38 = arith.constant 0 : index
    %56 = vector.load %arg5[%c0_37, %c0_38] : memref<1x1xf32, #tpu.memory_space<vmem>>, vector<1x1xf32>
    %57 = vector.broadcast %56 : vector<1x1xf32> to vector<2x1xf32>
    %58 = arith.addf %55, %57 : vector<2x1xf32>
    %59 = arith.negf %58 : vector<2x1xf32>
    %60 = math.exp %59 : vector<2x1xf32>
    %cst_39 = arith.constant 1.000000e+00 : f32
    %61 = vector.broadcast %cst_39 : f32 to vector<2x1xf32>
    %62 = arith.addf %61, %60 : vector<2x1xf32>
    %63 = arith.divf %61, %62 : vector<2x1xf32>
    %c0_40 = arith.constant 0 : index
    %c0_41 = arith.constant 0 : index
    %64 = vector.load %arg6[%c0_40, %c0_41] : memref<2x1xf32, #tpu.memory_space<vmem>>, vector<2x1xf32>
    tpu.vector_store %arg6[%c0_40, %c0_41], %63 {strides = array<i32>} : memref<2x1xf32, #tpu.memory_space<vmem>>, vector<2x1xf32>,
    return
  }
}

</mosaic_0001>

<bundles_post_ra>
// kernel: netd_forward.3
= control target key start
LH: loop header
LB: loop body
LE: loop exit
PB: predicated region body
PF: predicated region fallthrough
CT: control target
= control target key end

     0   :  { %7 = vsyncpa [#allocation3], 0  ;;  %s1340_s9 = smov [#allocation2]   ;;  %s1599_s0 = inlined_call_operand.vmem [shape: bf16[392,16], index: 0, kind: input, shape index: {}]   ;;  %s1600_s1 = inlined_call_operand.hbm [shape: bf16[16,128], index: 1, kind: input, shape index: {}]   ;;  %s1601_s2 = inlined_call_operand.vmem [shape: bf16[392,128], index: 2, kind: output, shape index: {}]  }
   0x1   :  { %s15_s10 = sshll.u32 %s1340_s9, 4  ;;  %s1316_s13 = scalar_lea.hbm %s1600_s1, 128  ;;  %s16_s10 = int_to_ptr.vmem [resolvable:$true] %s15_s10 }
   0x2   :  { %p1317_p0 = scmp.ne.s32.totalorder %s1600_s1, %s1316_s13  ;;  %p1320_p1 = scmp.lt.u32.totalorder %s1316_s13, %s1600_s1 }
   0x4   :  { %p1322_p2 = pnand %p1320_p1, %p1317_p0 }
   0x6   :  { %1325 = shalt.err (!%p1322_p2)
}
   0x7   :  { %s1326_s18 = scalar_lea.vmem %s16_s10, 128  ;;  %p1331_p4 = scmp.lt.s32.totalorder %s16_s10, %s16_s10 }
   0x8   :  { %p1327_p3 = scmp.ne.s32.totalorder %s16_s10, %s1326_s18  ;;  %p1332_p5 = scmp.lt.s32.totalorder %s1326_s18, %s1326_s18 }
   0xa   :  { %p1333_p6 = por %p1332_p5, %p1331_p4 }
   0xc   :  { %p1334_p7 = pnand %p1333_p6, %p1327_p3 }
   0xe   :  { %1337 = shalt.err (!%p1334_p7)
}
   0xf   :  { %s1341_s19 = smov 64   ;;  %s1342_s20 = smov 4  }
  0x10   :  { %21 = dma.hbm_to_vmem [thread:$0]  %s1600_s1, 128, %s16_s10, [#allocation3], %s1341_s19, %s1341_s19, %s1342_s20  }
  0x11   :  { %1338 = dma.done.wait [#allocation3], 128  }
  0x12   :  { %1339 = vsyncadd [#allocation3], 4294967168  ;;  %v1343_v0 = vmov 0.0   ;;  %vm1344_vm0 = vmmov 0   ;;  %v1290_v1 = vld [vmem:[#allocation2] sm:$0xff]   ;;  %vm206_vm1 = vcmask 130048  }
  0x13   :  { %1181 = vmatprep.subr.bf16.mxu0 %v1343_v0  ;;  %1183 = vmatprep.mubr.msk.bf16.mxu0 %vm1344_vm0, %v1343_v0  ;;  %v1291_v2 = vld [vmem:[%s1599_s0] sm:$0xff]   ;;  %v1292_v3 = vld [vmem:[%s1599_s0 + $0x68] sm:$0xff]   ;;  %v1294_v5 = vld [vmem:[%s1599_s0 + $0x70] sm:$0xff]  }
  0x14   :  { %1283 = vmatprep.subr.bf16.mxu1 %v1343_v0  ;;  %1235 = vmatprep.mubr.msk.bf16.mxu1 %vm1344_vm0, %v1343_v0  ;;  %v1293_v4 = vld [vmem:[%s1599_s0 + $0x8] sm:$0xff]   ;;  %v1295_v6 = vld [vmem:[%s1599_s0 + $0x10] sm:$0xff]   ;;  %v1296_v7 = vld [vmem:[%s1599_s0 + $0x78] sm:$0xff]  }
  0x15   :  { %1182 = vmatpush3.bf16.msra.mxu0 %v1290_v1  ;;  %1284 = vmatpush3.bf16.msra.mxu1 %v1290_v1  ;;  %v1297_v8 = vld [vmem:[%s1599_s0 + $0x18] sm:$0xff]   ;;  %v1298_v9 = vld [vmem:[%s1599_s0 + $0x80] sm:$0xff]   ;;  %v1300_v11 = vld [vmem:[%s1599_s0 + $0x88] sm:$0xff]  }
  0x16   :  { %v1299_v10 = vld [vmem:[%s1599_s0 + $0x20] sm:$0xff]   ;;  %v1301_v12 = vld [vmem:[%s1599_s0 + $0x28] sm:$0xff]   ;;  %v1302_v13 = vld [vmem:[%s1599_s0 + $0x90] sm:$0xff]  }
  0x17   :  { %v1303_v14 = vld [vmem:[%s1599_s0 + $0x30] sm:$0xff]   ;;  %v1304_v15 = vld [vmem:[%s1599_s0 + $0x98] sm:$0xff]   ;;  %v1306_v17 = vld [vmem:[%s1599_s0 + $0xa0] sm:$0xff]  }
  0x18   :  { %1184 = vmatmul.mubr.msk.bf16.vlgmr.msra.gmra.mrb[0].mxu0 %vm206_vm1, %v1291_v2  ;;  %1236 = vmatmul.mubr.msk.bf16.vlgmr.msra.gmra.mrb[0].mxu1 %vm206_vm1, %v1292_v3  ;;  %v1305_v16 = vld [vmem:[%s1599_s0 + $0x38] sm:$0xff]   ;;  %v1307_v18 = vld [vmem:[%s1599_s0 + $0x40] sm:$0xff]   ;;  %v1308_v19 = vld [vmem:[%s1599_s0 + $0xa8] sm:$0xff]  }
  0x19   :  { %1187 = vmatprep.mubr.msk.bf16.mxu0 %vm1344_vm0, %v1343_v0  ;;  %1239 = vmatprep.mubr.msk.bf16.mxu1 %vm1344_vm0, %v1343_v0  ;;  %v1309_v20 = vld [vmem:[%s1599_s0 + $0x48] sm:$0xff]   ;;  %v1310_v21 = vld [vmem:[%s1599_s0 + $0xb0] sm:$0xff]   ;;  %v1312_v23 = vld [vmem:[%s1599_s0 + $0xb8] sm:$0xff]  }
  0x1a   :  { %v1311_v22 = vld [vmem:[%s1599_s0 + $0x50] sm:$0xff]   ;;  %v1313_v24 = vld [vmem:[%s1599_s0 + $0x58] sm:$0xff]   ;;  %v1314_v25 = vld [vmem:[%s1599_s0 + $0xc0] ss:$0 sps:$4 sm:$0xff]  }
  0x1b   :  { %v1315_v26 = vld [vmem:[%s1599_s0 + $0x60] sm:$0xff]  }
  0x20   :  { %1188 = vmatmul.mubr.msk.bf16.gmra.mrb[4].mxu0 %vm206_vm1, %v1293_v4  ;;  %1240 = vmatmul.mubr.msk.bf16.gmra.mrb[4].mxu1 %vm206_vm1, %v1294_v5 }
  0x21   :  { %1191 = vmatprep.mubr.msk.bf16.mxu0 %vm1344_vm0, %v1343_v0  ;;  %1243 = vmatprep.mubr.msk.bf16.mxu1 %vm1344_vm0, %v1343_v0 }
  0x28   :  { %1192 = vmatmul.mubr.msk.bf16.gmra.mrb[8].mxu0 %vm206_vm1, %v1295_v6  ;;  %1244 = vmatmul.mubr.msk.bf16.gmra.mrb[8].mxu1 %vm206_vm1, %v1296_v7 }
  0x29   :  { %1195 = vmatprep.mubr.msk.bf16.mxu0 %vm1344_vm0, %v1343_v0  ;;  %1247 = vmatprep.mubr.msk.bf16.mxu1 %vm1344_vm0, %v1343_v0 }
  0x30   :  { %1196 = vmatmul.mubr.msk.bf16.gmra.mrb[12].mxu0 %vm206_vm1, %v1297_v8  ;;  %1248 = vmatmul.mubr.msk.bf16.gmra.mrb[12].mxu1 %vm206_vm1, %v1298_v9 }
  0x31   :  { %1199 = vmatprep.mubr.msk.bf16.mxu0 %vm1344_vm0, %v1343_v0  ;;  %1251 = vmatprep.mubr.msk.bf16.mxu1 %vm1344_vm0, %v1343_v0 }
  0x38   :  { %1200 = vmatmul.mubr.msk.bf16.gmra.mrb[16].mxu0 %vm206_vm1, %v1299_v10  ;;  %1252 = vmatmul.mubr.msk.bf16.gmra.mrb[16].mxu1 %vm206_vm1, %v1300_v11 }
  0x39   :  { %1203 = vmatprep.mubr.msk.bf16.mxu0 %vm1344_vm0, %v1343_v0  ;;  %1255 = vmatprep.mubr.msk.bf16.mxu1 %vm1344_vm0, %v1343_v0 }
  0x40   :  { %1204 = vmatmul.mubr.msk.bf16.gmra.mrb[20].mxu0 %vm206_vm1, %v1301_v12  ;;  %1256 = vmatmul.mubr.msk.bf16.gmra.mrb[20].mxu1 %vm206_vm1, %v1302_v13 }
  0x41   :  { %1207 = vmatprep.mubr.msk.bf16.mxu0 %vm1344_vm0, %v1343_v0  ;;  %1259 = vmatprep.mubr.msk.bf16.mxu1 %vm1344_vm0, %v1343_v0 }
  0x48   :  { %1208 = vmatmul.mubr.msk.bf16.gmra.mrb[24].mxu0 %vm206_vm1, %v1303_v14  ;;  %1260 = vmatmul.mubr.msk.bf16.gmra.mrb[24].mxu1 %vm206_vm1, %v1304_v15 }
  0x49   :  { %1211 = vmatprep.mubr.msk.bf16.mxu0 %vm1344_vm0, %v1343_v0  ;;  %1263 = vmatprep.mubr.msk.bf16.mxu1 %vm1344_vm0, %v1343_v0 }
  0x50   :  { %1212 = vmatmul.mubr.msk.bf16.gmra.mrb[28].mxu0 %vm206_vm1, %v1305_v16  ;;  %1264 = vmatmul.mubr.msk.bf16.gmra.mrb[28].mxu1 %vm206_vm1, %v1306_v17 }
  0x51   :  { %1215 = vmatprep.mubr.msk.bf16.mxu0 %vm1344_vm0, %v1343_v0  ;;  %1267 = vmatprep.mubr.msk.bf16.mxu1 %vm1344_vm0, %v1343_v0 }
  0x58   :  { %1216 = vmatmul.mubr.msk.bf16.gmra.mrb[32].mxu0 %vm206_vm1, %v1307_v18  ;;  %1268 = vmatmul.mubr.msk.bf16.gmra.mrb[32].mxu1 %vm206_vm1, %v1308_v19 }
  0x59   :  { %1219 = vmatprep.mubr.msk.bf16.mxu0 %vm1344_vm0, %v1343_v0  ;;  %1271 = vmatprep.mubr.msk.bf16.mxu1 %vm1344_vm0, %v1343_v0 }
  0x60   :  { %1220 = vmatmul.mubr.msk.bf16.gmra.mrb[36].mxu0 %vm206_vm1, %v1309_v20  ;;  %1272 = vmatmul.mubr.msk.bf16.gmra.mrb[36].mxu1 %vm206_vm1, %v1310_v21 }
  0x61   :  { %1223 = vmatprep.mubr.msk.bf16.mxu0 %vm1344_vm0, %v1343_v0  ;;  %1275 = vmatprep.mubr.msk.bf16.mxu1 %vm1344_vm0, %v1343_v0 }
  0x68   :  { %1224 = vmatmul.mubr.msk.bf16.gmra.mrb[40].mxu0 %vm206_vm1, %v1311_v22  ;;  %1276 = vmatmul.mubr.msk.bf16.gmra.mrb[40].mxu1 %vm206_vm1, %v1312_v23 }
  0x69   :  { %1227 = vmatprep.mubr.msk.bf16.mxu0 %vm1344_vm0, %v1343_v0  ;;  %1279 = vmatprep.mubr.msk.bf16.mxu1 %vm1344_vm0, %v1343_v0 }
  0x70   :  { %1228 = vmatmul.mubr.msk.bf16.gmra.mrb[44].mxu0 %vm206_vm1, %v1313_v24  ;;  %1280 = vmatmul.mubr.msk.bf16.gmra.mrb[44].mxu1 %vm206_vm1, %v1314_v25 }
  0x71   :  { %1231 = vmatprep.mubr.msk.bf16.mxu0 %vm1344_vm0, %v1343_v0 }
  0x78   :  { %1232 = vmatmul.mubr.msk.bf16.gmra.mrb[48].mxu0 %vm206_vm1, %v1315_v26 }
  0xeb   :  { %v316_v27 = vpop.f32.mrb[0].mxu0  ;;  %v420_v28 = vpop.f32.mrb[0].mxu1 }
  0xec   :  { %v514_v29 = vmul.f32 0.2, %v316_v27  ;;  %v1185_v30 = vpop.f32.mrb[1].mxu0  ;;  %v540_v31 = vmul.f32 0.2, %v420_v28  ;;  %v1237_v32 = vpop.f32.mrb[1].mxu1 }
  0xed   :  { %v319_v33 = vpop.f32.mrb[2].mxu0  ;;  %v423_v34 = vpop.f32.mrb[2].mxu1 }
  0xee   :  { %v515_v35 = vmul.f32 0.2, %v319_v33  ;;  %v1186_v36 = vpop.f32.mrb[3].mxu0  ;;  %v589_v37 = vmax.f32 %v420_v28, %v540_v31  ;;  %v541_v38 = vmul.f32 0.2, %v423_v34  ;;  %v1238_v39 = vpop.f32.mrb[3].mxu1  ;;  %v563_v40 = vmax.f32 %v316_v27, %v514_v29 }
  0xf0   :  { %v564_v41 = vmax.f32 %v319_v33, %v515_v35  ;;  %v590_v42 = vmax.f32 %v423_v34, %v541_v38 }
  0xf2   :  { %v1015_v43 = vpack.c.bf16 %v564_v41, %v563_v40  ;;  %v1080_v44 = vpack.c.bf16 %v590_v42, %v589_v37 }
  0xf3   :  { %v324_v45 = vpop.f32.mrb[4].mxu0  ;;  %v428_v46 = vpop.f32.mrb[4].mxu1 }
  0xf4   :  { %1016 = vst [vmem:[%s1601_s2] sm:$0xff] %v1015_v43   ;;  %v516_v47 = vmul.f32 0.2, %v324_v45  ;;  %1144 = vst [vmem:[%s1601_s2 + $0x68] sm:$0xff] %v1080_v44   ;;  %v1189_v48 = vpop.f32.mrb[5].mxu0  ;;  %v542_v49 = vmul.f32 0.2, %v428_v46 }
  0xf5   :  { %v1241_v50 = vpop.f32.mrb[5].mxu1  ;;  %v327_v51 = vpop.f32.mrb[6].mxu0 }
  0xf6   :  { %v431_v52 = vpop.f32.mrb[6].mxu1  ;;  %v517_v53 = vmul.f32 0.2, %v327_v51  ;;  %v1190_v54 = vpop.f32.mrb[7].mxu0  ;;  %v591_v55 = vmax.f32 %v428_v46, %v542_v49  ;;  %v565_v58 = vmax.f32 %v324_v45, %v516_v47 }
  0xf7   :  { %v543_v56 = vmul.f32 0.2, %v431_v52  ;;  %v1242_v57 = vpop.f32.mrb[7].mxu1 }
  0xf8   :  { %v566_v59 = vmax.f32 %v327_v51, %v517_v53 }
  0xf9   :  { %v592_v60 = vmax.f32 %v431_v52, %v543_v56 }
  0xfa   :  { %v1020_v61 = vpack.c.bf16 %v566_v59, %v565_v58 }
  0xfb   :  { %v1085_v62 = vpack.c.bf16 %v592_v60, %v591_v55  ;;  %v332_v63 = vpop.f32.mrb[8].mxu0  ;;  %v436_v0 = vpop.f32.mrb[8].mxu1 }
  0xfc   :  { %1132 = vst [vmem:[%s1601_s2 + $0x8] sm:$0xff] %v1020_v61   ;;  %v518_v1 = vmul.f32 0.2, %v332_v63  ;;  %v1193_v2 = vpop.f32.mrb[9].mxu0  ;;  %v544_v3 = vmul.f32 0.2, %v436_v0 }
  0xfd   :  { %1145 = vst [vmem:[%s1601_s2 + $0x70] sm:$0xff] %v1085_v62   ;;  %v1245_v4 = vpop.f32.mrb[9].mxu1  ;;  %v335_v5 = vpop.f32.mrb[10].mxu0 }
  0xfe   :  { %v439_v6 = vpop.f32.mrb[10].mxu1  ;;  %v519_v7 = vmul.f32 0.2, %v335_v5  ;;  %v1194_v8 = vpop.f32.mrb[11].mxu0  ;;  %v593_v9 = vmax.f32 %v436_v0, %v544_v3  ;;  %v567_v12 = vmax.f32 %v332_v63, %v518_v1 }
  0xff   :  { %v545_v10 = vmul.f32 0.2, %v439_v6  ;;  %v1246_v11 = vpop.f32.mrb[11].mxu1 }
 0x100   :  { %v568_v13 = vmax.f32 %v335_v5, %v519_v7 }
 0x101   :  { %v594_v14 = vmax.f32 %v439_v6, %v545_v10 }
 0x102   :  { %v1025_v15 = vpack.c.bf16 %v568_v13, %v567_v12 }
 0x103   :  { %v1090_v16 = vpack.c.bf16 %v594_v14, %v593_v9  ;;  %v340_v17 = vpop.f32.mrb[12].mxu0  ;;  %v444_v18 = vpop.f32.mrb[12].mxu1 }
 0x104   :  { %1133 = vst [vmem:[%s1601_s2 + $0x10] sm:$0xff] %v1025_v15   ;;  %v520_v19 = vmul.f32 0.2, %v340_v17  ;;  %v1197_v20 = vpop.f32.mrb[13].mxu0  ;;  %v546_v21 = vmul.f32 0.2, %v444_v18 }
 0x105   :  { %1146 = vst [vmem:[%s1601_s2 + $0x78] sm:$0xff] %v1090_v16   ;;  %v1249_v22 = vpop.f32.mrb[13].mxu1  ;;  %v343_v23 = vpop.f32.mrb[14].mxu0 }
 0x106   :  { %v447_v24 = vpop.f32.mrb[14].mxu1  ;;  %v521_v25 = vmul.f32 0.2, %v343_v23  ;;  %v1198_v26 = vpop.f32.mrb[15].mxu0  ;;  %v595_v27 = vmax.f32 %v444_v18, %v546_v21  ;;  %v569_v30 = vmax.f32 %v340_v17, %v520_v19 }
 0x107   :  { %v547_v28 = vmul.f32 0.2, %v447_v24  ;;  %v1250_v29 = vpop.f32.mrb[15].mxu1 }
 0x108   :  { %v570_v31 = vmax.f32 %v343_v23, %v521_v25 }
 0x109   :  { %v596_v32 = vmax.f32 %v447_v24, %v547_v28 }
 0x10a   :  { %v1030_v33 = vpack.c.bf16 %v570_v31, %v569_v30 }
 0x10b   :  { %v1095_v34 = vpack.c.bf16 %v596_v32, %v595_v27  ;;  %v348_v35 = vpop.f32.mrb[16].mxu0  ;;  %v452_v36 = vpop.f32.mrb[16].mxu1 }
 0x10c   :  { %1134 = vst [vmem:[%s1601_s2 + $0x18] sm:$0xff] %v1030_v33   ;;  %v522_v37 = vmul.f32 0.2, %v348_v35  ;;  %v1201_v38 = vpop.f32.mrb[17].mxu0  ;;  %v548_v39 = vmul.f32 0.2, %v452_v36 }
 0x10d   :  { %1147 = vst [vmem:[%s1601_s2 + $0x80] sm:$0xff] %v1095_v34   ;;  %v1253_v40 = vpop.f32.mrb[17].mxu1  ;;  %v351_v41 = vpop.f32.mrb[18].mxu0 }
 0x10e   :  { %v455_v42 = vpop.f32.mrb[18].mxu1  ;;  %v523_v43 = vmul.f32 0.2, %v351_v41  ;;  %v1202_v44 = vpop.f32.mrb[19].mxu0  ;;  %v597_v45 = vmax.f32 %v452_v36, %v548_v39  ;;  %v571_v48 = vmax.f32 %v348_v35, %v522_v37 }
 0x10f   :  { %v549_v46 = vmul.f32 0.2, %v455_v42  ;;  %v1254_v47 = vpop.f32.mrb[19].mxu1 }
 0x110   :  { %v572_v49 = vmax.f32 %v351_v41, %v523_v43 }
 0x111   :  { %v598_v50 = vmax.f32 %v455_v42, %v549_v46 }
 0x112   :  { %v1035_v51 = vpack.c.bf16 %v572_v49, %v571_v48 }
 0x113   :  { %v1100_v52 = vpack.c.bf16 %v598_v50, %v597_v45  ;;  %v356_v53 = vpop.f32.mrb[20].mxu0  ;;  %v460_v54 = vpop.f32.mrb[20].mxu1 }
 0x114   :  { %1135 = vst [vmem:[%s1601_s2 + $0x20] sm:$0xff] %v1035_v51   ;;  %v524_v55 = vmul.f32 0.2, %v356_v53  ;;  %v1205_v56 = vpop.f32.mrb[21].mxu0  ;;  %v550_v57 = vmul.f32 0.2, %v460_v54 }
 0x115   :  { %1148 = vst [vmem:[%s1601_s2 + $0x88] sm:$0xff] %v1100_v52   ;;  %v1257_v58 = vpop.f32.mrb[21].mxu1  ;;  %v359_v59 = vpop.f32.mrb[22].mxu0 }
 0x116   :  { %v463_v60 = vpop.f32.mrb[22].mxu1  ;;  %v525_v61 = vmul.f32 0.2, %v359_v59  ;;  %v1206_v62 = vpop.f32.mrb[23].mxu0  ;;  %v599_v63 = vmax.f32 %v460_v54, %v550_v57  ;;  %v573_v2 = vmax.f32 %v356_v53, %v524_v55 }
 0x117   :  { %v551_v0 = vmul.f32 0.2, %v463_v60  ;;  %v1258_v1 = vpop.f32.mrb[23].mxu1 }
 0x118   :  { %v574_v3 = vmax.f32 %v359_v59, %v525_v61 }
 0x119   :  { %v600_v4 = vmax.f32 %v463_v60, %v551_v0 }
 0x11a   :  { %v1040_v5 = vpack.c.bf16 %v574_v3, %v573_v2 }
 0x11b   :  { %v1105_v6 = vpack.c.bf16 %v600_v4, %v599_v63  ;;  %v364_v7 = vpop.f32.mrb[24].mxu0  ;;  %v468_v8 = vpop.f32.mrb[24].mxu1 }
 0x11c   :  { %1136 = vst [vmem:[%s1601_s2 + $0x28] sm:$0xff] %v1040_v5   ;;  %v526_v9 = vmul.f32 0.2, %v364_v7  ;;  %v1209_v10 = vpop.f32.mrb[25].mxu0  ;;  %v552_v11 = vmul.f32 0.2, %v468_v8 }
 0x11d   :  { %1149 = vst [vmem:[%s1601_s2 + $0x90] sm:$0xff] %v1105_v6   ;;  %v1261_v12 = vpop.f32.mrb[25].mxu1  ;;  %v367_v13 = vpop.f32.mrb[26].mxu0 }
 0x11e   :  { %v471_v14 = vpop.f32.mrb[26].mxu1  ;;  %v527_v15 = vmul.f32 0.2, %v367_v13  ;;  %v1210_v16 = vpop.f32.mrb[27].mxu0  ;;  %v601_v17 = vmax.f32 %v468_v8, %v552_v11  ;;  %v575_v20 = vmax.f32 %v364_v7, %v526_v9 }
 0x11f   :  { %v553_v18 = vmul.f32 0.2, %v471_v14  ;;  %v1262_v19 = vpop.f32.mrb[27].mxu1 }
 0x120   :  { %v576_v21 = vmax.f32 %v367_v13, %v527_v15 }
 0x121   :  { %v602_v22 = vmax.f32 %v471_v14, %v553_v18 }
 0x122   :  { %v1045_v23 = vpack.c.bf16 %v576_v21, %v575_v20 }
 0x123   :  { %v1110_v24 = vpack.c.bf16 %v602_v22, %v601_v17  ;;  %v372_v25 = vpop.f32.mrb[28].mxu0  ;;  %v476_v26 = vpop.f32.mrb[28].mxu1 }
 0x124   :  { %1137 = vst [vmem:[%s1601_s2 + $0x30] sm:$0xff] %v1045_v23   ;;  %v528_v27 = vmul.f32 0.2, %v372_v25  ;;  %v1213_v28 = vpop.f32.mrb[29].mxu0  ;;  %v554_v29 = vmul.f32 0.2, %v476_v26 }
 0x125   :  { %1150 = vst [vmem:[%s1601_s2 + $0x98] sm:$0xff] %v1110_v24   ;;  %v1265_v30 = vpop.f32.mrb[29].mxu1  ;;  %v375_v31 = vpop.f32.mrb[30].mxu0 }
 0x126   :  { %v479_v32 = vpop.f32.mrb[30].mxu1  ;;  %v529_v33 = vmul.f32 0.2, %v375_v31  ;;  %v1214_v34 = vpop.f32.mrb[31].mxu0  ;;  %v603_v35 = vmax.f32 %v476_v26, %v554_v29  ;;  %v577_v38 = vmax.f32 %v372_v25, %v528_v27 }
 0x127   :  { %v555_v36 = vmul.f32 0.2, %v479_v32  ;;  %v1266_v37 = vpop.f32.mrb[31].mxu1 }
 0x128   :  { %v578_v39 = vmax.f32 %v375_v31, %v529_v33 }
 0x129   :  { %v604_v40 = vmax.f32 %v479_v32, %v555_v36 }
 0x12a   :  { %v1050_v41 = vpack.c.bf16 %v578_v39, %v577_v38 }
 0x12b   :  { %v1115_v42 = vpack.c.bf16 %v604_v40, %v603_v35  ;;  %v380_v43 = vpop.f32.mrb[32].mxu0  ;;  %v484_v44 = vpop.f32.mrb[32].mxu1 }
 0x12c   :  { %1138 = vst [vmem:[%s1601_s2 + $0x38] sm:$0xff] %v1050_v41   ;;  %v530_v45 = vmul.f32 0.2, %v380_v43  ;;  %v1217_v46 = vpop.f32.mrb[33].mxu0  ;;  %v556_v47 = vmul.f32 0.2, %v484_v44 }
 0x12d   :  { %1151 = vst [vmem:[%s1601_s2 + $0xa0] sm:$0xff] %v1115_v42   ;;  %v1269_v48 = vpop.f32.mrb[33].mxu1  ;;  %v383_v49 = vpop.f32.mrb[34].mxu0 }
 0x12e   :  { %v487_v50 = vpop.f32.mrb[34].mxu1  ;;  %v531_v51 = vmul.f32 0.2, %v383_v49  ;;  %v1218_v52 = vpop.f32.mrb[35].mxu0  ;;  %v605_v53 = vmax.f32 %v484_v44, %v556_v47  ;;  %v579_v56 = vmax.f32 %v380_v43, %v530_v45 }
 0x12f   :  { %v557_v54 = vmul.f32 0.2, %v487_v50  ;;  %v1270_v55 = vpop.f32.mrb[35].mxu1 }
 0x130   :  { %v580_v57 = vmax.f32 %v383_v49, %v531_v51 }
 0x131   :  { %v606_v58 = vmax.f32 %v487_v50, %v557_v54 }
 0x132   :  { %v1055_v59 = vpack.c.bf16 %v580_v57, %v579_v56 }
 0x133   :  { %v1120_v60 = vpack.c.bf16 %v606_v58, %v605_v53  ;;  %v388_v61 = vpop.f32.mrb[36].mxu0  ;;  %v492_v62 = vpop.f32.mrb[36].mxu1 }
 0x134   :  { %1139 = vst [vmem:[%s1601_s2 + $0x40] sm:$0xff] %v1055_v59   ;;  %v532_v63 = vmul.f32 0.2, %v388_v61  ;;  %v1221_v0 = vpop.f32.mrb[37].mxu0  ;;  %v558_v1 = vmul.f32 0.2, %v492_v62 }
 0x135   :  { %1152 = vst [vmem:[%s1601_s2 + $0xa8] sm:$0xff] %v1120_v60   ;;  %v1273_v2 = vpop.f32.mrb[37].mxu1  ;;  %v391_v3 = vpop.f32.mrb[38].mxu0 }
 0x136   :  { %v495_v4 = vpop.f32.mrb[38].mxu1  ;;  %v533_v5 = vmul.f32 0.2, %v391_v3  ;;  %v1222_v6 = vpop.f32.mrb[39].mxu0  ;;  %v607_v7 = vmax.f32 %v492_v62, %v558_v1  ;;  %v581_v10 = vmax.f32 %v388_v61, %v532_v63 }
 0x137   :  { %v559_v8 = vmul.f32 0.2, %v495_v4  ;;  %v1274_v9 = vpop.f32.mrb[39].mxu1 }
 0x138   :  { %v582_v11 = vmax.f32 %v391_v3, %v533_v5 }
 0x139   :  { %v608_v12 = vmax.f32 %v495_v4, %v559_v8 }
 0x13a   :  { %v1060_v13 = vpack.c.bf16 %v582_v11, %v581_v10 }
 0x13b   :  { %v1125_v14 = vpack.c.bf16 %v608_v12, %v607_v7  ;;  %v396_v15 = vpop.f32.mrb[40].mxu0  ;;  %v500_v16 = vpop.f32.mrb[40].mxu1 }
 0x13c   :  { %1140 = vst [vmem:[%s1601_s2 + $0x48] sm:$0xff] %v1060_v13   ;;  %v534_v17 = vmul.f32 0.2, %v396_v15  ;;  %v1225_v18 = vpop.f32.mrb[41].mxu0  ;;  %v560_v19 = vmul.f32 0.2, %v500_v16 }
 0x13d   :  { %1153 = vst [vmem:[%s1601_s2 + $0xb0] sm:$0xff] %v1125_v14   ;;  %v1277_v20 = vpop.f32.mrb[41].mxu1  ;;  %v399_v21 = vpop.f32.mrb[42].mxu0 }
 0x13e   :  { %v503_v22 = vpop.f32.mrb[42].mxu1  ;;  %v535_v23 = vmul.f32 0.2, %v399_v21  ;;  %v1226_v24 = vpop.f32.mrb[43].mxu0  ;;  %v609_v25 = vmax.f32 %v500_v16, %v560_v19  ;;  %v583_v28 = vmax.f32 %v396_v15, %v534_v17 }
 0x13f   :  { %v561_v26 = vmul.f32 0.2, %v503_v22  ;;  %v1278_v27 = vpop.f32.mrb[43].mxu1 }
 0x140   :  { %v584_v29 = vmax.f32 %v399_v21, %v535_v23 }
 0x141   :  { %v610_v30 = vmax.f32 %v503_v22, %v561_v26 }
 0x142   :  { %v1065_v31 = vpack.c.bf16 %v584_v29, %v583_v28 }
 0x143   :  { %v1130_v32 = vpack.c.bf16 %v610_v30, %v609_v25  ;;  %v404_v33 = vpop.f32.mrb[44].mxu0  ;;  %v508_v34 = vpop.f32.mrb[44].mxu1 }
 0x144   :  { %1141 = vst [vmem:[%s1601_s2 + $0x50] sm:$0xff] %v1065_v31   ;;  %v536_v35 = vmul.f32 0.2, %v404_v33  ;;  %v1229_v36 = vpop.f32.mrb[45].mxu0  ;;  %v562_v37 = vmul.f32 0.2, %v508_v34 }
 0x145   :  { %1154 = vst [vmem:[%s1601_s2 + $0xb8] sm:$0xff] %v1130_v32   ;;  %v1281_v38 = vpop.f32.mrb[45].mxu1  ;;  %v407_v39 = vpop.f32.mrb[46].mxu0 }
 0x146   :  { %v511_v40 = vpop.f32.mrb[46].mxu1  ;;  %v537_v41 = vmul.f32 0.2, %v407_v39  ;;  %v1230_v42 = vpop.f32.mrb[47].mxu0  ;;  %v611_v43 = vmax.f32 %v508_v34, %v562_v37  ;;  %v585_v45 = vmax.f32 %v404_v33, %v536_v35 }
 0x147   :  { %v1282_v44 = vpop.f32.mrb[47].mxu1 }
 0x148   :  { %v586_v46 = vmax.f32 %v407_v39, %v537_v41  ;;  %v1011_v47 = vpack.c.bf16 %v611_v43, %v611_v43 }
 0x14a   :  { %v1070_v48 = vpack.c.bf16 %v586_v46, %v585_v45  ;;  %857 = vst [vmem:[%s1601_s2 + $0xc0] sm:$0xf] %v1011_v47 }
 0x14b   :  { %v412_v49 = vpop.f32.mrb[48].mxu0 }
 0x14c   :  { %1142 = vst [vmem:[%s1601_s2 + $0x58] sm:$0xff] %v1070_v48   ;;  %v538_v50 = vmul.f32 0.2, %v412_v49  ;;  %v1233_v51 = vpop.f32.mrb[49].mxu0 }
 0x14d   :  { %v415_v52 = vpop.f32.mrb[50].mxu0 }
 0x14e   :  { %v539_v53 = vmul.f32 0.2, %v415_v52  ;;  %v1234_v54 = vpop.f32.mrb[51].mxu0  ;;  %v587_v55 = vmax.f32 %v412_v49, %v538_v50 }
 0x150   :  { %v588_v56 = vmax.f32 %v415_v52, %v539_v53 }
 0x152   :  { %v1075_v57 = vpack.c.bf16 %v588_v56, %v587_v55 }
 0x154   :  { %1143 = vst [vmem:[%s1601_s2 + $0x60] sm:$0xff] %v1075_v57  }
 0x155   :  { %862 = vsyncpa [#allocation3], 1 }

// kernel: netd_forward.4
= control target key start
LH: loop header
LB: loop body
LE: loop exit
PB: predicated region body
PF: predicated region fallthrough
CT: control target
= control target key end

     0   :  { %9 = vsyncpa [#allocation3], 0  ;;  %s9926_s0 = inlined_call_operand.vmem [shape: bf16[2,8,8,512], index: 0, kind: input, shape index: {}]   ;;  %s9927_s1 = inlined_call_operand.hbm [shape: bf16[2048,256], index: 1, kind: input, shape index: {}]   ;;  %s9928_s2 = inlined_call_operand.hbm [shape: f32[1,256], index: 2, kind: input, shape index: {}]   ;;  %s9929_s3 = inlined_call_operand.hbm [shape: f32[1,256], index: 3, kind: input, shape index: {}]   ;;  %s9930_s4 = inlined_call_operand.vmem [shape: bf16[98,256], index: 4, kind: output, shape index: {}]  }
   0x1   :  { %10 = vsyncpa [#allocation5], 0  ;;  %s7887_s15 = smov [#allocation4]   ;;  %s7888_s17 = smov [#allocation2]  }
   0x2   :  { %s31_s16 = sshll.u32 %s7887_s15, 4  ;;  %s18_s18 = sshll.u32 %s7888_s17, 4  ;;  %s32_s16 = int_to_ptr.vmem [resolvable:$true] %s31_s16  ;;  %s7918_s18 = int_to_ptr.vmem [resolvable:$true] %s18_s18 }
   0x3   :  { %s7817_s21 = scalar_lea.hbm %s9928_s2, 32 }
   0x4   :  { %p7818_p0 = scmp.ne.s32.totalorder %s9928_s2, %s7817_s21  ;;  %p7821_p1 = scmp.lt.u32.totalorder %s7817_s21, %s9928_s2 }
   0x6   :  { %p7823_p2 = pnand %p7821_p1, %p7818_p0 }
   0x8   :  { %7826 = shalt.err (!%p7823_p2)
}
   0x9   :  { %s7827_s26 = scalar_lea.vmem %s32_s16, 32  ;;  %p7832_p4 = scmp.lt.s32.totalorder %s32_s16, %s32_s16 }
   0xa   :  { %p7828_p3 = scmp.ne.s32.totalorder %s32_s16, %s7827_s26  ;;  %p7833_p5 = scmp.lt.s32.totalorder %s7827_s26, %s7827_s26 }
   0xc   :  { %p7834_p6 = por %p7833_p5, %p7832_p4 }
   0xe   :  { %p7835_p7 = pnand %p7834_p6, %p7828_p3 }
  0x10   :  { %7838 = shalt.err (!%p7835_p7)
}
  0x11   :  { %34 = dma.hbm_to_vmem [thread:$0]  %s9928_s2, 32, %s32_s16, [#allocation5]  }
  0x12   :  { %s7839_s5 = scalar_lea.hbm %s9927_s1, 32768 }
  0x13   :  { %p7840_p8 = scmp.ne.s32.totalorder %s9927_s1, %s7839_s5  ;;  %p7843_p9 = scmp.lt.u32.totalorder %s7839_s5, %s9927_s1 }
  0x15   :  { %p7845_p10 = pnand %p7843_p9, %p7840_p8 }
  0x17   :  { %7848 = shalt.err (!%p7845_p10)
}
  0x18   :  { %s7849_s10 = scalar_lea.vmem %s7918_s18, 32768  ;;  %p7854_p12 = scmp.lt.s32.totalorder %s7918_s18, %s7918_s18 }
  0x19   :  { %p7850_p11 = scmp.ne.s32.totalorder %s7918_s18, %s7849_s10  ;;  %p7855_p13 = scmp.lt.s32.totalorder %s7849_s10, %s7849_s10 }
  0x1b   :  { %p7856_p0 = por %p7855_p13, %p7854_p12 }
  0x1d   :  { %p7857_p1 = pnand %p7856_p0, %p7850_p11 }
  0x1f   :  { %7860 = shalt.err (!%p7857_p1)
}
  0x20   :  { %s7889_s2 = smov 128   ;;  %s7890_s11 = smov 8  }
  0x21   :  { %24 = dma.hbm_to_vmem [thread:$0]  %s9927_s1, 32768, %s7918_s18, [#allocation3], %s7889_s2, %s7889_s2, %s7890_s11  }
  0x22   :  { %s7891_s14 = smov [#allocation6]   ;;  %s7861_s19 = scalar_lea.hbm %s9929_s3, 32 }
  0x23   :  { %s41_s15 = sshll.u32 %s7891_s14, 4  ;;  %p7862_p2 = scmp.ne.s32.totalorder %s9929_s3, %s7861_s19  ;;  %s42_s15 = int_to_ptr.vmem [resolvable:$true] %s41_s15 }
  0x24   :  { %p7865_p3 = scmp.lt.u32.totalorder %s7861_s19, %s9929_s3 }
  0x26   :  { %p7867_p4 = pnand %p7865_p3, %p7862_p2 }
  0x28   :  { %7870 = shalt.err (!%p7867_p4)
}
  0x29   :  { %s7871_s24 = scalar_lea.vmem %s42_s15, 32  ;;  %p7876_p6 = scmp.lt.s32.totalorder %s42_s15, %s42_s15 }
  0x2a   :  { %p7872_p5 = scmp.ne.s32.totalorder %s42_s15, %s7871_s24  ;;  %p7877_p7 = scmp.lt.s32.totalorder %s7871_s24, %s7871_s24 }
  0x2c   :  { %p7878_p8 = por %p7877_p7, %p7876_p6 }
  0x2e   :  { %p7879_p9 = pnand %p7878_p8, %p7872_p5 }
  0x30   :  { %7882 = shalt.err (!%p7879_p9)
}
  0x31   :  { %44 = dma.hbm_to_vmem [thread:$0]  %s9929_s3, 32, %s42_s15, [#allocation5]  }
  0x32   :  { %7883 = dma.done.wait [#allocation3], 32768  }
  0x33   :  { %7884 = vsyncadd [#allocation3], 4294934528 }
  0x34   :  { %7885 = dma.done.wait [#allocation5], 64  }
  0x35   :  { %7886 = vsyncadd [#allocation5], 4294967232  ;;  %v7429_v0 = vld [vmem:[#allocation2 + $0x204] ss:$8 sps:$4 sm:$0xff]   ;;  %v7433_v2 = vld [vmem:[#allocation2 + $0x200] ss:$8 sps:$4 sm:$0xff]   ;;  %v129_v40 = vlaneseq }
  0x36   :  { %v7431_v1 = vld [vmem:[#allocation2 + $0x404] ss:$8 sps:$4 sm:$0xff]   ;;  %1627 = vmatprep.subr.bf16.mxu1 %v7429_v0  ;;  %v7434_v3 = vld [vmem:[#allocation2 + $0x400] ss:$8 sps:$4 sm:$0xff]   ;;  %v7435_v4 = vld [vmem:[#allocation2 + $0x214] ss:$8 sps:$4 sm:$0xff]  }
  0x37   :  { %4356 = vmatprep.subr.bf16.mxu0 %v7431_v1  ;;  %1628 = vmatpush1.bf16.msra.mxu1 %v7433_v2  ;;  %v7437_v5 = vld [vmem:[#allocation2 + $0x414] ss:$8 sps:$4 sm:$0xff]   ;;  %v7439_v6 = vld [vmem:[#allocation2 + $0x210] ss:$8 sps:$4 sm:$0xff]   ;;  %v7441_v8 = vld [vmem:[#allocation2 + $0x224] ss:$8 sps:$4 sm:$0xff]  }
  0x38   :  { %4357 = vmatpush1.bf16.msra.mxu0 %v7434_v3  ;;  %1629 = vmatprep.subr.bf16.mxu1 %v7435_v4  ;;  %v7440_v7 = vld [vmem:[#allocation2 + $0x410] ss:$8 sps:$4 sm:$0xff]   ;;  %v7443_v9 = vld [vmem:[#allocation2 + $0x424] ss:$8 sps:$4 sm:$0xff]   ;;  %v7445_v10 = vld [vmem:[#allocation2 + $0x220] ss:$8 sps:$4 sm:$0xff]  }
  0x39   :  { %4358 = vmatprep.subr.bf16.mxu0 %v7437_v5  ;;  %v7446_v11 = vld [vmem:[#allocation2 + $0x420] ss:$8 sps:$4 sm:$0xff]   ;;  %v7447_v12 = vld [vmem:[#allocation2 + $0x234] ss:$8 sps:$4 sm:$0xff]   ;;  %v7451_v14 = vld [vmem:[#allocation2 + $0x230] ss:$8 sps:$4 sm:$0xff]  }
  0x3a   :  { %v7449_v13 = vld [vmem:[#allocation2 + $0x434] ss:$8 sps:$4 sm:$0xff]   ;;  %v7452_v15 = vld [vmem:[#allocation2 + $0x430] ss:$8 sps:$4 sm:$0xff]   ;;  %v7453_v16 = vld [vmem:[#allocation2 + $0x244] ss:$8 sps:$4 sm:$0xff]  }
  0x3b   :  { %1630 = vmatpush1.bf16.msra.mxu1 %v7439_v6  ;;  %v7455_v17 = vld [vmem:[#allocation2 + $0x444] ss:$8 sps:$4 sm:$0xff]   ;;  %v7457_v18 = vld [vmem:[#allocation2 + $0x240] ss:$8 sps:$4 sm:$0xff]   ;;  %v7459_v20 = vld [vmem:[#allocation2 + $0x254] ss:$8 sps:$4 sm:$0xff]  }
  0x3c   :  { %4359 = vmatpush1.bf16.msra.mxu0 %v7440_v7  ;;  %1631 = vmatprep.subr.bf16.mxu1 %v7441_v8  ;;  %v7458_v19 = vld [vmem:[#allocation2 + $0x440] ss:$8 sps:$4 sm:$0xff]   ;;  %v7461_v21 = vld [vmem:[#allocation2 + $0x454] ss:$8 sps:$4 sm:$0xff]   ;;  %v7463_v22 = vld [vmem:[#allocation2 + $0x250] ss:$8 sps:$4 sm:$0xff]  }
  0x3d   :  { %4360 = vmatprep.subr.bf16.mxu0 %v7443_v9  ;;  %v7464_v23 = vld [vmem:[#allocation2 + $0x450] ss:$8 sps:$4 sm:$0xff]   ;;  %v7465_v24 = vld [vmem:[#allocation2 + $0x264] ss:$8 sps:$4 sm:$0xff]   ;;  %v7469_v26 = vld [vmem:[#allocation2 + $0x260] ss:$8 sps:$4 sm:$0xff]  }
  0x3e   :  { %v7467_v25 = vld [vmem:[#allocation2 + $0x464] ss:$8 sps:$4 sm:$0xff]   ;;  %v7470_v27 = vld [vmem:[#allocation2 + $0x460] ss:$8 sps:$4 sm:$0xff]   ;;  %v7471_v28 = vld [vmem:[#allocation2 + $0x274] ss:$8 sps:$4 sm:$0xff]  }
  0x3f   :  { %1632 = vmatpush1.bf16.msra.mxu1 %v7445_v10  ;;  %v7473_v29 = vld [vmem:[#allocation2 + $0x474] ss:$8 sps:$4 sm:$0xff]   ;;  %v7475_v30 = vld [vmem:[#allocation2 + $0x270] ss:$8 sps:$4 sm:$0xff]   ;;  %v7477_v32 = vld [vmem:[#allocation2 + $0x284] ss:$8 sps:$4 sm:$0xff]  }
  0x40   :  { %4361 = vmatpush1.bf16.msra.mxu0 %v7446_v11  ;;  %1633 = vmatprep.subr.bf16.mxu1 %v7447_v12  ;;  %v7476_v31 = vld [vmem:[#allocation2 + $0x470] ss:$8 sps:$4 sm:$0xff]   ;;  %v7479_v33 = vld [vmem:[#allocation2 + $0x484] ss:$8 sps:$4 sm:$0xff]   ;;  %v7481_v34 = vld [vmem:[#allocation2 + $0x280] ss:$8 sps:$4 sm:$0xff]  }
  0x41   :  { %4362 = vmatprep.subr.bf16.mxu0 %v7449_v13  ;;  %v7482_v35 = vld [vmem:[#allocation2 + $0x480] ss:$8 sps:$4 sm:$0xff]   ;;  %v7483_v36 = vld [vmem:[#allocation2 + $0x294] ss:$8 sps:$4 sm:$0xff]   ;;  %v7892_v38 = vmov 1966171168  }
  0x42   :  { %v7485_v37 = vld [vmem:[#allocation2 + $0x494] ss:$8 sps:$4 sm:$0xff]   ;;  %v127_v39 = vunpack.c.l.s4 %v7892_v38  ;;  %v7487_v41 = vld [vmem:[#allocation2 + $0x290] ss:$8 sps:$4 sm:$0xff]   ;;  %v7489_v43 = vld [vmem:[#allocation2 + $0x2a4] ss:$8 sps:$4 sm:$0xff]  }
  0x43   :  { %1634 = vmatpush1.bf16.msra.mxu1 %v7451_v14  ;;  %v7488_v42 = vld [vmem:[#allocation2 + $0x490] ss:$8 sps:$4 sm:$0xff]   ;;  %v7491_v44 = vld [vmem:[#allocation2 + $0x4a4] ss:$8 sps:$4 sm:$0xff]   ;;  %v7961_v46 = vshrl.u32 %v129_v40, 7  ;;  %vm6320_vm0 = vcmask 1041408  }
  0x44   :  { %4363 = vmatpush1.bf16.msra.mxu0 %v7452_v15  ;;  %1635 = vmatprep.subr.bf16.mxu1 %v7453_v16  ;;  %v128_v45 = vunpack.c.0.s8 %v127_v39  ;;  %v7493_v47 = vld [vmem:[#allocation2 + $0x2a0] ss:$8 sps:$4 sm:$0xff]   ;;  %v7495_v49 = vld [vmem:[#allocation2 + $0x2b4] ss:$8 sps:$4 sm:$0xff]   ;;  %v7499_v51 = vld [vmem:[#allocation2 + $0x2b0] ss:$8 sps:$4 sm:$0xff]  }
  0x45   :  { %4364 = vmatprep.subr.bf16.mxu0 %v7455_v17  ;;  %10039 = vst [vmem:[#allocation9_spill] sm:$0xff] %v7961_v46  ;;  %v7494_v48 = vld [vmem:[#allocation2 + $0x4a0] ss:$8 sps:$4 sm:$0xff]   ;;  %v7497_v50 = vld [vmem:[#allocation2 + $0x4b4] ss:$8 sps:$4 sm:$0xff]  }
  0x46   :  { %v7500_v52 = vld [vmem:[#allocation2 + $0x4b0] ss:$8 sps:$4 sm:$0xff]   ;;  %v7964_v53 = vsub.s32 %v128_v45, %v7961_v46  ;;  %v7501_v54 = vld [vmem:[#allocation2 + $0x2c4] ss:$8 sps:$4 sm:$0xff]   ;;  %v7505_v6 = vld [vmem:[#allocation2 + $0x2c0] ss:$8 sps:$4 sm:$0xff]  }
  0x47   :  { %1636 = vmatpush1.bf16.msra.mxu1 %v7457_v18  ;;  %v7503_v55 = vld [vmem:[#allocation2 + $0x4c4] ss:$8 sps:$4 sm:$0xff]   ;;  %v6705_v58 = vld.sshfl [vmem:[%s9926_s0 + $0x10] sm:$0xff pattern:$0x75316420] }
  0x48   :  { %4365 = vmatpush1.bf16.msra.mxu0 %v7458_v19  ;;  %1637 = vmatprep.subr.bf16.mxu1 %v7459_v20  ;;  %v6703_v56 = vld.sshfl [vmem:[%s9926_s0] sm:$0xff pattern:$0x75316420]  ;;  %v6704_v57 = vld.sshfl [vmem:[%s9926_s0 + $0x8] sm:$0xff pattern:$0x75316420] }
  0x49   :  { %4366 = vmatprep.subr.bf16.mxu0 %v7461_v21  ;;  %v6706_v59 = vld.sshfl [vmem:[%s9926_s0 + $0x18] sm:$0xff pattern:$0x75316420]  ;;  %v124_v60 = vcombine.low %v6703_v56, %v6704_v57  ;;  %v125_v61 = vcombine.high %v6703_v56, %v6704_v57  ;;  %v6707_v62 = vld.sshfl [vmem:[%s9926_s0 + $0x20] sm:$0xff pattern:$0x75316420] }
  0x4a   :  { %v6708_v63 = vld.sshfl [vmem:[%s9926_s0 + $0x28] sm:$0xff pattern:$0x75316420]  ;;  %v156_v0 = vcombine.low %v6705_v58, %v6706_v59  ;;  %v157_v1 = vcombine.high %v6705_v58, %v6706_v59  ;;  %v7507_v10 = vld [vmem:[#allocation2 + $0x2d4] ss:$8 sps:$4 sm:$0xff]  }
  0x4b   :  { %1638 = vmatpush1.bf16.msra.mxu1 %v7463_v22  ;;  %v7985_v2 = vrot.slane %v124_v60, %v7964_v53  ;;  %v7988_v3 = vrot.slane %v125_v61, %v7964_v53  ;;  %v188_v4 = vcombine.low %v6707_v62, %v6708_v63  ;;  %v189_v5 = vcombine.high %v6707_v62, %v6708_v63  ;;  %v7506_v7 = vld [vmem:[#allocation2 + $0x4c0] ss:$8 sps:$4 sm:$0xff]   ;;  %v7509_v15 = vld [vmem:[#allocation2 + $0x4d4] ss:$8 sps:$4 sm:$0xff]   ;;  %v7511_v20 = vld [vmem:[#allocation2 + $0x2d0] ss:$8 sps:$4 sm:$0xff]  }
  0x4c   :  { %4367 = vmatpush1.bf16.msra.mxu0 %v7464_v23  ;;  %1639 = vmatprep.subr.bf16.mxu1 %v7465_v24  ;;  %v7991_v8 = vrot.slane %v156_v0, %v7964_v53  ;;  %v7994_v9 = vrot.slane %v157_v1, %v7964_v53  ;;  %v7512_v21 = vld [vmem:[#allocation2 + $0x4d0] ss:$8 sps:$4 sm:$0xff]   ;;  %v7517_v45 = vld [vmem:[#allocation2 + $0x2e0] ss:$8 sps:$4 sm:$0xff]   ;;  %v7519_v57 = vld [vmem:[#allocation2 + $0x2f4] ss:$8 sps:$4 sm:$0xff]  }
  0x4d   :  { %4368 = vmatprep.subr.bf16.mxu0 %v7467_v25  ;;  %10040 = vst [vmem:[#allocation10_spill] sm:$0xff] %v7985_v2  ;;  %10041 = vst [vmem:[#allocation11_spill] sm:$0xff] %v7988_v3  ;;  %v7998_v11 = vcombine.high %v7985_v2, %v7985_v2  ;;  %v8002_v12 = vcombine.high %v7988_v3, %v7988_v3  ;;  %v8005_v13 = vrot.slane %v188_v4, %v7964_v53  ;;  %v7521_v58 = vld [vmem:[#allocation2 + $0x4f4] ss:$8 sps:$4 sm:$0xff]   ;;  %v7561_v46 = vld [vmem:[#allocation2 + $0x360] ss:$8 sps:$4 sm:$0xff]  }
  0x4e   :  { %10042 = vst [vmem:[#allocation12_spill] sm:$0xff] %v7991_v8  ;;  %10043 = vst [vmem:[#allocation13_spill] sm:$0xff] %v7994_v9  ;;  %v559_v14 = vunpack.i.h.s16 %v7985_v2  ;;  %v8010_v16 = vcombine.high %v7991_v8, %v7991_v8  ;;  %v173_v17 = vcombine.high %v7994_v9, %v7994_v9  ;;  %v8015_v18 = vrot.slane %v189_v5, %v7964_v53 }
  0x4f   :  { %1640 = vmatpush1.bf16.msra.mxu1 %v7469_v26  ;;  %10044 = vst [vmem:[#allocation14_spill] sm:$0xff] %v7998_v11  ;;  %10045 = vst [vmem:[#allocation15_spill] sm:$0xff] %v8002_v12  ;;  %v561_v19 = vunpack.i.h.s16 %v7988_v3  ;;  %v563_v22 = vunpack.i.h.s16 %v7998_v11  ;;  %v9933_v23 = vunpack.i.h.s16 %v7991_v8  ;;  %v573_v24 = vunpack.i.h.s16 %v8005_v13  ;;  %v7513_v26 = vld [vmem:[#allocation2 + $0x2e4] ss:$8 sps:$4 sm:$0xff]  }
  0x50   :  { %4369 = vmatpush1.bf16.msra.mxu0 %v7470_v27  ;;  %1641 = vmatprep.subr.bf16.mxu1 %v7471_v28  ;;  %10046 = vst [vmem:[#allocation16_spill] sm:$0xff] %v8005_v13  ;;  %10047 = vst [vmem:[#allocation17_spill] sm:$0xff] %v8010_v16  ;;  %v720_v25 = vunpack.i.h.s16 %v8002_v12  ;;  %v570_v27 = vunpack.i.h.s16 %v8010_v16  ;;  %v6731_v28 = vpack.i.b16 %v7988_v3, %v559_v14  ;;  %v7524_v14 = vld [vmem:[#allocation2 + $0x4f0] ss:$8 sps:$4 sm:$0xff]  }
  0x51   :  { %4370 = vmatprep.subr.bf16.mxu0 %v7473_v29  ;;  %10048 = vst [vmem:[#allocation18_spill] sm:$0xff] %v8015_v18  ;;  %v6732_v29 = vpack.i.b16 %v7998_v11, %v561_v19  ;;  %v3576_v60 = vcombine.low %v7991_v8, %v7994_v9  ;;  %v7614_v11 = vld [vmem:[#allocation2 + $0x5e4] ss:$8 sps:$4 sm:$0xff]  }
  0x52   :  { %v8043_v40 = vpack.i.b16 %v173_v17, %v570_v27  ;;  %v7530_v27 = vld [vmem:[#allocation2 + $0x504] ss:$8 sps:$4 sm:$0xff]  }
  0x53   :  { %1642 = vmatpush1.bf16.msra.mxu1 %v7475_v30  ;;  %v849_v30 = vcombine.low %v7994_v9, %v8010_v16  ;;  %v847_v38 = vcombine.low %v6731_v28, %v6732_v29  ;;  %v3586_v5 = vrot.slane %v3576_v60, %v7964_v53 }
  0x54   :  { %4371 = vmatpush1.bf16.msra.mxu0 %v7476_v31  ;;  %1643 = vmatprep.subr.bf16.mxu1 %v7477_v32  ;;  %v8030_v31 = vld.sshfl [vmem:[%s9926_s0 + $0x30] sm:$0xff pattern:$0x75316420]  ;;  %v6733_v32 = vpack.i.b16 %v8002_v12, %v563_v22  ;;  %10049 = vst [vmem:[#allocation19_spill] sm:$0xff] %v8043_v40 }
  0x55   :  { %4372 = vmatprep.subr.bf16.mxu0 %v7479_v33  ;;  %v801_v33 = vpack.i.b16 %v9933_v23, %v720_v25  ;;  %v871_v39 = vrot.slane %v849_v30, %v7964_v53  ;;  %v6711_v30 = vld.sshfl [vmem:[%s9926_s0 + $0x40] sm:$0xff pattern:$0x75316420] }
  0x57   :  { %1644 = vmatpush1.bf16.msra.mxu1 %v7481_v34  ;;  %v6734_v34 = vpack.i.b16 %v8015_v18, %v573_v24 }
  0x58   :  { %4373 = vmatpush1.bf16.msra.mxu0 %v7482_v35  ;;  %1645 = vmatprep.subr.bf16.mxu1 %v7483_v36  ;;  %v8039_v35 = vld.sshfl [vmem:[%s9926_s0 + $0x38] sm:$0xff pattern:$0x75316420]  ;;  %v3375_v36 = vunpack.i.h.s16 %v8015_v18 }
  0x59   :  { %4374 = vmatprep.subr.bf16.mxu0 %v7485_v37  ;;  %v7515_v37 = vld [vmem:[#allocation2 + $0x4e4] ss:$8 sps:$4 sm:$0xff]  }
  0x5b   :  { %1646 = vmatpush1.bf16.msra.mxu1 %v7487_v41  ;;  %v848_v41 = vcombine.low %v6733_v32, %v801_v33  ;;  %v6712_v33 = vld.sshfl [vmem:[%s9926_s0 + $0x48] sm:$0xff pattern:$0x75316420] }
  0x5c   :  { %4375 = vmatpush1.bf16.msra.mxu0 %v7488_v42  ;;  %1647 = vmatprep.subr.bf16.mxu1 %v7489_v43  ;;  %v850_v42 = vcombine.low %v173_v17, %v6734_v34  ;;  %v8047_v43 = vcombine.high %v8005_v13, %v8005_v13 }
  0x5d   :  { %4376 = vmatprep.subr.bf16.mxu0 %v7491_v44  ;;  %v8051_v44 = vcombine.high %v8015_v18, %v8015_v18  ;;  %v7584_v18 = vld [vmem:[#allocation2 + $0x594] ss:$8 sps:$4 sm:$0xff]  }
  0x5e   :  { %10050 = vst [vmem:[#allocation20_spill] sm:$0xff] %v8047_v43  ;;  %v8063_v56 = vpack.i.b16 %v8047_v43, %v3375_v36 }
  0x5f   :  { %1648 = vmatpush1.bf16.msra.mxu1 %v7493_v47  ;;  %10051 = vst [vmem:[#allocation21_spill] sm:$0xff] %v8051_v44  ;;  %v857_v47 = vrot.slane %v847_v38, %v7964_v53 }
  0x60   :  { %4377 = vmatpush1.bf16.msra.mxu0 %v7494_v48  ;;  %1649 = vmatprep.subr.bf16.mxu1 %v7495_v49  ;;  %v2995_v48 = vcombine.low %v8030_v31, %v8039_v35  ;;  %v2996_v49 = vcombine.high %v8030_v31, %v8039_v35  ;;  %v3578_v1 = vcombine.low %v6734_v34, %v8063_v56  ;;  %v7525_v34 = vld [vmem:[#allocation2 + $0x300] ss:$8 sps:$4 sm:$0xff]  }
  0x61   :  { %4378 = vmatprep.subr.bf16.mxu0 %v7497_v50  ;;  %v6967_v50 = vpack.i.b16 %v8005_v13, %v173_v17 }
  0x62   :  { %v8066_v59 = vrot.slane %v2995_v48, %v7964_v53 }
  0x63   :  { %1650 = vmatpush1.bf16.msra.mxu1 %v7499_v51  ;;  %v7518_v51 = vld [vmem:[#allocation2 + $0x4e0] ss:$8 sps:$4 sm:$0xff]   ;;  %v3577_v61 = vcombine.low %v8010_v16, %v6967_v50  ;;  %v252_v50 = vcombine.low %v6711_v30, %v6712_v33 }
  0x64   :  { %4379 = vmatpush1.bf16.msra.mxu0 %v7500_v52  ;;  %1651 = vmatprep.subr.bf16.mxu1 %v7501_v54  ;;  %v864_v52 = vrot.slane %v848_v41, %v7964_v53  ;;  %v878_v54 = vrot.slane %v850_v42, %v7964_v53  ;;  %10052 = vst [vmem:[#allocation22_spill] sm:$0xff] %v8066_v59  ;;  %v9931_v38 = vunpack.i.h.s16 %v8066_v59  ;;  %v7533_v42 = vld [vmem:[#allocation2 + $0x314] ss:$8 sps:$4 sm:$0xff]  }
  0x65   :  { %4380 = vmatprep.subr.bf16.mxu0 %v7503_v55  ;;  %v3377_v55 = vunpack.i.h.s16 %v8047_v43  ;;  %v8077_v4 = vcombine.high %v8066_v59, %v8066_v59 }
  0x66   :  { %v880_v62 = vcombine.high %v857_v47, %v864_v52  ;;  %v882_v63 = vcombine.high %v871_v39, %v878_v54  ;;  %v881_v24 = vcombine.low %v871_v39, %v878_v54  ;;  %v7528_v54 = vld [vmem:[#allocation2 + $0x500] ss:$8 sps:$4 sm:$0xff]  }
  0x67   :  { %1652 = vmatpush1.bf16.msra.mxu1 %v7505_v6  ;;  %v8072_v0 = vpack.i.b16 %v8051_v44, %v3377_v55  ;;  %10053 = vst [vmem:[#allocation23_spill] sm:$0xff] %v8077_v4  ;;  %v3593_v6 = vrot.slane %v3577_v61, %v7964_v53  ;;  %v722_v55 = vunpack.i.h.s16 %v8051_v44  ;;  %v6951_v61 = vld.sshfl [vmem:[%s9926_s0 + $0x70] sm:$0xff pattern:$0x75316420] }
  0x68   :  { %4381 = vmatpush1.bf16.msra.mxu0 %v7506_v7  ;;  %1653 = vmatprep.subr.bf16.mxu1 %v7507_v10  ;;  %v879_v7 = vcombine.low %v857_v47, %v864_v52  ;;  %v7523_v10 = vld [vmem:[#allocation2 + $0x2f0] ss:$8 sps:$4 sm:$0xff]   ;;  %v8085_v17 = vrot.slane %v882_v63, %v7964_v53  ;;  %v8103_v32 = vrot.slane %v881_v24, %v7964_v53 }
  0x69   :  { %4382 = vmatprep.subr.bf16.mxu0 %v7509_v15  ;;  %v8082_v15 = vrot.slane %v880_v62, %v7964_v53  ;;  %v3579_v19 = vcombine.low %v8072_v0, %v8066_v59  ;;  %v3609_v22 = vcombine.high %v3586_v5, %v3593_v6  ;;  %v3608_v29 = vcombine.low %v3586_v5, %v3593_v6  ;;  %v6947_v52 = vld.sshfl [vmem:[%s9926_s0 + $0x50] sm:$0xff pattern:$0x75316420]  ;;  %v7539_v5 = vld [vmem:[#allocation2 + $0x324] ss:$8 sps:$4 sm:$0xff]  }
  0x6a   :  { %v8094_v28 = vrot.slane %v879_v7, %v7964_v53  ;;  %10055 = vst [vmem:[#allocation25_spill] sm:$0xff] %v8103_v32  ;;  %v7531_v62 = vld [vmem:[#allocation2 + $0x310] ss:$8 sps:$4 sm:$0xff]   ;;  %v8141_v63 = vrot.slane %v252_v50, %v7964_v53  ;;  %v808_v7 = vpack.i.b16 %v9931_v38, %v722_v55  ;;  %v7540_v55 = vld [vmem:[#allocation2 + $0x520] ss:$8 sps:$4 sm:$0xff]  }
  0x6b   :  { %1654 = vmatpush1.bf16.msra.mxu1 %v7511_v20  ;;  %v7527_v20 = vld [vmem:[#allocation2 + $0x304] ss:$8 sps:$4 sm:$0xff]   ;;  %v913_v25 = vcombine.low %v8082_v15, %v8085_v17  ;;  %v8100_v31 = vrot.slane %v3609_v22, %v7964_v53 }
  0x6c   :  { %4383 = vmatpush1.bf16.msra.mxu0 %v7512_v21  ;;  %1655 = vmatprep.subr.bf16.mxu1 %v7513_v26  ;;  %v3600_v21 = vrot.slane %v3578_v1, %v7964_v53  ;;  %v3607_v26 = vrot.slane %v3579_v19, %v7964_v53  ;;  %10054 = vst [vmem:[#allocation24_spill] sm:$0xff] %v8094_v28  ;;  %10059 = vst [vmem:[#allocation29_spill] sm:$0xff] %v8141_v63  ;;  %v7536_v1 = vld [vmem:[#allocation2 + $0x514] ss:$8 sps:$4 sm:$0xff]  }
  0x6d   :  { %4384 = vmatprep.subr.bf16.mxu0 %v7515_v37  ;;  %v8109_v37 = vrot.slane %v3608_v29, %v7964_v53  ;;  %1659 = vmatprep.mubr.bf16.mxu1 %v913_v25  ;;  %v911_v39 = vcombine.low %v8094_v28, %v8103_v32  ;;  %v8155_v19 = vcombine.high %v8141_v63, %v8141_v63  ;;  %v7582_v32 = vld [vmem:[#allocation2 + $0x590] ss:$8 sps:$4 sm:$0xff]  }
  0x6e   :  { %v3611_v35 = vcombine.high %v3600_v21, %v3607_v26  ;;  %v3610_v36 = vcombine.low %v3600_v21, %v3607_v26  ;;  %v7537_v26 = vld [vmem:[#allocation2 + $0x320] ss:$8 sps:$4 sm:$0xff]  }
  0x6f   :  { %1656 = vmatpush1.bf16.msra.mxu1 %v7517_v45  ;;  %10056 = vst [vmem:[#allocation26_spill] sm:$0xff] %v8109_v37  ;;  %v8117_v45 = vrot.slane %v2996_v49, %v7964_v53  ;;  %10061 = vst [vmem:[#allocation31_spill] sm:$0xff] %v8155_v19 }
  0x70   :  { %4385 = vmatpush1.bf16.msra.mxu0 %v7518_v51  ;;  %1657 = vmatprep.subr.bf16.mxu1 %v7519_v57  ;;  %v8120_v47 = vrot.slane %v3611_v35, %v7964_v53  ;;  %v8123_v48 = vrot.slane %v3610_v36, %v7964_v53  ;;  %v253_v51 = vcombine.high %v6711_v30, %v6712_v33  ;;  %v6948_v57 = vld.sshfl [vmem:[%s9926_s0 + $0x58] sm:$0xff pattern:$0x75316420]  ;;  %v3391_v33 = vunpack.i.h.s16 %v8155_v19 }
  0x71   :  { %4386 = vmatprep.subr.bf16.mxu0 %v7521_v58  ;;  %10057 = vst [vmem:[#allocation27_spill] sm:$0xff] %v8117_v45  ;;  %v6752_v49 = vcombine.high %v8066_v59, %v8117_v45  ;;  %v3059_v21 = vcombine.low %v6947_v52, %v6948_v57  ;;  %v916_v24 = vcombine.low %v808_v7, %v8117_v45  ;;  %v7545_v35 = vld [vmem:[#allocation2 + $0x334] ss:$8 sps:$4 sm:$0xff]  }
  0x72   :  { %10058 = vst [vmem:[#allocation28_spill] sm:$0xff] %v8123_v48  ;;  %v3642_v58 = vcombine.low %v8100_v31, %v8120_v47  ;;  %v3640_v60 = vcombine.low %v8109_v37, %v8123_v48  ;;  %v8144_v6 = vrot.slane %v253_v51, %v7964_v53  ;;  %v8168_v29 = vcombine.high %v8117_v45, %v8117_v45  ;;  %v7579_v37 = vld [vmem:[#allocation2 + $0x390] ss:$8 sps:$4 sm:$0xff]  }
  0x73   :  { %1658 = vmatpush1.bf16.msra.mxu1 %v7523_v10  ;;  %v915_v10 = vcombine.low %v8063_v56, %v8072_v0  ;;  %v7534_v0 = vld [vmem:[#allocation2 + $0x510] ss:$8 sps:$4 sm:$0xff]   ;;  %v3060_v30 = vcombine.high %v6947_v52, %v6948_v57 }
  0x74   :  { %4387 = vmatpush1.bf16.msra.mxu0 %v7524_v14  ;;  %1728 = vmatprep.subr.bf16.mxu1 %v7527_v20  ;;  %10060 = vst [vmem:[#allocation30_spill] sm:$0xff] %v8144_v6  ;;  %v8151_v14 = vrot.slane %v6752_v49, %v7964_v53  ;;  %v587_v20 = vunpack.i.h.s16 %v8141_v63  ;;  %v589_v22 = vunpack.i.h.s16 %v8144_v6  ;;  %v8163_v56 = vcombine.high %v8144_v6, %v8144_v6 }
  0x75   :  { %4457 = vmatprep.subr.bf16.mxu0 %v7530_v27  ;;  %4388 = vmatprep.mubr.bf16.mxu0 %v3642_v58  ;;  %v925_v25 = vrot.slane %v915_v10, %v7964_v53  ;;  %10063 = vst [vmem:[#allocation33_spill] sm:$0xff] %v8168_v29  ;;  %v8177_v50 = vrot.slane %v3060_v30, %v7964_v53 }
  0x76   :  { %1660 = vmatmul.mubr.bf16.vlgmr.msra.gmra.mrb[0].mxu1 %v911_v39  ;;  %10062 = vst [vmem:[#allocation32_spill] sm:$0xff] %v8163_v56  ;;  %v6737_v27 = vpack.i.b16 %v8144_v6, %v587_v20  ;;  %v6738_v36 = vpack.i.b16 %v8155_v19, %v589_v22  ;;  %v932_v39 = vrot.slane %v916_v24, %v7964_v53 }
  0x77   :  { %1729 = vmatpush1.bf16.msra.mxu1 %v7525_v34  ;;  %4389 = vmatmul.mubr.bf16.vlgmr.msra.gmra.mrb[0].mxu0 %v3640_v60  ;;  %v7542_v34 = vld [vmem:[#allocation2 + $0x524] ss:$8 sps:$4 sm:$0xff]   ;;  %10065 = vst [vmem:[#allocation35_spill] sm:$0xff] %v8177_v50  ;;  %v6971_v51 = vpack.i.b16 %v8141_v63, %v8168_v29  ;;  %v8182_v52 = vpack.i.b16 %v8163_v56, %v3391_v33  ;;  %v7543_v60 = vld [vmem:[#allocation2 + $0x330] ss:$8 sps:$4 sm:$0xff]  }
  0x78   :  { %1730 = vmatprep.subr.bf16.mxu1 %v7533_v42  ;;  %4458 = vmatpush1.bf16.msra.mxu0 %v7528_v54  ;;  %v8174_v42 = vrot.slane %v3059_v21, %v7964_v53  ;;  %v3644_v54 = vcombine.low %v8117_v45, %v8077_v4  ;;  %v918_v49 = vcombine.low %v6737_v27, %v6738_v36  ;;  %v7551_v21 = vld [vmem:[#allocation2 + $0x344] ss:$8 sps:$4 sm:$0xff]  }
  0x79   :  { %4459 = vmatprep.subr.bf16.mxu0 %v7536_v1  ;;  %v948_v57 = vcombine.high %v925_v25, %v932_v39  ;;  %v947_v58 = vcombine.low %v925_v25, %v932_v39  ;;  %v3645_v1 = vcombine.low %v6971_v51, %v6737_v27  ;;  %v6715_v27 = vld.sshfl [vmem:[%s9926_s0 + $0x60] sm:$0xff pattern:$0x75316420]  ;;  %v7546_v39 = vld [vmem:[#allocation2 + $0x530] ss:$8 sps:$4 sm:$0xff]  }
  0x7a   :  { %10064 = vst [vmem:[#allocation34_spill] sm:$0xff] %v8174_v42  ;;  %v3647_v7 = vcombine.low %v8174_v42, %v8177_v50  ;;  %v946_v10 = vrot.slane %v918_v49, %v7964_v53  ;;  %v3654_v22 = vrot.slane %v3644_v54, %v7964_v53  ;;  %v7549_v51 = vld [vmem:[#allocation2 + $0x340] ss:$8 sps:$4 sm:$0xff]  }
  0x7b   :  { %1731 = vmatpush1.bf16.msra.mxu1 %v7531_v62  ;;  %v7548_v62 = vld [vmem:[#allocation2 + $0x534] ss:$8 sps:$4 sm:$0xff]   ;;  %v8191_v20 = vrot.slane %v948_v57, %v7964_v53  ;;  %v3661_v24 = vrot.slane %v3645_v1, %v7964_v53  ;;  %v7554_v1 = vld [vmem:[#allocation2 + $0x544] ss:$8 sps:$4 sm:$0xff]  }
  0x7c   :  { %1732 = vmatprep.subr.bf16.mxu1 %v7539_v5  ;;  %4460 = vmatpush1.bf16.msra.mxu0 %v7534_v0  ;;  %v3646_v5 = vcombine.low %v6738_v36, %v8182_v52  ;;  %v3675_v0 = vrot.slane %v3647_v7, %v7964_v53  ;;  %v950_v30 = vcombine.high %v8151_v14, %v946_v10 }
  0x7d   :  { %4461 = vmatprep.subr.bf16.mxu0 %v7542_v34  ;;  %v949_v33 = vcombine.low %v8151_v14, %v946_v10  ;;  %v6716_v34 = vld.sshfl [vmem:[%s9926_s0 + $0x68] sm:$0xff pattern:$0x75316420]  ;;  %v8214_v36 = vcombine.high %v8177_v50, %v8177_v50  ;;  %v3677_v54 = vcombine.high %v3654_v22, %v3661_v24  ;;  %v3676_v57 = vcombine.low %v3654_v22, %v3661_v24  ;;  %v7555_v24 = vld [vmem:[#allocation2 + $0x350] ss:$8 sps:$4 sm:$0xff]  }
  0x7e   :  { %v3668_v25 = vrot.slane %v3646_v5, %v7964_v53  ;;  %v9932_v14 = vunpack.i.h.s16 %v8174_v42  ;;  %v7552_v22 = vld [vmem:[#allocation2 + $0x540] ss:$8 sps:$4 sm:$0xff]   ;;  %v317_v38 = vcombine.high %v6715_v27, %v6716_v34 }
  0x7f   :  { %1733 = vmatpush1.bf16.msra.mxu1 %v7537_v26  ;;  %v8198_v26 = vrot.slane %v947_v58, %v7964_v53  ;;  %10067 = vst [vmem:[#allocation37_spill] sm:$0xff] %v8214_v36  ;;  %v8218_v58 = vrot.slane %v950_v30, %v7964_v53  ;;  %v8221_v5 = vrot.slane %v949_v33, %v7964_v53  ;;  %v7557_v33 = vld [vmem:[#allocation2 + $0x354] ss:$8 sps:$4 sm:$0xff]  }
  0x80   :  { %1734 = vmatprep.subr.bf16.mxu1 %v7545_v35  ;;  %v8210_v35 = vcombine.high %v8174_v42, %v8174_v42  ;;  %4462 = vmatpush1.bf16.msra.mxu0 %v7540_v55  ;;  %v3679_v49 = vcombine.high %v3668_v25, %v3675_v0  ;;  %v3678_v7 = vcombine.low %v3668_v25, %v3675_v0  ;;  %v724_v55 = vunpack.i.h.s16 %v8163_v56  ;;  %v7566_v56 = vld [vmem:[#allocation2 + $0x564] ss:$8 sps:$4 sm:$0xff]  }
  0x81   :  { %4463 = vmatprep.subr.bf16.mxu0 %v7548_v62  ;;  %v8231_v62 = vrot.slane %v3676_v57, %v7964_v53  ;;  %v316_v30 = vcombine.low %v6715_v27, %v6716_v34  ;;  %v979_v25 = vcombine.low %v8198_v26, %v8221_v5  ;;  %v8251_v41 = vrot.slane %v317_v38, %v7964_v53  ;;  %v7563_v34 = vld [vmem:[#allocation2 + $0x364] ss:$8 sps:$4 sm:$0xff]  }
  0x82   :  { %10066 = vst [vmem:[#allocation36_spill] sm:$0xff] %v8210_v35  ;;  %v8228_v10 = vrot.slane %v3679_v49, %v7964_v53  ;;  %v8238_v0 = vrot.slane %v3678_v7, %v7964_v53  ;;  %v815_v27 = vpack.i.b16 %v9932_v14, %v724_v55  ;;  %v984_v38 = vcombine.low %v8177_v50, %v8210_v35 }
  0x83   :  { %1735 = vmatpush1.bf16.msra.mxu1 %v7543_v60  ;;  %v8225_v60 = vrot.slane %v3677_v54, %v7964_v53  ;;  %v7560_v54 = vld [vmem:[#allocation2 + $0x554] ss:$8 sps:$4 sm:$0xff]   ;;  %v8243_v57 = vrot.slane %v316_v30, %v7964_v53  ;;  %10069 = vst [vmem:[#allocation39_spill] sm:$0xff] %v8251_v41  ;;  %v7558_v30 = vld [vmem:[#allocation2 + $0x550] ss:$8 sps:$4 sm:$0xff]   ;;  %v8267_v55 = vcombine.high %v8251_v41, %v8251_v41 }
  0x84   :  { %1736 = vmatprep.subr.bf16.mxu1 %v7551_v21  ;;  %v981_v21 = vcombine.low %v8191_v20, %v8218_v58  ;;  %4464 = vmatpush1.bf16.msra.mxu0 %v7546_v39  ;;  %v3708_v7 = vcombine.low %v8231_v62, %v8238_v0  ;;  %v6952_v39 = vld.sshfl [vmem:[%s9926_s0 + $0x78] sm:$0xff pattern:$0x75316420]  ;;  %v1000_v23 = vrot.slane %v984_v38, %v7964_v53 }
  0x85   :  { %v3710_v49 = vcombine.low %v8225_v60, %v8228_v10  ;;  %10068 = vst [vmem:[#allocation38_spill] sm:$0xff] %v8243_v57  ;;  %4465 = vmatprep.subr.bf16.mxu0 %v7554_v1  ;;  %v601_v1 = vunpack.i.h.s16 %v8243_v57  ;;  %10071 = vst [vmem:[#allocation41_spill] sm:$0xff] %v8267_v55  ;;  %v3124_v42 = vcombine.high %v6951_v61, %v6952_v39  ;;  %v7569_v38 = vld [vmem:[#allocation2 + $0x374] ss:$8 sps:$4 sm:$0xff]  }
  0x86   :  { %1669 = vmatprep.mubr.bf16.mxu1 %v981_v21  ;;  %v603_v21 = vunpack.i.h.s16 %v8251_v41 }
  0x87   :  { %1737 = vmatpush1.bf16.msra.mxu1 %v7549_v51  ;;  %4398 = vmatprep.mubr.bf16.mxu0 %v3710_v49  ;;  %v8260_v51 = vcombine.high %v8243_v57, %v8243_v57  ;;  %v6740_v14 = vpack.i.b16 %v8251_v41, %v601_v1 }
  0x88   :  { %1670 = vmatmul.mubr.bf16.gmra.mrb[4].mxu1 %v979_v25  ;;  %4399 = vmatmul.mubr.bf16.gmra.mrb[4].mxu0 %v3708_v7  ;;  %v983_v25 = vcombine.low %v8182_v52, %v815_v27  ;;  %v3123_v7 = vcombine.low %v6951_v61, %v6952_v39  ;;  %v6717_v52 = vld.sshfl [vmem:[%s9926_s0 + $0x80] sm:$0xff pattern:$0x75316420]  ;;  %v6718_v61 = vld.sshfl [vmem:[%s9926_s0 + $0x88] sm:$0xff pattern:$0x75316420]  ;;  %v8289_v39 = vrot.slane %v3124_v42, %v7964_v53 }
  0x89   :  { %10070 = vst [vmem:[#allocation40_spill] sm:$0xff] %v8260_v51  ;;  %1738 = vmatprep.subr.bf16.mxu1 %v7557_v33  ;;  %4466 = vmatpush1.bf16.msra.mxu0 %v7552_v22  ;;  %v605_v49 = vunpack.i.h.s16 %v8260_v51  ;;  %v6741_v33 = vpack.i.b16 %v8260_v51, %v603_v21  ;;  %v985_v27 = vcombine.low %v8214_v36, %v6740_v14 }
  0x8a   :  { %4467 = vmatprep.subr.bf16.mxu0 %v7560_v54  ;;  %v993_v19 = vrot.slane %v983_v25, %v7964_v53  ;;  %v3131_v1 = vrot.slane %v3123_v7, %v7964_v53  ;;  %v6975_v54 = vpack.i.b16 %v8243_v57, %v8214_v36  ;;  %v7564_v57 = vld [vmem:[#allocation2 + $0x560] ss:$8 sps:$4 sm:$0xff]   ;;  %v6720_v36 = vld.sshfl [vmem:[%s9926_s0 + $0x98] sm:$0xff pattern:$0x75316420]  ;;  %v348_v50 = vcombine.low %v6717_v52, %v6718_v61 }
  0x8b   :  { %1739 = vmatpush1.bf16.msra.mxu1 %v7555_v24  ;;  %v6742_v24 = vpack.i.b16 %v8267_v55, %v605_v49  ;;  %v3713_v21 = vcombine.low %v6740_v14, %v6741_v33  ;;  %v6719_v49 = vld.sshfl [vmem:[%s9926_s0 + $0x90] sm:$0xff pattern:$0x75316420]  ;;  %v1007_v22 = vrot.slane %v985_v27, %v7964_v53 }
  0x8c   :  { %1740 = vmatprep.subr.bf16.mxu1 %v7563_v34  ;;  %v1016_v34 = vcombine.high %v993_v19, %v1000_v23  ;;  %v1015_v25 = vcombine.low %v993_v19, %v1000_v23  ;;  %v3139_v41 = vcombine.high %v3131_v1, %v3131_v1  ;;  %v3712_v51 = vcombine.low %v8210_v35, %v6975_v54  ;;  %v7567_v35 = vld [vmem:[#allocation2 + $0x370] ss:$8 sps:$4 sm:$0xff]  }
  0x8d   :  { %4468 = vmatpush1.bf16.msra.mxu0 %v7558_v30  ;;  %v986_v7 = vcombine.low %v6741_v33, %v6742_v24  ;;  %v3714_v23 = vcombine.low %v6742_v24, %v3131_v1  ;;  %v3729_v19 = vrot.slane %v3713_v21, %v7964_v53  ;;  %v7572_v30 = vld [vmem:[#allocation2 + $0x574] ss:$8 sps:$4 sm:$0xff]   ;;  %v349_v24 = vcombine.high %v6717_v52, %v6718_v61 }
  0x8e   :  { %v8300_v42 = vrot.slane %v1016_v34, %v7964_v53  ;;  %4469 = vmatprep.subr.bf16.mxu0 %v7566_v56  ;;  %v8304_v14 = vrot.slane %v1015_v25, %v7964_v53  ;;  %v3715_v27 = vcombine.low %v8289_v39, %v3139_v41  ;;  %v3722_v54 = vrot.slane %v3712_v51, %v7964_v53  ;;  %v7575_v56 = vld [vmem:[#allocation2 + $0x384] ss:$8 sps:$4 sm:$0xff]  }
  0x8f   :  { %v1014_v33 = vrot.slane %v986_v7, %v7964_v53  ;;  %1741 = vmatpush1.bf16.msra.mxu1 %v7561_v46  ;;  %v3736_v34 = vrot.slane %v3714_v23, %v7964_v53  ;;  %v380_v1 = vcombine.low %v6719_v49, %v6720_v36  ;;  %v381_v21 = vcombine.high %v6719_v49, %v6720_v36  ;;  %v7570_v7 = vld [vmem:[#allocation2 + $0x570] ss:$8 sps:$4 sm:$0xff]   ;;  %v8314_v46 = vld.sshfl [vmem:[%s9926_s0 + $0xa0] sm:$0xff pattern:$0x75316420] }
  0x90   :  { %1742 = vmatprep.subr.bf16.mxu1 %v7569_v38  ;;  %v3743_v25 = vrot.slane %v3715_v27, %v7964_v53  ;;  %v3745_v6 = vcombine.high %v3722_v54, %v3729_v19  ;;  %v3744_v41 = vcombine.low %v3722_v54, %v3729_v19  ;;  %v8319_v51 = vld.sshfl [vmem:[%s9926_s0 + $0xa8] sm:$0xff pattern:$0x75316420]  ;;  %v8322_v36 = vrot.slane %v348_v50, %v7964_v53  ;;  %v7581_v27 = vld [vmem:[#allocation2 + $0x394] ss:$8 sps:$4 sm:$0xff]  }
  0x91   :  { %v1018_v63 = vcombine.high %v1007_v22, %v1014_v33  ;;  %v1017_v29 = vcombine.low %v1007_v22, %v1014_v33  ;;  %4470 = vmatpush1.bf16.msra.mxu0 %v7564_v57  ;;  %v8325_v52 = vrot.slane %v349_v24, %v7964_v53  ;;  %v8328_v57 = vrot.slane %v380_v1, %v7964_v53  ;;  %v7578_v22 = vld [vmem:[#allocation2 + $0x584] ss:$8 sps:$4 sm:$0xff]   ;;  %v7573_v50 = vld [vmem:[#allocation2 + $0x380] ss:$8 sps:$4 sm:$0xff]  }
  0x92   :  { %4471 = vmatprep.subr.bf16.mxu0 %v7572_v30  ;;  %10072 = vst [vmem:[#allocation42_spill] sm:$0xff] %v8322_v36  ;;  %v3747_v61 = vcombine.high %v3736_v34, %v3743_v25  ;;  %v8334_v49 = vrot.slane %v3745_v6, %v7964_v53  ;;  %v3746_v19 = vcombine.low %v3736_v34, %v3743_v25  ;;  %v7576_v34 = vld [vmem:[#allocation2 + $0x580] ss:$8 sps:$4 sm:$0xff]   ;;  %v8370_v25 = vld.sshfl [vmem:[%s9926_s0 + $0xb0] sm:$0xff pattern:$0x75316420] }
  0x93   :  { %10073 = vst [vmem:[#allocation43_spill] sm:$0xff] %v8325_v52  ;;  %10074 = vst [vmem:[#allocation44_spill] sm:$0xff] %v8328_v57  ;;  %v8331_v38 = vrot.slane %v1018_v63, %v7964_v53  ;;  %v8337_v23 = vrot.slane %v1017_v29, %v7964_v53  ;;  %1743 = vmatpush1.bf16.msra.mxu1 %v7567_v35  ;;  %v8340_v30 = vrot.slane %v3744_v41, %v7964_v53 }
  0x94   :  { %v8343_v33 = vrot.slane %v381_v21, %v7964_v53  ;;  %v8347_v63 = vcombine.high %v8328_v57, %v8328_v57  ;;  %1744 = vmatprep.subr.bf16.mxu1 %v7575_v56  ;;  %v8352_v29 = vrot.slane %v3747_v61, %v7964_v53  ;;  %v412_v54 = vcombine.low %v8314_v46, %v8319_v51 }
  0x95   :  { %v1049_v6 = vcombine.low %v8300_v42, %v8331_v38  ;;  %v1047_v35 = vcombine.low %v8304_v14, %v8337_v23  ;;  %4472 = vmatpush1.bf16.msra.mxu0 %v7570_v7  ;;  %v8359_v24 = vrot.slane %v3746_v19, %v7964_v53  ;;  %v615_v56 = vunpack.i.h.s16 %v8328_v57  ;;  %v8375_v7 = vld.sshfl [vmem:[%s9926_s0 + $0xb8] sm:$0xff pattern:$0x75316420] }
  0x96   :  { %10075 = vst [vmem:[#allocation45_spill] sm:$0xff] %v8343_v33  ;;  %10076 = vst [vmem:[#allocation46_spill] sm:$0xff] %v8347_v63  ;;  %v8363_v1 = vcombine.high %v8343_v33, %v8343_v33  ;;  %4473 = vmatprep.subr.bf16.mxu0 %v7578_v22  ;;  %v3778_v41 = vcombine.low %v8334_v49, %v8352_v29  ;;  %v8380_v61 = vrot.slane %v412_v54, %v7964_v53 }
  0x97   :  { %1679 = vmatprep.mubr.bf16.mxu1 %v1049_v6  ;;  %v617_v19 = vunpack.i.h.s16 %v8343_v33  ;;  %v619_v21 = vunpack.i.h.s16 %v8347_v63  ;;  %1745 = vmatpush1.bf16.msra.mxu1 %v7573_v50  ;;  %v3776_v43 = vcombine.low %v8340_v30, %v8359_v24  ;;  %v10079_v22 = vunpack.i.h.s16 %v8267_v55 }
  0x98   :  { %10077 = vst [vmem:[#allocation47_spill] sm:$0xff] %v8363_v1  ;;  %10078 = vst [vmem:[#allocation48_spill] sm:$0xff] %v8380_v61  ;;  %1680 = vmatmul.mubr.bf16.gmra.mrb[8].mxu1 %v1047_v35  ;;  %v728_v4 = vunpack.i.h.s16 %v8363_v1  ;;  %v10080_v6 = vunpack.i.h.s16 %v8322_v36  ;;  %v6743_v54 = vpack.i.b16 %v8343_v33, %v615_v56  ;;  %1746 = vmatprep.subr.bf16.mxu1 %v7581_v27  ;;  %v9964_v59 = vunpack.i.h.s16 %v8380_v61 }
  0x99   :  { %4408 = vmatprep.mubr.bf16.mxu0 %v3778_v41  ;;  %v6744_v50 = vpack.i.b16 %v8347_v63, %v617_v19  ;;  %v6745_v35 = vpack.i.b16 %v8363_v1, %v619_v21  ;;  %v6753_v44 = vcombine.high %v8322_v36, %v8325_v52  ;;  %4474 = vmatpush1.bf16.msra.mxu0 %v7576_v34  ;;  %v7587_v19 = vld [vmem:[#allocation2 + $0x3a4] ss:$8 sps:$4 sm:$0xff]   ;;  %v7585_v63 = vld [vmem:[#allocation2 + $0x3a0] ss:$8 sps:$4 sm:$0xff]  }
  0x9a   :  { %v822_v48 = vpack.i.b16 %v10080_v6, %v10079_v22  ;;  %4409 = vmatmul.mubr.bf16.gmra.mrb[8].mxu0 %v3776_v43  ;;  %v3140_v56 = vcombine.high %v8289_v39, %v8289_v39  ;;  %v3188_v27 = vcombine.high %v8314_v46, %v8319_v51  ;;  %v8404_v41 = vcombine.high %v8380_v61, %v8380_v61 }
  0x9b   :  { %v829_v21 = vpack.i.b16 %v9964_v59, %v728_v4  ;;  %v1053_v22 = vcombine.low %v6743_v54, %v6744_v50  ;;  %v1068_v34 = vrot.slane %v6753_v44, %v7964_v53  ;;  %v3219_v43 = vcombine.low %v8370_v25, %v8375_v7  ;;  %4475 = vmatprep.subr.bf16.mxu0 %v7584_v18  ;;  %v7588_v59 = vld [vmem:[#allocation2 + $0x5a0] ss:$8 sps:$4 sm:$0xff]  }
  0x9c   :  { %v1051_v55 = vcombine.low %v822_v48, %v8325_v52  ;;  %10081 = vst [vmem:[#allocation49_spill] sm:$0xff] %v8404_v41  ;;  %v7590_v48 = vld [vmem:[#allocation2 + $0x5a4] ss:$8 sps:$4 sm:$0xff]   ;;  %v8413_v46 = vrot.slane %v3188_v27, %v7964_v53  ;;  %v6979_v51 = vpack.i.b16 %v8328_v57, %v3140_v56  ;;  %v3781_v6 = vcombine.low %v6744_v50, %v6745_v35 }
  0x9d   :  { %1747 = vmatpush1.bf16.msra.mxu1 %v7579_v37  ;;  %v1054_v33 = vcombine.low %v6745_v35, %v829_v21  ;;  %v1075_v4 = vrot.slane %v1053_v22, %v7964_v53  ;;  %v8418_v44 = vrot.slane %v3219_v43, %v7964_v53  ;;  %4476 = vmatpush1.bf16.msra.mxu0 %v7582_v32  ;;  %v6725_v37 = vld.sshfl [vmem:[%s9926_s0 + $0xc0] sm:$0xff pattern:$0x75316420]  ;;  %v6726_v50 = vld.sshfl [vmem:[%s9926_s0 + $0xc8] sm:$0xff pattern:$0x75316420] }
  0x9e   :  { %v1061_v39 = vrot.slane %v1051_v55, %v7964_v53  ;;  %10082 = vst [vmem:[#allocation50_spill] sm:$0xff] %v8413_v46  ;;  %v8422_v55 = vcombine.high %v8413_v46, %v8413_v46  ;;  %v3780_v27 = vcombine.low %v6979_v51, %v6743_v54  ;;  %v3782_v56 = vcombine.low %v8380_v61, %v8413_v46  ;;  %v7593_v32 = vld [vmem:[#allocation2 + $0x3b4] ss:$8 sps:$4 sm:$0xff]  }
  0x9f   :  { %10083 = vst [vmem:[#allocation51_spill] sm:$0xff] %v8418_v44  ;;  %1748 = vmatprep.subr.bf16.mxu1 %v7587_v19  ;;  %v1082_v35 = vrot.slane %v1054_v33, %v7964_v53  ;;  %v3797_v21 = vrot.slane %v3781_v6, %v7964_v53  ;;  %v445_v54 = vcombine.high %v8370_v25, %v8375_v7  ;;  %v7596_v43 = vld [vmem:[#allocation2 + $0x5b4] ss:$8 sps:$4 sm:$0xff]   ;;  %v7591_v33 = vld [vmem:[#allocation2 + $0x3b0] ss:$8 sps:$4 sm:$0xff]  }
  0xa0   :  { %v1084_v18 = vcombine.high %v1061_v39, %v1068_v34  ;;  %10084 = vst [vmem:[#allocation52_spill] sm:$0xff] %v8422_v55  ;;  %v1083_v22 = vcombine.low %v1061_v39, %v1068_v34  ;;  %4477 = vmatprep.subr.bf16.mxu0 %v7590_v48  ;;  %v6983_v57 = vpack.i.b16 %v8418_v44, %v8422_v55  ;;  %v7594_v7 = vld [vmem:[#allocation2 + $0x5b0] ss:$8 sps:$4 sm:$0xff]   ;;  %v7599_v48 = vld [vmem:[#allocation2 + $0x3c4] ss:$8 sps:$4 sm:$0xff]  }
  0xa1   :  { %v3790_v61 = vrot.slane %v3780_v27, %v7964_v53  ;;  %v3804_v19 = vrot.slane %v3782_v56, %v7964_v53  ;;  %1749 = vmatpush1.bf16.msra.mxu1 %v7585_v63  ;;  %v1086_v1 = vcombine.high %v1075_v4, %v1082_v35  ;;  %v1085_v6 = vcombine.low %v1075_v4, %v1082_v35  ;;  %v7602_v63 = vld [vmem:[#allocation2 + $0x5c4] ss:$8 sps:$4 sm:$0xff]  }
  0xa2   :  { %v8437_v51 = vrot.slane %v1084_v18, %v7964_v53  ;;  %v8444_v34 = vrot.slane %v1083_v22, %v7964_v53  ;;  %v8447_v25 = vrot.slane %v445_v54, %v7964_v53  ;;  %4478 = vmatpush1.bf16.msra.mxu0 %v7588_v59  ;;  %v3783_v39 = vcombine.low %v8404_v41, %v6983_v57 }
  0xa3   :  { %v3813_v18 = vcombine.high %v3790_v61, %v3797_v21  ;;  %v3812_v36 = vcombine.low %v3790_v61, %v3797_v21  ;;  %v8452_v27 = vcombine.high %v8418_v44, %v8418_v44  ;;  %1750 = vmatprep.subr.bf16.mxu1 %v7593_v32  ;;  %v8455_v4 = vrot.slane %v1086_v1, %v7964_v53 }
  0xa4   :  { %10085 = vst [vmem:[#allocation53_spill] sm:$0xff] %v8447_v25  ;;  %v8458_v56 = vrot.slane %v1085_v6, %v7964_v53  ;;  %v8462_v59 = vcombine.high %v8447_v25, %v8447_v25  ;;  %v476_v35 = vcombine.low %v6725_v37, %v6726_v50  ;;  %4479 = vmatprep.subr.bf16.mxu0 %v7596_v43  ;;  %v629_v43 = vunpack.i.h.s16 %v8418_v44  ;;  %v7597_v6 = vld [vmem:[#allocation2 + $0x3c0] ss:$8 sps:$4 sm:$0xff]  }
  0xa5   :  { %10086 = vst [vmem:[#allocation54_spill] sm:$0xff] %v8452_v27  ;;  %v3811_v57 = vrot.slane %v3783_v39, %v7964_v53  ;;  %v8466_v61 = vrot.slane %v3813_v18, %v7964_v53  ;;  %v8469_v32 = vrot.slane %v3812_v36, %v7964_v53  ;;  %v477_v21 = vcombine.high %v6725_v37, %v6726_v50  ;;  %v7600_v50 = vld [vmem:[#allocation2 + $0x5c0] ss:$8 sps:$4 sm:$0xff]  }
  0xa6   :  { %10087 = vst [vmem:[#allocation55_spill] sm:$0xff] %v8462_v59  ;;  %1751 = vmatpush1.bf16.msra.mxu1 %v7591_v33  ;;  %v1117_v1 = vcombine.low %v8437_v51, %v8455_v4  ;;  %v1115_v22 = vcombine.low %v8444_v34, %v8458_v56  ;;  %v8476_v54 = vrot.slane %v476_v35, %v7964_v53  ;;  %v631_v37 = vunpack.i.h.s16 %v8447_v25  ;;  %v7608_v35 = vld [vmem:[#allocation2 + $0x5d4] ss:$8 sps:$4 sm:$0xff]  }
  0xa7   :  { %4480 = vmatpush1.bf16.msra.mxu0 %v7594_v7  ;;  %1752 = vmatprep.subr.bf16.mxu1 %v7599_v48  ;;  %v3815_v39 = vcombine.high %v3804_v19, %v3811_v57  ;;  %v3814_v18 = vcombine.low %v3804_v19, %v3811_v57  ;;  %v8480_v36 = vrot.slane %v477_v21, %v7964_v53  ;;  %v633_v33 = vunpack.i.h.s16 %v8452_v27  ;;  %v6961_v19 = vld.sshfl [vmem:[%s9926_s0 + $0xd0] sm:$0xff pattern:$0x75316420] }
  0xa8   :  { %10088 = vst [vmem:[#allocation56_spill] sm:$0xff] %v8476_v54  ;;  %4481 = vmatprep.subr.bf16.mxu0 %v7602_v63  ;;  %1689 = vmatprep.mubr.bf16.mxu1 %v1117_v1  ;;  %v730_v52 = vunpack.i.h.s16 %v8462_v59  ;;  %v6746_v7 = vpack.i.b16 %v8447_v25, %v629_v43  ;;  %v7605_v48 = vld [vmem:[#allocation2 + $0x3d4] ss:$8 sps:$4 sm:$0xff]   ;;  %v6747_v21 = vpack.i.b16 %v8452_v27, %v631_v37  ;;  %v10090_v25 = vunpack.i.h.s16 %v8476_v54 }
  0xa9   :  { %10089 = vst [vmem:[#allocation57_spill] sm:$0xff] %v8480_v36  ;;  %v8491_v57 = vrot.slane %v3815_v39, %v7964_v53  ;;  %1690 = vmatmul.mubr.bf16.gmra.mrb[12].mxu1 %v1115_v22  ;;  %v8494_v63 = vrot.slane %v3814_v18, %v7964_v53  ;;  %v1119_v1 = vcombine.low %v8413_v46, %v8404_v41  ;;  %v6962_v22 = vld.sshfl [vmem:[%s9926_s0 + $0xd8] sm:$0xff pattern:$0x75316420]  ;;  %v7611_v41 = vld [vmem:[#allocation2 + $0x3e4] ss:$8 sps:$4 sm:$0xff]  }
  0xaa   :  { %v6748_v43 = vpack.i.b16 %v8462_v59, %v633_v33  ;;  %v836_v44 = vpack.i.b16 %v10090_v25, %v730_v52  ;;  %v1120_v28 = vcombine.low %v8422_v55, %v6746_v7  ;;  %1753 = vmatpush1.bf16.msra.mxu1 %v7597_v6  ;;  %v8513_v33 = vcombine.high %v8476_v54, %v8476_v54  ;;  %v7603_v52 = vld [vmem:[#allocation2 + $0x3d0] ss:$8 sps:$4 sm:$0xff]  }
  0xab   :  { %v3846_v39 = vcombine.low %v8466_v61, %v8491_v57  ;;  %v3844_v18 = vcombine.low %v8469_v32, %v8494_v63  ;;  %v1129_v37 = vrot.slane %v1119_v1, %v7964_v53  ;;  %4482 = vmatpush1.bf16.msra.mxu0 %v7600_v50  ;;  %v7606_v25 = vld [vmem:[#allocation2 + $0x5d0] ss:$8 sps:$4 sm:$0xff]   ;;  %v8519_v55 = vcombine.high %v8480_v36, %v8480_v36 }
  0xac   :  { %10091 = vst [vmem:[#allocation58_spill] sm:$0xff] %v8513_v33  ;;  %v1121_v27 = vcombine.low %v6747_v21, %v6748_v43  ;;  %v1122_v59 = vcombine.low %v836_v44, %v8480_v36  ;;  %v1136_v6 = vrot.slane %v1120_v28, %v7964_v53  ;;  %1754 = vmatprep.subr.bf16.mxu1 %v7605_v48  ;;  %v6729_v48 = vld.sshfl [vmem:[%s9926_s0 + $0xe0] sm:$0xff pattern:$0x75316420] }
  0xad   :  { %10092 = vst [vmem:[#allocation59_spill] sm:$0xff] %v8519_v55  ;;  %4418 = vmatprep.mubr.bf16.mxu0 %v3846_v39  ;;  %v3283_v1 = vcombine.low %v6961_v19, %v6962_v22  ;;  %v3284_v46 = vcombine.high %v6961_v19, %v6962_v22  ;;  %4483 = vmatprep.subr.bf16.mxu0 %v7608_v35  ;;  %v6730_v35 = vld.sshfl [vmem:[%s9926_s0 + $0xe8] sm:$0xff pattern:$0x75316420] }
  0xae   :  { %4419 = vmatmul.mubr.bf16.gmra.mrb[12].mxu0 %v3844_v18  ;;  %v1143_v50 = vrot.slane %v1121_v27, %v7964_v53  ;;  %v1150_v40 = vrot.slane %v1122_v59, %v7964_v53  ;;  %v1152_v13 = vcombine.high %v1129_v37, %v1136_v6  ;;  %1755 = vmatpush1.bf16.msra.mxu1 %v7603_v52  ;;  %v7609_v19 = vld [vmem:[#allocation2 + $0x3e0] ss:$8 sps:$4 sm:$0xff]   ;;  %v7617_v52 = vld [vmem:[#allocation2 + $0x3f4] ss:$8 sps:$4 sm:$0xff]  }
  0xaf   :  { %v8524_v44 = vrot.slane %v3283_v1, %v7964_v53  ;;  %v8527_v28 = vrot.slane %v3284_v46, %v7964_v53  ;;  %v3850_v22 = vcombine.low %v8480_v36, %v8513_v33  ;;  %v1151_v39 = vcombine.low %v1129_v37, %v1136_v6  ;;  %4484 = vmatpush1.bf16.msra.mxu0 %v7606_v25  ;;  %v7612_v46 = vld [vmem:[#allocation2 + $0x5e0] ss:$8 sps:$4 sm:$0xff]   ;;  %v7620_v25 = vld [vmem:[#allocation2 + $0x5f4] ss:$8 sps:$4 sm:$0xff]  }
  0xb0   :  { %v1154_v27 = vcombine.high %v1143_v50, %v1150_v40  ;;  %v8536_v59 = vrot.slane %v1152_v13, %v7964_v53  ;;  %v3848_v2 = vcombine.low %v6746_v7, %v6747_v21  ;;  %v3849_v3 = vcombine.low %v6748_v43, %v8476_v54  ;;  %1756 = vmatprep.subr.bf16.mxu1 %v7611_v41  ;;  %v7615_v41 = vld [vmem:[#allocation2 + $0x3f0] ss:$8 sps:$4 sm:$0xff]  }
  0xb1   :  { %10093 = vst [vmem:[#allocation60_spill] sm:$0xff] %v8524_v44  ;;  %10094 = vst [vmem:[#allocation61_spill] sm:$0xff] %v8527_v28  ;;  %v3443_v18 = vunpack.i.h.s16 %v8524_v44  ;;  %v6987_v1 = vpack.i.b16 %v8524_v44, %v8519_v55  ;;  %4485 = vmatprep.subr.bf16.mxu0 %v7614_v11  ;;  %v3872_v16 = vrot.slane %v3850_v22, %v7964_v53 }
  0xb2   :  { %v8545_v13 = vrot.slane %v1154_v27, %v7964_v53  ;;  %v1153_v33 = vcombine.low %v1143_v50, %v1150_v40  ;;  %v8549_v37 = vrot.slane %v1151_v39, %v7964_v53  ;;  %v3858_v55 = vrot.slane %v3848_v2, %v7964_v53  ;;  %1757 = vmatpush1.bf16.msra.mxu1 %v7609_v19  ;;  %v7618_v2 = vld [vmem:[#allocation2 + $0x5f0] ss:$8 sps:$4 sm:$0xff]   ;;  %v7623_v19 = vld [vmem:[#allocation2 + $0x4] ss:$8 sps:$4 sm:$0xff]  }
  0xb3   :  { %v6988_v6 = vpack.i.b16 %v8527_v28, %v3443_v18  ;;  %v3865_v7 = vrot.slane %v3849_v3, %v7964_v53  ;;  %v8556_v11 = vcombine.high %v8524_v44, %v8524_v44  ;;  %v8565_v43 = vcombine.high %v8527_v28, %v8527_v28  ;;  %4486 = vmatpush1.bf16.msra.mxu0 %v7612_v46  ;;  %v7626_v46 = vld [vmem:[#allocation2 + $0x604] ss:$8 sps:$4 sm:$0xff]  }
  0xb4   :  { %v1185_v21 = vcombine.low %v8536_v59, %v8545_v13  ;;  %v8561_v40 = vrot.slane %v1153_v33, %v7964_v53  ;;  %v540_v50 = vcombine.low %v6729_v48, %v6730_v35  ;;  %v541_v39 = vcombine.high %v6729_v48, %v6730_v35  ;;  %1758 = vmatprep.subr.bf16.mxu1 %v7617_v52 }
  0xb5   :  { %10095 = vst [vmem:[#allocation62_spill] sm:$0xff] %v8556_v11  ;;  %10096 = vst [vmem:[#allocation63_spill] sm:$0xff] %v8565_v43  ;;  %v3851_v3 = vcombine.low %v6987_v1, %v6988_v6  ;;  %v3881_v27 = vcombine.high %v3858_v55, %v3865_v7  ;;  %v3880_v22 = vcombine.low %v3858_v55, %v3865_v7  ;;  %v645_v44 = vunpack.i.h.s16 %v8527_v28 }
  0xb6   :  { %1699 = vmatprep.mubr.bf16.mxu1 %v1185_v21  ;;  %v1183_v18 = vcombine.low %v8549_v37, %v8561_v40  ;;  %v8570_v33 = vrot.slane %v540_v50, %v7964_v53  ;;  %v647_v8 = vunpack.i.h.s16 %v8556_v11  ;;  %4487 = vmatprep.subr.bf16.mxu0 %v7620_v25  ;;  %v8582_v35 = vrot.slane %v541_v39, %v7964_v53 }
  0xb7   :  { %v3879_v1 = vrot.slane %v3851_v3, %v7964_v53  ;;  %v8576_v55 = vrot.slane %v3881_v27, %v7964_v53  ;;  %v8579_v48 = vrot.slane %v3880_v22, %v7964_v53  ;;  %1759 = vmatpush1.bf16.msra.mxu1 %v7615_v41  ;;  %v732_v7 = vunpack.i.h.s16 %v8565_v43  ;;  %4488 = vmatpush1.bf16.msra.mxu0 %v7618_v2  ;;  %v6965_v41 = vld.sshfl [vmem:[%s9926_s0 + $0xf0] sm:$0xff pattern:$0x75316420] }
  0xb8   :  { %10097 = vst [vmem:[#allocation64_spill] sm:$0xff] %v8570_v33  ;;  %10099 = vst [vmem:[#allocation66_spill] sm:$0xff] %v8582_v35  ;;  %1700 = vmatmul.mubr.bf16.gmra.mrb[16].mxu1 %v1183_v18  ;;  %v8586_v52 = vcombine.high %v8570_v33, %v8570_v33  ;;  %v9994_v25 = vunpack.i.h.s16 %v8570_v33  ;;  %v6750_v21 = vpack.i.b16 %v8556_v11, %v645_v44  ;;  %2658 = vmatprep.subr.bf16.mxu1 %v7623_v19 }
  0xb9   :  { %10098 = vst [vmem:[#allocation65_spill] sm:$0xff] %v8579_v48  ;;  %v3883_v50 = vcombine.high %v3872_v16, %v3879_v1  ;;  %v3882_v3 = vcombine.low %v3872_v16, %v3879_v1  ;;  %v6751_v27 = vpack.i.b16 %v8565_v43, %v647_v8  ;;  %v6754_v22 = vcombine.high %v8476_v54, %v8480_v36  ;;  %v6966_v16 = vld.sshfl [vmem:[%s9926_s0 + $0xf8] sm:$0xff pattern:$0x75316420] }
  0xba   :  { %10100 = vst [vmem:[#allocation67_spill] sm:$0xff] %v8586_v52  ;;  %v843_v39 = vpack.i.b16 %v9994_v25, %v732_v7  ;;  %v1188_v18 = vcombine.low %v6988_v6, %v6750_v21  ;;  %v1190_v44 = vcombine.low %v8582_v35, %v8586_v52  ;;  %6079 = vmatprep.subr.bf16.mxu0 %v7626_v46 }
  0xbb   :  { %v8605_v8 = vrot.slane %v3883_v50, %v7964_v53  ;;  %v8608_v2 = vrot.slane %v3882_v3, %v7964_v53  ;;  %v1197_v19 = vrot.slane %v6754_v22, %v7964_v53  ;;  %v8615_v25 = vcombine.high %v8582_v35, %v8582_v35 }
  0xbc   :  { %v1189_v1 = vcombine.low %v6751_v27, %v843_v39  ;;  %v1204_v7 = vrot.slane %v1188_v18, %v7964_v53  ;;  %v1218_v6 = vrot.slane %v1190_v44, %v7964_v53  ;;  %v3347_v11 = vcombine.low %v6965_v41, %v6966_v16 }
  0xbd   :  { %10101 = vst [vmem:[#allocation68_spill] sm:$0xff] %v8608_v2  ;;  %10102 = vst [vmem:[#allocation69_spill] sm:$0xff] %v8615_v25  ;;  %v3914_v46 = vcombine.low %v8576_v55, %v8605_v8  ;;  %v3912_v50 = vcombine.low %v8579_v48, %v8608_v2  ;;  %v3348_v3 = vcombine.high %v6965_v41, %v6966_v16 }
  0xbe   :  { %v1211_v28 = vrot.slane %v1189_v1, %v7964_v53  ;;  %v1220_v22 = vcombine.high %v1197_v19, %v1204_v7  ;;  %v3355_v39 = vrot.slane %v3347_v11, %v7964_v53  ;;  %v3917_v44 = vcombine.low %v8570_v33, %v8582_v35 }
  0xbf   :  { %4428 = vmatprep.mubr.bf16.mxu0 %v3914_v46  ;;  %v3362_v18 = vrot.slane %v3348_v3, %v7964_v53  ;;  %v1219_v43 = vcombine.low %v1197_v19, %v1204_v7  ;;  %v3916_v11 = vcombine.low %v6750_v21, %v6751_v27 }
  0xc0   :  { %4429 = vmatmul.mubr.bf16.gmra.mrb[16].mxu0 %v3912_v50  ;;  %v1222_v36 = vcombine.high %v1211_v28, %v1218_v6  ;;  %v8627_v54 = vrot.slane %v1220_v22, %v7964_v53  ;;  %v3363_v12 = vcombine.high %v3355_v39, %v3355_v39  ;;  %v3457_v45 = vunpack.i.h.s16 %v3355_v39 }
  0xc1   :  { %v3459_v41 = vunpack.i.h.s16 %v3362_v18  ;;  %v6991_v16 = vpack.i.b16 %v3355_v39, %v8615_v25  ;;  %v3933_v46 = vrot.slane %v3917_v44, %v7964_v53  ;;  %v1221_v3 = vcombine.low %v1211_v28, %v1218_v6 }
  0xc2   :  { %v8631_v1 = vrot.slane %v1222_v36, %v7964_v53  ;;  %v6992_v9 = vpack.i.b16 %v3362_v18, %v3457_v45  ;;  %v8636_v7 = vrot.slane %v1219_v43, %v7964_v53  ;;  %v3926_v22 = vrot.slane %v3916_v11, %v7964_v53 }
  0xc3   :  { %v6993_v33 = vpack.i.b16 %v3363_v12, %v3459_v41  ;;  %v3918_v19 = vcombine.low %v8586_v52, %v6991_v16  ;;  %v8642_v39 = vrot.slane %v1221_v3, %v7964_v53  ;;  %v3364_v27 = vcombine.high %v3362_v18, %v3362_v18 }
  0xc4   :  { %10103 = vst [vmem:[#allocation70_spill] sm:$0xff] %v8631_v1  ;;  %10104 = vst [vmem:[#allocation71_spill] sm:$0xff] %v8636_v7  ;;  %v1253_v50 = vcombine.low %v8627_v54, %v8631_v1  ;;  %v3461_v28 = vunpack.i.h.s16 %v3363_v12  ;;  %v3949_v45 = vcombine.high %v3926_v22, %v3933_v46  ;;  %v3948_v43 = vcombine.low %v3926_v22, %v3933_v46  ;;  %v10114_v22 = vld [vmem:[#allocation27_spill] sm:$0xff] }
  0xc5   :  { %10105 = vst [vmem:[#allocation72_spill] sm:$0xff] %v8642_v39  ;;  %v3919_v36 = vcombine.low %v6992_v9, %v6993_v33  ;;  %v3940_v21 = vrot.slane %v3918_v19, %v7964_v53  ;;  %v1251_v6 = vcombine.low %v8636_v7, %v8642_v39  ;;  %v1261_v44 = vrot.slane %v8615_v25, %v7964_v53  ;;  %v10115_v9 = vld [vmem:[#allocation15_spill] sm:$0xff] }
  0xc6   :  { %1709 = vmatprep.mubr.bf16.mxu1 %v1253_v50  ;;  %v6994_v16 = vpack.i.b16 %v3364_v27, %v3461_v28  ;;  %v914_v11 = vcombine.high %v8082_v15, %v8085_v17  ;;  %v8655_v12 = vrot.slane %v3949_v45, %v7964_v53  ;;  %v8658_v33 = vrot.slane %v3948_v43, %v7964_v53  ;;  %v7088_v27 = vld.sshfl [vmem:[%s9926_s0 + $0x18] sm:$0xff pattern:$0x75316420] }
  0xc7   :  { %v3947_v41 = vrot.slane %v3919_v36, %v7964_v53  ;;  %1710 = vmatmul.mubr.bf16.gmra.mrb[20].mxu1 %v1251_v6  ;;  %v1262_v18 = vcombine.high %v1261_v44, %v1261_v44  ;;  %v8661_v46 = vrot.slane %v1261_v44, %v7964_v53  ;;  %v7090_v44 = vld.sshfl [vmem:[%s9926_s0 + $0x28] sm:$0xff pattern:$0x75316420]  ;;  %v7091_v36 = vld.sshfl [vmem:[%s9926_s0 + $0x30] sm:$0xff pattern:$0x75316420] }
  0xc8   :  { %10106 = vst [vmem:[#allocation73_spill] sm:$0xff] %v8655_v12  ;;  %10107 = vst [vmem:[#allocation74_spill] sm:$0xff] %v8658_v33  ;;  %v3990_v50 = vrot.slane %v6994_v16, %v7964_v53  ;;  %v7089_v16 = vld.sshfl [vmem:[%s9926_s0 + $0x20] sm:$0xff pattern:$0x75316420] }
  0xc9   :  { %10108 = vst [vmem:[#allocation75_spill] sm:$0xff] %v8661_v46  ;;  %v3951_v3 = vcombine.high %v3940_v21, %v3947_v41  ;;  %v3950_v19 = vcombine.low %v3940_v21, %v3947_v41  ;;  %v8667_v17 = vrot.slane %v1262_v18, %v7964_v53  ;;  %v10113_v41 = vld [vmem:[#allocation13_spill] sm:$0xff] }
  0xca   :  { %v3991_v45 = vcombine.high %v3990_v50, %v3990_v50  ;;  %v8682_v6 = vrot.slane %v3990_v50, %v7964_v53  ;;  %v568_v43 = vunpack.i.h.s16 %v10113_v41  ;;  %v10120_v50 = vld [vmem:[#allocation10_spill] sm:$0xff] }
  0xcb   :  { %10109 = vst [vmem:[#allocation76_spill] sm:$0xff] %v8667_v17  ;;  %v8676_v28 = vrot.slane %v3951_v3, %v7964_v53  ;;  %v8679_v21 = vrot.slane %v3950_v19, %v7964_v53  ;;  %1719 = vmatprep.mubr.bf16.mxu1 %v8667_v17 }
  0xcc   :  { %v8698_v19 = vrot.slane %v3991_v45, %v7964_v53  ;;  %v7087_v45 = vld.sshfl [vmem:[%s9926_s0 + $0x10] sm:$0xff pattern:$0x75316420] }
  0xcd   :  { %10110 = vst [vmem:[#allocation77_spill] sm:$0xff] %v8676_v28  ;;  %10111 = vst [vmem:[#allocation78_spill] sm:$0xff] %v8679_v21  ;;  %v3982_v18 = vcombine.low %v8655_v12, %v8676_v28  ;;  %v3980_v3 = vcombine.low %v8658_v33, %v8679_v21  ;;  %v10121_v21 = vld [vmem:[#allocation16_spill] sm:$0xff]  ;;  %v10122_v33 = vld [vmem:[#allocation19_spill] sm:$0xff]  ;;  %v4654_v15 = vcombine.low %v7087_v45, %v7088_v27 }
  0xce   :  { %10112 = vst [vmem:[#allocation79_spill] sm:$0xff] %v8698_v19  ;;  %v1881_v17 = vcombine.low %v10122_v33, %v10121_v21  ;;  %v4655_v28 = vcombine.high %v7087_v45, %v7088_v27  ;;  %v10123_v12 = vld [vmem:[#allocation14_spill] sm:$0xff] }
  0xcf   :  { %4438 = vmatprep.mubr.bf16.mxu0 %v3982_v18  ;;  %1720 = vmatmul.mubr.bf16.gmra.mrb[24].mxu1 %v8661_v46  ;;  %v10118_v18 = vld [vmem:[#allocation17_spill] sm:$0xff]  ;;  %v4662_v21 = vrot.slane %v4654_v15, %v7964_v53 }
  0xd0   :  { %4439 = vmatmul.mubr.bf16.gmra.mrb[20].mxu0 %v3980_v3  ;;  %1760 = vmatprep.mubr.bf16.mxu1 %v914_v11  ;;  %v10116_v11 = vld [vmem:[#allocation12_spill] sm:$0xff]  ;;  %v6821_v35 = vpack.i.b16 %v10118_v18, %v568_v43  ;;  %v4686_v43 = vcombine.low %v7089_v16, %v7090_v44  ;;  %v4687_v18 = vcombine.high %v7089_v16, %v7090_v44 }
  0xd1   :  { %4448 = vmatprep.mubr.bf16.mxu0 %v8698_v19  ;;  %v6819_v25 = vpack.i.b16 %v10116_v11, %v10115_v9  ;;  %v10117_v3 = vunpack.i.h.s16 %v10116_v11  ;;  %v10119_v19 = vld [vmem:[#allocation11_spill] sm:$0xff]  ;;  %v1909_v33 = vrot.slane %v1881_v17, %v7964_v53  ;;  %v10125_v17 = vld [vmem:[#allocation25_spill] sm:$0xff] }
  0xd2   :  { %v1878_v46 = vcombine.low %v10120_v50, %v10119_v19  ;;  %v4669_v50 = vrot.slane %v4655_v28, %v7964_v53  ;;  %v7629_v11 = vld [vmem:[#allocation2 + $0x14] ss:$8 sps:$4 sm:$0xff]  }
  0xd3   :  { %v6820_v52 = vpack.i.b16 %v10113_v41, %v10117_v3  ;;  %v1879_v9 = vcombine.low %v10123_v12, %v6819_v25  ;;  %v7092_v41 = vld.sshfl [vmem:[%s9926_s0 + $0x38] sm:$0xff pattern:$0x75316420]  ;;  %v7621_v3 = vld [vmem:[#allocation2] ss:$8 sps:$4 sm:$0xff]   ;;  %v4701_v25 = vrot.slane %v4687_v18, %v7964_v53  ;;  %v4670_v12 = vcombine.high %v4662_v21, %v4662_v21 }
  0xd4   :  { %v1888_v19 = vrot.slane %v1878_v46, %v7964_v53  ;;  %v4671_v44 = vcombine.high %v4669_v50, %v4669_v50  ;;  %v4718_v16 = vcombine.low %v7091_v36, %v7092_v41  ;;  %v4719_v45 = vcombine.high %v7091_v36, %v7092_v41  ;;  %v10124_v46 = vld [vmem:[#allocation24_spill] sm:$0xff]  ;;  %v7635_v41 = vld [vmem:[#allocation2 + $0x24] ss:$8 sps:$4 sm:$0xff]  }
  0xd5   :  { %v1880_v39 = vcombine.low %v6820_v52, %v6821_v35  ;;  %v1895_v27 = vrot.slane %v1879_v9, %v7964_v53  ;;  %v4694_v52 = vrot.slane %v4686_v43, %v7964_v53  ;;  %v10126_v15 = vcombine.high %v10124_v46, %v10125_v17  ;;  %v7627_v43 = vld [vmem:[#allocation2 + $0x10] ss:$8 sps:$4 sm:$0xff]  }
  0xd6   :  { %v5088_v9 = vunpack.i.h.s16 %v4662_v21  ;;  %v4703_v1 = vcombine.high %v4701_v25, %v4701_v25  ;;  %v5090_v36 = vunpack.i.h.s16 %v4669_v50  ;;  %v10128_v46 = vcombine.high %v8191_v20, %v8218_v58 }
  0xd7   :  { %v1902_v35 = vrot.slane %v1880_v39, %v7964_v53  ;;  %1761 = vmatmul.mubr.bf16.vlgmr.msra.gmra.mrb[0].mxu1 %v10126_v15  ;;  %v1910_v28 = vcombine.low %v1888_v19, %v1895_v27  ;;  %v1911_v7 = vcombine.high %v1888_v19, %v1895_v27  ;;  %v10127_v39 = vcombine.high %v8100_v31, %v8120_v47  ;;  %v7633_v15 = vld [vmem:[#allocation2 + $0x20] ss:$8 sps:$4 sm:$0xff]  }
  0xd8   :  { %4449 = vmatmul.mubr.bf16.gmra.mrb[24].mxu0 %v8682_v6  ;;  %2659 = vmatpush1.bf16.msra.mxu1 %v7621_v3  ;;  %v4702_v48 = vcombine.high %v4694_v52, %v4694_v52  ;;  %v8787_v21 = vrot.slane %v4718_v16, %v7964_v53  ;;  %v8790_v31 = vrot.slane %v4719_v45, %v7964_v53  ;;  %v5092_v47 = vunpack.i.h.s16 %v4670_v12 }
  0xd9   :  { %v1912_v2 = vcombine.low %v1902_v35, %v1909_v33  ;;  %4489 = vmatprep.mubr.bf16.mxu0 %v10127_v39  ;;  %v1913_v18 = vcombine.high %v1902_v35, %v1909_v33  ;;  %2660 = vmatprep.subr.bf16.mxu1 %v7629_v11  ;;  %v8784_v19 = vrot.slane %v1911_v7, %v7964_v53  ;;  %v5094_v33 = vunpack.i.h.s16 %v4671_v44  ;;  %v7624_v7 = vld [vmem:[#allocation2 + $0x600] ss:$8 sps:$4 sm:$0xff]  }
  0xda   :  { %1770 = vmatprep.mubr.bf16.mxu1 %v10128_v46  ;;  %v5095_v11 = vunpack.i.h.s16 %v4694_v52  ;;  %v7115_v27 = vpack.i.b16 %v4669_v50, %v5088_v9  ;;  %v5102_v35 = vunpack.i.h.s16 %v8787_v21  ;;  %v7116_v20 = vpack.i.b16 %v4670_v12, %v5090_v36  ;;  %v7632_v52 = vld [vmem:[#allocation2 + $0x614] ss:$8 sps:$4 sm:$0xff]   ;;  %v10130_v36 = vld [vmem:[#allocation22_spill] sm:$0xff] }
  0xdb   :  { %v8793_v3 = vrot.slane %v1913_v18, %v7964_v53  ;;  %v7117_v58 = vpack.i.b16 %v4671_v44, %v5092_v47  ;;  %v5301_v17 = vcombine.low %v4701_v25, %v4702_v48  ;;  %v8799_v39 = vrot.slane %v1910_v28, %v7964_v53  ;;  %v7641_v50 = vld [vmem:[#allocation2 + $0x34] ss:$8 sps:$4 sm:$0xff]   ;;  %v10131_v28 = vld [vmem:[#allocation26_spill] sm:$0xff] }
  0xdc   :  { %2661 = vmatpush1.bf16.msra.mxu1 %v7627_v43  ;;  %v5253_v45 = vpack.i.b16 %v5095_v11, %v5094_v33  ;;  %v8802_v18 = vrot.slane %v1912_v2, %v7964_v53  ;;  %v7118_v12 = vpack.i.b16 %v8790_v31, %v5102_v35  ;;  %v5299_v44 = vcombine.low %v7115_v27, %v7116_v20  ;;  %v10129_v43 = vld [vmem:[#allocation21_spill] sm:$0xff]  ;;  %v10132_v47 = vld [vmem:[#allocation28_spill] sm:$0xff]  ;;  %v7630_v2 = vld [vmem:[#allocation2 + $0x610] ss:$8 sps:$4 sm:$0xff]  }
  0xdd   :  { %v1944_v16 = vcombine.low %v8784_v19, %v8793_v3  ;;  %2662 = vmatprep.subr.bf16.mxu1 %v7635_v41  ;;  %v5323_v48 = vrot.slane %v5301_v17, %v7964_v53  ;;  %v6823_v46 = vpack.i.b16 %v10130_v36, %v10129_v43  ;;  %v10133_v33 = vcombine.high %v10131_v28, %v10132_v47  ;;  %v10135_v35 = vld [vmem:[#allocation23_spill] sm:$0xff] }
  0xde   :  { %v5300_v25 = vcombine.low %v7117_v58, %v5253_v45  ;;  %v10134_v41 = vcombine.high %v8198_v26, %v8221_v5  ;;  %v5302_v11 = vcombine.low %v4703_v1, %v7118_v12  ;;  %v5309_v27 = vrot.slane %v5299_v44, %v7964_v53  ;;  %v7638_v45 = vld [vmem:[#allocation2 + $0x624] ss:$8 sps:$4 sm:$0xff]   ;;  %v7639_v43 = vld [vmem:[#allocation2 + $0x30] ss:$8 sps:$4 sm:$0xff]   ;;  %v10138_v5 = vld [vmem:[#allocation20_spill] sm:$0xff] }
  0xdf   :  { %v584_v20 = vunpack.i.h.s16 %v10135_v35  ;;  %v10136_v58 = vunpack.i.h.s16 %v10130_v36  ;;  %v10137_v47 = vunpack.i.h.s16 %v10114_v22  ;;  %v10139_v1 = vld [vmem:[#allocation18_spill] sm:$0xff] }
  0xe0   :  { %4490 = vmatmul.mubr.bf16.vlgmr.msra.gmra.mrb[0].mxu0 %v10133_v33  ;;  %1771 = vmatmul.mubr.bf16.gmra.mrb[4].mxu1 %v10134_v41  ;;  %v5316_v28 = vrot.slane %v5300_v25, %v7964_v53  ;;  %v1946_v12 = vcombine.low %v10139_v1, %v10138_v5  ;;  %v7647_v44 = vld [vmem:[#allocation2 + $0x44] ss:$8 sps:$4 sm:$0xff]   ;;  %v5330_v36 = vrot.slane %v5302_v11, %v7964_v53  ;;  %v7644_v5 = vld [vmem:[#allocation2 + $0x634] ss:$8 sps:$4 sm:$0xff]   ;;  %v7645_v1 = vld [vmem:[#allocation2 + $0x40] ss:$8 sps:$4 sm:$0xff]  }
  0xe1   :  { %v6824_v17 = vpack.i.b16 %v10114_v22, %v10136_v58  ;;  %6080 = vmatpush1.bf16.msra.mxu0 %v7624_v7  ;;  %2663 = vmatpush1.bf16.msra.mxu1 %v7633_v15  ;;  %v6825_v26 = vpack.i.b16 %v10135_v35, %v10137_v47  ;;  %v10140_v33 = vld [vmem:[#allocation33_spill] sm:$0xff]  ;;  %v10141_v15 = vcombine.high %v8225_v60, %v8228_v10  ;;  %v10143_v47 = vld [vmem:[#allocation30_spill] sm:$0xff]  ;;  %v7653_v10 = vld [vmem:[#allocation2 + $0x54] ss:$8 sps:$4 sm:$0xff]  }
  0xe2   :  { %6081 = vmatprep.subr.bf16.mxu0 %v7632_v52  ;;  %2664 = vmatprep.subr.bf16.mxu1 %v7641_v50  ;;  %v6826_v41 = vpack.i.b16 %v10140_v33, %v584_v20  ;;  %v7636_v58 = vld [vmem:[#allocation2 + $0x620] ss:$8 sps:$4 sm:$0xff]   ;;  %v10142_v22 = vcombine.high %v8300_v42, %v8331_v38  ;;  %v5331_v25 = vcombine.low %v5309_v27, %v5316_v28  ;;  %v7642_v33 = vld [vmem:[#allocation2 + $0x630] ss:$8 sps:$4 sm:$0xff]  }
  0xe3   :  { %v1947_v7 = vcombine.low %v6823_v46, %v6824_v17  ;;  %4499 = vmatprep.mubr.bf16.mxu0 %v10141_v15  ;;  %v5332_v35 = vcombine.high %v5309_v27, %v5316_v28  ;;  %v10144_v52 = vld [vmem:[#allocation29_spill] sm:$0xff]  ;;  %v5333_v11 = vcombine.low %v5323_v48, %v5330_v36  ;;  %v5334_v9 = vcombine.high %v5323_v48, %v5330_v36  ;;  %v7095_v28 = vld.sshfl [vmem:[%s9926_s0 + $0x50] sm:$0xff pattern:$0x75316420] }
  0xe4   :  { %1780 = vmatprep.mubr.bf16.mxu1 %v10142_v22  ;;  %v1949_v50 = vcombine.low %v10144_v52, %v10143_v47  ;;  %v1948_v20 = vcombine.low %v6825_v26, %v6826_v41  ;;  %v8838_v46 = vrot.slane %v1946_v12, %v7964_v53  ;;  %v7093_v60 = vld.sshfl [vmem:[%s9926_s0 + $0x40] sm:$0xff pattern:$0x75316420]  ;;  %v8847_v38 = vrot.slane %v5331_v25, %v7964_v53  ;;  %v7094_v48 = vld.sshfl [vmem:[%s9926_s0 + $0x48] sm:$0xff pattern:$0x75316420] }
  0xe5   :  { %6082 = vmatpush1.bf16.msra.mxu0 %v7630_v2  ;;  %2665 = vmatpush1.bf16.msra.mxu1 %v7639_v43  ;;  %v8844_v42 = vrot.slane %v5332_v35, %v7964_v53  ;;  %v8850_v27 = vrot.slane %v1947_v7, %v7964_v53  ;;  %v8856_v17 = vrot.slane %v5334_v9, %v7964_v53  ;;  %v5104_v26 = vunpack.i.h.s16 %v8790_v31  ;;  %v7096_v9 = vld.sshfl [vmem:[%s9926_s0 + $0x58] sm:$0xff pattern:$0x75316420] }
  0xe6   :  { %6083 = vmatprep.subr.bf16.mxu0 %v7638_v45  ;;  %2666 = vmatprep.subr.bf16.mxu1 %v7647_v44  ;;  %v8859_v2 = vrot.slane %v5333_v11, %v7964_v53  ;;  %v8862_v43 = vrot.slane %v1948_v20, %v7964_v53  ;;  %v8869_v12 = vrot.slane %v1949_v50, %v7964_v53  ;;  %v10206_v22 = vld [vmem:[#allocation52_spill] sm:$0xff] }
  0xe7   :  { %v1979_v45 = vcombine.high %v8838_v46, %v8850_v27  ;;  %v4734_v44 = vcombine.high %v8787_v21, %v8787_v21  ;;  %v4735_v36 = vcombine.high %v8790_v31, %v8790_v31  ;;  %v10145_v41 = vcombine.high %v8231_v62, %v8238_v0  ;;  %v7651_v21 = vld [vmem:[#allocation2 + $0x50] ss:$8 sps:$4 sm:$0xff]  }
  0xe8   :  { %v10146_v7 = vcombine.high %v8304_v14, %v8337_v23  ;;  %v5365_v15 = vcombine.low %v8844_v42, %v8856_v17  ;;  %v4750_v25 = vcombine.low %v7093_v60, %v7094_v48  ;;  %v1981_v31 = vcombine.high %v8862_v43, %v8869_v12  ;;  %v7650_v14 = vld [vmem:[#allocation2 + $0x644] ss:$8 sps:$4 sm:$0xff]  }
  0xe9   :  { %4500 = vmatmul.mubr.bf16.gmra.mrb[4].mxu0 %v10145_v41  ;;  %2667 = vmatpush1.bf16.msra.mxu1 %v7645_v1  ;;  %v8893_v62 = vrot.slane %v1979_v45, %v7964_v53  ;;  %v4751_v0 = vcombine.high %v7093_v60, %v7094_v48  ;;  %v5106_v35 = vunpack.i.h.s16 %v4734_v44  ;;  %v7659_v23 = vld [vmem:[#allocation2 + $0x64] ss:$8 sps:$4 sm:$0xff]   ;;  %v4782_v52 = vcombine.low %v7095_v28, %v7096_v9  ;;  %v7648_v45 = vld [vmem:[#allocation2 + $0x640] ss:$8 sps:$4 sm:$0xff]  }
  0xea   :  { %1781 = vmatmul.mubr.bf16.gmra.mrb[8].mxu1 %v10146_v7  ;;  %6084 = vmatpush1.bf16.msra.mxu0 %v7636_v58  ;;  %v4758_v47 = vrot.slane %v4750_v25, %v7964_v53  ;;  %v4783_v50 = vcombine.high %v7095_v28, %v7096_v9  ;;  %v5108_v11 = vunpack.i.h.s16 %v4735_v36  ;;  %v10148_v58 = vcombine.high %v8334_v49, %v8352_v29  ;;  %v7656_v25 = vld [vmem:[#allocation2 + $0x654] ss:$8 sps:$4 sm:$0xff]  }
  0xeb   :  { %10147 = vst [vmem:[#allocation13_spill] sm:$0xff] %v8893_v62  ;;  %6085 = vmatprep.subr.bf16.mxu0 %v7644_v5  ;;  %2668 = vmatprep.subr.bf16.mxu1 %v7653_v10  ;;  %v10149_v1 = vcombine.high %v8437_v51, %v8455_v4  ;;  %v8903_v20 = vrot.slane %v1981_v31, %v7964_v53  ;;  %v10150_v10 = vld [vmem:[#allocation35_spill] sm:$0xff]  ;;  %v7657_v51 = vld [vmem:[#allocation2 + $0x60] ss:$8 sps:$4 sm:$0xff]  }
  0xec   :  { %4509 = vmatprep.mubr.bf16.mxu0 %v10148_v58  ;;  %v4765_v5 = vrot.slane %v4751_v0, %v7964_v53  ;;  %v7119_v60 = vpack.i.b16 %v4734_v44, %v5104_v26  ;;  %v596_v48 = vunpack.i.h.s16 %v10150_v10  ;;  %v4790_v28 = vrot.slane %v4782_v52, %v7964_v53  ;;  %v10151_v44 = vld [vmem:[#allocation36_spill] sm:$0xff] }
  0xed   :  { %1790 = vmatprep.mubr.bf16.mxu1 %v10149_v1  ;;  %v8909_v9 = vrot.slane %v4783_v50, %v7964_v53  ;;  %v5109_v49 = vunpack.i.h.s16 %v4758_v47  ;;  %v7120_v29 = vpack.i.b16 %v4735_v36, %v5106_v35  ;;  %2669 = vmatpush1.bf16.msra.mxu1 %v7651_v21  ;;  %v2012_v4 = vcombine.low %v8893_v62, %v8903_v20  ;;  %v7665_v31 = vld [vmem:[#allocation2 + $0x74] ss:$8 sps:$4 sm:$0xff]   ;;  %v7732_v62 = vld [vmem:[#allocation2 + $0x720] ss:$8 sps:$4 sm:$0xff]  }
  0xee   :  { %6086 = vmatpush1.bf16.msra.mxu0 %v7642_v33  ;;  %v7136_v41 = vcombine.high %v4758_v47, %v4765_v5  ;;  %v1978_v26 = vcombine.low %v8838_v46, %v8850_v27  ;;  %v598_v7 = vunpack.i.h.s16 %v10151_v44  ;;  %2670 = vmatprep.subr.bf16.mxu1 %v7659_v23  ;;  %v8916_v0 = vcombine.high %v4790_v28, %v4790_v28  ;;  %v7654_v27 = vld [vmem:[#allocation2 + $0x650] ss:$8 sps:$4 sm:$0xff]  }
  0xef   :  { %6087 = vmatprep.subr.bf16.mxu0 %v7650_v14  ;;  %v5116_v52 = vunpack.i.h.s16 %v4790_v28  ;;  %v5118_v36 = vunpack.i.h.s16 %v8909_v9  ;;  %v5260_v33 = vpack.i.b16 %v5109_v49, %v5108_v11  ;;  %v5367_v21 = vcombine.low %v7119_v60, %v7120_v29  ;;  %v10154_v60 = vld [vmem:[#allocation32_spill] sm:$0xff]  ;;  %v7662_v28 = vld [vmem:[#allocation2 + $0x664] ss:$8 sps:$4 sm:$0xff]  }
  0xf0   :  { %v5391_v35 = vrot.slane %v7136_v41, %v7964_v53  ;;  %v1980_v47 = vcombine.low %v8862_v43, %v8869_v12  ;;  %v8923_v46 = vrot.slane %v1978_v26, %v7964_v53  ;;  %v10152_v14 = vcombine.high %v8340_v30, %v8359_v24  ;;  %v7663_v43 = vld [vmem:[#allocation2 + $0x70] ss:$8 sps:$4 sm:$0xff]   ;;  %v7660_v29 = vld [vmem:[#allocation2 + $0x660] ss:$8 sps:$4 sm:$0xff]  }
  0xf1   :  { %v10153_v23 = vcombine.high %v8444_v34, %v8458_v56  ;;  %v7121_v50 = vpack.i.b16 %v8909_v9, %v5116_v52  ;;  %v7122_v11 = vpack.i.b16 %v8916_v0, %v5118_v36  ;;  %v5368_v58 = vcombine.low %v5260_v33, %v4765_v5  ;;  %2671 = vmatpush1.bf16.msra.mxu1 %v7657_v51  ;;  %v10155_v30 = vld [vmem:[#allocation34_spill] sm:$0xff]  ;;  %v7668_v36 = vld [vmem:[#allocation2 + $0x674] ss:$8 sps:$4 sm:$0xff]   ;;  %v7669_v33 = vld [vmem:[#allocation2 + $0x80] ss:$8 sps:$4 sm:$0xff]  }
  0xf2   :  { %4510 = vmatmul.mubr.bf16.gmra.mrb[8].mxu0 %v10152_v14  ;;  %v5377_v12 = vrot.slane %v5367_v21, %v7964_v53  ;;  %v8935_v1 = vrot.slane %v1980_v47, %v7964_v53  ;;  %v6827_v24 = vpack.i.b16 %v10155_v30, %v10154_v60  ;;  %2672 = vmatprep.subr.bf16.mxu1 %v7665_v31  ;;  %v7671_v34 = vld [vmem:[#allocation2 + $0x84] ss:$8 sps:$4 sm:$0xff]   ;;  %v10156_v5 = vunpack.i.h.s16 %v10155_v30  ;;  %v10160_v14 = vld [vmem:[#allocation31_spill] sm:$0xff] }
  0xf3   :  { %1791 = vmatmul.mubr.bf16.gmra.mrb[12].mxu1 %v10153_v23  ;;  %6088 = vmatpush1.bf16.msra.mxu0 %v7648_v45  ;;  %v5370_v56 = vcombine.low %v7121_v50, %v7122_v11  ;;  %v5384_v49 = vrot.slane %v5368_v58, %v7964_v53  ;;  %v10157_v51 = vcombine.high %v8466_v61, %v8491_v57  ;;  %v10159_v31 = vld [vmem:[#allocation37_spill] sm:$0xff]  ;;  %v7677_v57 = vld [vmem:[#allocation2 + $0x94] ss:$8 sps:$4 sm:$0xff]  }
  0xf4   :  { %6089 = vmatprep.subr.bf16.mxu0 %v7656_v25  ;;  %v6828_v45 = vpack.i.b16 %v10150_v10, %v10156_v5  ;;  %v10158_v41 = vcombine.high %v8536_v59, %v8545_v13  ;;  %v6829_v25 = vpack.i.b16 %v10151_v44, %v596_v48  ;;  %v6830_v52 = vpack.i.b16 %v10159_v31, %v598_v7  ;;  %v10161_v13 = vld [vmem:[#allocation38_spill] sm:$0xff]  ;;  %v10162_v50 = vld [vmem:[#allocation40_spill] sm:$0xff]  ;;  %v10163_v11 = vld [vmem:[#allocation39_spill] sm:$0xff] }
  0xf5   :  { %4519 = vmatprep.mubr.bf16.mxu0 %v10157_v51  ;;  %v5398_v10 = vrot.slane %v5370_v56, %v7964_v53  ;;  %v5400_v21 = vcombine.high %v5377_v12, %v5384_v49  ;;  %v5399_v47 = vcombine.low %v5377_v12, %v5384_v49  ;;  %v2014_v61 = vcombine.low %v10160_v14, %v6827_v24  ;;  %v7097_v12 = vld.sshfl [vmem:[%s9926_s0 + $0x60] sm:$0xff pattern:$0x75316420]  ;;  %v7711_v31 = vld [vmem:[#allocation2 + $0xf0] ss:$8 sps:$4 sm:$0xff]  }
  0xf6   :  { %1800 = vmatprep.mubr.bf16.mxu1 %v10158_v41  ;;  %2673 = vmatpush1.bf16.msra.mxu1 %v7663_v43  ;;  %v2015_v59 = vcombine.low %v6828_v45, %v6829_v25  ;;  %v2016_v23 = vcombine.low %v6830_v52, %v10161_v13  ;;  %v2017_v58 = vcombine.low %v10163_v11, %v10162_v50  ;;  %v5120_v51 = vunpack.i.h.s16 %v8916_v0  ;;  %v7674_v25 = vld [vmem:[#allocation2 + $0x684] ss:$8 sps:$4 sm:$0xff]  }
  0xf7   :  { %6090 = vmatpush1.bf16.msra.mxu0 %v7654_v27  ;;  %2674 = vmatprep.subr.bf16.mxu1 %v7671_v34  ;;  %v5402_v48 = vcombine.high %v5391_v35, %v5398_v10  ;;  %v8959_v44 = vrot.slane %v5400_v21, %v7964_v53  ;;  %v5401_v7 = vcombine.low %v5391_v35, %v5398_v10  ;;  %v7098_v27 = vld.sshfl [vmem:[%s9926_s0 + $0x68] sm:$0xff pattern:$0x75316420]  ;;  %v7666_v35 = vld [vmem:[#allocation2 + $0x670] ss:$8 sps:$4 sm:$0xff]  }
  0xf8   :  { %6091 = vmatprep.subr.bf16.mxu0 %v7662_v28  ;;  %v8968_v43 = vrot.slane %v5399_v47, %v7964_v53  ;;  %v8971_v60 = vrot.slane %v2014_v61, %v7964_v53  ;;  %v8974_v30 = vrot.slane %v2015_v59, %v7964_v53  ;;  %v8977_v24 = vrot.slane %v2016_v23, %v7964_v53  ;;  %v7675_v34 = vld [vmem:[#allocation2 + $0x90] ss:$8 sps:$4 sm:$0xff]   ;;  %v7683_v0 = vld [vmem:[#allocation2 + $0xa4] ss:$8 sps:$4 sm:$0xff]  }
  0xf9   :  { %10164 = vst [vmem:[#allocation27_spill] sm:$0xff] %v8959_v44  ;;  %v10165_v28 = vcombine.high %v8469_v32, %v8494_v63  ;;  %v10166_v56 = vcombine.high %v8549_v37, %v8561_v40  ;;  %v8986_v49 = vrot.slane %v5402_v48, %v7964_v53  ;;  %v8989_v5 = vrot.slane %v5401_v7, %v7964_v53  ;;  %v7099_v63 = vld.sshfl [vmem:[%s9926_s0 + $0x70] sm:$0xff pattern:$0x75316420] }
  0xfa   :  { %v8992_v45 = vrot.slane %v2017_v58, %v7964_v53  ;;  %2675 = vmatpush1.bf16.msra.mxu1 %v7669_v33  ;;  %v2047_v32 = vcombine.high %v8971_v60, %v8974_v30  ;;  %v7100_v37 = vld.sshfl [vmem:[%s9926_s0 + $0x78] sm:$0xff pattern:$0x75316420]  ;;  %v4799_v40 = vcombine.high %v8909_v9, %v8909_v9  ;;  %v4814_v41 = vcombine.low %v7097_v12, %v7098_v27  ;;  %v10168_v9 = vld [vmem:[#allocation70_spill] sm:$0xff] }
  0xfb   :  { %4520 = vmatmul.mubr.bf16.gmra.mrb[12].mxu0 %v10165_v28  ;;  %1801 = vmatmul.mubr.bf16.gmra.mrb[16].mxu1 %v10166_v56  ;;  %v10167_v33 = vcombine.high %v8576_v55, %v8605_v8  ;;  %v10169_v10 = vcombine.high %v8627_v54, %v10168_v9  ;;  %v4815_v21 = vcombine.high %v7097_v12, %v7098_v27  ;;  %v7672_v55 = vld [vmem:[#allocation2 + $0x680] ss:$8 sps:$4 sm:$0xff]   ;;  %v7680_v58 = vld [vmem:[#allocation2 + $0x694] ss:$8 sps:$4 sm:$0xff]  }
  0xfc   :  { %6092 = vmatpush1.bf16.msra.mxu0 %v7660_v29  ;;  %2676 = vmatprep.subr.bf16.mxu1 %v7677_v57  ;;  %v2049_v52 = vcombine.high %v8977_v24, %v8992_v45  ;;  %v4822_v47 = vrot.slane %v4814_v41, %v7964_v53  ;;  %v5122_v14 = vunpack.i.h.s16 %v4799_v40  ;;  %v4846_v57 = vcombine.low %v7099_v63, %v7100_v37  ;;  %v7681_v8 = vld [vmem:[#allocation2 + $0xa0] ss:$8 sps:$4 sm:$0xff]   ;;  %v7689_v48 = vld [vmem:[#allocation2 + $0xb4] ss:$8 sps:$4 sm:$0xff]  }
  0xfd   :  { %6093 = vmatprep.subr.bf16.mxu0 %v7668_v36  ;;  %4529 = vmatprep.mubr.bf16.mxu0 %v10167_v33  ;;  %v9018_v36 = vrot.slane %v2047_v32, %v7964_v53  ;;  %v4847_v59 = vcombine.high %v7099_v63, %v7100_v37  ;;  %v7123_v13 = vpack.i.b16 %v4799_v40, %v5120_v51  ;;  %v10172_v51 = vld [vmem:[#allocation65_spill] sm:$0xff]  ;;  %v10173_v32 = vld [vmem:[#allocation68_spill] sm:$0xff]  ;;  %v7687_v33 = vld [vmem:[#allocation2 + $0xb0] ss:$8 sps:$4 sm:$0xff]  }
  0xfe   :  { %1810 = vmatprep.mubr.bf16.mxu1 %v10169_v10  ;;  %v9022_v61 = vrot.slane %v2049_v52, %v7964_v53  ;;  %2677 = vmatpush1.bf16.msra.mxu1 %v7675_v34  ;;  %v4829_v54 = vrot.slane %v4815_v21, %v7964_v53  ;;  %v4830_v23 = vcombine.high %v4822_v47, %v4822_v47  ;;  %v5123_v50 = vunpack.i.h.s16 %v4822_v47  ;;  %v10176_v63 = vld [vmem:[#allocation72_spill] sm:$0xff]  ;;  %v7678_v52 = vld [vmem:[#allocation2 + $0x690] ss:$8 sps:$4 sm:$0xff]   ;;  %v7686_v47 = vld [vmem:[#allocation2 + $0x6a4] ss:$8 sps:$4 sm:$0xff]  }
  0xff   :  { %10170 = vst [vmem:[#allocation15_spill] sm:$0xff] %v9018_v36  ;;  %v2046_v11 = vcombine.low %v8971_v60, %v8974_v30  ;;  %2678 = vmatprep.subr.bf16.mxu1 %v7683_v0  ;;  %v4854_v12 = vrot.slane %v4846_v57, %v7964_v53  ;;  %v4861_v27 = vrot.slane %v4847_v59, %v7964_v53  ;;  %v10175_v30 = vld [vmem:[#allocation71_spill] sm:$0xff] }
 0x100   :  { %10171 = vst [vmem:[#allocation12_spill] sm:$0xff] %v9022_v61  ;;  %6094 = vmatpush1.bf16.msra.mxu0 %v7666_v35  ;;  %v4831_v35 = vcombine.high %v4829_v54, %v4829_v54  ;;  %v5267_v28 = vpack.i.b16 %v5123_v50, %v5122_v14  ;;  %v5436_v34 = vcombine.low %v4829_v54, %v4830_v23  ;;  %v10178_v10 = vld [vmem:[#allocation43_spill] sm:$0xff]  ;;  %v7695_v14 = vld [vmem:[#allocation2 + $0xc4] ss:$8 sps:$4 sm:$0xff]   ;;  %v10182_v50 = vld [vmem:[#allocation76_spill] sm:$0xff] }
 0x101   :  { %6095 = vmatprep.subr.bf16.mxu0 %v7674_v25  ;;  %v2048_v56 = vcombine.low %v8977_v24, %v8992_v45  ;;  %v10174_v60 = vcombine.high %v10172_v51, %v10173_v32  ;;  %v10177_v37 = vcombine.high %v10175_v30, %v10176_v63  ;;  %v4862_v40 = vcombine.high %v4854_v12, %v4854_v12  ;;  %v10180_v23 = vld [vmem:[#allocation77_spill] sm:$0xff]  ;;  %v7692_v30 = vld [vmem:[#allocation2 + $0x6b4] ss:$8 sps:$4 sm:$0xff]  }
 0x102   :  { %v9039_v41 = vcombine.high %v4861_v27, %v4861_v27  ;;  %v5130_v25 = vunpack.i.h.s16 %v4854_v12  ;;  %v5132_v0 = vunpack.i.h.s16 %v4861_v27  ;;  %2679 = vmatpush1.bf16.msra.mxu1 %v7681_v8  ;;  %v5435_v9 = vcombine.low %v7123_v13, %v5267_v28  ;;  %v10179_v8 = vld [vmem:[#allocation73_spill] sm:$0xff] }
 0x103   :  { %4530 = vmatmul.mubr.bf16.gmra.mrb[16].mxu0 %v10174_v60  ;;  %1811 = vmatmul.mubr.bf16.gmra.mrb[20].mxu1 %v10177_v37  ;;  %v5452_v24 = vrot.slane %v5436_v34, %v7964_v53  ;;  %v9043_v45 = vrot.slane %v2046_v11, %v7964_v53  ;;  %v610_v21 = vunpack.i.h.s16 %v10178_v10  ;;  %v5134_v57 = vunpack.i.h.s16 %v4862_v40  ;;  %v7684_v28 = vld [vmem:[#allocation2 + $0x6a0] ss:$8 sps:$4 sm:$0xff]   ;;  %v7701_v37 = vld [vmem:[#allocation2 + $0xd4] ss:$8 sps:$4 sm:$0xff]  }
 0x104   :  { %6096 = vmatpush1.bf16.msra.mxu0 %v7672_v55  ;;  %2680 = vmatprep.subr.bf16.mxu1 %v7689_v48  ;;  %v7124_v59 = vpack.i.b16 %v4861_v27, %v5130_v25  ;;  %v7125_v54 = vpack.i.b16 %v4862_v40, %v5132_v0  ;;  %v9047_v55 = vrot.slane %v2048_v56, %v7964_v53  ;;  %v10185_v32 = vld [vmem:[#allocation41_spill] sm:$0xff] }
 0x105   :  { %6097 = vmatprep.subr.bf16.mxu0 %v7680_v58  ;;  %v10181_v13 = vcombine.high %v10179_v8, %v10180_v23  ;;  %v10183_v11 = vcombine.high %v10182_v50, %v10182_v50  ;;  %v5445_v12 = vrot.slane %v5435_v9, %v7964_v53  ;;  %v10184_v58 = vld [vmem:[#allocation42_spill] sm:$0xff]  ;;  %v365_v27 = vcombine.high %v10178_v10, %v10178_v10  ;;  %v7693_v63 = vld [vmem:[#allocation2 + $0xc0] ss:$8 sps:$4 sm:$0xff]  }
 0x106   :  { %v364_v48 = vcombine.high %v10184_v58, %v10184_v58  ;;  %v7126_v34 = vpack.i.b16 %v9039_v41, %v5134_v57  ;;  %v5437_v56 = vcombine.low %v4831_v35, %v7124_v59  ;;  %v6831_v60 = vpack.i.b16 %v10184_v58, %v10185_v32  ;;  %2681 = vmatpush1.bf16.msra.mxu1 %v7687_v33  ;;  %v7102_v33 = vld.sshfl [vmem:[%s9926_s0 + $0x98] sm:$0xff pattern:$0x75316420]  ;;  %v10191_v50 = vld [vmem:[#allocation78_spill] sm:$0xff] }
 0x107   :  { %4539 = vmatprep.mubr.bf16.mxu0 %v10181_v13  ;;  %1820 = vmatprep.mubr.bf16.mxu1 %v10183_v11  ;;  %v5468_v40 = vcombine.high %v5445_v12, %v5452_v24  ;;  %v5467_v25 = vcombine.low %v5445_v12, %v5452_v24  ;;  %v10186_v9 = vunpack.i.h.s16 %v10184_v58  ;;  %v7690_v13 = vld [vmem:[#allocation2 + $0x6b0] ss:$8 sps:$4 sm:$0xff]   ;;  %v10196_v32 = vld [vmem:[#allocation44_spill] sm:$0xff] }
 0x108   :  { %6098 = vmatpush1.bf16.msra.mxu0 %v7678_v52  ;;  %v612_v0 = vunpack.i.h.s16 %v364_v48  ;;  %2682 = vmatprep.subr.bf16.mxu1 %v7695_v14  ;;  %v5438_v35 = vcombine.low %v7125_v54, %v7126_v34  ;;  %v5459_v57 = vrot.slane %v5437_v56, %v7964_v53  ;;  %v6833_v59 = vpack.i.b16 %v364_v48, %v610_v21  ;;  %v7101_v52 = vld.sshfl [vmem:[%s9926_s0 + $0x90] sm:$0xff pattern:$0x75316420]  ;;  %v10189_v14 = vld [vmem:[#allocation48_spill] sm:$0xff]  ;;  %v10195_v56 = vld [vmem:[#allocation45_spill] sm:$0xff] }
 0x109   :  { %v6832_v8 = vpack.i.b16 %v10178_v10, %v10186_v9  ;;  %6099 = vmatprep.subr.bf16.mxu0 %v7686_v47  ;;  %v9076_v24 = vrot.slane %v5468_v40, %v7964_v53  ;;  %v9079_v23 = vrot.slane %v5467_v25, %v7964_v53  ;;  %v10188_v47 = vld [vmem:[#allocation47_spill] sm:$0xff]  ;;  %v10190_v21 = vld [vmem:[#allocation74_spill] sm:$0xff]  ;;  %v2084_v40 = vcombine.low %v10196_v32, %v10195_v56 }
 0x10a   :  { %v6834_v10 = vpack.i.b16 %v365_v27, %v612_v0  ;;  %v6835_v54 = vpack.i.b16 %v10189_v14, %v10188_v47  ;;  %v10192_v11 = vcombine.high %v10190_v21, %v10191_v50  ;;  %v10193_v12 = vld [vmem:[#allocation75_spill] sm:$0xff]  ;;  %v5466_v48 = vrot.slane %v5438_v35, %v7964_v53  ;;  %v7698_v27 = vld [vmem:[#allocation2 + $0x6c4] ss:$8 sps:$4 sm:$0xff]   ;;  %2683 = vmatpush1.bf16.msra.mxu1 %v7693_v63 }
 0x10b   :  { %10187 = vst [vmem:[#allocation17_spill] sm:$0xff] %v9076_v24  ;;  %v10194_v58 = vcombine.high %v10193_v12, %v10193_v12  ;;  %v2082_v34 = vcombine.low %v6831_v60, %v6832_v8  ;;  %v7699_v25 = vld [vmem:[#allocation2 + $0xd0] ss:$8 sps:$4 sm:$0xff]   ;;  %v7707_v0 = vld [vmem:[#allocation2 + $0xe4] ss:$8 sps:$4 sm:$0xff]   ;;  %v4878_v21 = vcombine.low %v7101_v52, %v7102_v33  ;;  %2684 = vmatprep.subr.bf16.mxu1 %v7701_v37  ;;  %v10205_v29 = vunpack.i.h.s16 %v10189_v14 }
 0x10c   :  { %4540 = vmatmul.mubr.bf16.gmra.mrb[20].mxu0 %v10192_v11  ;;  %v2083_v9 = vcombine.low %v6833_v59, %v6834_v10  ;;  %v10197_v47 = vld [vmem:[#allocation46_spill] sm:$0xff]  ;;  %v5470_v50 = vcombine.high %v5459_v57, %v5466_v48  ;;  %v5469_v11 = vcombine.low %v5459_v57, %v5466_v48  ;;  %v7103_v60 = vld.sshfl [vmem:[%s9926_s0 + $0xa0] sm:$0xff pattern:$0x75316420]  ;;  %v10198_v63 = vld [vmem:[#allocation79_spill] sm:$0xff]  ;;  %v9110_v37 = vrot.slane %v2084_v40, %v7964_v53 }
 0x10d   :  { %1821 = vmatmul.mubr.bf16.gmra.mrb[24].mxu1 %v10194_v58  ;;  %6100 = vmatpush1.bf16.msra.mxu0 %v7684_v28  ;;  %v2085_v51 = vcombine.low %v10197_v47, %v6835_v54  ;;  %v9094_v12 = vrot.slane %v2082_v34, %v7964_v53  ;;  %v7104_v28 = vld.sshfl [vmem:[%s9926_s0 + $0xa8] sm:$0xff pattern:$0x75316420]  ;;  %v10199_v8 = vcombine.high %v10198_v63, %v10198_v63  ;;  %v5136_v57 = vunpack.i.h.s16 %v9039_v41  ;;  %v9129_v41 = vld.sshfl [vmem:[%s9926_s0 + $0xb0] sm:$0xff pattern:$0x75316420] }
 0x10e   :  { %6101 = vmatprep.subr.bf16.mxu0 %v7692_v30  ;;  %2690 = vmatprep.mubr.bf16.mxu1 %v1944_v16  ;;  %v2099_v30 = vrot.slane %v2083_v9, %v7964_v53  ;;  %v7696_v59 = vld [vmem:[#allocation2 + $0x6c0] ss:$8 sps:$4 sm:$0xff]   ;;  %v9117_v54 = vrot.slane %v5470_v50, %v7964_v53  ;;  %v9120_v58 = vrot.slane %v5469_v11, %v7964_v53  ;;  %v9134_v56 = vld.sshfl [vmem:[%s9926_s0 + $0xb8] sm:$0xff pattern:$0x75316420] }
 0x10f   :  { %4549 = vmatprep.mubr.bf16.mxu0 %v10199_v8  ;;  %v9113_v35 = vrot.slane %v2085_v51, %v7964_v53  ;;  %v7705_v10 = vld [vmem:[#allocation2 + $0xe0] ss:$8 sps:$4 sm:$0xff]   ;;  %v4879_v48 = vcombine.high %v7101_v52, %v7102_v33  ;;  %v4886_v16 = vrot.slane %v4878_v21, %v7964_v53  ;;  %2685 = vmatpush1.bf16.msra.mxu1 %v7699_v25  ;;  %v10200_v33 = vld [vmem:[#allocation50_spill] sm:$0xff]  ;;  %v7713_v40 = vld [vmem:[#allocation2 + $0xf4] ss:$8 sps:$4 sm:$0xff]  }
 0x110   :  { %v2115_v34 = vcombine.high %v9094_v12, %v2099_v30  ;;  %v4910_v52 = vcombine.low %v7103_v60, %v7104_v28  ;;  %v624_v32 = vunpack.i.h.s16 %v10200_v33  ;;  %2686 = vmatprep.subr.bf16.mxu1 %v7707_v0  ;;  %v4911_v63 = vcombine.high %v7103_v60, %v7104_v28 }
 0x111   :  { %6102 = vmatpush1.bf16.msra.mxu0 %v7690_v13  ;;  %v2117_v51 = vcombine.high %v9110_v37, %v9113_v35  ;;  %v7704_v13 = vld [vmem:[#allocation2 + $0x6d4] ss:$8 sps:$4 sm:$0xff]   ;;  %v4893_v47 = vrot.slane %v4879_v48, %v7964_v53  ;;  %v5137_v21 = vunpack.i.h.s16 %v4886_v16  ;;  %v10203_v0 = vcombine.high %v8682_v6, %v8682_v6  ;;  %v7710_v6 = vld [vmem:[#allocation2 + $0x6e4] ss:$8 sps:$4 sm:$0xff]  }
 0x112   :  { %6103 = vmatprep.subr.bf16.mxu0 %v7698_v27  ;;  %v9143_v50 = vrot.slane %v2115_v34, %v7964_v53  ;;  %v4918_v27 = vrot.slane %v4910_v52, %v7964_v53  ;;  %v4942_v8 = vcombine.low %v9129_v41, %v9134_v56  ;;  %v2114_v48 = vcombine.low %v9094_v12, %v2099_v30  ;;  %v7702_v34 = vld [vmem:[#allocation2 + $0x6d0] ss:$8 sps:$4 sm:$0xff]   ;;  %v10204_v30 = vld [vmem:[#allocation49_spill] sm:$0xff] }
 0x113   :  { %v9146_v11 = vrot.slane %v2117_v51, %v7964_v53  ;;  %v5274_v9 = vpack.i.b16 %v5137_v21, %v5136_v57  ;;  %v7137_v25 = vcombine.high %v4886_v16, %v4893_v47  ;;  %2687 = vmatpush1.bf16.msra.mxu1 %v7705_v10  ;;  %v4925_v28 = vrot.slane %v4911_v63, %v7964_v53 }
 0x114   :  { %10201 = vst [vmem:[#allocation11_spill] sm:$0xff] %v9143_v50  ;;  %4550 = vmatmul.mubr.bf16.gmra.mrb[24].mxu0 %v10203_v0  ;;  %v4926_v51 = vcombine.high %v4918_v27, %v4918_v27  ;;  %v5144_v52 = vunpack.i.h.s16 %v4918_v27  ;;  %2688 = vmatprep.subr.bf16.mxu1 %v7713_v40  ;;  %v7719_v0 = vld [vmem:[#allocation2 + $0x104] ss:$8 sps:$4 sm:$0xff]   ;;  %v9159_v57 = vrot.slane %v4942_v8, %v7964_v53 }
 0x115   :  { %10202 = vst [vmem:[#allocation10_spill] sm:$0xff] %v9146_v11  ;;  %6104 = vmatpush1.bf16.msra.mxu0 %v7696_v59  ;;  %v5503_v16 = vcombine.low %v5274_v9, %v4893_v47  ;;  %v5520_v12 = vrot.slane %v7137_v25, %v7964_v53  ;;  %v626_v59 = vunpack.i.h.s16 %v10204_v30  ;;  %6111 = vmatprep.mubr.bf16.mxu0 %v5365_v15  ;;  %v5146_v21 = vunpack.i.h.s16 %v4925_v28  ;;  %v7708_v25 = vld [vmem:[#allocation2 + $0x6e0] ss:$8 sps:$4 sm:$0xff]  }
 0x116   :  { %6105 = vmatprep.subr.bf16.mxu0 %v7704_v13  ;;  %v4927_v10 = vcombine.high %v4925_v28, %v4925_v28  ;;  %v5148_v63 = vunpack.i.h.s16 %v4926_v51  ;;  %v7127_v27 = vpack.i.b16 %v4925_v28, %v5144_v52  ;;  %v5151_v13 = vunpack.i.h.s16 %v9159_v57  ;;  %v7717_v47 = vld [vmem:[#allocation2 + $0x100] ss:$8 sps:$4 sm:$0xff]   ;;  %v7716_v52 = vld [vmem:[#allocation2 + $0x6f4] ss:$8 sps:$4 sm:$0xff]  }
 0x117   :  { %v5513_v40 = vrot.slane %v5503_v16, %v7964_v53  ;;  %v2116_v8 = vcombine.low %v9110_v37, %v9113_v35  ;;  %v9171_v9 = vrot.slane %v2114_v48, %v7964_v53  ;;  %2689 = vmatpush1.bf16.msra.mxu1 %v7711_v31  ;;  %v7128_v15 = vpack.i.b16 %v4926_v51, %v5146_v21  ;;  %v7725_v16 = vld [vmem:[#allocation2 + $0x114] ss:$8 sps:$4 sm:$0xff]   ;;  %v10211_v21 = vld [vmem:[#allocation57_spill] sm:$0xff] }
 0x118   :  { %v5150_v60 = vunpack.i.h.s16 %v4927_v10  ;;  %v7129_v7 = vpack.i.b16 %v4927_v10, %v5148_v63  ;;  %v6836_v28 = vpack.i.b16 %v10200_v33, %v10205_v29  ;;  %2759 = vmatprep.subr.bf16.mxu1 %v7719_v0  ;;  %v6837_v31 = vpack.i.b16 %v10204_v30, %v624_v32  ;;  %v7714_v10 = vld [vmem:[#allocation2 + $0x6f0] ss:$8 sps:$4 sm:$0xff]  }
 0x119   :  { %6106 = vmatpush1.bf16.msra.mxu0 %v7702_v34  ;;  %v5536_v26 = vcombine.high %v5513_v40, %v5520_v12  ;;  %v9177_v37 = vrot.slane %v2116_v8, %v7964_v53  ;;  %v5535_v35 = vcombine.low %v5513_v40, %v5520_v12  ;;  %v5505_v34 = vcombine.low %v7127_v27, %v7128_v15  ;;  %v7723_v29 = vld [vmem:[#allocation2 + $0x110] ss:$8 sps:$4 sm:$0xff]   ;;  %v10209_v12 = vld [vmem:[#allocation56_spill] sm:$0xff]  ;;  %v7108_v27 = vld.sshfl [vmem:[%s9926_s0 + $0xc8] sm:$0xff pattern:$0x75316420] }
 0x11a   :  { %6107 = vmatprep.subr.bf16.mxu0 %v7710_v6  ;;  %v5281_v48 = vpack.i.b16 %v5151_v13, %v5150_v60  ;;  %v6838_v51 = vpack.i.b16 %v10206_v22, %v626_v59  ;;  %v10207_v14 = vcombine.low %v8799_v39, %v8802_v18  ;;  %v10208_v60 = vld [vmem:[#allocation55_spill] sm:$0xff]  ;;  %v10210_v59 = vunpack.i.h.s16 %v10209_v12  ;;  %v7722_v13 = vld [vmem:[#allocation2 + $0x704] ss:$8 sps:$4 sm:$0xff]  }
 0x11b   :  { %v9185_v33 = vrot.slane %v5536_v26, %v7964_v53  ;;  %v9190_v0 = vrot.slane %v5535_v35, %v7964_v53  ;;  %v6839_v32 = vpack.i.b16 %v10209_v12, %v10208_v60  ;;  %v5527_v30 = vrot.slane %v5505_v34, %v7964_v53  ;;  %v7107_v26 = vld.sshfl [vmem:[%s9926_s0 + $0xc0] sm:$0xff pattern:$0x75316420] }
 0x11c   :  { %2691 = vmatmul.mubr.bf16.vlgmr.msra.gmra.mrb[0].mxu1 %v10207_v14  ;;  %v5506_v22 = vcombine.low %v7129_v7, %v5281_v48  ;;  %v6840_v63 = vpack.i.b16 %v10211_v21, %v10210_v59  ;;  %v7731_v40 = vld [vmem:[#allocation2 + $0x124] ss:$8 sps:$4 sm:$0xff]   ;;  %v2150_v8 = vcombine.low %v6836_v28, %v6837_v31  ;;  %v10212_v7 = vld [vmem:[#allocation51_spill] sm:$0xff]  ;;  %v4943_v14 = vcombine.high %v9129_v41, %v9134_v56  ;;  %v7729_v60 = vld [vmem:[#allocation2 + $0x120] ss:$8 sps:$4 sm:$0xff]  }
 0x11d   :  { %6108 = vmatpush1.bf16.msra.mxu0 %v7708_v25  ;;  %2760 = vmatpush1.bf16.msra.mxu1 %v7717_v47  ;;  %v2151_v25 = vcombine.low %v6838_v51, %v10212_v7  ;;  %v10213_v47 = vld [vmem:[#allocation54_spill] sm:$0xff]  ;;  %v10214_v15 = vld [vmem:[#allocation53_spill] sm:$0xff]  ;;  %v4974_v51 = vcombine.low %v7107_v26, %v7108_v27  ;;  %v7728_v56 = vld [vmem:[#allocation2 + $0x714] ss:$8 sps:$4 sm:$0xff]  }
 0x11e   :  { %6109 = vmatprep.subr.bf16.mxu0 %v7716_v52  ;;  %2761 = vmatprep.subr.bf16.mxu1 %v7725_v16  ;;  %v2152_v35 = vcombine.low %v10214_v15, %v10213_v47  ;;  %v5534_v48 = vrot.slane %v5506_v22, %v7964_v53  ;;  %v2153_v34 = vcombine.low %v6839_v32, %v6840_v63  ;;  %v7726_v15 = vld [vmem:[#allocation2 + $0x710] ss:$8 sps:$4 sm:$0xff]  }
 0x11f   :  { %2700 = vmatprep.mubr.bf16.mxu1 %v2012_v4  ;;  %v4958_v52 = vcombine.high %v9159_v57, %v9159_v57  ;;  %v9216_v28 = vrot.slane %v2150_v8, %v7964_v53  ;;  %v9219_v16 = vrot.slane %v2151_v25, %v7964_v53  ;;  %v7720_v4 = vld [vmem:[#allocation2 + $0x700] ss:$8 sps:$4 sm:$0xff]   ;;  %v7737_v57 = vld [vmem:[#allocation2 + $0x134] ss:$8 sps:$4 sm:$0xff]   ;;  %v4957_v59 = vrot.slane %v4943_v14, %v7964_v53 }
 0x120   :  { %v9222_v31 = vrot.slane %v2152_v35, %v7964_v53  ;;  %v5538_v12 = vcombine.high %v5527_v30, %v5534_v48  ;;  %v5537_v32 = vcombine.low %v5527_v30, %v5534_v48  ;;  %v9225_v41 = vrot.slane %v2153_v34, %v7964_v53  ;;  %v7735_v35 = vld [vmem:[#allocation2 + $0x130] ss:$8 sps:$4 sm:$0xff]  }
 0x121   :  { %6110 = vmatpush1.bf16.msra.mxu0 %v7714_v10  ;;  %2762 = vmatpush1.bf16.msra.mxu1 %v7723_v29  ;;  %v2183_v22 = vcombine.high %v9216_v28, %v9219_v16  ;;  %v4975_v63 = vcombine.high %v7107_v26, %v7108_v27  ;;  %v4982_v8 = vrot.slane %v4974_v51, %v7964_v53 }
 0x122   :  { %6180 = vmatprep.subr.bf16.mxu0 %v7722_v13  ;;  %2763 = vmatprep.subr.bf16.mxu1 %v7731_v40  ;;  %v9231_v10 = vrot.slane %v5538_v12, %v7964_v53  ;;  %v9234_v29 = vrot.slane %v5537_v32, %v7964_v53  ;;  %v2185_v30 = vcombine.high %v9222_v31, %v9225_v41  ;;  %v7109_v13 = vld.sshfl [vmem:[%s9926_s0 + $0xd0] sm:$0xff pattern:$0x75316420]  ;;  %v7110_v40 = vld.sshfl [vmem:[%s9926_s0 + $0xd8] sm:$0xff pattern:$0x75316420] }
 0x123   :  { %v10215_v26 = vcombine.low %v8847_v38, %v8859_v2  ;;  %v10216_v27 = vcombine.low %v8923_v46, %v8935_v1  ;;  %v9252_v7 = vrot.slane %v2183_v22, %v7964_v53  ;;  %v4959_v25 = vcombine.high %v4957_v59, %v4957_v59  ;;  %v7734_v12 = vld [vmem:[#allocation2 + $0x724] ss:$8 sps:$4 sm:$0xff]  }
 0x124   :  { %v4989_v47 = vrot.slane %v4975_v63, %v7964_v53  ;;  %v9260_v14 = vrot.slane %v2185_v30, %v7964_v53  ;;  %v5158_v51 = vunpack.i.h.s16 %v4982_v8  ;;  %v7743_v32 = vld [vmem:[#allocation2 + $0x144] ss:$8 sps:$4 sm:$0xff]   ;;  %v4990_v22 = vcombine.high %v4982_v8, %v4982_v8 }
 0x125   :  { %6112 = vmatmul.mubr.bf16.vlgmr.msra.gmra.mrb[0].mxu0 %v10215_v26  ;;  %2701 = vmatmul.mubr.bf16.gmra.mrb[4].mxu1 %v10216_v27  ;;  %v10218_v27 = vcombine.low %v9018_v36, %v9022_v61  ;;  %v5007_v34 = vcombine.high %v7109_v13, %v7110_v40  ;;  %v5571_v36 = vcombine.low %v4957_v59, %v4958_v52  ;;  %v638_v61 = vunpack.i.h.s16 %v10211_v21  ;;  %v7738_v59 = vld [vmem:[#allocation2 + $0x730] ss:$8 sps:$4 sm:$0xff]  }
 0x126   :  { %6181 = vmatpush1.bf16.msra.mxu0 %v7720_v4  ;;  %2764 = vmatpush1.bf16.msra.mxu1 %v7729_v60  ;;  %v4991_v63 = vcombine.high %v4989_v47, %v4989_v47  ;;  %v5006_v4 = vcombine.low %v7109_v13, %v7110_v40  ;;  %v5160_v26 = vunpack.i.h.s16 %v4989_v47  ;;  %v10217_v60 = vcombine.low %v8959_v44, %v8986_v49  ;;  %v7741_v44 = vld [vmem:[#allocation2 + $0x140] ss:$8 sps:$4 sm:$0xff]   ;;  %v7740_v13 = vld [vmem:[#allocation2 + $0x734] ss:$8 sps:$4 sm:$0xff]  }
 0x127   :  { %6182 = vmatprep.subr.bf16.mxu0 %v7728_v56  ;;  %2765 = vmatprep.subr.bf16.mxu1 %v7737_v57  ;;  %v7130_v56 = vpack.i.b16 %v4989_v47, %v5158_v51  ;;  %v5162_v8 = vunpack.i.h.s16 %v4990_v22  ;;  %v7749_v40 = vld [vmem:[#allocation2 + $0x154] ss:$8 sps:$4 sm:$0xff]   ;;  %v10219_v21 = vcombine.low %v8968_v43, %v8989_v5 }
 0x128   :  { %6121 = vmatprep.mubr.bf16.mxu0 %v10217_v60  ;;  %2710 = vmatprep.mubr.bf16.mxu1 %v10218_v27  ;;  %v9271_v57 = vrot.slane %v5006_v4, %v7964_v53  ;;  %v5164_v48 = vunpack.i.h.s16 %v4991_v63  ;;  %v7131_v6 = vpack.i.b16 %v4990_v22, %v5160_v26  ;;  %v9274_v60 = vrot.slane %v5007_v34, %v7964_v53  ;;  %v7755_v22 = vld [vmem:[#allocation2 + $0x164] ss:$8 sps:$4 sm:$0xff]  }
 0x129   :  { %v5572_v27 = vcombine.low %v4959_v25, %v7130_v56  ;;  %v7132_v51 = vpack.i.b16 %v4991_v63, %v5162_v8  ;;  %v5581_v34 = vrot.slane %v5571_v36, %v7964_v53  ;;  %v10220_v25 = vcombine.low %v9043_v45, %v9047_v55  ;;  %v7746_v36 = vld [vmem:[#allocation2 + $0x744] ss:$8 sps:$4 sm:$0xff]  }
 0x12a   :  { %6183 = vmatpush1.bf16.msra.mxu0 %v7726_v15  ;;  %2766 = vmatpush1.bf16.msra.mxu1 %v7735_v35  ;;  %v5165_v47 = vunpack.i.h.s16 %v9271_v57  ;;  %v2182_v15 = vcombine.low %v9216_v28, %v9219_v16  ;;  %v2184_v35 = vcombine.low %v9222_v31, %v9225_v41  ;;  %v10221_v16 = vld [vmem:[#allocation66_spill] sm:$0xff] }
 0x12b   :  { %6184 = vmatprep.subr.bf16.mxu0 %v7734_v12  ;;  %2767 = vmatprep.subr.bf16.mxu1 %v7743_v32  ;;  %v5588_v52 = vrot.slane %v5572_v27, %v7964_v53  ;;  %v5573_v32 = vcombine.low %v7131_v6, %v7132_v51  ;;  %v652_v31 = vunpack.i.h.s16 %v10221_v16  ;;  %v7747_v41 = vld [vmem:[#allocation2 + $0x150] ss:$8 sps:$4 sm:$0xff]  }
 0x12c   :  { %v5288_v12 = vpack.i.b16 %v5165_v47, %v5164_v48  ;;  %v9291_v28 = vrot.slane %v2182_v15, %v7964_v53  ;;  %v9295_v4 = vrot.slane %v2184_v35, %v7964_v53  ;;  %v10222_v56 = vld [vmem:[#allocation58_spill] sm:$0xff]  ;;  %v10223_v47 = vcombine.low %v9076_v24, %v9117_v54  ;;  %v10226_v35 = vld [vmem:[#allocation59_spill] sm:$0xff] }
 0x12d   :  { %6122 = vmatmul.mubr.bf16.gmra.mrb[4].mxu0 %v10219_v21  ;;  %2711 = vmatmul.mubr.bf16.gmra.mrb[8].mxu1 %v10220_v25  ;;  %v5604_v63 = vcombine.high %v5581_v34, %v5588_v52  ;;  %v5603_v26 = vcombine.low %v5581_v34, %v5588_v52  ;;  %v640_v8 = vunpack.i.h.s16 %v10222_v56  ;;  %v5595_v48 = vrot.slane %v5573_v32, %v7964_v53  ;;  %v10227_v52 = vld [vmem:[#allocation63_spill] sm:$0xff]  ;;  %v10228_v21 = vld [vmem:[#allocation64_spill] sm:$0xff] }
 0x12e   :  { %6185 = vmatpush1.bf16.msra.mxu0 %v7732_v62  ;;  %2768 = vmatpush1.bf16.msra.mxu1 %v7741_v44  ;;  %v5574_v6 = vcombine.low %v5288_v12, %v9274_v60  ;;  %v6841_v27 = vpack.i.b16 %v10222_v56, %v638_v61  ;;  %v7111_v62 = vld.sshfl [vmem:[%s9926_s0 + $0xe0] sm:$0xff pattern:$0x75316420]  ;;  %v7112_v44 = vld.sshfl [vmem:[%s9926_s0 + $0xe8] sm:$0xff pattern:$0x75316420]  ;;  %v6843_v25 = vpack.i.b16 %v10228_v21, %v10227_v52  ;;  %v10229_v12 = vunpack.i.h.s16 %v10228_v21 }
 0x12f   :  { %6186 = vmatprep.subr.bf16.mxu0 %v7740_v13  ;;  %2769 = vmatprep.subr.bf16.mxu1 %v7749_v40  ;;  %v10224_v13 = vcombine.low %v9143_v50, %v9146_v11  ;;  %v9314_v40 = vrot.slane %v5604_v63, %v7964_v53  ;;  %v9319_v51 = vrot.slane %v5603_v26, %v7964_v53  ;;  %v7744_v63 = vld [vmem:[#allocation2 + $0x740] ss:$8 sps:$4 sm:$0xff]   ;;  %v10233_v21 = vld [vmem:[#allocation62_spill] sm:$0xff] }
 0x130   :  { %6131 = vmatprep.mubr.bf16.mxu0 %v10223_v47  ;;  %v5602_v15 = vrot.slane %v5574_v6, %v7964_v53  ;;  %v6842_v34 = vpack.i.b16 %v10226_v35, %v640_v8  ;;  %v6844_v32 = vpack.i.b16 %v10221_v16, %v10229_v12  ;;  %v7753_v56 = vld [vmem:[#allocation2 + $0x160] ss:$8 sps:$4 sm:$0xff]   ;;  %v10230_v47 = vld [vmem:[#allocation67_spill] sm:$0xff]  ;;  %v5038_v50 = vcombine.low %v7111_v62, %v7112_v44 }
 0x131   :  { %2720 = vmatprep.mubr.bf16.mxu1 %v10224_v13  ;;  %10225 = vst [vmem:[#allocation16_spill] sm:$0xff] %v9314_v40  ;;  %v6845_v13 = vpack.i.b16 %v10230_v47, %v652_v31  ;;  %v10231_v61 = vld [vmem:[#allocation61_spill] sm:$0xff]  ;;  %v10232_v26 = vld [vmem:[#allocation60_spill] sm:$0xff]  ;;  %v2220_v24 = vcombine.low %v10233_v21, %v6843_v25  ;;  %v7750_v12 = vld [vmem:[#allocation2 + $0x750] ss:$8 sps:$4 sm:$0xff]   ;;  %v10234_v31 = vcombine.low %v9079_v23, %v9120_v58 }
 0x132   :  { %6187 = vmatpush1.bf16.msra.mxu0 %v7738_v59  ;;  %2770 = vmatpush1.bf16.msra.mxu1 %v7747_v41  ;;  %v2219_v30 = vcombine.low %v10232_v26, %v10231_v61  ;;  %v7752_v6 = vld [vmem:[#allocation2 + $0x754] ss:$8 sps:$4 sm:$0xff]   ;;  %v5606_v35 = vcombine.high %v5595_v48, %v5602_v15  ;;  %v5605_v52 = vcombine.low %v5595_v48, %v5602_v15  ;;  %v7759_v61 = vld [vmem:[#allocation2 + $0x170] ss:$8 sps:$4 sm:$0xff]   ;;  %v7767_v25 = vld [vmem:[#allocation2 + $0x184] ss:$8 sps:$4 sm:$0xff]  }
 0x133   :  { %6188 = vmatprep.subr.bf16.mxu0 %v7746_v36  ;;  %2771 = vmatprep.subr.bf16.mxu1 %v7755_v22  ;;  %v7761_v8 = vld [vmem:[#allocation2 + $0x174] ss:$8 sps:$4 sm:$0xff]   ;;  %v2218_v11 = vcombine.low %v6841_v27, %v6842_v34  ;;  %v2221_v16 = vcombine.low %v6844_v32, %v6845_v13  ;;  %v5039_v41 = vcombine.high %v7111_v62, %v7112_v44 }
 0x134   :  { %v9333_v59 = vrot.slane %v2219_v30, %v7964_v53  ;;  %v10235_v36 = vcombine.low %v9171_v9, %v9177_v37  ;;  %v9342_v22 = vrot.slane %v5606_v35, %v7964_v53  ;;  %v9345_v48 = vrot.slane %v5605_v52, %v7964_v53  ;;  %v7113_v44 = vld.sshfl [vmem:[%s9926_s0 + $0xf0] sm:$0xff pattern:$0x75316420]  ;;  %v7114_v15 = vld.sshfl [vmem:[%s9926_s0 + $0xf8] sm:$0xff pattern:$0x75316420] }
 0x135   :  { %6132 = vmatmul.mubr.bf16.gmra.mrb[8].mxu0 %v10234_v31  ;;  %v9348_v30 = vrot.slane %v2218_v11, %v7964_v53  ;;  %v9351_v27 = vrot.slane %v2220_v24, %v7964_v53  ;;  %v9354_v62 = vrot.slane %v2221_v16, %v7964_v53  ;;  %v5046_v34 = vrot.slane %v5038_v50, %v7964_v53  ;;  %v7758_v11 = vld [vmem:[#allocation2 + $0x764] ss:$8 sps:$4 sm:$0xff]   ;;  %v7756_v31 = vld [vmem:[#allocation2 + $0x760] ss:$8 sps:$4 sm:$0xff]  }
 0x136   :  { %2721 = vmatmul.mubr.bf16.gmra.mrb[12].mxu1 %v10235_v36  ;;  %10236 = vst [vmem:[#allocation19_spill] sm:$0xff] %v9342_v22  ;;  %6189 = vmatpush1.bf16.msra.mxu0 %v7744_v63  ;;  %v5637_v24 = vcombine.low %v9314_v40, %v9342_v22  ;;  %v10237_v13 = vcombine.low %v9185_v33, %v9231_v10  ;;  %v7765_v36 = vld [vmem:[#allocation2 + $0x180] ss:$8 sps:$4 sm:$0xff]  }
 0x137   :  { %2772 = vmatpush1.bf16.msra.mxu1 %v7753_v56  ;;  %6190 = vmatprep.subr.bf16.mxu0 %v7752_v6  ;;  %v2251_v63 = vcombine.high %v9348_v30, %v9333_v59  ;;  %v654_v56 = vunpack.i.h.s16 %v10230_v47  ;;  %v10238_v50 = vcombine.low %v9252_v7, %v9260_v14  ;;  %v2253_v26 = vcombine.high %v9351_v27, %v9354_v62 }
 0x138   :  { %2773 = vmatprep.subr.bf16.mxu1 %v7761_v8  ;;  %6141 = vmatprep.mubr.bf16.mxu0 %v10237_v13  ;;  %v5053_v6 = vrot.slane %v5039_v41, %v7964_v53  ;;  %v5054_v8 = vcombine.high %v5046_v34, %v5046_v34  ;;  %v5172_v35 = vunpack.i.h.s16 %v5046_v34  ;;  %v5070_v21 = vcombine.low %v7113_v44, %v7114_v15  ;;  %v7764_v34 = vld [vmem:[#allocation2 + $0x774] ss:$8 sps:$4 sm:$0xff]  }
 0x139   :  { %2730 = vmatprep.mubr.bf16.mxu1 %v10238_v50  ;;  %v9380_v52 = vrot.slane %v2251_v63, %v7964_v53  ;;  %v5071_v47 = vcombine.high %v7113_v44, %v7114_v15  ;;  %v7138_v16 = vcombine.high %v9271_v57, %v9274_v60  ;;  %v9385_v13 = vrot.slane %v2253_v26, %v7964_v53  ;;  %v7773_v63 = vld [vmem:[#allocation2 + $0x194] ss:$8 sps:$4 sm:$0xff]  }
 0x13a   :  { %6191 = vmatpush1.bf16.msra.mxu0 %v7750_v12  ;;  %v5055_v50 = vcombine.high %v5053_v6, %v5053_v6  ;;  %v5174_v32 = vunpack.i.h.s16 %v5053_v6  ;;  %v5176_v41 = vunpack.i.h.s16 %v5054_v8  ;;  %v5078_v40 = vrot.slane %v5070_v21, %v7964_v53 }
 0x13b   :  { %10239 = vst [vmem:[#allocation14_spill] sm:$0xff] %v9380_v52  ;;  %2774 = vmatpush1.bf16.msra.mxu1 %v7759_v61  ;;  %6192 = vmatprep.subr.bf16.mxu0 %v7758_v11  ;;  %v5085_v44 = vrot.slane %v5071_v47, %v7964_v53  ;;  %v7133_v15 = vpack.i.b16 %v5053_v6, %v5172_v35  ;;  %v7762_v35 = vld [vmem:[#allocation2 + $0x770] ss:$8 sps:$4 sm:$0xff]  }
 0x13c   :  { %2775 = vmatprep.subr.bf16.mxu1 %v7767_v25  ;;  %v2284_v57 = vcombine.low %v9380_v52, %v9385_v13  ;;  %v5178_v60 = vunpack.i.h.s16 %v5055_v50  ;;  %v7134_v12 = vpack.i.b16 %v5054_v8, %v5174_v32  ;;  %v7135_v61 = vpack.i.b16 %v5055_v50, %v5176_v41  ;;  %v7771_v32 = vld [vmem:[#allocation2 + $0x190] ss:$8 sps:$4 sm:$0xff]   ;;  %v10242_v50 = vld [vmem:[#allocation69_spill] sm:$0xff] }
 0x13d   :  { %v10240_v26 = vcombine.low %v9190_v0, %v9234_v29  ;;  %v10241_v11 = vcombine.low %v9291_v28, %v9295_v4  ;;  %v5086_v25 = vcombine.high %v5078_v40, %v5078_v40  ;;  %v5179_v22 = vunpack.i.h.s16 %v5078_v40 }
 0x13e   :  { %v5649_v21 = vrot.slane %v7138_v16, %v7964_v53  ;;  %v2250_v6 = vcombine.low %v9348_v30, %v9333_v59  ;;  %6193 = vmatpush1.bf16.msra.mxu0 %v7756_v31  ;;  %v5640_v8 = vcombine.low %v7133_v15, %v7134_v12  ;;  %v2252_v47 = vcombine.low %v9351_v27, %v9354_v62 }
 0x13f   :  { %6142 = vmatmul.mubr.bf16.gmra.mrb[12].mxu0 %v10240_v26  ;;  %2731 = vmatmul.mubr.bf16.gmra.mrb[16].mxu1 %v10241_v11  ;;  %v6846_v41 = vpack.i.b16 %v10242_v50, %v654_v56  ;;  %v7770_v26 = vld [vmem:[#allocation2 + $0x784] ss:$8 sps:$4 sm:$0xff]   ;;  %v5295_v40 = vpack.i.b16 %v5179_v22, %v5178_v60  ;;  %v5642_v52 = vcombine.low %v5085_v44, %v5086_v25  ;;  %v7785_v60 = vld [vmem:[#allocation2 + $0x1b4] ss:$8 sps:$4 sm:$0xff]   ;;  %v7783_v50 = vld [vmem:[#allocation2 + $0x1b0] ss:$8 sps:$4 sm:$0xff]  }
 0x140   :  { %2776 = vmatpush1.bf16.msra.mxu1 %v7765_v36  ;;  %6194 = vmatprep.subr.bf16.mxu0 %v7764_v34  ;;  %v7779_v11 = vld [vmem:[#allocation2 + $0x1a4] ss:$8 sps:$4 sm:$0xff]   ;;  %v9404_v16 = vrot.slane %v2250_v6, %v7964_v53  ;;  %v5656_v59 = vrot.slane %v5640_v8, %v7964_v53  ;;  %v9408_v30 = vrot.slane %v2252_v47, %v7964_v53  ;;  %v7768_v36 = vld [vmem:[#allocation2 + $0x780] ss:$8 sps:$4 sm:$0xff]   ;;  %v7774_v47 = vld [vmem:[#allocation2 + $0x790] ss:$8 sps:$4 sm:$0xff]  }
 0x141   :  { %2777 = vmatprep.subr.bf16.mxu1 %v7773_v63  ;;  %6151 = vmatprep.mubr.bf16.mxu0 %v5637_v24  ;;  %v2292_v27 = vrot.slane %v6846_v41, %v7964_v53  ;;  %v5641_v62 = vcombine.low %v7135_v61, %v5295_v40  ;;  %v5670_v56 = vrot.slane %v5642_v52, %v7964_v53  ;;  %v7777_v34 = vld [vmem:[#allocation2 + $0x1a0] ss:$8 sps:$4 sm:$0xff]  }
 0x142   :  { %2740 = vmatprep.mubr.bf16.mxu1 %v2284_v57  ;;  %v5087_v31 = vcombine.high %v5085_v44, %v5085_v44  ;;  %v1945_v22 = vcombine.high %v8784_v19, %v8793_v3  ;;  %6195 = vmatpush1.bf16.msra.mxu0 %v7762_v35  ;;  %v5672_v24 = vcombine.high %v5649_v21, %v5656_v59  ;;  %v7776_v57 = vld [vmem:[#allocation2 + $0x794] ss:$8 sps:$4 sm:$0xff]   ;;  %v7806_v19 = vld [vmem:[#allocation2 + $0x7e4] ss:$8 sps:$4 sm:$0xff]  }
 0x143   :  { %v2282_v63 = vcombine.low %v9404_v16, %v9408_v30  ;;  %v5671_v15 = vcombine.low %v5649_v21, %v5656_v59  ;;  %6196 = vmatprep.subr.bf16.mxu0 %v7770_v26  ;;  %v5663_v12 = vrot.slane %v5641_v62, %v7964_v53  ;;  %v2293_v52 = vcombine.high %v2292_v27, %v2292_v27  ;;  %v7782_v26 = vld [vmem:[#allocation2 + $0x7a4] ss:$8 sps:$4 sm:$0xff]  }
 0x144   :  { %2778 = vmatpush1.bf16.msra.mxu1 %v7771_v32  ;;  %v9418_v44 = vrot.slane %v5672_v24, %v7964_v53  ;;  %v5713_v25 = vrot.slane %v5087_v31, %v7964_v53  ;;  %v5366_v6 = vcombine.high %v8844_v42, %v8856_v17  ;;  %v10243_v21 = vcombine.low %v9319_v51, %v9345_v48  ;;  %v7791_v62 = vld [vmem:[#allocation2 + $0x1c4] ss:$8 sps:$4 sm:$0xff]   ;;  %v10245_v42 = vld [vmem:[#allocation27_spill] sm:$0xff] }
 0x145   :  { %2779 = vmatprep.subr.bf16.mxu1 %v7779_v11  ;;  %v9421_v61 = vrot.slane %v5671_v15, %v7964_v53  ;;  %v5674_v35 = vcombine.high %v5663_v12, %v5670_v56  ;;  %v5673_v32 = vcombine.low %v5663_v12, %v5670_v56  ;;  %v9430_v8 = vrot.slane %v2293_v52, %v7964_v53  ;;  %v7780_v15 = vld [vmem:[#allocation2 + $0x7a0] ss:$8 sps:$4 sm:$0xff]   ;;  %v7788_v52 = vld [vmem:[#allocation2 + $0x7b4] ss:$8 sps:$4 sm:$0xff]  }
 0x146   :  { %6197 = vmatpush1.bf16.msra.mxu0 %v7768_v36  ;;  %v1943_v41 = vcombine.high %v8799_v39, %v8802_v18  ;;  %v5364_v59 = vcombine.high %v8847_v38, %v8859_v2  ;;  %v5714_v56 = vcombine.high %v5713_v25, %v5713_v25  ;;  %v2011_v31 = vcombine.high %v8923_v46, %v8935_v1  ;;  %v10244_v3 = vld [vmem:[#allocation13_spill] sm:$0xff]  ;;  %v10251_v46 = vld [vmem:[#allocation19_spill] sm:$0xff]  ;;  %v10252_v1 = vld [vmem:[#allocation16_spill] sm:$0xff] }
 0x147   :  { %6152 = vmatmul.mubr.bf16.gmra.mrb[16].mxu0 %v10243_v21  ;;  %2741 = vmatmul.mubr.bf16.gmra.mrb[20].mxu1 %v2282_v63  ;;  %v9435_v11 = vrot.slane %v5674_v35, %v7964_v53  ;;  %v9438_v40 = vrot.slane %v5673_v32, %v7964_v53  ;;  %v9450_v24 = vrot.slane %v2292_v27, %v7964_v53  ;;  %v7797_v21 = vld [vmem:[#allocation2 + $0x1d4] ss:$8 sps:$4 sm:$0xff]   ;;  %v7794_v32 = vld [vmem:[#allocation2 + $0x7c4] ss:$8 sps:$4 sm:$0xff]  }
 0x148   :  { %2780 = vmatpush1.bf16.msra.mxu1 %v7777_v34  ;;  %6198 = vmatprep.subr.bf16.mxu0 %v7776_v57  ;;  %v5432_v63 = vcombine.high %v8968_v43, %v8989_v5  ;;  %v7789_v57 = vld [vmem:[#allocation2 + $0x1c0] ss:$8 sps:$4 sm:$0xff]   ;;  %v5500_v12 = vcombine.high %v9079_v23, %v9120_v58  ;;  %v2147_v27 = vcombine.high %v9171_v9, %v9177_v37 }
 0x149   :  { %2781 = vmatprep.subr.bf16.mxu1 %v7785_v60  ;;  %2750 = vmatprep.mubr.bf16.mxu1 %v9430_v8  ;;  %v5705_v36 = vcombine.low %v9418_v44, %v9435_v11  ;;  %v5703_v34 = vcombine.low %v9421_v61, %v9438_v40  ;;  %v2079_v60 = vcombine.high %v9043_v45, %v9047_v55  ;;  %v10248_v39 = vld [vmem:[#allocation17_spill] sm:$0xff] }
 0x14a   :  { %6199 = vmatpush1.bf16.msra.mxu0 %v7774_v47  ;;  %v9461_v35 = vrot.slane %v5714_v56, %v7964_v53  ;;  %v7803_v47 = vld [vmem:[#allocation2 + $0x1e4] ss:$8 sps:$4 sm:$0xff]   ;;  %v7807_v56 = vld [vmem:[#allocation2 + $0x1f0] ss:$8 sps:$4 sm:$0xff]   ;;  %v5434_v17 = vcombine.high %v10245_v42, %v8986_v49  ;;  %v5502_v18 = vcombine.high %v10248_v39, %v9117_v54  ;;  %v5570_v38 = vcombine.high %v9185_v33, %v9231_v10 }
 0x14b   :  { %6200 = vmatprep.subr.bf16.mxu0 %v7782_v26  ;;  %6161 = vmatprep.mubr.bf16.mxu0 %v5705_v36  ;;  %v7786_v26 = vld [vmem:[#allocation2 + $0x7b0] ss:$8 sps:$4 sm:$0xff]   ;;  %v2217_v2 = vcombine.high %v9252_v7, %v9260_v14  ;;  %v5638_v43 = vcombine.high %v10252_v1, %v10251_v46  ;;  %v10254_v45 = vcombine.high %v9190_v0, %v9234_v29 }
 0x14c   :  { %2782 = vmatpush1.bf16.msra.mxu1 %v7783_v50  ;;  %v5636_v50 = vcombine.high %v9319_v51, %v9345_v48  ;;  %v7795_v36 = vld [vmem:[#allocation2 + $0x1d0] ss:$8 sps:$4 sm:$0xff]   ;;  %v10255_v55 = vcombine.high %v9291_v28, %v9295_v4  ;;  %v5706_v23 = vcombine.high %v9418_v44, %v9435_v11  ;;  %v2309_v54 = vcombine.high %v9430_v8, %v9430_v8 }
 0x14d   :  { %2783 = vmatprep.subr.bf16.mxu1 %v7791_v62  ;;  %v7800_v62 = vld [vmem:[#allocation2 + $0x7d4] ss:$8 sps:$4 sm:$0xff]   ;;  %v10253_v49 = vld [vmem:[#allocation14_spill] sm:$0xff]  ;;  %v10256_v58 = vcombine.high %v9404_v16, %v9408_v30  ;;  %v2308_v9 = vcombine.high %v9450_v24, %v9450_v24  ;;  %v5730_v37 = vcombine.high %v9461_v35, %v9461_v35  ;;  %v10257_v33 = vcombine.high %v9421_v61, %v9438_v40 }
 0x14e   :  { %6201 = vmatpush1.bf16.msra.mxu0 %v7780_v15  ;;  %v7792_v15 = vld [vmem:[#allocation2 + $0x7c0] ss:$8 sps:$4 sm:$0xff]   ;;  %v2285_v5 = vcombine.high %v10253_v49, %v9385_v13 }
 0x14f   :  { %6162 = vmatmul.mubr.bf16.gmra.mrb[20].mxu0 %v5703_v34  ;;  %2751 = vmatmul.mubr.bf16.gmra.mrb[24].mxu1 %v9450_v24  ;;  %v9479_v34 = vrot.slane %v5713_v25, %v7964_v53  ;;  %v7804_v53 = vld [vmem:[#allocation2 + $0x7e0] ss:$8 sps:$4 sm:$0xff]   ;;  %v7812_v25 = vld [vmem:[#allocation2 + $0x7f4] ss:$8 sps:$4 sm:$0xff]  }
 0x150   :  { %2784 = vmatpush1.bf16.msra.mxu1 %v7789_v57  ;;  %6202 = vmatprep.subr.bf16.mxu0 %v7788_v52  ;;  %v7801_v57 = vld [vmem:[#allocation2 + $0x1e0] ss:$8 sps:$4 sm:$0xff]   ;;  %v7809_v52 = vld [vmem:[#allocation2 + $0x1f4] ss:$8 sps:$4 sm:$0xff]  }
 0x151   :  { %2785 = vmatprep.subr.bf16.mxu1 %v7797_v21  ;;  %6171 = vmatprep.mubr.bf16.mxu0 %v9461_v35  ;;  %v7798_v21 = vld [vmem:[#allocation2 + $0x7d0] ss:$8 sps:$4 sm:$0xff]   ;;  %v5729_v0 = vcombine.high %v9479_v34, %v9479_v34 }
 0x152   :  { %2791 = vmatprep.mubr.bf16.mxu1 %v1945_v22  ;;  %6203 = vmatpush1.bf16.msra.mxu0 %v7786_v26  ;;  %v2013_v22 = vcombine.high %v10244_v3, %v8903_v20  ;;  %v10249_v20 = vld [vmem:[#allocation10_spill] sm:$0xff] }
 0x153   :  { %6204 = vmatprep.subr.bf16.mxu0 %v7794_v32  ;;  %v7810_v32 = vld [vmem:[#allocation2 + $0x7f0] ss:$8 sps:$4 sm:$0xff]  }
 0x154   :  { %2786 = vmatpush1.bf16.msra.mxu1 %v7795_v36 }
 0x155   :  { %2787 = vmatprep.subr.bf16.mxu1 %v7803_v47  ;;  %v10247_v47 = vld [vmem:[#allocation15_spill] sm:$0xff] }
 0x156   :  { %6205 = vmatpush1.bf16.msra.mxu0 %v7792_v15 }
 0x157   :  { %6172 = vmatmul.mubr.bf16.gmra.mrb[24].mxu0 %v9479_v34  ;;  %6206 = vmatprep.subr.bf16.mxu0 %v7800_v62 }
 0x158   :  { %2788 = vmatpush1.bf16.msra.mxu1 %v7801_v57  ;;  %6212 = vmatprep.mubr.bf16.mxu0 %v5366_v6  ;;  %v10246_v6 = vld [vmem:[#allocation12_spill] sm:$0xff] }
 0x159   :  { %2789 = vmatprep.subr.bf16.mxu1 %v7809_v52  ;;  %v2081_v26 = vcombine.high %v10247_v47, %v10246_v6 }
 0x15a   :  { %6207 = vmatpush1.bf16.msra.mxu0 %v7798_v21 }
 0x15b   :  { %6208 = vmatprep.subr.bf16.mxu0 %v7806_v19 }
 0x15c   :  { %2790 = vmatpush1.bf16.msra.mxu1 %v7807_v56 }
 0x15e   :  { %6209 = vmatpush1.bf16.msra.mxu0 %v7804_v53 }
 0x15f   :  { %2792 = vmatmul.mubr.bf16.vlgmr.msra.gmra.mrb[0].mxu1 %v1943_v41  ;;  %6210 = vmatprep.subr.bf16.mxu0 %v7812_v25  ;;  %v10250_v41 = vld [vmem:[#allocation11_spill] sm:$0xff] }
 0x160   :  { %2801 = vmatprep.mubr.bf16.mxu1 %v2013_v22  ;;  %v2149_v36 = vcombine.high %v10250_v41, %v10249_v20 }
 0x162   :  { %6211 = vmatpush1.bf16.msra.mxu0 %v7810_v32 }
 0x165   :  { %6213 = vmatmul.mubr.bf16.vlgmr.msra.gmra.mrb[0].mxu0 %v5364_v59 }
 0x166   :  { %6222 = vmatprep.mubr.bf16.mxu0 %v5434_v17 }
 0x167   :  { %2802 = vmatmul.mubr.bf16.gmra.mrb[4].mxu1 %v2011_v31 }
 0x168   :  { %2811 = vmatprep.mubr.bf16.mxu1 %v2081_v26 }
 0x16d   :  { %6223 = vmatmul.mubr.bf16.gmra.mrb[4].mxu0 %v5432_v63 }
 0x16e   :  { %6232 = vmatprep.mubr.bf16.mxu0 %v5502_v18 }
 0x16f   :  { %2812 = vmatmul.mubr.bf16.gmra.mrb[8].mxu1 %v2079_v60 }
 0x170   :  { %2821 = vmatprep.mubr.bf16.mxu1 %v2149_v36 }
 0x175   :  { %6233 = vmatmul.mubr.bf16.gmra.mrb[8].mxu0 %v5500_v12 }
 0x176   :  { %6242 = vmatprep.mubr.bf16.mxu0 %v5570_v38 }
 0x177   :  { %2822 = vmatmul.mubr.bf16.gmra.mrb[12].mxu1 %v2147_v27 }
 0x178   :  { %2831 = vmatprep.mubr.bf16.mxu1 %v2217_v2 }
 0x17d   :  { %6243 = vmatmul.mubr.bf16.gmra.mrb[12].mxu0 %v10254_v45 }
 0x17e   :  { %6252 = vmatprep.mubr.bf16.mxu0 %v5638_v43 }
 0x17f   :  { %2832 = vmatmul.mubr.bf16.gmra.mrb[16].mxu1 %v10255_v55 }
 0x180   :  { %2841 = vmatprep.mubr.bf16.mxu1 %v2285_v5 }
 0x185   :  { %6253 = vmatmul.mubr.bf16.gmra.mrb[16].mxu0 %v5636_v50 }
 0x186   :  { %6262 = vmatprep.mubr.bf16.mxu0 %v5706_v23 }
 0x187   :  { %2842 = vmatmul.mubr.bf16.gmra.mrb[20].mxu1 %v10256_v58 }
 0x188   :  { %2851 = vmatprep.mubr.bf16.mxu1 %v2309_v54 }
 0x18d   :  { %6263 = vmatmul.mubr.bf16.gmra.mrb[20].mxu0 %v10257_v33 }
 0x18e   :  { %6272 = vmatprep.mubr.bf16.mxu0 %v5730_v37 }
 0x18f   :  { %2852 = vmatmul.mubr.bf16.gmra.mrb[24].mxu1 %v2308_v9 }
 0x195   :  { %6273 = vmatmul.mubr.bf16.gmra.mrb[24].mxu0 %v5729_v0 }
 0x232   :  { %v2793_v10 = vpop.f32.mrb[0].mxu1 }
 0x233   :  { %v2795_v29 = vpop.f32.mrb[1].mxu1 }
 0x234   :  { %v2797_v7 = vpop.f32.mrb[2].mxu1 }
 0x235   :  { %v2799_v14 = vpop.f32.mrb[3].mxu1 }
 0x238   :  { %v6214_v28 = vpop.f32.mrb[0].mxu0 }
 0x239   :  { %v9549_v51 = vadd.f32 %v6214_v28, %v2793_v10  ;;  %v6216_v48 = vpop.f32.mrb[1].mxu0 }
 0x23a   :  { %v2803_v4 = vpop.f32.mrb[4].mxu1  ;;  %v9551_v16 = vadd.f32 %v6216_v48, %v2795_v29  ;;  %v6218_v30 = vpop.f32.mrb[2].mxu0 }
 0x23b   :  { %v2805_v13 = vpop.f32.mrb[5].mxu1  ;;  %v9553_v61 = vadd.f32 %v6218_v30, %v2797_v7  ;;  %v6220_v8 = vpop.f32.mrb[3].mxu0  ;;  %v6350_v59 = vmul.f32 %v9549_v51, %v9549_v51 }
 0x23c   :  { %v2807_v44 = vpop.f32.mrb[6].mxu1  ;;  %v9555_v40 = vadd.f32 %v6220_v8, %v2799_v14  ;;  %v6351_v63 = vmul.f32 %v9551_v16, %v9551_v16 }
 0x23d   :  { %v2809_v11 = vpop.f32.mrb[7].mxu1  ;;  %v6309_v31 = vadd.f32 %v9553_v61, %v9549_v51  ;;  %v6352_v24 = vmul.f32 %v9553_v61, %v9553_v61 }
 0x23e   :  { %v6329_v60 = vadd.f32 %v9555_v40, %v9551_v16  ;;  %v6353_v12 = vmul.f32 %v9555_v40, %v9555_v40 }
 0x23f   :  { %v6376_v27 = vadd.f32 %v6352_v24, %v6350_v59 }
 0x240   :  { %v6395_v35 = vadd.f32 %v6353_v12, %v6351_v63  ;;  %v6224_v50 = vpop.f32.mrb[4].mxu0 }
 0x241   :  { %v9569_v56 = vadd.f32 %v6224_v50, %v2803_v4  ;;  %v6226_v34 = vpop.f32.mrb[5].mxu0 }
 0x242   :  { %v2813_v62 = vpop.f32.mrb[8].mxu1  ;;  %v9571_v57 = vadd.f32 %v6226_v34, %v2805_v13  ;;  %v6228_v52 = vpop.f32.mrb[6].mxu0 }
 0x243   :  { %v2815_v15 = vpop.f32.mrb[9].mxu1  ;;  %v6310_v19 = vadd.f32 %v9569_v56, %v6309_v31  ;;  %v6354_v53 = vmul.f32 %v9569_v56, %v9569_v56  ;;  %v9576_v3 = vadd.f32 %v6228_v52, %v2807_v44  ;;  %v6230_v22 = vpop.f32.mrb[7].mxu0 }
 0x244   :  { %v2817_v21 = vpop.f32.mrb[10].mxu1  ;;  %v6330_v32 = vadd.f32 %v9571_v57, %v6329_v60  ;;  %v6355_v42 = vmul.f32 %v9571_v57, %v9571_v57  ;;  %v9581_v17 = vadd.f32 %v6230_v22, %v2809_v11 }
 0x245   :  { %v2819_v25 = vpop.f32.mrb[11].mxu1  ;;  %v6377_v6 = vadd.f32 %v6376_v27, %v6354_v53  ;;  %v6311_v47 = vadd.f32 %v9576_v3, %v6310_v19  ;;  %v6356_v26 = vmul.f32 %v9576_v3, %v9576_v3 }
 0x246   :  { %v6396_v39 = vadd.f32 %v6395_v35, %v6355_v42  ;;  %v6331_v18 = vadd.f32 %v9581_v17, %v6330_v32  ;;  %v6357_v20 = vmul.f32 %v9581_v17, %v9581_v17 }
 0x247   :  { %v6378_v41 = vadd.f32 %v6377_v6, %v6356_v26 }
 0x248   :  { %v6397_v36 = vadd.f32 %v6396_v39, %v6357_v20  ;;  %v6234_v38 = vpop.f32.mrb[8].mxu0 }
 0x249   :  { %v9589_v46 = vadd.f32 %v6234_v38, %v2813_v62  ;;  %v6236_v1 = vpop.f32.mrb[9].mxu0 }
 0x24a   :  { %v2823_v2 = vpop.f32.mrb[12].mxu1  ;;  %v9591_v49 = vadd.f32 %v6236_v1, %v2815_v15  ;;  %v6238_v5 = vpop.f32.mrb[10].mxu0 }
 0x24b   :  { %v2825_v43 = vpop.f32.mrb[13].mxu1  ;;  %v6312_v55 = vadd.f32 %v9589_v46, %v6311_v47  ;;  %v6358_v23 = vmul.f32 %v9589_v46, %v9589_v46  ;;  %v9596_v54 = vadd.f32 %v6238_v5, %v2817_v21  ;;  %v6240_v58 = vpop.f32.mrb[11].mxu0 }
 0x24c   :  { %v2827_v45 = vpop.f32.mrb[14].mxu1  ;;  %v6332_v37 = vadd.f32 %v9591_v49, %v6331_v18  ;;  %v6359_v33 = vmul.f32 %v9591_v49, %v9591_v49  ;;  %v9601_v0 = vadd.f32 %v6240_v58, %v2819_v25 }
 0x24d   :  { %v2829_v9 = vpop.f32.mrb[15].mxu1  ;;  %v6379_v10 = vadd.f32 %v6378_v41, %v6358_v23  ;;  %v6313_v29 = vadd.f32 %v9596_v54, %v6312_v55  ;;  %v6360_v7 = vmul.f32 %v9596_v54, %v9596_v54 }
 0x24e   :  { %v6398_v14 = vadd.f32 %v6397_v36, %v6359_v33  ;;  %v6333_v28 = vadd.f32 %v9601_v0, %v6332_v37  ;;  %v6361_v4 = vmul.f32 %v9601_v0, %v9601_v0 }
 0x24f   :  { %v6380_v48 = vadd.f32 %v6379_v10, %v6360_v7 }
 0x250   :  { %v6399_v13 = vadd.f32 %v6398_v14, %v6361_v4  ;;  %v6244_v30 = vpop.f32.mrb[12].mxu0 }
 0x251   :  { %v9609_v8 = vadd.f32 %v6244_v30, %v2823_v2  ;;  %v6246_v11 = vpop.f32.mrb[13].mxu0 }
 0x252   :  { %v2833_v44 = vpop.f32.mrb[16].mxu1  ;;  %v9611_v31 = vadd.f32 %v6246_v11, %v2825_v43  ;;  %v6248_v24 = vpop.f32.mrb[14].mxu0 }
 0x253   :  { %v2835_v59 = vpop.f32.mrb[17].mxu1  ;;  %v6314_v60 = vadd.f32 %v9609_v8, %v6313_v29  ;;  %v6362_v12 = vmul.f32 %v9609_v8, %v9609_v8  ;;  %v9616_v27 = vadd.f32 %v6248_v24, %v2827_v45  ;;  %v6250_v35 = vpop.f32.mrb[15].mxu0 }
 0x254   :  { %v2837_v63 = vpop.f32.mrb[18].mxu1  ;;  %v6334_v62 = vadd.f32 %v9611_v31, %v6333_v28  ;;  %v6363_v34 = vmul.f32 %v9611_v31, %v9611_v31  ;;  %v9621_v15 = vadd.f32 %v6250_v35, %v2829_v9 }
 0x255   :  { %v2839_v50 = vpop.f32.mrb[19].mxu1  ;;  %v6381_v52 = vadd.f32 %v6380_v48, %v6362_v12  ;;  %v6315_v21 = vadd.f32 %v9616_v27, %v6314_v60  ;;  %v6364_v19 = vmul.f32 %v9616_v27, %v9616_v27 }
 0x256   :  { %v6400_v53 = vadd.f32 %v6399_v13, %v6363_v34  ;;  %v6335_v22 = vadd.f32 %v9621_v15, %v6334_v62  ;;  %v6365_v25 = vmul.f32 %v9621_v15, %v9621_v15 }
 0x257   :  { %v6382_v32 = vadd.f32 %v6381_v52, %v6364_v19 }
 0x258   :  { %v6401_v42 = vadd.f32 %v6400_v53, %v6365_v25  ;;  %v6254_v6 = vpop.f32.mrb[16].mxu0 }
 0x259   :  { %v9629_v26 = vadd.f32 %v6254_v6, %v2833_v44  ;;  %v6256_v39 = vpop.f32.mrb[17].mxu0 }
 0x25a   :  { %v2843_v47 = vpop.f32.mrb[20].mxu1  ;;  %v9631_v20 = vadd.f32 %v6256_v39, %v2835_v59  ;;  %v6258_v41 = vpop.f32.mrb[18].mxu0 }
 0x25b   :  { %v2845_v18 = vpop.f32.mrb[21].mxu1  ;;  %v6316_v38 = vadd.f32 %v9629_v26, %v6315_v21  ;;  %v6366_v2 = vmul.f32 %v9629_v26, %v9629_v26  ;;  %v9636_v1 = vadd.f32 %v6258_v41, %v2837_v63  ;;  %v6260_v43 = vpop.f32.mrb[19].mxu0 }
 0x25c   :  { %v2847_v36 = vpop.f32.mrb[22].mxu1  ;;  %v6336_v45 = vadd.f32 %v9631_v20, %v6335_v22  ;;  %v6367_v55 = vmul.f32 %v9631_v20, %v9631_v20  ;;  %v9641_v23 = vadd.f32 %v6260_v43, %v2839_v50 }
 0x25d   :  { %v2849_v5 = vpop.f32.mrb[23].mxu1  ;;  %v6383_v58 = vadd.f32 %v6382_v32, %v6366_v2  ;;  %v6317_v9 = vadd.f32 %v9636_v1, %v6316_v38  ;;  %v6368_v37 = vmul.f32 %v9636_v1, %v9636_v1 }
 0x25e   :  { %v6402_v33 = vadd.f32 %v6401_v42, %v6367_v55  ;;  %v6337_v10 = vadd.f32 %v9641_v23, %v6336_v45  ;;  %v6369_v29 = vmul.f32 %v9641_v23, %v9641_v23 }
 0x25f   :  { %v6384_v7 = vadd.f32 %v6383_v58, %v6368_v37 }
 0x260   :  { %v6403_v14 = vadd.f32 %v6402_v33, %v6369_v29  ;;  %v6264_v28 = vpop.f32.mrb[20].mxu0 }
 0x261   :  { %v9649_v48 = vadd.f32 %v6264_v28, %v2843_v47  ;;  %v6266_v13 = vpop.f32.mrb[21].mxu0 }
 0x262   :  { %v2853_v4 = vpop.f32.mrb[24].mxu1  ;;  %v9651_v44 = vadd.f32 %v6266_v13, %v2845_v18  ;;  %v6268_v11 = vpop.f32.mrb[22].mxu0 }
 0x263   :  { %v2855_v30 = vpop.f32.mrb[25].mxu1  ;;  %v6318_v24 = vadd.f32 %v9649_v48, %v6317_v9  ;;  %v6370_v63 = vmul.f32 %v9649_v48, %v9649_v48  ;;  %v9656_v60 = vadd.f32 %v6268_v11, %v2847_v36  ;;  %v6270_v12 = vpop.f32.mrb[23].mxu0 }
 0x264   :  { %v2857_v59 = vpop.f32.mrb[26].mxu1  ;;  %v6338_v50 = vadd.f32 %v9651_v44, %v6337_v10  ;;  %v6371_v62 = vmul.f32 %v9651_v44, %v9651_v44  ;;  %v9661_v34 = vadd.f32 %v6270_v12, %v2849_v5 }
 0x265   :  { %v2858_v35 = vpop.f32.mrb[27].mxu1  ;;  %v6385_v52 = vadd.f32 %v6384_v7, %v6370_v63  ;;  %v6319_v21 = vadd.f32 %v9656_v60, %v6318_v24  ;;  %v6372_v19 = vmul.f32 %v9656_v60, %v9656_v60 }
 0x266   :  { %v6404_v53 = vadd.f32 %v6403_v14, %v6371_v62  ;;  %v6339_v22 = vadd.f32 %v9661_v34, %v6338_v50  ;;  %v6373_v25 = vmul.f32 %v9661_v34, %v9661_v34 }
 0x267   :  { %v6386_v32 = vadd.f32 %v6385_v52, %v6372_v19 }
 0x268   :  { %v6405_v42 = vadd.f32 %v6404_v53, %v6373_v25  ;;  %v6274_v6 = vpop.f32.mrb[24].mxu0 }
 0x269   :  { %v9669_v47 = vadd.f32 %v6274_v6, %v2853_v4  ;;  %v6276_v39 = vpop.f32.mrb[25].mxu0 }
 0x26a   :  { %v9671_v18 = vadd.f32 %v6276_v39, %v2855_v30  ;;  %v6278_v41 = vpop.f32.mrb[26].mxu0 }
 0x26b   :  { %v6321_v36 = vsel %vm6320_vm0, %v9669_v47, 0.0  ;;  %v6374_v38 = vmul.f32 %v9669_v47, %v9669_v47  ;;  %v6279_v2 = vpop.f32.mrb[27].mxu0 }
 0x26c   :  { %v6322_v43 = vadd.f32 %v6321_v36, %v6319_v21  ;;  %v6340_v5 = vsel %vm6320_vm0, %v9671_v18, 0.0  ;;  %v6375_v45 = vmul.f32 %v9671_v18, %v9671_v18 }
 0x26d   :  { %v6387_v55 = vsel %vm6320_vm0, %v6374_v38, 0.0  ;;  %v6341_v58 = vadd.f32 %v6340_v5, %v6339_v22 }
 0x26e   :  { %v6323_v9 = vrot.slane %v6322_v43, 4  ;;  %v6388_v37 = vadd.f32 %v6387_v55, %v6386_v32  ;;  %v6406_v33 = vsel %vm6320_vm0, %v6375_v45, 0.0 }
 0x26f   :  { %v6342_v10 = vrot.slane %v6341_v58, 4  ;;  %v6407_v29 = vadd.f32 %v6406_v33, %v6405_v42 }
 0x270   :  { %v6324_v7 = vadd.f32 %v6323_v9, %v6322_v43  ;;  %v6389_v14 = vrot.slane %v6388_v37, 4 }
 0x271   :  { %v6343_v28 = vadd.f32 %v6342_v10, %v6341_v58  ;;  %v6408_v4 = vrot.slane %v6407_v29, 4 }
 0x272   :  { %v6325_v13 = vrot.slane %v6324_v7, 2  ;;  %v6390_v30 = vadd.f32 %v6389_v14, %v6388_v37 }
 0x273   :  { %v6344_v11 = vrot.slane %v6343_v28, 2  ;;  %v6409_v59 = vadd.f32 %v6408_v4, %v6407_v29 }
 0x274   :  { %v6326_v24 = vadd.f32 %v6325_v13, %v6324_v7  ;;  %v6391_v63 = vrot.slane %v6390_v30, 2 }
 0x275   :  { %v6345_v12 = vadd.f32 %v6344_v11, %v6343_v28  ;;  %v6410_v35 = vrot.slane %v6409_v59, 2 }
 0x276   :  { %v6327_v50 = vrot.slane %v6326_v24, 1  ;;  %v6392_v62 = vadd.f32 %v6391_v63, %v6390_v30  ;;  %v10258_v63 = vld [vmem:[#allocation9_spill] sm:$0xff] }
 0x277   :  { %v6346_v52 = vrot.slane %v6345_v12, 1  ;;  %v6411_v21 = vadd.f32 %v6410_v35, %v6409_v59  ;;  %v6307_v35 = vld [vmem:[#allocation4] sm:$0x3] }
 0x278   :  { %v6328_v19 = vadd.f32 %v6327_v50, %v6326_v24  ;;  %v6393_v53 = vrot.slane %v6392_v62, 1  ;;  %v6308_v50 = vld [vmem:[#allocation6] sm:$0x3] }
 0x279   :  { %v6347_v22 = vadd.f32 %v6346_v52, %v6345_v12  ;;  %v6412_v25 = vrot.slane %v6411_v21, 1  ;;  %v6481_v12 = vsub.s32 0, %v10258_v63 }
 0x27a   :  { %v6348_v32 = vmul.f32 0.010204081, %v6328_v19  ;;  %v6394_v42 = vadd.f32 %v6393_v53, %v6392_v62  ;;  %v6485_v19 = vsub.s32 1, %v10258_v63 }
 0x27b   :  { %v9679_v6 = vmul.f32 0.010204081, %v6347_v22  ;;  %v6413_v39 = vadd.f32 %v6412_v25, %v6411_v21  ;;  %v6482_v52 = vrot.slane %v6307_v35, %v6481_v12  ;;  %v6519_v21 = vrot.slane %v6308_v50, %v6481_v12 }
 0x27c   :  { %v6414_v41 = vmul.f32 0.010204081, %v6394_v42  ;;  %v6416_v36 = vmul.f32 %v6348_v32, %v6348_v32  ;;  %v6422_v38 = vsub.f32 %v9549_v51, %v6348_v32  ;;  %v6424_v2 = vsub.f32 %v9553_v61, %v6348_v32 }
 0x27d   :  { %v6426_v43 = vsub.f32 %v9569_v56, %v6348_v32  ;;  %v6428_v5 = vsub.f32 %v9576_v3, %v6348_v32  ;;  %v6430_v45 = vsub.f32 %v9589_v46, %v6348_v32  ;;  %v6432_v55 = vsub.f32 %v9596_v54, %v6348_v32 }
 0x27e   :  { %v6418_v58 = vsub.f32 %v6414_v41, %v6416_v36  ;;  %v6434_v9 = vsub.f32 %v9609_v8, %v6348_v32  ;;  %v6436_v37 = vsub.f32 %v9616_v27, %v6348_v32  ;;  %v6438_v33 = vsub.f32 %v9629_v26, %v6348_v32 }
 0x27f   :  { %v6440_v10 = vsub.f32 %v9636_v1, %v6348_v32  ;;  %v6442_v51 = vsub.f32 %v9649_v48, %v6348_v32  ;;  %v6444_v61 = vsub.f32 %v9656_v60, %v6348_v32  ;;  %v6446_v56 = vsub.f32 %v9669_v47, %v6348_v32 }
 0x280   :  { %v6420_v3 = vmax.f32 %v6418_v58, 0.0  ;;  %v6415_v29 = vmul.f32 0.010204081, %v6413_v39  ;;  %v6417_v46 = vmul.f32 %v9679_v6, %v9679_v6  ;;  %v6423_v54 = vsub.f32 %v9551_v16, %v9679_v6 }
 0x281   :  { %v6425_v8 = vsub.f32 %v9555_v40, %v9679_v6  ;;  %v6427_v27 = vsub.f32 %v9571_v57, %v9679_v6  ;;  %v6429_v26 = vsub.f32 %v9581_v17, %v9679_v6  ;;  %v6431_v1 = vsub.f32 %v9591_v49, %v9679_v6 }
 0x282   :  { %v6448_v48 = vadd.f32 1e-05, %v6420_v3  ;;  %v6419_v60 = vsub.f32 %v6415_v29, %v6417_v46  ;;  %v6433_v47 = vsub.f32 %v9601_v0, %v9679_v6  ;;  %v6435_v7 = vsub.f32 %v9611_v31, %v9679_v6 }
 0x283   :  { %v6437_v14 = vsub.f32 %v9621_v15, %v9679_v6  ;;  %v6439_v28 = vsub.f32 %v9631_v20, %v9679_v6  ;;  %v6441_v4 = vsub.f32 %v9641_v23, %v9679_v6  ;;  %v6443_v13 = vsub.f32 %v9651_v44, %v9679_v6 }
 0x284   :  { %7813 = vrsqrt.f32 %v6448_v48  ;;  %v6421_v30 = vmax.f32 %v6419_v60, 0.0  ;;  %v6523_v16 = vrot.slane %v6308_v50, %v6485_v19  ;;  %v10259_v31 = vsub.f32 %v9661_v34, %v9679_v6 }
 0x285   :  { %v10260_v15 = vsub.f32 %v9671_v18, %v9679_v6 }
 0x286   :  { %v6449_v24 = vadd.f32 1e-05, %v6421_v30 }
 0x288   :  { %7815 = vrsqrt.f32 %v6449_v24 }
 0x28e   :  { %v7814_v62 = vpop.eup %7813 }
 0x28f   :  { %v6452_v53 = vmul.f32 %v7814_v62, %v6422_v38  ;;  %v6454_v22 = vmul.f32 %v7814_v62, %v6424_v2  ;;  %v6456_v25 = vmul.f32 %v7814_v62, %v6426_v43  ;;  %v6458_v32 = vmul.f32 %v7814_v62, %v6428_v5 }
 0x290   :  { %v6460_v42 = vmul.f32 %v7814_v62, %v6430_v45  ;;  %v6462_v39 = vmul.f32 %v7814_v62, %v6432_v55  ;;  %v6464_v41 = vmul.f32 %v7814_v62, %v6434_v9  ;;  %v6466_v36 = vmul.f32 %v7814_v62, %v6436_v37 }
 0x291   :  { %v6468_v58 = vmul.f32 %v7814_v62, %v6438_v33  ;;  %v6470_v3 = vmul.f32 %v7814_v62, %v6440_v10  ;;  %v6472_v29 = vmul.f32 %v7814_v62, %v6442_v51  ;;  %v6474_v46 = vmul.f32 %v7814_v62, %v6444_v61 }
 0x292   :  { %v6476_v48 = vmul.f32 %v7814_v62, %v6446_v56  ;;  %v6489_v60 = vmul.f32 %v6482_v52, %v6452_v53  ;;  %v6491_v30 = vmul.f32 %v6482_v52, %v6454_v22  ;;  %v6493_v24 = vmul.f32 %v6482_v52, %v6456_v25  ;;  %v7816_v33 = vpop.eup %7815 }
 0x293   :  { %v6495_v59 = vmul.f32 %v6482_v52, %v6458_v32  ;;  %v6497_v12 = vmul.f32 %v6482_v52, %v6460_v42  ;;  %v6499_v11 = vmul.f32 %v6482_v52, %v6462_v39  ;;  %v6501_v63 = vmul.f32 %v6482_v52, %v6464_v41 }
 0x294   :  { %v6503_v38 = vmul.f32 %v6482_v52, %v6466_v36  ;;  %v6505_v2 = vmul.f32 %v6482_v52, %v6468_v58  ;;  %v6507_v43 = vmul.f32 %v6482_v52, %v6470_v3  ;;  %v6509_v5 = vmul.f32 %v6482_v52, %v6472_v29 }
 0x295   :  { %v6511_v45 = vmul.f32 %v6482_v52, %v6474_v46  ;;  %v6513_v55 = vmul.f32 %v6482_v52, %v6476_v48  ;;  %v9724_v9 = vadd.f32 %v6519_v21, %v6489_v60  ;;  %v9726_v37 = vadd.f32 %v6519_v21, %v6491_v30 }
 0x296   :  { %v9728_v10 = vadd.f32 %v6519_v21, %v6493_v24  ;;  %v9730_v51 = vadd.f32 %v6519_v21, %v6495_v59  ;;  %v9732_v61 = vadd.f32 %v6519_v21, %v6497_v12  ;;  %v9734_v56 = vadd.f32 %v6519_v21, %v6499_v11 }
 0x297   :  { %v9736_v62 = vadd.f32 %v6519_v21, %v6501_v63  ;;  %v9738_v53 = vadd.f32 %v6519_v21, %v6503_v38  ;;  %v9740_v22 = vadd.f32 %v6519_v21, %v6505_v2  ;;  %v9742_v52 = vadd.f32 %v6519_v21, %v6507_v43 }
 0x298   :  { %v9744_v25 = vadd.f32 %v6519_v21, %v6509_v5  ;;  %v9746_v32 = vadd.f32 %v6519_v21, %v6511_v45  ;;  %v9748_v42 = vadd.f32 %v6519_v21, %v6513_v55  ;;  %v9751_v59 = vmul.f32 0.2, %v9724_v9 }
 0x299   :  { %v9754_v11 = vmul.f32 0.2, %v9726_v37  ;;  %v9757_v39 = vmul.f32 0.2, %v9728_v10  ;;  %v9760_v41 = vmul.f32 0.2, %v9730_v51  ;;  %v6453_v36 = vmul.f32 %v7816_v33, %v6423_v54 }
 0x29a   :  { %v9766_v58 = vmul.f32 0.2, %v9732_v61  ;;  %v9769_v21 = vmul.f32 0.2, %v9734_v56  ;;  %v9772_v3 = vmul.f32 0.2, %v9736_v62  ;;  %v6486_v29 = vrot.slane %v6307_v35, %v6485_v19 }
 0x29b   :  { %v9775_v46 = vmul.f32 0.2, %v9738_v53  ;;  %v9778_v48 = vmul.f32 0.2, %v9740_v22  ;;  %v9781_v60 = vmul.f32 0.2, %v9742_v52  ;;  %v6578_v24 = vmax.f32 %v9724_v9, %v9751_v59 }
 0x29c   :  { %v9784_v54 = vmul.f32 0.2, %v9744_v25  ;;  %v9787_v30 = vmul.f32 0.2, %v9746_v32  ;;  %v9794_v12 = vmul.f32 0.2, %v9748_v42  ;;  %v6455_v19 = vmul.f32 %v7816_v33, %v6425_v8 }
 0x29d   :  { %v6457_v2 = vmul.f32 %v7816_v33, %v6427_v27  ;;  %v6459_v43 = vmul.f32 %v7816_v33, %v6429_v26  ;;  %v6461_v5 = vmul.f32 %v7816_v33, %v6431_v1  ;;  %v6463_v55 = vmul.f32 %v7816_v33, %v6433_v47 }
 0x29e   :  { %v6465_v40 = vmul.f32 %v7816_v33, %v6435_v7  ;;  %v6467_v57 = vmul.f32 %v7816_v33, %v6437_v14  ;;  %v6469_v17 = vmul.f32 %v7816_v33, %v6439_v28  ;;  %v6471_v49 = vmul.f32 %v7816_v33, %v6441_v4 }
 0x29f   :  { %v6473_v0 = vmul.f32 %v7816_v33, %v6443_v13  ;;  %v6475_v8 = vmul.f32 %v7816_v33, %v10259_v31  ;;  %v6477_v27 = vmul.f32 %v7816_v33, %v10260_v15  ;;  %v6490_v26 = vmul.f32 %v6486_v29, %v6453_v36 }
 0x2a0   :  { %v6492_v1 = vmul.f32 %v6486_v29, %v6455_v19  ;;  %v6494_v20 = vmul.f32 %v6486_v29, %v6457_v2  ;;  %v6496_v47 = vmul.f32 %v6486_v29, %v6459_v43  ;;  %v6498_v7 = vmul.f32 %v6486_v29, %v6461_v5 }
 0x2a1   :  { %v6500_v14 = vmul.f32 %v6486_v29, %v6463_v55  ;;  %v6502_v23 = vmul.f32 %v6486_v29, %v6465_v40  ;;  %v6504_v28 = vmul.f32 %v6486_v29, %v6467_v57  ;;  %v6506_v4 = vmul.f32 %v6486_v29, %v6469_v17 }
 0x2a2   :  { %v6508_v45 = vmul.f32 %v6486_v29, %v6471_v49  ;;  %v6510_v44 = vmul.f32 %v6486_v29, %v6473_v0  ;;  %v6512_v13 = vmul.f32 %v6486_v29, %v6475_v8  ;;  %v6514_v38 = vmul.f32 %v6486_v29, %v6477_v27 }
 0x2a3   :  { %v6527_v50 = vadd.f32 %v6523_v16, %v6490_v26  ;;  %v6529_v34 = vadd.f32 %v6523_v16, %v6492_v1  ;;  %v6531_v31 = vadd.f32 %v6523_v16, %v6494_v20  ;;  %v6533_v63 = vadd.f32 %v6523_v16, %v6496_v47 }
 0x2a4   :  { %v6535_v35 = vadd.f32 %v6523_v16, %v6498_v7  ;;  %v6537_v18 = vadd.f32 %v6523_v16, %v6500_v14  ;;  %v6539_v6 = vadd.f32 %v6523_v16, %v6502_v23  ;;  %v6541_v33 = vadd.f32 %v6523_v16, %v6504_v28 }
 0x2a5   :  { %v6543_v36 = vadd.f32 %v6523_v16, %v6506_v4  ;;  %v6600_v19 = vmax.f32 %v9746_v32, %v9787_v30  ;;  %v6545_v2 = vadd.f32 %v6523_v16, %v6508_v45  ;;  %v6547_v43 = vadd.f32 %v6523_v16, %v6510_v44 }
 0x2a6   :  { %v6549_v5 = vadd.f32 %v6523_v16, %v6512_v13  ;;  %v6551_v55 = vadd.f32 %v6523_v16, %v6514_v38  ;;  %v6553_v40 = vmul.f32 0.2, %v6527_v50  ;;  %v6555_v57 = vmul.f32 0.2, %v6529_v34 }
 0x2a7   :  { %v6557_v17 = vmul.f32 0.2, %v6531_v31  ;;  %v6602_v29 = vmax.f32 %v9748_v42, %v9794_v12  ;;  %v6559_v49 = vmul.f32 0.2, %v6533_v63  ;;  %v6561_v0 = vmul.f32 0.2, %v6535_v35 }
 0x2a8   :  { %v6563_v8 = vmul.f32 0.2, %v6537_v18  ;;  %v6565_v15 = vmul.f32 0.2, %v6539_v6  ;;  %v6567_v27 = vmul.f32 0.2, %v6541_v33  ;;  %v6579_v1 = vmax.f32 %v6527_v50, %v6553_v40 }
 0x2a9   :  { %v6569_v26 = vmul.f32 0.2, %v6543_v36  ;;  %v6571_v20 = vmul.f32 0.2, %v6545_v2  ;;  %v6573_v47 = vmul.f32 0.2, %v6547_v43  ;;  %v6581_v30 = vmax.f32 %v6529_v34, %v6555_v57 }
 0x2aa   :  { %v6575_v32 = vmul.f32 0.2, %v6549_v5  ;;  %v6577_v45 = vmul.f32 0.2, %v6551_v55  ;;  %v6583_v7 = vmax.f32 %v6531_v31, %v6557_v17  ;;  %v6585_v16 = vmax.f32 %v6533_v63, %v6559_v49 }
 0x2ab   :  { %v6587_v38 = vmax.f32 %v6535_v35, %v6561_v0  ;;  %v6589_v14 = vmax.f32 %v6537_v18, %v6563_v8  ;;  %v6591_v23 = vmax.f32 %v6539_v6, %v6565_v15  ;;  %v6593_v28 = vmax.f32 %v6541_v33, %v6567_v27 }
 0x2ac   :  { %v6595_v4 = vmax.f32 %v6543_v36, %v6569_v26  ;;  %v6597_v42 = vmax.f32 %v6545_v2, %v6571_v20  ;;  %v6599_v12 = vmax.f32 %v6547_v43, %v6573_v47  ;;  %v6601_v44 = vmax.f32 %v6549_v5, %v6575_v32 }
 0x2ad   :  { %v6603_v13 = vmax.f32 %v6551_v55, %v6577_v45  ;;  %v7216_v50 = vpack.c.bf16 %v6579_v1, %v6578_v24  ;;  %v10261_v40 = vmax.f32 %v9726_v37, %v9754_v11  ;;  %v10262_v63 = vmax.f32 %v9728_v10, %v9757_v39 }
 0x2ae   :  { %v10263_v31 = vmax.f32 %v9730_v51, %v9760_v41  ;;  %v10264_v6 = vmax.f32 %v9732_v61, %v9766_v58  ;;  %v10265_v9 = vmax.f32 %v9734_v56, %v9769_v21  ;;  %v10266_v37 = vmax.f32 %v9736_v62, %v9772_v3 }
 0x2af   :  { %v7217_v34 = vpack.c.bf16 %v6581_v30, %v10261_v40  ;;  %v7218_v35 = vpack.c.bf16 %v6583_v7, %v10262_v63  ;;  %v10267_v10 = vmax.f32 %v9738_v53, %v9775_v46  ;;  %v10268_v51 = vmax.f32 %v9740_v22, %v9778_v48  ;;  %6684 = vst [vmem:[%s9930_s4] sm:$0xff] %v7216_v50 }
 0x2b0   :  { %v7219_v18 = vpack.c.bf16 %v6585_v16, %v10263_v31  ;;  %v7220_v33 = vpack.c.bf16 %v6587_v38, %v10264_v6  ;;  %v7221_v59 = vpack.c.bf16 %v6589_v14, %v10265_v9  ;;  %v7222_v11 = vpack.c.bf16 %v6591_v23, %v10266_v37 }
 0x2b1   :  { %v7223_v39 = vpack.c.bf16 %v6593_v28, %v10267_v10  ;;  %v7224_v41 = vpack.c.bf16 %v6595_v4, %v10268_v51  ;;  %v10269_v61 = vmax.f32 %v9742_v52, %v9781_v60  ;;  %v10270_v56 = vmax.f32 %v9744_v25, %v9784_v54  ;;  %6685 = vst [vmem:[%s9930_s4 + $0x8] sm:$0xff] %v7217_v34 }
 0x2b2   :  { %v7227_v24 = vpack.c.bf16 %v6601_v44, %v6600_v19  ;;  %6686 = vst [vmem:[%s9930_s4 + $0x10] sm:$0xff] %v7218_v35  ;;  %6687 = vst [vmem:[%s9930_s4 + $0x18] sm:$0xff] %v7219_v18  ;;  %v7228_v62 = vpack.c.bf16 %v6603_v13, %v6602_v29 }
 0x2b3   :  { %v7225_v58 = vpack.c.bf16 %v6597_v42, %v10269_v61  ;;  %v7226_v21 = vpack.c.bf16 %v6599_v12, %v10270_v56  ;;  %6688 = vst [vmem:[%s9930_s4 + $0x20] sm:$0xff] %v7220_v33  ;;  %6689 = vst [vmem:[%s9930_s4 + $0x28] sm:$0xff] %v7221_v59 }
 0x2b4   :  { %6690 = vst [vmem:[%s9930_s4 + $0x30] sm:$0xff] %v7222_v11  ;;  %6691 = vst [vmem:[%s9930_s4 + $0x38] sm:$0xff] %v7223_v39 }
 0x2b5   :  { %6692 = vst [vmem:[%s9930_s4 + $0x40] sm:$0xff] %v7224_v41  ;;  %6693 = vst [vmem:[%s9930_s4 + $0x48] sm:$0xff] %v7225_v58 }
 0x2b6   :  { %6694 = vst [vmem:[%s9930_s4 + $0x50] sm:$0xff] %v7226_v21  ;;  %6695 = vst [vmem:[%s9930_s4 + $0x58] sm:$0xff] %v7227_v24 }
 0x2b7   :  { %6696 = vst [vmem:[%s9930_s4 + $0x60] sm:$0x11] %v7228_v62 }
 0x2b8   :  { %6701 = vsyncpa [#allocation3], 1 }
 0x2b9   :  { %6702 = vsyncpa [#allocation5], 1 }

// kernel: netd_forward.5
= control target key start
LH: loop header
LB: loop body
LE: loop exit
PB: predicated region body
PF: predicated region fallthrough
CT: control target
= control target key end

     0   :  { %v12873_v42 = vmov 1966171168   ;;  %v701_v44 = vlaneseq  ;;  %vm9089_vm0 = vcmask 1041408   ;;  %vm9871_vm1 = vcmask 1040384   ;;  %s16937_s1 = inlined_call_operand.vmem [shape: bf16[4096,512], index: 1, kind: input, shape index: {}]   ;;  %s16938_s0 = inlined_call_operand.vmem [shape: bf16[2,4,4,1024], index: 0, kind: input, shape index: {}]   ;;  %s16939_s4 = inlined_call_operand.vmem [shape: f32[9,512], index: 4, kind: input, shape index: {}]   ;;  %s16940_s2 = inlined_call_operand.vmem [shape: f32[1,512], index: 2, kind: input, shape index: {}]   ;;  %s16941_s3 = inlined_call_operand.vmem [shape: f32[1,512], index: 3, kind: input, shape index: {}]   ;;  %s16942_s5 = inlined_call_operand.<no memory space> [shape: f32[1,1], index: 5, kind: input, shape index: {}]   ;;  %s16943_s6 = inlined_call_operand.vmem [shape: f32[2,1], index: 6, kind: output, shape index: {}]  }
   0x1   :  { %v11302_v0 = vld [vmem:[%s16937_s1 + $0x804] ss:$16 sps:$4 sm:$0xff]   ;;  %v11304_v1 = vld [vmem:[%s16937_s1 + $0x80c] ss:$16 sps:$4 sm:$0xff]   ;;  %v11306_v2 = vld [vmem:[%s16937_s1 + $0x800] ss:$16 sps:$4 sm:$0xff]   ;;  %v699_v43 = vunpack.c.l.s4 %v12873_v42 }
   0x2   :  { %2171 = vmatprep.subr.bf16.mxu0 %v11302_v0  ;;  %v11307_v3 = vld [vmem:[%s16937_s1 + $0x808] ss:$16 sps:$4 sm:$0xff]   ;;  %2375 = vmatprep.subr.bf16.mxu1 %v11304_v1  ;;  %v11308_v4 = vld [vmem:[%s16937_s1 + $0x824] ss:$16 sps:$4 sm:$0xff]   ;;  %v11310_v5 = vld [vmem:[%s16937_s1 + $0x82c] ss:$16 sps:$4 sm:$0xff]  }
   0x3   :  { %2172 = vmatpush1.bf16.msra.mxu0 %v11306_v2  ;;  %2376 = vmatpush1.bf16.msra.mxu1 %v11307_v3  ;;  %v11312_v6 = vld [vmem:[%s16937_s1 + $0x820] ss:$16 sps:$4 sm:$0xff]   ;;  %v11313_v7 = vld [vmem:[%s16937_s1 + $0x828] ss:$16 sps:$4 sm:$0xff]   ;;  %v11314_v8 = vld [vmem:[%s16937_s1 + $0x844] ss:$16 sps:$4 sm:$0xff]   ;;  %v700_v49 = vunpack.c.0.s8 %v699_v43 }
   0x4   :  { %2173 = vmatprep.subr.bf16.mxu0 %v11308_v4  ;;  %2377 = vmatprep.subr.bf16.mxu1 %v11310_v5  ;;  %v11316_v9 = vld [vmem:[%s16937_s1 + $0x84c] ss:$16 sps:$4 sm:$0xff]   ;;  %v11318_v10 = vld [vmem:[%s16937_s1 + $0x840] ss:$16 sps:$4 sm:$0xff]   ;;  %v11319_v11 = vld [vmem:[%s16937_s1 + $0x848] ss:$16 sps:$4 sm:$0xff]  }
   0x5   :  { %v11320_v12 = vld [vmem:[%s16937_s1 + $0x864] ss:$16 sps:$4 sm:$0xff]   ;;  %v11322_v13 = vld [vmem:[%s16937_s1 + $0x86c] ss:$16 sps:$4 sm:$0xff]   ;;  %v11324_v14 = vld [vmem:[%s16937_s1 + $0x860] ss:$16 sps:$4 sm:$0xff]  }
   0x6   :  { %v11325_v15 = vld [vmem:[%s16937_s1 + $0x868] ss:$16 sps:$4 sm:$0xff]   ;;  %v11326_v16 = vld [vmem:[%s16937_s1 + $0x884] ss:$16 sps:$4 sm:$0xff]   ;;  %v11328_v17 = vld [vmem:[%s16937_s1 + $0x88c] ss:$16 sps:$4 sm:$0xff]  }
   0x7   :  { %2174 = vmatpush1.bf16.msra.mxu0 %v11312_v6  ;;  %2378 = vmatpush1.bf16.msra.mxu1 %v11313_v7  ;;  %v11330_v18 = vld [vmem:[%s16937_s1 + $0x880] ss:$16 sps:$4 sm:$0xff]   ;;  %v11331_v19 = vld [vmem:[%s16937_s1 + $0x888] ss:$16 sps:$4 sm:$0xff]   ;;  %v11332_v20 = vld [vmem:[%s16937_s1 + $0x8a4] ss:$16 sps:$4 sm:$0xff]  }
   0x8   :  { %2175 = vmatprep.subr.bf16.mxu0 %v11314_v8  ;;  %2379 = vmatprep.subr.bf16.mxu1 %v11316_v9  ;;  %v11334_v21 = vld [vmem:[%s16937_s1 + $0x8ac] ss:$16 sps:$4 sm:$0xff]   ;;  %v11336_v22 = vld [vmem:[%s16937_s1 + $0x8a0] ss:$16 sps:$4 sm:$0xff]   ;;  %v11337_v23 = vld [vmem:[%s16937_s1 + $0x8a8] ss:$16 sps:$4 sm:$0xff]  }
   0x9   :  { %v11338_v24 = vld [vmem:[%s16937_s1 + $0x8c4] ss:$16 sps:$4 sm:$0xff]   ;;  %v11340_v25 = vld [vmem:[%s16937_s1 + $0x8cc] ss:$16 sps:$4 sm:$0xff]   ;;  %v11342_v26 = vld [vmem:[%s16937_s1 + $0x8c0] ss:$16 sps:$4 sm:$0xff]  }
   0xa   :  { %v11343_v27 = vld [vmem:[%s16937_s1 + $0x8c8] ss:$16 sps:$4 sm:$0xff]   ;;  %v11344_v28 = vld [vmem:[%s16937_s1 + $0x8e4] ss:$16 sps:$4 sm:$0xff]   ;;  %v11346_v29 = vld [vmem:[%s16937_s1 + $0x8ec] ss:$16 sps:$4 sm:$0xff]  }
   0xb   :  { %2176 = vmatpush1.bf16.msra.mxu0 %v11318_v10  ;;  %2380 = vmatpush1.bf16.msra.mxu1 %v11319_v11  ;;  %v11348_v30 = vld [vmem:[%s16937_s1 + $0x8e0] ss:$16 sps:$4 sm:$0xff]   ;;  %v11349_v31 = vld [vmem:[%s16937_s1 + $0x8e8] ss:$16 sps:$4 sm:$0xff]   ;;  %v11350_v32 = vld [vmem:[%s16937_s1 + $0x904] ss:$16 sps:$4 sm:$0xff]  }
   0xc   :  { %2177 = vmatprep.subr.bf16.mxu0 %v11320_v12  ;;  %2381 = vmatprep.subr.bf16.mxu1 %v11322_v13  ;;  %v11352_v33 = vld [vmem:[%s16937_s1 + $0x90c] ss:$16 sps:$4 sm:$0xff]   ;;  %v11354_v34 = vld [vmem:[%s16937_s1 + $0x900] ss:$16 sps:$4 sm:$0xff]   ;;  %v11355_v35 = vld [vmem:[%s16937_s1 + $0x908] ss:$16 sps:$4 sm:$0xff]  }
   0xd   :  { %v11356_v36 = vld [vmem:[%s16937_s1 + $0x924] ss:$16 sps:$4 sm:$0xff]   ;;  %v11358_v37 = vld [vmem:[%s16937_s1 + $0x92c] ss:$16 sps:$4 sm:$0xff]   ;;  %v11360_v38 = vld [vmem:[%s16937_s1 + $0x920] ss:$16 sps:$4 sm:$0xff]  }
   0xe   :  { %v11361_v39 = vld [vmem:[%s16937_s1 + $0x928] ss:$16 sps:$4 sm:$0xff]   ;;  %v11362_v40 = vld [vmem:[%s16937_s1 + $0x944] ss:$16 sps:$4 sm:$0xff]   ;;  %v11364_v41 = vld [vmem:[%s16937_s1 + $0x94c] ss:$16 sps:$4 sm:$0xff]  }
   0xf   :  { %2178 = vmatpush1.bf16.msra.mxu0 %v11324_v14  ;;  %2382 = vmatpush1.bf16.msra.mxu1 %v11325_v15  ;;  %v11366_v45 = vld [vmem:[%s16937_s1 + $0x940] ss:$16 sps:$4 sm:$0xff]   ;;  %v11367_v46 = vld [vmem:[%s16937_s1 + $0x948] ss:$16 sps:$4 sm:$0xff]   ;;  %v11368_v47 = vld [vmem:[%s16937_s1 + $0x964] ss:$16 sps:$4 sm:$0xff]  }
  0x10   :  { %2179 = vmatprep.subr.bf16.mxu0 %v11326_v16  ;;  %2383 = vmatprep.subr.bf16.mxu1 %v11328_v17  ;;  %v11370_v48 = vld [vmem:[%s16937_s1 + $0x96c] ss:$16 sps:$4 sm:$0xff]   ;;  %v13047_v50 = vshrl.u32 %v701_v44, 7  ;;  %v11372_v51 = vld [vmem:[%s16937_s1 + $0x960] ss:$16 sps:$4 sm:$0xff]   ;;  %vm9935_vm2 = vcmask 1041409  }
  0x11   :  { %v11373_v52 = vld [vmem:[%s16937_s1 + $0x968] ss:$16 sps:$4 sm:$0xff]   ;;  %v11374_v53 = vld [vmem:[%s16937_s1 + $0x984] ss:$16 sps:$4 sm:$0xff]   ;;  %v11376_v54 = vld [vmem:[%s16937_s1 + $0x98c] ss:$16 sps:$4 sm:$0xff]  }
  0x12   :  { %v9944_v55 = vld.sshfl [vmem:[%s16938_s0] sm:$0xff pattern:$0x75316420]  ;;  %v9945_v56 = vld.sshfl [vmem:[%s16938_s0 + $0x8] sm:$0xff pattern:$0x75316420]  ;;  %v13089_v0 = vsub.s32 %v700_v49, %v13047_v50 }
  0x13   :  { %2180 = vmatpush1.bf16.msra.mxu0 %v11330_v18  ;;  %2384 = vmatpush1.bf16.msra.mxu1 %v11331_v19  ;;  %v9946_v57 = vld.sshfl [vmem:[%s16938_s0 + $0x10] sm:$0xff pattern:$0x75316420]  ;;  %v13073_v58 = vld.sshfl [vmem:[%s16938_s0 + $0x18] sm:$0xff pattern:$0x75316420]  ;;  %v13075_v59 = vcombine.low %v9944_v55, %v9945_v56  ;;  %v13077_v60 = vcombine.high %v9944_v55, %v9945_v56 }
  0x14   :  { %2181 = vmatprep.subr.bf16.mxu0 %v11332_v20  ;;  %2385 = vmatprep.subr.bf16.mxu1 %v11334_v21  ;;  %v9948_v61 = vld.sshfl [vmem:[%s16938_s0 + $0x20] sm:$0xff pattern:$0x75316420]  ;;  %v9949_v62 = vld.sshfl [vmem:[%s16938_s0 + $0x28] sm:$0xff pattern:$0x75316420]  ;;  %v13086_v63 = vcombine.low %v9946_v57, %v13073_v58  ;;  %v80_v11 = vcombine.high %v9946_v57, %v13073_v58 }
  0x15   :  { %v11378_v1 = vld [vmem:[%s16937_s1 + $0x980] ss:$16 sps:$4 sm:$0xff]   ;;  %v11379_v2 = vld [vmem:[%s16937_s1 + $0x988] ss:$16 sps:$4 sm:$0xff]   ;;  %v13105_v5 = vcombine.low %v9948_v61, %v9949_v62  ;;  %v13107_v6 = vcombine.high %v9948_v61, %v9949_v62  ;;  %v146_v7 = vunpack.i.h.s16 %v13075_v59  ;;  %v419_v8 = vunpack.i.h.s16 %v13077_v60  ;;  %v11380_v21 = vld [vmem:[%s16937_s1 + $0x9a4] ss:$16 sps:$4 sm:$0xff]  }
  0x16   :  { %v9950_v3 = vld.sshfl [vmem:[%s16938_s0 + $0x40] sm:$0xff pattern:$0x75316420]  ;;  %v13103_v4 = vld.sshfl [vmem:[%s16938_s0 + $0x48] sm:$0xff pattern:$0x75316420]  ;;  %v149_v14 = vunpack.i.h.s16 %v13086_v63 }
  0x17   :  { %2182 = vmatpush1.bf16.msra.mxu0 %v11336_v22  ;;  %2386 = vmatpush1.bf16.msra.mxu1 %v11337_v23  ;;  %v9952_v9 = vld.sshfl [vmem:[%s16938_s0 + $0x50] sm:$0xff pattern:$0x75316420]  ;;  %v9953_v10 = vld.sshfl [vmem:[%s16938_s0 + $0x58] sm:$0xff pattern:$0x75316420]  ;;  %v13119_v12 = vcombine.low %v9950_v3, %v13103_v4  ;;  %v112_v13 = vcombine.high %v9950_v3, %v13103_v4  ;;  %v152_v19 = vunpack.i.h.s16 %v13105_v5  ;;  %v421_v20 = vunpack.i.h.s16 %v13107_v6 }
  0x18   :  { %2183 = vmatprep.subr.bf16.mxu0 %v11338_v24  ;;  %2387 = vmatprep.subr.bf16.mxu1 %v11340_v25  ;;  %v9954_v15 = vld.sshfl [vmem:[%s16938_s0 + $0x60] sm:$0xff pattern:$0x75316420]  ;;  %v9955_v16 = vld.sshfl [vmem:[%s16938_s0 + $0x68] sm:$0xff pattern:$0x75316420]  ;;  %v13129_v17 = vcombine.low %v9952_v9, %v9953_v10  ;;  %v13131_v18 = vcombine.high %v9952_v9, %v9953_v10  ;;  %v9956_v25 = vpack.i.b16 %v13077_v60, %v146_v7 }
  0x19   :  { %v11382_v22 = vld [vmem:[%s16937_s1 + $0x9ac] ss:$16 sps:$4 sm:$0xff]   ;;  %v13141_v23 = vcombine.low %v9954_v15, %v9955_v16  ;;  %v155_v24 = vunpack.i.h.s16 %v13119_v12  ;;  %v11391_v49 = vld [vmem:[%s16937_s1 + $0x9c8] ss:$16 sps:$4 sm:$0xff]   ;;  %vm9938_vm3 = vcmask 1024  }
  0x1a   :  { %v11394_v55 = vld [vmem:[%s16937_s1 + $0x9ec] ss:$16 sps:$4 sm:$0xff]   ;;  %v11397_v9 = vld [vmem:[%s16937_s1 + $0x9e8] ss:$16 sps:$4 sm:$0xff]  }
  0x1b   :  { %2184 = vmatpush1.bf16.msra.mxu0 %v11342_v26  ;;  %2388 = vmatpush1.bf16.msra.mxu1 %v11343_v27  ;;  %v682_v26 = vpack.i.b16 %v149_v14, %v419_v8  ;;  %v158_v27 = vunpack.i.h.s16 %v13129_v17  ;;  %v11396_v8 = vld [vmem:[%s16937_s1 + $0x9e0] ss:$16 sps:$4 sm:$0xff]  }
  0x1c   :  { %2185 = vmatprep.subr.bf16.mxu0 %v11344_v28  ;;  %2389 = vmatprep.subr.bf16.mxu1 %v11346_v29  ;;  %v423_v28 = vunpack.i.h.s16 %v13131_v18  ;;  %v9957_v29 = vpack.i.b16 %v13107_v6, %v152_v19 }
  0x1d   :  { %v691_v57 = vcombine.high %v9956_v25, %v682_v26 }
  0x1e   :  { %v9959_v62 = vcombine.high %v13073_v58, %v9957_v29 }
  0x1f   :  { %2186 = vmatpush1.bf16.msra.mxu0 %v11348_v30  ;;  %2390 = vmatpush1.bf16.msra.mxu1 %v11349_v31  ;;  %v13148_v30 = vpack.i.b16 %v80_v11, %v149_v14  ;;  %v161_v31 = vunpack.i.h.s16 %v13141_v23 }
  0x20   :  { %2187 = vmatprep.subr.bf16.mxu0 %v11350_v32  ;;  %2391 = vmatprep.subr.bf16.mxu1 %v11352_v33  ;;  %v685_v32 = vpack.i.b16 %v155_v24, %v421_v20  ;;  %v690_v33 = vcombine.low %v9956_v25, %v682_v26  ;;  %v11398_v25 = vld [vmem:[%s16937_s1 + $0xa00] ss:$16 sps:$4 sm:$0xff]   ;;  %v11401_v26 = vld [vmem:[%s16937_s1 + $0xa08] ss:$16 sps:$4 sm:$0xff]  }
  0x21   :  { %v688_v42 = vpack.i.b16 %v161_v31, %v423_v28 }
  0x22   :  { %v694_v43 = vcombine.low %v685_v32, %v112_v13  ;;  %v704_v44 = vrot.slane %v690_v33, %v13089_v0  ;;  %v9960_v7 = vcombine.high %v685_v32, %v13103_v4  ;;  %v11406_v32 = vld [vmem:[%s16937_s1 + $0xa24] ss:$16 sps:$4 sm:$0xff]   ;;  %v11409_v33 = vld [vmem:[%s16937_s1 + $0xa2c] ss:$16 sps:$4 sm:$0xff]  }
  0x23   :  { %2188 = vmatpush1.bf16.msra.mxu0 %v11354_v34  ;;  %2392 = vmatpush1.bf16.msra.mxu1 %v11355_v35  ;;  %v13151_v34 = vpack.i.b16 %v112_v13, %v155_v24  ;;  %v11384_v35 = vld [vmem:[%s16937_s1 + $0x9a0] ss:$16 sps:$4 sm:$0xff]   ;;  %v11400_v13 = vld [vmem:[%s16937_s1 + $0xa04] ss:$16 sps:$4 sm:$0xff]  }
  0x24   :  { %2189 = vmatprep.subr.bf16.mxu0 %v11356_v36  ;;  %2393 = vmatprep.subr.bf16.mxu1 %v11358_v37  ;;  %v11385_v36 = vld [vmem:[%s16937_s1 + $0x9a8] ss:$16 sps:$4 sm:$0xff]   ;;  %v9958_v37 = vpack.i.b16 %v13131_v18, %v158_v27  ;;  %v739_v19 = vrot.slane %v9960_v7, %v13089_v0  ;;  %v11428_v7 = vld [vmem:[%s16937_s1 + $0xaa0] ss:$16 sps:$4 sm:$0xff]  }
  0x26   :  { %v697_v58 = vcombine.high %v9958_v37, %v688_v42 }
  0x27   :  { %2190 = vmatpush1.bf16.msra.mxu0 %v11360_v38  ;;  %2394 = vmatpush1.bf16.msra.mxu1 %v11361_v39  ;;  %v692_v38 = vcombine.low %v80_v11, %v9957_v29  ;;  %v13160_v39 = vcombine.high %v9954_v15, %v9955_v16  ;;  %v711_v11 = vrot.slane %v691_v57, %v13089_v0  ;;  %v11403_v16 = vld [vmem:[%s16937_s1 + $0xa0c] ss:$16 sps:$4 sm:$0xff]   ;;  %v11424_v57 = vld [vmem:[%s16937_s1 + $0xa84] ss:$16 sps:$4 sm:$0xff]  }
  0x28   :  { %2191 = vmatprep.subr.bf16.mxu0 %v11362_v40  ;;  %2395 = vmatprep.subr.bf16.mxu1 %v11364_v41  ;;  %v11386_v40 = vld [vmem:[%s16937_s1 + $0x9c4] ss:$16 sps:$4 sm:$0xff]   ;;  %v11388_v41 = vld [vmem:[%s16937_s1 + $0x9cc] ss:$16 sps:$4 sm:$0xff]   ;;  %v725_v15 = vrot.slane %v9959_v62, %v13089_v0  ;;  %v753_v20 = vrot.slane %v697_v58, %v13089_v0  ;;  %v11422_v62 = vld [vmem:[%s16937_s1 + $0xa80] ss:$16 sps:$4 sm:$0xff]  }
  0x29   :  { %v11434_v58 = vld [vmem:[%s16937_s1 + $0xac0] ss:$16 sps:$4 sm:$0xff]  }
  0x2a   :  { %v756_v27 = vcombine.low %v711_v11, %v725_v15  ;;  %v757_v28 = vcombine.high %v711_v11, %v725_v15  ;;  %v760_v29 = vcombine.low %v739_v19, %v753_v20  ;;  %v11437_v11 = vld [vmem:[%s16937_s1 + $0xac8] ss:$16 sps:$4 sm:$0xff]  }
  0x2b   :  { %2192 = vmatpush1.bf16.msra.mxu0 %v11366_v45  ;;  %2396 = vmatpush1.bf16.msra.mxu1 %v11367_v46  ;;  %v718_v45 = vrot.slane %v692_v38, %v13089_v0  ;;  %v696_v46 = vcombine.low %v9958_v37, %v688_v42  ;;  %v11404_v42 = vld [vmem:[%s16937_s1 + $0xa20] ss:$16 sps:$4 sm:$0xff]   ;;  %v11443_v15 = vld [vmem:[%s16937_s1 + $0xae8] ss:$16 sps:$4 sm:$0xff]  }
  0x2c   :  { %2193 = vmatprep.subr.bf16.mxu0 %v11368_v47  ;;  %2397 = vmatprep.subr.bf16.mxu1 %v11370_v48  ;;  %v732_v47 = vrot.slane %v694_v43, %v13089_v0  ;;  %v11390_v48 = vld [vmem:[%s16937_s1 + $0x9c0] ss:$16 sps:$4 sm:$0xff]   ;;  %v13235_v37 = vrot.slane %v757_v28, %v13089_v0  ;;  %v13238_v38 = vrot.slane %v756_v27, %v13089_v0  ;;  %v11407_v43 = vld [vmem:[%s16937_s1 + $0xa28] ss:$16 sps:$4 sm:$0xff]   ;;  %v11460_v28 = vld [vmem:[%s16937_s1 + $0xb44] ss:$16 sps:$4 sm:$0xff]  }
  0x2d   :  { %v746_v56 = vrot.slane %v696_v46, %v13089_v0  ;;  %v11415_v46 = vld [vmem:[%s16937_s1 + $0xa4c] ss:$16 sps:$4 sm:$0xff]   ;;  %v11455_v27 = vld [vmem:[%s16937_s1 + $0xb28] ss:$16 sps:$4 sm:$0xff]  }
  0x2f   :  { %2194 = vmatpush1.bf16.msra.mxu0 %v11372_v51  ;;  %2398 = vmatpush1.bf16.msra.mxu1 %v11373_v52  ;;  %v755_v51 = vcombine.high %v704_v44, %v718_v45  ;;  %v754_v52 = vcombine.low %v704_v44, %v718_v45  ;;  %v11412_v45 = vld [vmem:[%s16937_s1 + $0xa44] ss:$16 sps:$4 sm:$0xff]  }
  0x30   :  { %2195 = vmatprep.subr.bf16.mxu0 %v11374_v53  ;;  %2399 = vmatprep.subr.bf16.mxu1 %v11376_v54  ;;  %v13181_v53 = vrot.slane %v13160_v39, %v13089_v0  ;;  %v11392_v54 = vld [vmem:[%s16937_s1 + $0x9e4] ss:$16 sps:$4 sm:$0xff]  }
  0x31   :  { %v13191_v61 = vrot.slane %v755_v51, %v13089_v0  ;;  %v768_v3 = vrot.slane %v754_v52, %v13089_v0  ;;  %v11413_v51 = vld [vmem:[%s16937_s1 + $0xa48] ss:$16 sps:$4 sm:$0xff]   ;;  %v11418_v52 = vld [vmem:[%s16937_s1 + $0xa64] ss:$16 sps:$4 sm:$0xff]  }
  0x32   :  { %v841_v10 = vcombine.high %v13181_v53, %v13181_v53 }
  0x33   :  { %2196 = vmatpush1.bf16.msra.mxu0 %v11378_v1  ;;  %2400 = vmatpush1.bf16.msra.mxu1 %v11379_v2  ;;  %v759_v1 = vcombine.high %v732_v47, %v746_v56  ;;  %v758_v2 = vcombine.low %v732_v47, %v746_v56  ;;  %v11419_v56 = vld [vmem:[%s16937_s1 + $0xa68] ss:$16 sps:$4 sm:$0xff]  }
  0x34   :  { %2197 = vmatprep.subr.bf16.mxu0 %v11380_v21  ;;  %2401 = vmatprep.subr.bf16.mxu1 %v11382_v22 }
  0x35   :  { %v810_v4 = vrot.slane %v759_v1, %v13089_v0  ;;  %v796_v14 = vrot.slane %v758_v2, %v13089_v0  ;;  %v11425_v1 = vld [vmem:[%s16937_s1 + $0xa88] ss:$16 sps:$4 sm:$0xff]   ;;  %v11430_v2 = vld [vmem:[%s16937_s1 + $0xaa4] ss:$16 sps:$4 sm:$0xff]  }
  0x37   :  { %2198 = vmatpush1.bf16.msra.mxu0 %v11384_v35  ;;  %2402 = vmatpush1.bf16.msra.mxu1 %v11385_v36  ;;  %v822_v21 = vcombine.low %v13191_v61, %v810_v4  ;;  %v818_v22 = vcombine.low %v768_v3, %v796_v14  ;;  %v13217_v24 = vcombine.high %v768_v3, %v796_v14  ;;  %v11433_v3 = vld [vmem:[%s16937_s1 + $0xaac] ss:$16 sps:$4 sm:$0xff]   ;;  %v11440_v14 = vld [vmem:[%s16937_s1 + $0xae0] ss:$16 sps:$4 sm:$0xff]  }
  0x38   :  { %2199 = vmatprep.subr.bf16.mxu0 %v11386_v40  ;;  %2403 = vmatprep.subr.bf16.mxu1 %v11388_v41  ;;  %v13232_v35 = vrot.slane %v841_v10, %v13089_v0  ;;  %v761_v36 = vcombine.high %v739_v19, %v753_v20  ;;  %v13241_v40 = vrot.slane %v760_v29, %v13089_v0  ;;  %v11439_v10 = vld [vmem:[%s16937_s1 + $0xacc] ss:$16 sps:$4 sm:$0xff]   ;;  %v11446_v20 = vld [vmem:[%s16937_s1 + $0xb00] ss:$16 sps:$4 sm:$0xff]  }
  0x39   :  { %2203 = vmatprep.mubr.bf16.mxu0 %v822_v21  ;;  %2407 = vmatprep.mubr.bf16.mxu1 %v822_v21  ;;  %v11451_v19 = vld [vmem:[%s16937_s1 + $0xb0c] ss:$16 sps:$4 sm:$0xff]   ;;  %v11449_v21 = vld [vmem:[%s16937_s1 + $0xb08] ss:$16 sps:$4 sm:$0xff]  }
  0x3a   :  { %v13244_v41 = vrot.slane %v761_v36, %v13089_v0  ;;  %v13254_v44 = vcombine.low %v13238_v38, %v13241_v40  ;;  %v11463_v29 = vld [vmem:[%s16937_s1 + $0xb4c] ss:$16 sps:$4 sm:$0xff]   ;;  %v11466_v36 = vld [vmem:[%s16937_s1 + $0xb64] ss:$16 sps:$4 sm:$0xff]  }
  0x3b   :  { %2200 = vmatpush1.bf16.msra.mxu0 %v11390_v48  ;;  %2404 = vmatpush1.bf16.msra.mxu1 %v11391_v49  ;;  %v13270_v48 = vrot.slane %v13181_v53, %v13089_v0  ;;  %v11410_v49 = vld [vmem:[%s16937_s1 + $0xa40] ss:$16 sps:$4 sm:$0xff]   ;;  %v11421_v53 = vld [vmem:[%s16937_s1 + $0xa6c] ss:$16 sps:$4 sm:$0xff]  }
  0x3c   :  { %2201 = vmatprep.subr.bf16.mxu0 %v11392_v54  ;;  %2405 = vmatprep.subr.bf16.mxu1 %v11394_v55  ;;  %v13264_v47 = vcombine.low %v13235_v37, %v13244_v41  ;;  %v823_v54 = vcombine.high %v13191_v61, %v810_v4  ;;  %v11416_v55 = vld [vmem:[%s16937_s1 + $0xa60] ss:$16 sps:$4 sm:$0xff]   ;;  %v11427_v61 = vld [vmem:[%s16937_s1 + $0xa8c] ss:$16 sps:$4 sm:$0xff]   ;;  %v11442_v4 = vld [vmem:[%s16937_s1 + $0xae4] ss:$16 sps:$4 sm:$0xff]  }
  0x3f   :  { %2202 = vmatpush1.bf16.msra.mxu0 %v11396_v8  ;;  %2406 = vmatpush1.bf16.msra.mxu1 %v11397_v9  ;;  %v11431_v8 = vld [vmem:[%s16937_s1 + $0xaa8] ss:$16 sps:$4 sm:$0xff]   ;;  %v11436_v9 = vld [vmem:[%s16937_s1 + $0xac4] ss:$16 sps:$4 sm:$0xff]  }
  0x40   :  { %2222 = vmatprep.subr.bf16.mxu0 %v11400_v13  ;;  %2426 = vmatprep.subr.bf16.mxu1 %v11403_v16  ;;  %v11445_v13 = vld [vmem:[%s16937_s1 + $0xaec] ss:$16 sps:$4 sm:$0xff]   ;;  %v11448_v16 = vld [vmem:[%s16937_s1 + $0xb04] ss:$16 sps:$4 sm:$0xff]  }
  0x42   :  { %2204 = vmatmul.mubr.bf16.vlgmr.msra.gmra.mrb[0].mxu0 %v818_v22  ;;  %2408 = vmatmul.mubr.bf16.vlgmr.msra.gmra.mrb[0].mxu1 %v818_v22  ;;  %v11454_v22 = vld [vmem:[%s16937_s1 + $0xb24] ss:$16 sps:$4 sm:$0xff]  }
  0x43   :  { %2223 = vmatpush1.bf16.msra.mxu0 %v11398_v25  ;;  %2427 = vmatpush1.bf16.msra.mxu1 %v11401_v26  ;;  %v11457_v25 = vld [vmem:[%s16937_s1 + $0xb2c] ss:$16 sps:$4 sm:$0xff]   ;;  %v11452_v26 = vld [vmem:[%s16937_s1 + $0xb20] ss:$16 sps:$4 sm:$0xff]  }
  0x44   :  { %2224 = vmatprep.subr.bf16.mxu0 %v11406_v32  ;;  %2428 = vmatprep.subr.bf16.mxu1 %v11409_v33  ;;  %v11458_v32 = vld [vmem:[%s16937_s1 + $0xb40] ss:$16 sps:$4 sm:$0xff]   ;;  %v11461_v33 = vld [vmem:[%s16937_s1 + $0xb48] ss:$16 sps:$4 sm:$0xff]  }
  0x45   :  { %2213 = vmatprep.mubr.bf16.mxu0 %v13232_v35  ;;  %2417 = vmatprep.mubr.bf16.mxu1 %v13232_v35 }
  0x47   :  { %2225 = vmatpush1.bf16.msra.mxu0 %v11404_v42  ;;  %2429 = vmatpush1.bf16.msra.mxu1 %v11407_v43  ;;  %v11469_v42 = vld [vmem:[%s16937_s1 + $0xb6c] ss:$16 sps:$4 sm:$0xff]   ;;  %v11464_v43 = vld [vmem:[%s16937_s1 + $0xb60] ss:$16 sps:$4 sm:$0xff]  }
  0x48   :  { %2226 = vmatprep.subr.bf16.mxu0 %v11412_v45  ;;  %2430 = vmatprep.subr.bf16.mxu1 %v11415_v46  ;;  %v11467_v45 = vld [vmem:[%s16937_s1 + $0xb68] ss:$16 sps:$4 sm:$0xff]   ;;  %v11472_v46 = vld [vmem:[%s16937_s1 + $0xb84] ss:$16 sps:$4 sm:$0xff]  }
  0x4a   :  { %2214 = vmatmul.mubr.bf16.gmra.mrb[4].mxu0 %v13270_v48  ;;  %2418 = vmatmul.mubr.bf16.gmra.mrb[4].mxu1 %v13270_v48 }
  0x4b   :  { %2227 = vmatpush1.bf16.msra.mxu0 %v11410_v49  ;;  %2431 = vmatpush1.bf16.msra.mxu1 %v11413_v51  ;;  %v11475_v49 = vld [vmem:[%s16937_s1 + $0xb8c] ss:$16 sps:$4 sm:$0xff]   ;;  %v11470_v51 = vld [vmem:[%s16937_s1 + $0xb80] ss:$16 sps:$4 sm:$0xff]  }
  0x4c   :  { %2228 = vmatprep.subr.bf16.mxu0 %v11418_v52  ;;  %2432 = vmatprep.subr.bf16.mxu1 %v11421_v53  ;;  %v11473_v52 = vld [vmem:[%s16937_s1 + $0xb88] ss:$16 sps:$4 sm:$0xff]   ;;  %v11478_v53 = vld [vmem:[%s16937_s1 + $0xba4] ss:$16 sps:$4 sm:$0xff]  }
  0x4d   :  { %2254 = vmatprep.mubr.bf16.mxu0 %v823_v54  ;;  %2458 = vmatprep.mubr.bf16.mxu1 %v823_v54  ;;  %v11481_v54 = vld [vmem:[%s16937_s1 + $0xbac] ss:$16 sps:$4 sm:$0xff]  }
  0x4f   :  { %2229 = vmatpush1.bf16.msra.mxu0 %v11416_v55  ;;  %2433 = vmatpush1.bf16.msra.mxu1 %v11419_v56  ;;  %v11476_v55 = vld [vmem:[%s16937_s1 + $0xba0] ss:$16 sps:$4 sm:$0xff]   ;;  %v11479_v56 = vld [vmem:[%s16937_s1 + $0xba8] ss:$16 sps:$4 sm:$0xff]  }
  0x50   :  { %2230 = vmatprep.subr.bf16.mxu0 %v11424_v57  ;;  %2434 = vmatprep.subr.bf16.mxu1 %v11427_v61  ;;  %v11484_v57 = vld [vmem:[%s16937_s1 + $0xbc4] ss:$16 sps:$4 sm:$0xff]   ;;  %v11487_v61 = vld [vmem:[%s16937_s1 + $0xbcc] ss:$16 sps:$4 sm:$0xff]  }
  0x53   :  { %2231 = vmatpush1.bf16.msra.mxu0 %v11422_v62  ;;  %2435 = vmatpush1.bf16.msra.mxu1 %v11425_v1  ;;  %v11482_v62 = vld [vmem:[%s16937_s1 + $0xbc0] ss:$16 sps:$4 sm:$0xff]   ;;  %v11485_v1 = vld [vmem:[%s16937_s1 + $0xbc8] ss:$16 sps:$4 sm:$0xff]  }
  0x54   :  { %2232 = vmatprep.subr.bf16.mxu0 %v11430_v2  ;;  %2436 = vmatprep.subr.bf16.mxu1 %v11433_v3  ;;  %v11490_v2 = vld [vmem:[%s16937_s1 + $0xbe4] ss:$16 sps:$4 sm:$0xff]   ;;  %v11493_v3 = vld [vmem:[%s16937_s1 + $0xbec] ss:$16 sps:$4 sm:$0xff]  }
  0x57   :  { %2233 = vmatpush1.bf16.msra.mxu0 %v11428_v7  ;;  %2437 = vmatpush1.bf16.msra.mxu1 %v11431_v8  ;;  %v11488_v7 = vld [vmem:[%s16937_s1 + $0xbe0] ss:$16 sps:$4 sm:$0xff]   ;;  %v11491_v8 = vld [vmem:[%s16937_s1 + $0xbe8] ss:$16 sps:$4 sm:$0xff]  }
  0x58   :  { %2234 = vmatprep.subr.bf16.mxu0 %v11436_v9  ;;  %2438 = vmatprep.subr.bf16.mxu1 %v11439_v10  ;;  %v11496_v9 = vld [vmem:[%s16937_s1 + $0xc04] ss:$16 sps:$4 sm:$0xff]   ;;  %v11499_v10 = vld [vmem:[%s16937_s1 + $0xc0c] ss:$16 sps:$4 sm:$0xff]  }
  0x5b   :  { %2235 = vmatpush1.bf16.msra.mxu0 %v11434_v58  ;;  %2439 = vmatpush1.bf16.msra.mxu1 %v11437_v11  ;;  %v11494_v58 = vld [vmem:[%s16937_s1 + $0xc00] ss:$16 sps:$4 sm:$0xff]   ;;  %v11497_v11 = vld [vmem:[%s16937_s1 + $0xc08] ss:$16 sps:$4 sm:$0xff]  }
  0x5c   :  { %2236 = vmatprep.subr.bf16.mxu0 %v11442_v4  ;;  %2440 = vmatprep.subr.bf16.mxu1 %v11445_v13  ;;  %v13451_v4 = vcombine.high %v13235_v37, %v13244_v41  ;;  %v11502_v13 = vld [vmem:[%s16937_s1 + $0xc24] ss:$16 sps:$4 sm:$0xff]   ;;  %v11500_v37 = vld [vmem:[%s16937_s1 + $0xc20] ss:$16 sps:$4 sm:$0xff]   ;;  %v11503_v41 = vld [vmem:[%s16937_s1 + $0xc28] ss:$16 sps:$4 sm:$0xff]  }
  0x5f   :  { %2237 = vmatpush1.bf16.msra.mxu0 %v11440_v14  ;;  %2441 = vmatpush1.bf16.msra.mxu1 %v11443_v15  ;;  %v11505_v14 = vld [vmem:[%s16937_s1 + $0xc2c] ss:$16 sps:$4 sm:$0xff]   ;;  %v13461_v15 = vcombine.high %v13238_v38, %v13241_v40  ;;  %v871_v38 = vcombine.high %v13270_v48, %v13270_v48  ;;  %v11506_v40 = vld [vmem:[%s16937_s1 + $0xc40] ss:$16 sps:$4 sm:$0xff]  }
  0x60   :  { %2238 = vmatprep.subr.bf16.mxu0 %v11448_v16  ;;  %2442 = vmatprep.subr.bf16.mxu1 %v11451_v19  ;;  %v873_v16 = vcombine.high %v13232_v35, %v13232_v35  ;;  %v11508_v35 = vld [vmem:[%s16937_s1 + $0xc44] ss:$16 sps:$4 sm:$0xff]   ;;  %v11509_v19 = vld [vmem:[%s16937_s1 + $0xc48] ss:$16 sps:$4 sm:$0xff]   ;;  %v11517_v48 = vld [vmem:[%s16937_s1 + $0xc6c] ss:$16 sps:$4 sm:$0xff]  }
  0x63   :  { %2239 = vmatpush1.bf16.msra.mxu0 %v11446_v20  ;;  %2443 = vmatpush1.bf16.msra.mxu1 %v11449_v21  ;;  %v11514_v20 = vld [vmem:[%s16937_s1 + $0xc64] ss:$16 sps:$4 sm:$0xff]   ;;  %v11512_v21 = vld [vmem:[%s16937_s1 + $0xc60] ss:$16 sps:$4 sm:$0xff]  }
  0x64   :  { %2240 = vmatprep.subr.bf16.mxu0 %v11454_v22  ;;  %2444 = vmatprep.subr.bf16.mxu1 %v11457_v25  ;;  %v11515_v22 = vld [vmem:[%s16937_s1 + $0xc68] ss:$16 sps:$4 sm:$0xff]   ;;  %v11520_v25 = vld [vmem:[%s16937_s1 + $0xc84] ss:$16 sps:$4 sm:$0xff]  }
  0x67   :  { %2241 = vmatpush1.bf16.msra.mxu0 %v11452_v26  ;;  %2445 = vmatpush1.bf16.msra.mxu1 %v11455_v27  ;;  %v11523_v26 = vld [vmem:[%s16937_s1 + $0xc8c] ss:$16 sps:$4 sm:$0xff]   ;;  %v11518_v27 = vld [vmem:[%s16937_s1 + $0xc80] ss:$16 sps:$4 sm:$0xff]  }
  0x68   :  { %2242 = vmatprep.subr.bf16.mxu0 %v11460_v28  ;;  %2446 = vmatprep.subr.bf16.mxu1 %v11463_v29  ;;  %v11521_v28 = vld [vmem:[%s16937_s1 + $0xc88] ss:$16 sps:$4 sm:$0xff]   ;;  %v11526_v29 = vld [vmem:[%s16937_s1 + $0xca4] ss:$16 sps:$4 sm:$0xff]  }
  0x6b   :  { %2243 = vmatpush1.bf16.msra.mxu0 %v11458_v32  ;;  %2447 = vmatpush1.bf16.msra.mxu1 %v11461_v33  ;;  %v11524_v32 = vld [vmem:[%s16937_s1 + $0xca0] ss:$16 sps:$4 sm:$0xff]   ;;  %v11527_v33 = vld [vmem:[%s16937_s1 + $0xca8] ss:$16 sps:$4 sm:$0xff]  }
  0x6c   :  { %2244 = vmatprep.subr.bf16.mxu0 %v11466_v36  ;;  %2448 = vmatprep.subr.bf16.mxu1 %v11469_v42  ;;  %v11532_v36 = vld [vmem:[%s16937_s1 + $0xcc4] ss:$16 sps:$4 sm:$0xff]   ;;  %v11535_v42 = vld [vmem:[%s16937_s1 + $0xccc] ss:$16 sps:$4 sm:$0xff]  }
  0x6f   :  { %2245 = vmatpush1.bf16.msra.mxu0 %v11464_v43  ;;  %2449 = vmatpush1.bf16.msra.mxu1 %v11467_v45  ;;  %v11530_v43 = vld [vmem:[%s16937_s1 + $0xcc0] ss:$16 sps:$4 sm:$0xff]   ;;  %v11533_v45 = vld [vmem:[%s16937_s1 + $0xcc8] ss:$16 sps:$4 sm:$0xff]  }
  0x70   :  { %2246 = vmatprep.subr.bf16.mxu0 %v11472_v46  ;;  %2450 = vmatprep.subr.bf16.mxu1 %v11475_v49  ;;  %v11538_v46 = vld [vmem:[%s16937_s1 + $0xce4] ss:$16 sps:$4 sm:$0xff]   ;;  %v11541_v49 = vld [vmem:[%s16937_s1 + $0xcec] ss:$16 sps:$4 sm:$0xff]  }
  0x73   :  { %2247 = vmatpush1.bf16.msra.mxu0 %v11470_v51  ;;  %2451 = vmatpush1.bf16.msra.mxu1 %v11473_v52  ;;  %v11536_v51 = vld [vmem:[%s16937_s1 + $0xce0] ss:$16 sps:$4 sm:$0xff]   ;;  %v11539_v52 = vld [vmem:[%s16937_s1 + $0xce8] ss:$16 sps:$4 sm:$0xff]  }
  0x74   :  { %2248 = vmatprep.subr.bf16.mxu0 %v11478_v53  ;;  %2452 = vmatprep.subr.bf16.mxu1 %v11481_v54  ;;  %v11544_v53 = vld [vmem:[%s16937_s1 + $0xd04] ss:$16 sps:$4 sm:$0xff]   ;;  %v11547_v54 = vld [vmem:[%s16937_s1 + $0xd0c] ss:$16 sps:$4 sm:$0xff]  }
  0x77   :  { %2249 = vmatpush1.bf16.msra.mxu0 %v11476_v55  ;;  %2453 = vmatpush1.bf16.msra.mxu1 %v11479_v56  ;;  %v11542_v55 = vld [vmem:[%s16937_s1 + $0xd00] ss:$16 sps:$4 sm:$0xff]   ;;  %v11545_v56 = vld [vmem:[%s16937_s1 + $0xd08] ss:$16 sps:$4 sm:$0xff]  }
  0x78   :  { %2250 = vmatprep.subr.bf16.mxu0 %v11484_v57  ;;  %2454 = vmatprep.subr.bf16.mxu1 %v11487_v61  ;;  %v11550_v57 = vld [vmem:[%s16937_s1 + $0xd24] ss:$16 sps:$4 sm:$0xff]   ;;  %v11553_v61 = vld [vmem:[%s16937_s1 + $0xd2c] ss:$16 sps:$4 sm:$0xff]  }
  0x7b   :  { %2251 = vmatpush1.bf16.msra.mxu0 %v11482_v62  ;;  %2455 = vmatpush1.bf16.msra.mxu1 %v11485_v1  ;;  %v11548_v62 = vld [vmem:[%s16937_s1 + $0xd20] ss:$16 sps:$4 sm:$0xff]   ;;  %v11551_v1 = vld [vmem:[%s16937_s1 + $0xd28] ss:$16 sps:$4 sm:$0xff]  }
  0x7c   :  { %2252 = vmatprep.subr.bf16.mxu0 %v11490_v2  ;;  %2456 = vmatprep.subr.bf16.mxu1 %v11493_v3  ;;  %v11556_v2 = vld [vmem:[%s16937_s1 + $0xd44] ss:$16 sps:$4 sm:$0xff]   ;;  %v11559_v3 = vld [vmem:[%s16937_s1 + $0xd4c] ss:$16 sps:$4 sm:$0xff]  }
  0x7f   :  { %2253 = vmatpush1.bf16.msra.mxu0 %v11488_v7  ;;  %2457 = vmatpush1.bf16.msra.mxu1 %v11491_v8  ;;  %v11554_v7 = vld [vmem:[%s16937_s1 + $0xd40] ss:$16 sps:$4 sm:$0xff]   ;;  %v11557_v8 = vld [vmem:[%s16937_s1 + $0xd48] ss:$16 sps:$4 sm:$0xff]  }
  0x80   :  { %2273 = vmatprep.subr.bf16.mxu0 %v11496_v9  ;;  %2477 = vmatprep.subr.bf16.mxu1 %v11499_v10  ;;  %v11562_v9 = vld [vmem:[%s16937_s1 + $0xd64] ss:$16 sps:$4 sm:$0xff]   ;;  %v11565_v10 = vld [vmem:[%s16937_s1 + $0xd6c] ss:$16 sps:$4 sm:$0xff]  }
  0x82   :  { %2255 = vmatmul.mubr.bf16.vlgmr.msra.gmra.mrb[0].mxu0 %v13217_v24  ;;  %2459 = vmatmul.mubr.bf16.vlgmr.msra.gmra.mrb[0].mxu1 %v13217_v24  ;;  %v11511_v24 = vld [vmem:[%s16937_s1 + $0xc4c] ss:$16 sps:$4 sm:$0xff]  }
  0x83   :  { %2274 = vmatpush1.bf16.msra.mxu0 %v11494_v58  ;;  %2478 = vmatpush1.bf16.msra.mxu1 %v11497_v11  ;;  %v11560_v58 = vld [vmem:[%s16937_s1 + $0xd60] ss:$16 sps:$4 sm:$0xff]   ;;  %v11563_v11 = vld [vmem:[%s16937_s1 + $0xd68] ss:$16 sps:$4 sm:$0xff]  }
  0x84   :  { %2275 = vmatprep.subr.bf16.mxu0 %v11502_v13  ;;  %2479 = vmatprep.subr.bf16.mxu1 %v11505_v14  ;;  %v11568_v13 = vld [vmem:[%s16937_s1 + $0xd84] ss:$16 sps:$4 sm:$0xff]   ;;  %v11571_v14 = vld [vmem:[%s16937_s1 + $0xd8c] ss:$16 sps:$4 sm:$0xff]  }
  0x85   :  { %2264 = vmatprep.mubr.bf16.mxu0 %v873_v16  ;;  %2468 = vmatprep.mubr.bf16.mxu1 %v873_v16  ;;  %v11566_v16 = vld [vmem:[%s16937_s1 + $0xd80] ss:$16 sps:$4 sm:$0xff]  }
  0x87   :  { %2276 = vmatpush1.bf16.msra.mxu0 %v11500_v37  ;;  %2480 = vmatpush1.bf16.msra.mxu1 %v11503_v41  ;;  %v11569_v37 = vld [vmem:[%s16937_s1 + $0xd88] ss:$16 sps:$4 sm:$0xff]   ;;  %v11574_v41 = vld [vmem:[%s16937_s1 + $0xda4] ss:$16 sps:$4 sm:$0xff]  }
  0x88   :  { %2277 = vmatprep.subr.bf16.mxu0 %v11508_v35  ;;  %2481 = vmatprep.subr.bf16.mxu1 %v11511_v24  ;;  %v11577_v35 = vld [vmem:[%s16937_s1 + $0xdac] ss:$16 sps:$4 sm:$0xff]   ;;  %v11572_v24 = vld [vmem:[%s16937_s1 + $0xda0] ss:$16 sps:$4 sm:$0xff]  }
  0x8a   :  { %2265 = vmatmul.mubr.bf16.gmra.mrb[4].mxu0 %v871_v38  ;;  %2469 = vmatmul.mubr.bf16.gmra.mrb[4].mxu1 %v871_v38  ;;  %v11575_v38 = vld [vmem:[%s16937_s1 + $0xda8] ss:$16 sps:$4 sm:$0xff]  }
  0x8b   :  { %2278 = vmatpush1.bf16.msra.mxu0 %v11506_v40  ;;  %2482 = vmatpush1.bf16.msra.mxu1 %v11509_v19  ;;  %v11580_v40 = vld [vmem:[%s16937_s1 + $0xdc4] ss:$16 sps:$4 sm:$0xff]   ;;  %v11583_v19 = vld [vmem:[%s16937_s1 + $0xdcc] ss:$16 sps:$4 sm:$0xff]  }
  0x8c   :  { %2279 = vmatprep.subr.bf16.mxu0 %v11514_v20  ;;  %2483 = vmatprep.subr.bf16.mxu1 %v11517_v48  ;;  %v12862_v20 = vld.sshfl [vmem:[%s16938_s0 + $0x68] sm:$0xff pattern:$0x75316420] }
  0x8d   :  { %2305 = vmatprep.mubr.bf16.mxu0 %v13264_v47  ;;  %2509 = vmatprep.mubr.bf16.mxu1 %v13264_v47  ;;  %v11529_v47 = vld [vmem:[%s16937_s1 + $0xcac] ss:$16 sps:$4 sm:$0xff]   ;;  %v9961_v48 = vcombine.high %v12862_v20, %v12862_v20  ;;  %v11646_v20 = vld [vmem:[%s16937_s1 + $0xf24] ss:$16 sps:$4 sm:$0xff]  }
  0x8f   :  { %2280 = vmatpush1.bf16.msra.mxu0 %v11512_v21  ;;  %2484 = vmatpush1.bf16.msra.mxu1 %v11515_v22  ;;  %v11578_v21 = vld [vmem:[%s16937_s1 + $0xdc0] ss:$16 sps:$4 sm:$0xff]   ;;  %v11581_v22 = vld [vmem:[%s16937_s1 + $0xdc8] ss:$16 sps:$4 sm:$0xff]  }
  0x90   :  { %2281 = vmatprep.subr.bf16.mxu0 %v11520_v25  ;;  %2485 = vmatprep.subr.bf16.mxu1 %v11523_v26  ;;  %v11586_v25 = vld [vmem:[%s16937_s1 + $0xde4] ss:$16 sps:$4 sm:$0xff]   ;;  %v11589_v26 = vld [vmem:[%s16937_s1 + $0xdec] ss:$16 sps:$4 sm:$0xff]  }
  0x93   :  { %2282 = vmatpush1.bf16.msra.mxu0 %v11518_v27  ;;  %2486 = vmatpush1.bf16.msra.mxu1 %v11521_v28  ;;  %v840_v27 = vrot.slane %v9961_v48, %v13089_v0  ;;  %v11584_v28 = vld [vmem:[%s16937_s1 + $0xde0] ss:$16 sps:$4 sm:$0xff]   ;;  %v11649_v48 = vld [vmem:[%s16937_s1 + $0xf2c] ss:$16 sps:$4 sm:$0xff]  }
  0x94   :  { %2283 = vmatprep.subr.bf16.mxu0 %v11526_v29  ;;  %2487 = vmatprep.subr.bf16.mxu1 %v11529_v47  ;;  %v11587_v29 = vld [vmem:[%s16937_s1 + $0xde8] ss:$16 sps:$4 sm:$0xff]   ;;  %v11592_v47 = vld [vmem:[%s16937_s1 + $0xe04] ss:$16 sps:$4 sm:$0xff]  }
  0x97   :  { %2284 = vmatpush1.bf16.msra.mxu0 %v11524_v32  ;;  %2488 = vmatpush1.bf16.msra.mxu1 %v11527_v33  ;;  %v11595_v32 = vld [vmem:[%s16937_s1 + $0xe0c] ss:$16 sps:$4 sm:$0xff]   ;;  %v842_v33 = vcombine.high %v840_v27, %v840_v27 }
  0x98   :  { %2285 = vmatprep.subr.bf16.mxu0 %v11532_v36  ;;  %2489 = vmatprep.subr.bf16.mxu1 %v11535_v42  ;;  %v11590_v36 = vld [vmem:[%s16937_s1 + $0xe00] ss:$16 sps:$4 sm:$0xff]   ;;  %v11593_v42 = vld [vmem:[%s16937_s1 + $0xe08] ss:$16 sps:$4 sm:$0xff]  }
  0x9b   :  { %2286 = vmatpush1.bf16.msra.mxu0 %v11530_v43  ;;  %2490 = vmatpush1.bf16.msra.mxu1 %v11533_v45  ;;  %v11598_v43 = vld [vmem:[%s16937_s1 + $0xe24] ss:$16 sps:$4 sm:$0xff]   ;;  %v11601_v45 = vld [vmem:[%s16937_s1 + $0xe2c] ss:$16 sps:$4 sm:$0xff]  }
  0x9c   :  { %2287 = vmatprep.subr.bf16.mxu0 %v11538_v46  ;;  %2491 = vmatprep.subr.bf16.mxu1 %v11541_v49  ;;  %v13668_v46 = vrot.slane %v842_v33, %v13089_v0  ;;  %v11596_v49 = vld [vmem:[%s16937_s1 + $0xe20] ss:$16 sps:$4 sm:$0xff]   ;;  %v11659_v33 = vld [vmem:[%s16937_s1 + $0xf68] ss:$16 sps:$4 sm:$0xff]  }
  0x9f   :  { %2288 = vmatpush1.bf16.msra.mxu0 %v11536_v51  ;;  %2492 = vmatpush1.bf16.msra.mxu1 %v11539_v52  ;;  %v11599_v51 = vld [vmem:[%s16937_s1 + $0xe28] ss:$16 sps:$4 sm:$0xff]   ;;  %v11604_v52 = vld [vmem:[%s16937_s1 + $0xe44] ss:$16 sps:$4 sm:$0xff]  }
  0xa0   :  { %2289 = vmatprep.subr.bf16.mxu0 %v11544_v53  ;;  %2493 = vmatprep.subr.bf16.mxu1 %v11547_v54  ;;  %v13687_v53 = vrot.slane %v840_v27, %v13089_v0  ;;  %v11602_v54 = vld [vmem:[%s16937_s1 + $0xe40] ss:$16 sps:$4 sm:$0xff]  }
  0xa1   :  { %v11650_v27 = vld [vmem:[%s16937_s1 + $0xf40] ss:$16 sps:$4 sm:$0xff]  }
  0xa3   :  { %2290 = vmatpush1.bf16.msra.mxu0 %v11542_v55  ;;  %2494 = vmatpush1.bf16.msra.mxu1 %v11545_v56  ;;  %v11605_v55 = vld [vmem:[%s16937_s1 + $0xe48] ss:$16 sps:$4 sm:$0xff]   ;;  %v11610_v56 = vld [vmem:[%s16937_s1 + $0xe64] ss:$16 sps:$4 sm:$0xff]  }
  0xa4   :  { %2291 = vmatprep.subr.bf16.mxu0 %v11550_v57  ;;  %2495 = vmatprep.subr.bf16.mxu1 %v11553_v61  ;;  %v11613_v57 = vld [vmem:[%s16937_s1 + $0xe6c] ss:$16 sps:$4 sm:$0xff]   ;;  %v11608_v61 = vld [vmem:[%s16937_s1 + $0xe60] ss:$16 sps:$4 sm:$0xff]  }
  0xa7   :  { %2292 = vmatpush1.bf16.msra.mxu0 %v11548_v62  ;;  %2496 = vmatpush1.bf16.msra.mxu1 %v11551_v1  ;;  %v11611_v62 = vld [vmem:[%s16937_s1 + $0xe68] ss:$16 sps:$4 sm:$0xff]   ;;  %v11616_v1 = vld [vmem:[%s16937_s1 + $0xe84] ss:$16 sps:$4 sm:$0xff]  }
  0xa8   :  { %2293 = vmatprep.subr.bf16.mxu0 %v11556_v2  ;;  %2497 = vmatprep.subr.bf16.mxu1 %v11559_v3  ;;  %v11619_v2 = vld [vmem:[%s16937_s1 + $0xe8c] ss:$16 sps:$4 sm:$0xff]   ;;  %v11614_v3 = vld [vmem:[%s16937_s1 + $0xe80] ss:$16 sps:$4 sm:$0xff]  }
  0xab   :  { %2294 = vmatpush1.bf16.msra.mxu0 %v11554_v7  ;;  %2498 = vmatpush1.bf16.msra.mxu1 %v11557_v8  ;;  %v11617_v7 = vld [vmem:[%s16937_s1 + $0xe88] ss:$16 sps:$4 sm:$0xff]   ;;  %v11622_v8 = vld [vmem:[%s16937_s1 + $0xea4] ss:$16 sps:$4 sm:$0xff]  }
  0xac   :  { %2295 = vmatprep.subr.bf16.mxu0 %v11562_v9  ;;  %2499 = vmatprep.subr.bf16.mxu1 %v11565_v10  ;;  %v11620_v9 = vld [vmem:[%s16937_s1 + $0xea0] ss:$16 sps:$4 sm:$0xff]   ;;  %v11623_v10 = vld [vmem:[%s16937_s1 + $0xea8] ss:$16 sps:$4 sm:$0xff]  }
  0xaf   :  { %2296 = vmatpush1.bf16.msra.mxu0 %v11560_v58  ;;  %2500 = vmatpush1.bf16.msra.mxu1 %v11563_v11  ;;  %v11628_v58 = vld [vmem:[%s16937_s1 + $0xec4] ss:$16 sps:$4 sm:$0xff]   ;;  %v11631_v11 = vld [vmem:[%s16937_s1 + $0xecc] ss:$16 sps:$4 sm:$0xff]  }
  0xb0   :  { %2297 = vmatprep.subr.bf16.mxu0 %v11568_v13  ;;  %2501 = vmatprep.subr.bf16.mxu1 %v11571_v14  ;;  %v11626_v13 = vld [vmem:[%s16937_s1 + $0xec0] ss:$16 sps:$4 sm:$0xff]   ;;  %v11629_v14 = vld [vmem:[%s16937_s1 + $0xec8] ss:$16 sps:$4 sm:$0xff]  }
  0xb3   :  { %2298 = vmatpush1.bf16.msra.mxu0 %v11566_v16  ;;  %2502 = vmatpush1.bf16.msra.mxu1 %v11569_v37  ;;  %v11634_v16 = vld [vmem:[%s16937_s1 + $0xee4] ss:$16 sps:$4 sm:$0xff]   ;;  %v11637_v37 = vld [vmem:[%s16937_s1 + $0xeec] ss:$16 sps:$4 sm:$0xff]  }
  0xb4   :  { %2299 = vmatprep.subr.bf16.mxu0 %v11574_v41  ;;  %2503 = vmatprep.subr.bf16.mxu1 %v11577_v35  ;;  %v11632_v41 = vld [vmem:[%s16937_s1 + $0xee0] ss:$16 sps:$4 sm:$0xff]   ;;  %v11635_v35 = vld [vmem:[%s16937_s1 + $0xee8] ss:$16 sps:$4 sm:$0xff]  }
  0xb7   :  { %2300 = vmatpush1.bf16.msra.mxu0 %v11572_v24  ;;  %2504 = vmatpush1.bf16.msra.mxu1 %v11575_v38  ;;  %v11640_v24 = vld [vmem:[%s16937_s1 + $0xf04] ss:$16 sps:$4 sm:$0xff]   ;;  %v11643_v38 = vld [vmem:[%s16937_s1 + $0xf0c] ss:$16 sps:$4 sm:$0xff]  }
  0xb8   :  { %2301 = vmatprep.subr.bf16.mxu0 %v11580_v40  ;;  %2505 = vmatprep.subr.bf16.mxu1 %v11583_v19  ;;  %v11638_v40 = vld [vmem:[%s16937_s1 + $0xf00] ss:$16 sps:$4 sm:$0xff]   ;;  %v11641_v19 = vld [vmem:[%s16937_s1 + $0xf08] ss:$16 sps:$4 sm:$0xff]  }
  0xbb   :  { %2302 = vmatpush1.bf16.msra.mxu0 %v11578_v21  ;;  %2506 = vmatpush1.bf16.msra.mxu1 %v11581_v22  ;;  %v11644_v21 = vld [vmem:[%s16937_s1 + $0xf20] ss:$16 sps:$4 sm:$0xff]   ;;  %v11647_v22 = vld [vmem:[%s16937_s1 + $0xf28] ss:$16 sps:$4 sm:$0xff]  }
  0xbc   :  { %2303 = vmatprep.subr.bf16.mxu0 %v11586_v25  ;;  %2507 = vmatprep.subr.bf16.mxu1 %v11589_v26  ;;  %v11652_v25 = vld [vmem:[%s16937_s1 + $0xf44] ss:$16 sps:$4 sm:$0xff]   ;;  %v11655_v26 = vld [vmem:[%s16937_s1 + $0xf4c] ss:$16 sps:$4 sm:$0xff]  }
  0xbf   :  { %2304 = vmatpush1.bf16.msra.mxu0 %v11584_v28  ;;  %2508 = vmatpush1.bf16.msra.mxu1 %v11587_v29  ;;  %v11653_v28 = vld [vmem:[%s16937_s1 + $0xf48] ss:$16 sps:$4 sm:$0xff]   ;;  %v11658_v29 = vld [vmem:[%s16937_s1 + $0xf64] ss:$16 sps:$4 sm:$0xff]  }
  0xc0   :  { %2324 = vmatprep.subr.bf16.mxu0 %v11592_v47  ;;  %2528 = vmatprep.subr.bf16.mxu1 %v11595_v32  ;;  %v11661_v47 = vld [vmem:[%s16937_s1 + $0xf6c] ss:$16 sps:$4 sm:$0xff]   ;;  %v11656_v32 = vld [vmem:[%s16937_s1 + $0xf60] ss:$16 sps:$4 sm:$0xff]  }
  0xc2   :  { %2306 = vmatmul.mubr.bf16.vlgmr.msra.gmra.mrb[0].mxu0 %v13254_v44  ;;  %2510 = vmatmul.mubr.bf16.vlgmr.msra.gmra.mrb[0].mxu1 %v13254_v44  ;;  %v11607_v44 = vld [vmem:[%s16937_s1 + $0xe4c] ss:$16 sps:$4 sm:$0xff]  }
  0xc3   :  { %2325 = vmatpush1.bf16.msra.mxu0 %v11590_v36  ;;  %2529 = vmatpush1.bf16.msra.mxu1 %v11593_v42  ;;  %v11664_v36 = vld [vmem:[%s16937_s1 + $0xf84] ss:$16 sps:$4 sm:$0xff]   ;;  %v11667_v42 = vld [vmem:[%s16937_s1 + $0xf8c] ss:$16 sps:$4 sm:$0xff]  }
  0xc4   :  { %2326 = vmatprep.subr.bf16.mxu0 %v11598_v43  ;;  %2530 = vmatprep.subr.bf16.mxu1 %v11601_v45  ;;  %v13815_v43 = vpack.i.b16 %v13086_v63, %v13077_v60  ;;  %v13819_v45 = vpack.i.b16 %v13119_v12, %v13107_v6  ;;  %v11670_v60 = vld [vmem:[%s16937_s1 + $0xfa4] ss:$16 sps:$4 sm:$0xff]   ;;  %v11673_v63 = vld [vmem:[%s16937_s1 + $0xfac] ss:$16 sps:$4 sm:$0xff]  }
  0xc5   :  { %2315 = vmatprep.mubr.bf16.mxu0 %v13668_v46  ;;  %2519 = vmatprep.mubr.bf16.mxu1 %v13668_v46  ;;  %v12863_v6 = vld.sshfl [vmem:[%s16938_s0] sm:$0xff pattern:$0x75316420] }
  0xc6   :  { %v10224_v12 = vcombine.low %v12863_v6, %v13815_v43  ;;  %v11715_v6 = vld [vmem:[%s16937_s1 + $0x8c] ss:$16 sps:$4 sm:$0xff]  }
  0xc7   :  { %2327 = vmatpush1.bf16.msra.mxu0 %v11596_v49  ;;  %2531 = vmatpush1.bf16.msra.mxu1 %v11599_v51  ;;  %v13823_v49 = vpack.i.b16 %v13141_v23, %v13131_v18  ;;  %v11662_v51 = vld [vmem:[%s16937_s1 + $0xf80] ss:$16 sps:$4 sm:$0xff]   ;;  %v11781_v23 = vld [vmem:[%s16937_s1 + $0x1ec] ss:$16 sps:$4 sm:$0xff]  }
  0xc8   :  { %2328 = vmatprep.subr.bf16.mxu0 %v11604_v52  ;;  %2532 = vmatprep.subr.bf16.mxu1 %v11607_v44  ;;  %v11665_v52 = vld [vmem:[%s16937_s1 + $0xf88] ss:$16 sps:$4 sm:$0xff]   ;;  %v12864_v18 = vld.sshfl [vmem:[%s16938_s0 + $0x20] sm:$0xff pattern:$0x75316420] }
  0xc9   :  { %v10225_v44 = vcombine.low %v13148_v30, %v12864_v18  ;;  %v11713_v18 = vld [vmem:[%s16937_s1 + $0x88] ss:$16 sps:$4 sm:$0xff]  }
  0xca   :  { %2316 = vmatmul.mubr.bf16.gmra.mrb[4].mxu0 %v13687_v53  ;;  %2520 = vmatmul.mubr.bf16.gmra.mrb[4].mxu1 %v13687_v53 }
  0xcb   :  { %2329 = vmatpush1.bf16.msra.mxu0 %v11602_v54  ;;  %2533 = vmatpush1.bf16.msra.mxu1 %v11605_v55  ;;  %v2592_v54 = vcombine.low %v13819_v45, %v13151_v34  ;;  %v12865_v55 = vld.sshfl [vmem:[%s16938_s0 + $0x50] sm:$0xff pattern:$0x75316420] }
  0xcc   :  { %2330 = vmatprep.subr.bf16.mxu0 %v11610_v56  ;;  %2534 = vmatprep.subr.bf16.mxu1 %v11613_v57  ;;  %v10226_v56 = vcombine.low %v12865_v55, %v13823_v49  ;;  %v11668_v57 = vld [vmem:[%s16937_s1 + $0xfa0] ss:$16 sps:$4 sm:$0xff]  }
  0xcd   :  { %2356 = vmatprep.mubr.bf16.mxu0 %v13451_v4  ;;  %2560 = vmatprep.mubr.bf16.mxu1 %v13451_v4  ;;  %v11625_v4 = vld [vmem:[%s16937_s1 + $0xeac] ss:$16 sps:$4 sm:$0xff]   ;;  %v11716_v55 = vld [vmem:[%s16937_s1 + $0xa0] ss:$16 sps:$4 sm:$0xff]  }
  0xcf   :  { %2331 = vmatpush1.bf16.msra.mxu0 %v11608_v61  ;;  %2535 = vmatpush1.bf16.msra.mxu1 %v11611_v62  ;;  %v11671_v61 = vld [vmem:[%s16937_s1 + $0xfa8] ss:$16 sps:$4 sm:$0xff]   ;;  %v11676_v62 = vld [vmem:[%s16937_s1 + $0xfc4] ss:$16 sps:$4 sm:$0xff]  }
  0xd0   :  { %2332 = vmatprep.subr.bf16.mxu0 %v11616_v1  ;;  %2536 = vmatprep.subr.bf16.mxu1 %v11619_v2  ;;  %v11679_v1 = vld [vmem:[%s16937_s1 + $0xfcc] ss:$16 sps:$4 sm:$0xff]   ;;  %v2602_v2 = vrot.slane %v10224_v12, %v13089_v0  ;;  %v11710_v12 = vld [vmem:[%s16937_s1 + $0x80] ss:$16 sps:$4 sm:$0xff]  }
  0xd3   :  { %2333 = vmatpush1.bf16.msra.mxu0 %v11614_v3  ;;  %2537 = vmatpush1.bf16.msra.mxu1 %v11617_v7  ;;  %v2616_v3 = vrot.slane %v10225_v44, %v13089_v0  ;;  %v2630_v7 = vrot.slane %v2592_v54, %v13089_v0  ;;  %v11718_v44 = vld [vmem:[%s16937_s1 + $0xa4] ss:$16 sps:$4 sm:$0xff]   ;;  %v11721_v54 = vld [vmem:[%s16937_s1 + $0xac] ss:$16 sps:$4 sm:$0xff]  }
  0xd4   :  { %2334 = vmatprep.subr.bf16.mxu0 %v11622_v8  ;;  %2538 = vmatprep.subr.bf16.mxu1 %v11625_v4  ;;  %v2644_v8 = vrot.slane %v10226_v56, %v13089_v0  ;;  %v11674_v4 = vld [vmem:[%s16937_s1 + $0xfc0] ss:$16 sps:$4 sm:$0xff]   ;;  %v11719_v56 = vld [vmem:[%s16937_s1 + $0xa8] ss:$16 sps:$4 sm:$0xff]  }
  0xd7   :  { %2335 = vmatpush1.bf16.msra.mxu0 %v11620_v9  ;;  %2539 = vmatpush1.bf16.msra.mxu1 %v11623_v10  ;;  %v11677_v9 = vld [vmem:[%s16937_s1 + $0xfc8] ss:$16 sps:$4 sm:$0xff]   ;;  %v11682_v10 = vld [vmem:[%s16937_s1 + $0xfe4] ss:$16 sps:$4 sm:$0xff]  }
  0xd8   :  { %2336 = vmatprep.subr.bf16.mxu0 %v11628_v58  ;;  %2540 = vmatprep.subr.bf16.mxu1 %v11631_v11  ;;  %v11685_v58 = vld [vmem:[%s16937_s1 + $0xfec] ss:$16 sps:$4 sm:$0xff]   ;;  %v2653_v11 = vcombine.high %v2602_v2, %v2616_v3 }
  0xdb   :  { %2337 = vmatpush1.bf16.msra.mxu0 %v11626_v13  ;;  %2541 = vmatpush1.bf16.msra.mxu1 %v11629_v14  ;;  %v2657_v13 = vcombine.high %v2630_v7, %v2644_v8  ;;  %v2652_v14 = vcombine.low %v2602_v2, %v2616_v3  ;;  %v11730_v2 = vld [vmem:[%s16937_s1 + $0xe4] ss:$16 sps:$4 sm:$0xff]   ;;  %v11733_v3 = vld [vmem:[%s16937_s1 + $0xec] ss:$16 sps:$4 sm:$0xff]  }
  0xdc   :  { %2338 = vmatprep.subr.bf16.mxu0 %v11634_v16  ;;  %2542 = vmatprep.subr.bf16.mxu1 %v11637_v37  ;;  %v2656_v16 = vcombine.low %v2630_v7, %v2644_v8  ;;  %v11680_v37 = vld [vmem:[%s16937_s1 + $0xfe0] ss:$16 sps:$4 sm:$0xff]   ;;  %v11731_v8 = vld [vmem:[%s16937_s1 + $0xe8] ss:$16 sps:$4 sm:$0xff]  }
  0xdd   :  { %v11728_v7 = vld [vmem:[%s16937_s1 + $0xe0] ss:$16 sps:$4 sm:$0xff]  }
  0xdf   :  { %2339 = vmatpush1.bf16.msra.mxu0 %v11632_v41  ;;  %2543 = vmatpush1.bf16.msra.mxu1 %v11635_v35  ;;  %v11683_v41 = vld [vmem:[%s16937_s1 + $0xfe8] ss:$16 sps:$4 sm:$0xff]   ;;  %v11688_v35 = vld [vmem:[%s16937_s1 + $0x4] ss:$16 sps:$4 sm:$0xff]  }
  0xe0   :  { %2340 = vmatprep.subr.bf16.mxu0 %v11640_v24  ;;  %2544 = vmatprep.subr.bf16.mxu1 %v11643_v38  ;;  %v11691_v24 = vld [vmem:[%s16937_s1 + $0xc] ss:$16 sps:$4 sm:$0xff]   ;;  %v2680_v38 = vrot.slane %v2653_v11, %v13089_v0  ;;  %v11742_v11 = vld [vmem:[%s16937_s1 + $0x124] ss:$16 sps:$4 sm:$0xff]  }
  0xe3   :  { %2341 = vmatpush1.bf16.msra.mxu0 %v11638_v40  ;;  %2545 = vmatpush1.bf16.msra.mxu1 %v11641_v19  ;;  %v2708_v40 = vrot.slane %v2657_v13, %v13089_v0  ;;  %v13894_v19 = vrot.slane %v2652_v14, %v13089_v0  ;;  %v11745_v13 = vld [vmem:[%s16937_s1 + $0x12c] ss:$16 sps:$4 sm:$0xff]   ;;  %v11740_v14 = vld [vmem:[%s16937_s1 + $0x120] ss:$16 sps:$4 sm:$0xff]  }
  0xe4   :  { %2342 = vmatprep.subr.bf16.mxu0 %v11646_v20  ;;  %2546 = vmatprep.subr.bf16.mxu1 %v11649_v48  ;;  %v13897_v20 = vrot.slane %v2656_v16, %v13089_v0  ;;  %v11686_v48 = vld [vmem:[%s16937_s1] ss:$16 sps:$4 sm:$0xff]   ;;  %v11743_v16 = vld [vmem:[%s16937_s1 + $0x128] ss:$16 sps:$4 sm:$0xff]  }
  0xe7   :  { %2343 = vmatpush1.bf16.msra.mxu0 %v11644_v21  ;;  %2547 = vmatpush1.bf16.msra.mxu1 %v11647_v22  ;;  %v11689_v21 = vld [vmem:[%s16937_s1 + $0x8] ss:$16 sps:$4 sm:$0xff]   ;;  %v13905_v22 = vcombine.high %v2680_v38, %v2708_v40 }
  0xe8   :  { %2344 = vmatprep.subr.bf16.mxu0 %v11652_v25  ;;  %2548 = vmatprep.subr.bf16.mxu1 %v11655_v26  ;;  %v11694_v25 = vld [vmem:[%s16937_s1 + $0x24] ss:$16 sps:$4 sm:$0xff]   ;;  %v11697_v26 = vld [vmem:[%s16937_s1 + $0x2c] ss:$16 sps:$4 sm:$0xff]  }
  0xeb   :  { %2345 = vmatpush1.bf16.msra.mxu0 %v11650_v27  ;;  %2549 = vmatpush1.bf16.msra.mxu1 %v11653_v28  ;;  %v13915_v27 = vcombine.high %v13894_v19, %v13897_v20  ;;  %v874_v28 = vcombine.high %v13668_v46, %v13668_v46  ;;  %v11700_v46 = vld [vmem:[%s16937_s1 + $0x44] ss:$16 sps:$4 sm:$0xff]  }
  0xec   :  { %2346 = vmatprep.subr.bf16.mxu0 %v11658_v29  ;;  %2550 = vmatprep.subr.bf16.mxu1 %v11661_v47  ;;  %v11692_v29 = vld [vmem:[%s16937_s1 + $0x20] ss:$16 sps:$4 sm:$0xff]   ;;  %v11695_v47 = vld [vmem:[%s16937_s1 + $0x28] ss:$16 sps:$4 sm:$0xff]  }
  0xef   :  { %2347 = vmatpush1.bf16.msra.mxu0 %v11656_v32  ;;  %2551 = vmatpush1.bf16.msra.mxu1 %v11659_v33  ;;  %v872_v32 = vcombine.high %v13687_v53, %v13687_v53  ;;  %v11698_v33 = vld [vmem:[%s16937_s1 + $0x40] ss:$16 sps:$4 sm:$0xff]   ;;  %v11709_v53 = vld [vmem:[%s16937_s1 + $0x6c] ss:$16 sps:$4 sm:$0xff]  }
  0xf0   :  { %2348 = vmatprep.subr.bf16.mxu0 %v11664_v36  ;;  %2552 = vmatprep.subr.bf16.mxu1 %v11667_v42  ;;  %v11701_v36 = vld [vmem:[%s16937_s1 + $0x48] ss:$16 sps:$4 sm:$0xff]   ;;  %v11706_v42 = vld [vmem:[%s16937_s1 + $0x64] ss:$16 sps:$4 sm:$0xff]  }
  0xf3   :  { %2349 = vmatpush1.bf16.msra.mxu0 %v11662_v51  ;;  %2553 = vmatpush1.bf16.msra.mxu1 %v11665_v52  ;;  %v2720_v51 = vcombine.low %v2680_v38, %v2708_v40  ;;  %v11704_v52 = vld [vmem:[%s16937_s1 + $0x60] ss:$16 sps:$4 sm:$0xff]   ;;  %v11754_v38 = vld [vmem:[%s16937_s1 + $0x164] ss:$16 sps:$4 sm:$0xff]   ;;  %v11757_v40 = vld [vmem:[%s16937_s1 + $0x16c] ss:$16 sps:$4 sm:$0xff]  }
  0xf4   :  { %2350 = vmatprep.subr.bf16.mxu0 %v11670_v60  ;;  %2554 = vmatprep.subr.bf16.mxu1 %v11673_v63  ;;  %v11707_v60 = vld [vmem:[%s16937_s1 + $0x68] ss:$16 sps:$4 sm:$0xff]   ;;  %v11712_v63 = vld [vmem:[%s16937_s1 + $0x84] ss:$16 sps:$4 sm:$0xff]  }
  0xf7   :  { %2351 = vmatpush1.bf16.msra.mxu0 %v11668_v57  ;;  %2555 = vmatpush1.bf16.msra.mxu1 %v11671_v61  ;;  %v11724_v57 = vld [vmem:[%s16937_s1 + $0xc4] ss:$16 sps:$4 sm:$0xff]   ;;  %v11727_v61 = vld [vmem:[%s16937_s1 + $0xcc] ss:$16 sps:$4 sm:$0xff]  }
  0xf8   :  { %2352 = vmatprep.subr.bf16.mxu0 %v11676_v62  ;;  %2556 = vmatprep.subr.bf16.mxu1 %v11679_v1  ;;  %v11722_v62 = vld [vmem:[%s16937_s1 + $0xc0] ss:$16 sps:$4 sm:$0xff]   ;;  %v11725_v1 = vld [vmem:[%s16937_s1 + $0xc8] ss:$16 sps:$4 sm:$0xff]  }
  0xfb   :  { %2353 = vmatpush1.bf16.msra.mxu0 %v11674_v4  ;;  %2557 = vmatpush1.bf16.msra.mxu1 %v11677_v9  ;;  %v11736_v4 = vld [vmem:[%s16937_s1 + $0x104] ss:$16 sps:$4 sm:$0xff]   ;;  %v11739_v9 = vld [vmem:[%s16937_s1 + $0x10c] ss:$16 sps:$4 sm:$0xff]  }
  0xfc   :  { %2354 = vmatprep.subr.bf16.mxu0 %v11682_v10  ;;  %2558 = vmatprep.subr.bf16.mxu1 %v11685_v58  ;;  %v11734_v10 = vld [vmem:[%s16937_s1 + $0x100] ss:$16 sps:$4 sm:$0xff]   ;;  %v11737_v58 = vld [vmem:[%s16937_s1 + $0x108] ss:$16 sps:$4 sm:$0xff]  }
  0xff   :  { %2355 = vmatpush1.bf16.msra.mxu0 %v11680_v37  ;;  %2559 = vmatpush1.bf16.msra.mxu1 %v11683_v41  ;;  %v11748_v37 = vld [vmem:[%s16937_s1 + $0x144] ss:$16 sps:$4 sm:$0xff]   ;;  %v11751_v41 = vld [vmem:[%s16937_s1 + $0x14c] ss:$16 sps:$4 sm:$0xff]  }
 0x100   :  { %4069 = vmatprep.subr.bf16.mxu0 %v11688_v35  ;;  %4273 = vmatprep.subr.bf16.mxu1 %v11691_v24  ;;  %v11746_v35 = vld [vmem:[%s16937_s1 + $0x140] ss:$16 sps:$4 sm:$0xff]   ;;  %v11749_v24 = vld [vmem:[%s16937_s1 + $0x148] ss:$16 sps:$4 sm:$0xff]  }
 0x102   :  { %2357 = vmatmul.mubr.bf16.vlgmr.msra.gmra.mrb[0].mxu0 %v13461_v15  ;;  %2561 = vmatmul.mubr.bf16.vlgmr.msra.gmra.mrb[0].mxu1 %v13461_v15  ;;  %v11703_v15 = vld [vmem:[%s16937_s1 + $0x4c] ss:$16 sps:$4 sm:$0xff]  }
 0x103   :  { %4070 = vmatpush1.bf16.msra.mxu0 %v11686_v48  ;;  %4274 = vmatpush1.bf16.msra.mxu1 %v11689_v21  ;;  %v11752_v48 = vld [vmem:[%s16937_s1 + $0x160] ss:$16 sps:$4 sm:$0xff]   ;;  %v11755_v21 = vld [vmem:[%s16937_s1 + $0x168] ss:$16 sps:$4 sm:$0xff]  }
 0x104   :  { %4071 = vmatprep.subr.bf16.mxu0 %v11694_v25  ;;  %4275 = vmatprep.subr.bf16.mxu1 %v11697_v26  ;;  %v11760_v25 = vld [vmem:[%s16937_s1 + $0x184] ss:$16 sps:$4 sm:$0xff]   ;;  %v11763_v26 = vld [vmem:[%s16937_s1 + $0x18c] ss:$16 sps:$4 sm:$0xff]  }
 0x105   :  { %2366 = vmatprep.mubr.bf16.mxu0 %v874_v28  ;;  %2570 = vmatprep.mubr.bf16.mxu1 %v874_v28  ;;  %v11758_v28 = vld [vmem:[%s16937_s1 + $0x180] ss:$16 sps:$4 sm:$0xff]  }
 0x107   :  { %4072 = vmatpush1.bf16.msra.mxu0 %v11692_v29  ;;  %4276 = vmatpush1.bf16.msra.mxu1 %v11695_v47  ;;  %v11761_v29 = vld [vmem:[%s16937_s1 + $0x188] ss:$16 sps:$4 sm:$0xff]   ;;  %v11766_v47 = vld [vmem:[%s16937_s1 + $0x1a4] ss:$16 sps:$4 sm:$0xff]  }
 0x108   :  { %4073 = vmatprep.subr.bf16.mxu0 %v11700_v46  ;;  %4277 = vmatprep.subr.bf16.mxu1 %v11703_v15  ;;  %v11769_v46 = vld [vmem:[%s16937_s1 + $0x1ac] ss:$16 sps:$4 sm:$0xff]   ;;  %v11764_v15 = vld [vmem:[%s16937_s1 + $0x1a0] ss:$16 sps:$4 sm:$0xff]  }
 0x10a   :  { %2367 = vmatmul.mubr.bf16.gmra.mrb[4].mxu0 %v872_v32  ;;  %2571 = vmatmul.mubr.bf16.gmra.mrb[4].mxu1 %v872_v32  ;;  %v11767_v32 = vld [vmem:[%s16937_s1 + $0x1a8] ss:$16 sps:$4 sm:$0xff]  }
 0x10b   :  { %4074 = vmatpush1.bf16.msra.mxu0 %v11698_v33  ;;  %4278 = vmatpush1.bf16.msra.mxu1 %v11701_v36  ;;  %v11772_v33 = vld [vmem:[%s16937_s1 + $0x1c4] ss:$16 sps:$4 sm:$0xff]   ;;  %v11775_v36 = vld [vmem:[%s16937_s1 + $0x1cc] ss:$16 sps:$4 sm:$0xff]  }
 0x10c   :  { %4075 = vmatprep.subr.bf16.mxu0 %v11706_v42  ;;  %4279 = vmatprep.subr.bf16.mxu1 %v11709_v53  ;;  %v14082_v42 = vpack.i.b16 %v13160_v39, %v161_v31  ;;  %v11770_v53 = vld [vmem:[%s16937_s1 + $0x1c0] ss:$16 sps:$4 sm:$0xff]  }
 0x10d   :  { %4101 = vmatprep.mubr.bf16.mxu0 %v2720_v51  ;;  %4305 = vmatprep.mubr.bf16.mxu1 %v2720_v51  ;;  %v11773_v51 = vld [vmem:[%s16937_s1 + $0x1c8] ss:$16 sps:$4 sm:$0xff]   ;;  %v11776_v39 = vld [vmem:[%s16937_s1 + $0x1e0] ss:$16 sps:$4 sm:$0xff]  }
 0x10e   :  { %v2731_v31 = vrot.slane %v14082_v42, %v13089_v0 }
 0x10f   :  { %4076 = vmatpush1.bf16.msra.mxu0 %v11704_v52  ;;  %4280 = vmatpush1.bf16.msra.mxu1 %v11707_v60  ;;  %v11778_v52 = vld [vmem:[%s16937_s1 + $0x1e4] ss:$16 sps:$4 sm:$0xff]   ;;  %v11779_v60 = vld [vmem:[%s16937_s1 + $0x1e8] ss:$16 sps:$4 sm:$0xff]  }
 0x110   :  { %4077 = vmatprep.subr.bf16.mxu0 %v11712_v63  ;;  %4281 = vmatprep.subr.bf16.mxu1 %v11715_v6  ;;  %v11784_v63 = vld [vmem:[%s16937_s1 + $0x204] ss:$16 sps:$4 sm:$0xff]   ;;  %v11787_v6 = vld [vmem:[%s16937_s1 + $0x20c] ss:$16 sps:$4 sm:$0xff]  }
 0x113   :  { %4078 = vmatpush1.bf16.msra.mxu0 %v11710_v12  ;;  %4282 = vmatpush1.bf16.msra.mxu1 %v11713_v18  ;;  %v2739_v12 = vcombine.high %v2731_v31, %v2731_v31  ;;  %v2716_v18 = vcombine.low %v13894_v19, %v13897_v20  ;;  %v11793_v19 = vld [vmem:[%s16937_s1 + $0x22c] ss:$16 sps:$4 sm:$0xff]  }
 0x114   :  { %4079 = vmatprep.subr.bf16.mxu0 %v11718_v44  ;;  %4283 = vmatprep.subr.bf16.mxu1 %v11721_v54  ;;  %v11782_v44 = vld [vmem:[%s16937_s1 + $0x200] ss:$16 sps:$4 sm:$0xff]   ;;  %v11785_v54 = vld [vmem:[%s16937_s1 + $0x208] ss:$16 sps:$4 sm:$0xff]  }
 0x115   :  { %v14125_v20 = vrot.slane %v2739_v12, %v13089_v0  ;;  %v11854_v12 = vld [vmem:[%s16937_s1 + $0x380] ss:$16 sps:$4 sm:$0xff]  }
 0x117   :  { %4080 = vmatpush1.bf16.msra.mxu0 %v11716_v55  ;;  %4284 = vmatpush1.bf16.msra.mxu1 %v11719_v56  ;;  %v11790_v55 = vld [vmem:[%s16937_s1 + $0x224] ss:$16 sps:$4 sm:$0xff]   ;;  %v11788_v56 = vld [vmem:[%s16937_s1 + $0x220] ss:$16 sps:$4 sm:$0xff]  }
 0x118   :  { %4081 = vmatprep.subr.bf16.mxu0 %v11724_v57  ;;  %4285 = vmatprep.subr.bf16.mxu1 %v11727_v61  ;;  %v11791_v57 = vld [vmem:[%s16937_s1 + $0x228] ss:$16 sps:$4 sm:$0xff]   ;;  %v11796_v61 = vld [vmem:[%s16937_s1 + $0x244] ss:$16 sps:$4 sm:$0xff]  }
 0x11b   :  { %4082 = vmatpush1.bf16.msra.mxu0 %v11722_v62  ;;  %4286 = vmatpush1.bf16.msra.mxu1 %v11725_v1  ;;  %v11799_v62 = vld [vmem:[%s16937_s1 + $0x24c] ss:$16 sps:$4 sm:$0xff]   ;;  %v14142_v1 = vrot.slane %v2731_v31, %v13089_v0 }
 0x11c   :  { %4083 = vmatprep.subr.bf16.mxu0 %v11730_v2  ;;  %4287 = vmatprep.subr.bf16.mxu1 %v11733_v3  ;;  %v11794_v2 = vld [vmem:[%s16937_s1 + $0x240] ss:$16 sps:$4 sm:$0xff]   ;;  %v11797_v3 = vld [vmem:[%s16937_s1 + $0x248] ss:$16 sps:$4 sm:$0xff]   ;;  %v11853_v31 = vld [vmem:[%s16937_s1 + $0x36c] ss:$16 sps:$4 sm:$0xff]  }
 0x11f   :  { %4084 = vmatpush1.bf16.msra.mxu0 %v11728_v7  ;;  %4288 = vmatpush1.bf16.msra.mxu1 %v11731_v8  ;;  %v11802_v7 = vld [vmem:[%s16937_s1 + $0x264] ss:$16 sps:$4 sm:$0xff]   ;;  %v11805_v8 = vld [vmem:[%s16937_s1 + $0x26c] ss:$16 sps:$4 sm:$0xff]  }
 0x120   :  { %4085 = vmatprep.subr.bf16.mxu0 %v11736_v4  ;;  %4289 = vmatprep.subr.bf16.mxu1 %v11739_v9  ;;  %v11800_v4 = vld [vmem:[%s16937_s1 + $0x260] ss:$16 sps:$4 sm:$0xff]   ;;  %v11803_v9 = vld [vmem:[%s16937_s1 + $0x268] ss:$16 sps:$4 sm:$0xff]  }
 0x123   :  { %4086 = vmatpush1.bf16.msra.mxu0 %v11734_v10  ;;  %4290 = vmatpush1.bf16.msra.mxu1 %v11737_v58  ;;  %v11808_v10 = vld [vmem:[%s16937_s1 + $0x284] ss:$16 sps:$4 sm:$0xff]   ;;  %v11811_v58 = vld [vmem:[%s16937_s1 + $0x28c] ss:$16 sps:$4 sm:$0xff]  }
 0x124   :  { %4087 = vmatprep.subr.bf16.mxu0 %v11742_v11  ;;  %4291 = vmatprep.subr.bf16.mxu1 %v11745_v13  ;;  %v11806_v11 = vld [vmem:[%s16937_s1 + $0x280] ss:$16 sps:$4 sm:$0xff]   ;;  %v11809_v13 = vld [vmem:[%s16937_s1 + $0x288] ss:$16 sps:$4 sm:$0xff]  }
 0x127   :  { %4088 = vmatpush1.bf16.msra.mxu0 %v11740_v14  ;;  %4292 = vmatpush1.bf16.msra.mxu1 %v11743_v16  ;;  %v11814_v14 = vld [vmem:[%s16937_s1 + $0x2a4] ss:$16 sps:$4 sm:$0xff]   ;;  %v11812_v16 = vld [vmem:[%s16937_s1 + $0x2a0] ss:$16 sps:$4 sm:$0xff]  }
 0x128   :  { %4089 = vmatprep.subr.bf16.mxu0 %v11748_v37  ;;  %4293 = vmatprep.subr.bf16.mxu1 %v11751_v41  ;;  %v11815_v37 = vld [vmem:[%s16937_s1 + $0x2a8] ss:$16 sps:$4 sm:$0xff]   ;;  %v11820_v41 = vld [vmem:[%s16937_s1 + $0x2c4] ss:$16 sps:$4 sm:$0xff]  }
 0x12b   :  { %4090 = vmatpush1.bf16.msra.mxu0 %v11746_v35  ;;  %4294 = vmatpush1.bf16.msra.mxu1 %v11749_v24  ;;  %v11823_v35 = vld [vmem:[%s16937_s1 + $0x2cc] ss:$16 sps:$4 sm:$0xff]   ;;  %v11818_v24 = vld [vmem:[%s16937_s1 + $0x2c0] ss:$16 sps:$4 sm:$0xff]  }
 0x12c   :  { %4091 = vmatprep.subr.bf16.mxu0 %v11754_v38  ;;  %4295 = vmatprep.subr.bf16.mxu1 %v11757_v40  ;;  %v11821_v38 = vld [vmem:[%s16937_s1 + $0x2c8] ss:$16 sps:$4 sm:$0xff]   ;;  %v11826_v40 = vld [vmem:[%s16937_s1 + $0x2e4] ss:$16 sps:$4 sm:$0xff]  }
 0x12f   :  { %4092 = vmatpush1.bf16.msra.mxu0 %v11752_v48  ;;  %4296 = vmatpush1.bf16.msra.mxu1 %v11755_v21  ;;  %v11829_v48 = vld [vmem:[%s16937_s1 + $0x2ec] ss:$16 sps:$4 sm:$0xff]   ;;  %v11824_v21 = vld [vmem:[%s16937_s1 + $0x2e0] ss:$16 sps:$4 sm:$0xff]  }
 0x130   :  { %4093 = vmatprep.subr.bf16.mxu0 %v11760_v25  ;;  %4297 = vmatprep.subr.bf16.mxu1 %v11763_v26  ;;  %v11827_v25 = vld [vmem:[%s16937_s1 + $0x2e8] ss:$16 sps:$4 sm:$0xff]   ;;  %v11832_v26 = vld [vmem:[%s16937_s1 + $0x304] ss:$16 sps:$4 sm:$0xff]  }
 0x133   :  { %4094 = vmatpush1.bf16.msra.mxu0 %v11758_v28  ;;  %4298 = vmatpush1.bf16.msra.mxu1 %v11761_v29  ;;  %v11835_v28 = vld [vmem:[%s16937_s1 + $0x30c] ss:$16 sps:$4 sm:$0xff]   ;;  %v11830_v29 = vld [vmem:[%s16937_s1 + $0x300] ss:$16 sps:$4 sm:$0xff]  }
 0x134   :  { %4095 = vmatprep.subr.bf16.mxu0 %v11766_v47  ;;  %4299 = vmatprep.subr.bf16.mxu1 %v11769_v46  ;;  %v11833_v47 = vld [vmem:[%s16937_s1 + $0x308] ss:$16 sps:$4 sm:$0xff]   ;;  %v11838_v46 = vld [vmem:[%s16937_s1 + $0x324] ss:$16 sps:$4 sm:$0xff]  }
 0x137   :  { %4096 = vmatpush1.bf16.msra.mxu0 %v11764_v15  ;;  %4300 = vmatpush1.bf16.msra.mxu1 %v11767_v32  ;;  %v11841_v15 = vld [vmem:[%s16937_s1 + $0x32c] ss:$16 sps:$4 sm:$0xff]   ;;  %v11836_v32 = vld [vmem:[%s16937_s1 + $0x320] ss:$16 sps:$4 sm:$0xff]  }
 0x138   :  { %4097 = vmatprep.subr.bf16.mxu0 %v11772_v33  ;;  %4301 = vmatprep.subr.bf16.mxu1 %v11775_v36  ;;  %v11839_v33 = vld [vmem:[%s16937_s1 + $0x328] ss:$16 sps:$4 sm:$0xff]   ;;  %v11844_v36 = vld [vmem:[%s16937_s1 + $0x344] ss:$16 sps:$4 sm:$0xff]  }
 0x13b   :  { %4098 = vmatpush1.bf16.msra.mxu0 %v11770_v53  ;;  %4302 = vmatpush1.bf16.msra.mxu1 %v11773_v51  ;;  %v11847_v53 = vld [vmem:[%s16937_s1 + $0x34c] ss:$16 sps:$4 sm:$0xff]   ;;  %v11842_v51 = vld [vmem:[%s16937_s1 + $0x340] ss:$16 sps:$4 sm:$0xff]  }
 0x13c   :  { %4099 = vmatprep.subr.bf16.mxu0 %v11778_v52  ;;  %4303 = vmatprep.subr.bf16.mxu1 %v11781_v23  ;;  %v11845_v52 = vld [vmem:[%s16937_s1 + $0x348] ss:$16 sps:$4 sm:$0xff]   ;;  %v11850_v23 = vld [vmem:[%s16937_s1 + $0x364] ss:$16 sps:$4 sm:$0xff]  }
 0x13f   :  { %4100 = vmatpush1.bf16.msra.mxu0 %v11776_v39  ;;  %4304 = vmatpush1.bf16.msra.mxu1 %v11779_v60  ;;  %v11848_v39 = vld [vmem:[%s16937_s1 + $0x360] ss:$16 sps:$4 sm:$0xff]   ;;  %v11851_v60 = vld [vmem:[%s16937_s1 + $0x368] ss:$16 sps:$4 sm:$0xff]  }
 0x140   :  { %4120 = vmatprep.subr.bf16.mxu0 %v11784_v63  ;;  %4324 = vmatprep.subr.bf16.mxu1 %v11787_v6  ;;  %v11856_v63 = vld [vmem:[%s16937_s1 + $0x384] ss:$16 sps:$4 sm:$0xff]   ;;  %v11859_v6 = vld [vmem:[%s16937_s1 + $0x38c] ss:$16 sps:$4 sm:$0xff]  }
 0x142   :  { %4102 = vmatmul.mubr.bf16.vlgmr.msra.gmra.mrb[0].mxu0 %v2716_v18  ;;  %4306 = vmatmul.mubr.bf16.vlgmr.msra.gmra.mrb[0].mxu1 %v2716_v18  ;;  %v11857_v18 = vld [vmem:[%s16937_s1 + $0x388] ss:$16 sps:$4 sm:$0xff]  }
 0x143   :  { %4121 = vmatpush1.bf16.msra.mxu0 %v11782_v44  ;;  %4325 = vmatpush1.bf16.msra.mxu1 %v11785_v54  ;;  %v11862_v44 = vld [vmem:[%s16937_s1 + $0x3a4] ss:$16 sps:$4 sm:$0xff]   ;;  %v11865_v54 = vld [vmem:[%s16937_s1 + $0x3ac] ss:$16 sps:$4 sm:$0xff]  }
 0x144   :  { %4122 = vmatprep.subr.bf16.mxu0 %v11790_v55  ;;  %4326 = vmatprep.subr.bf16.mxu1 %v11793_v19  ;;  %v2589_v55 = vcombine.high %v13075_v59, %v13815_v43  ;;  %v2591_v19 = vcombine.high %v13148_v30, %v13105_v5  ;;  %v11868_v59 = vld [vmem:[%s16937_s1 + $0x3c4] ss:$16 sps:$4 sm:$0xff]   ;;  %v11871_v5 = vld [vmem:[%s16937_s1 + $0x3cc] ss:$16 sps:$4 sm:$0xff]  }
 0x145   :  { %4111 = vmatprep.mubr.bf16.mxu0 %v14125_v20  ;;  %4315 = vmatprep.mubr.bf16.mxu1 %v14125_v20 }
 0x146   :  { %v2623_v30 = vrot.slane %v2591_v19, %v13089_v0  ;;  %v11923_v19 = vld [vmem:[%s16937_s1 + $0x4e8] ss:$16 sps:$4 sm:$0xff]  }
 0x147   :  { %4123 = vmatpush1.bf16.msra.mxu0 %v11788_v56  ;;  %4327 = vmatpush1.bf16.msra.mxu1 %v11791_v57  ;;  %v2593_v56 = vcombine.high %v13819_v45, %v13151_v34  ;;  %v2595_v57 = vcombine.high %v13129_v17, %v13823_v49  ;;  %v2609_v17 = vrot.slane %v2589_v55, %v13089_v0  ;;  %v11866_v45 = vld [vmem:[%s16937_s1 + $0x3c0] ss:$16 sps:$4 sm:$0xff]   ;;  %v11869_v49 = vld [vmem:[%s16937_s1 + $0x3c8] ss:$16 sps:$4 sm:$0xff]  }
 0x148   :  { %4124 = vmatprep.subr.bf16.mxu0 %v11796_v61  ;;  %4328 = vmatprep.subr.bf16.mxu1 %v11799_v62  ;;  %v11860_v61 = vld [vmem:[%s16937_s1 + $0x3a0] ss:$16 sps:$4 sm:$0xff]   ;;  %v11863_v62 = vld [vmem:[%s16937_s1 + $0x3a8] ss:$16 sps:$4 sm:$0xff]  }
 0x149   :  { %v2637_v34 = vrot.slane %v2593_v56, %v13089_v0  ;;  %v2651_v43 = vrot.slane %v2595_v57, %v13089_v0  ;;  %v11920_v55 = vld [vmem:[%s16937_s1 + $0x4e0] ss:$16 sps:$4 sm:$0xff]   ;;  %v11928_v56 = vld [vmem:[%s16937_s1 + $0x504] ss:$16 sps:$4 sm:$0xff]   ;;  %v11931_v57 = vld [vmem:[%s16937_s1 + $0x50c] ss:$16 sps:$4 sm:$0xff]  }
 0x14a   :  { %4112 = vmatmul.mubr.bf16.gmra.mrb[4].mxu0 %v14142_v1  ;;  %4316 = vmatmul.mubr.bf16.gmra.mrb[4].mxu1 %v14142_v1 }
 0x14b   :  { %4125 = vmatpush1.bf16.msra.mxu0 %v11794_v2  ;;  %4329 = vmatpush1.bf16.msra.mxu1 %v11797_v3  ;;  %v11874_v2 = vld [vmem:[%s16937_s1 + $0x3e4] ss:$16 sps:$4 sm:$0xff]   ;;  %v11877_v3 = vld [vmem:[%s16937_s1 + $0x3ec] ss:$16 sps:$4 sm:$0xff]  }
 0x14c   :  { %4126 = vmatprep.subr.bf16.mxu0 %v11802_v7  ;;  %4330 = vmatprep.subr.bf16.mxu1 %v11805_v8  ;;  %v2655_v7 = vcombine.high %v2609_v17, %v2623_v30  ;;  %v2659_v8 = vcombine.high %v2637_v34, %v2651_v43 }
 0x14d   :  { %4152 = vmatprep.mubr.bf16.mxu0 %v13905_v22  ;;  %4356 = vmatprep.mubr.bf16.mxu1 %v13905_v22  ;;  %v11817_v22 = vld [vmem:[%s16937_s1 + $0x2ac] ss:$16 sps:$4 sm:$0xff]  }
 0x14f   :  { %4127 = vmatpush1.bf16.msra.mxu0 %v11800_v4  ;;  %4331 = vmatpush1.bf16.msra.mxu1 %v11803_v9  ;;  %v2654_v4 = vcombine.low %v2609_v17, %v2623_v30  ;;  %v2658_v9 = vcombine.low %v2637_v34, %v2651_v43  ;;  %v11932_v17 = vld [vmem:[%s16937_s1 + $0x520] ss:$16 sps:$4 sm:$0xff]   ;;  %v11935_v30 = vld [vmem:[%s16937_s1 + $0x528] ss:$16 sps:$4 sm:$0xff]   ;;  %v11940_v34 = vld [vmem:[%s16937_s1 + $0x544] ss:$16 sps:$4 sm:$0xff]  }
 0x150   :  { %4128 = vmatprep.subr.bf16.mxu0 %v11808_v10  ;;  %4332 = vmatprep.subr.bf16.mxu1 %v11811_v58  ;;  %v11872_v10 = vld [vmem:[%s16937_s1 + $0x3e0] ss:$16 sps:$4 sm:$0xff]   ;;  %v11875_v58 = vld [vmem:[%s16937_s1 + $0x3e8] ss:$16 sps:$4 sm:$0xff]   ;;  %v11943_v43 = vld [vmem:[%s16937_s1 + $0x54c] ss:$16 sps:$4 sm:$0xff]  }
 0x153   :  { %4129 = vmatpush1.bf16.msra.mxu0 %v11806_v11  ;;  %4333 = vmatpush1.bf16.msra.mxu1 %v11809_v13  ;;  %v11880_v11 = vld [vmem:[%s16937_s1 + $0x404] ss:$16 sps:$4 sm:$0xff]   ;;  %v11883_v13 = vld [vmem:[%s16937_s1 + $0x40c] ss:$16 sps:$4 sm:$0xff]  }
 0x154   :  { %4130 = vmatprep.subr.bf16.mxu0 %v11814_v14  ;;  %4334 = vmatprep.subr.bf16.mxu1 %v11817_v22  ;;  %v2687_v14 = vrot.slane %v2655_v7, %v13089_v0  ;;  %v2715_v22 = vrot.slane %v2659_v8, %v13089_v0  ;;  %v11944_v7 = vld [vmem:[%s16937_s1 + $0x560] ss:$16 sps:$4 sm:$0xff]   ;;  %v11947_v8 = vld [vmem:[%s16937_s1 + $0x568] ss:$16 sps:$4 sm:$0xff]  }
 0x157   :  { %4131 = vmatpush1.bf16.msra.mxu0 %v11812_v16  ;;  %4335 = vmatpush1.bf16.msra.mxu1 %v11815_v37  ;;  %v14331_v16 = vrot.slane %v2654_v4, %v13089_v0  ;;  %v14334_v37 = vrot.slane %v2658_v9, %v13089_v0  ;;  %v11952_v4 = vld [vmem:[%s16937_s1 + $0x584] ss:$16 sps:$4 sm:$0xff]   ;;  %v11955_v9 = vld [vmem:[%s16937_s1 + $0x58c] ss:$16 sps:$4 sm:$0xff]  }
 0x158   :  { %4132 = vmatprep.subr.bf16.mxu0 %v11820_v41  ;;  %4336 = vmatprep.subr.bf16.mxu1 %v11823_v35  ;;  %v11878_v41 = vld [vmem:[%s16937_s1 + $0x400] ss:$16 sps:$4 sm:$0xff]   ;;  %v11881_v35 = vld [vmem:[%s16937_s1 + $0x408] ss:$16 sps:$4 sm:$0xff]  }
 0x15b   :  { %4133 = vmatpush1.bf16.msra.mxu0 %v11818_v24  ;;  %4337 = vmatpush1.bf16.msra.mxu1 %v11821_v38  ;;  %v14342_v24 = vcombine.high %v2687_v14, %v2715_v22  ;;  %v11886_v38 = vld [vmem:[%s16937_s1 + $0x424] ss:$16 sps:$4 sm:$0xff]  }
 0x15c   :  { %4134 = vmatprep.subr.bf16.mxu0 %v11826_v40  ;;  %4338 = vmatprep.subr.bf16.mxu1 %v11829_v48  ;;  %v11889_v40 = vld [vmem:[%s16937_s1 + $0x42c] ss:$16 sps:$4 sm:$0xff]   ;;  %v14352_v48 = vcombine.high %v14331_v16, %v14334_v37 }
 0x15f   :  { %4135 = vmatpush1.bf16.msra.mxu0 %v11824_v21  ;;  %4339 = vmatpush1.bf16.msra.mxu1 %v11827_v25  ;;  %v2771_v21 = vcombine.high %v14125_v20, %v14125_v20  ;;  %v11884_v25 = vld [vmem:[%s16937_s1 + $0x420] ss:$16 sps:$4 sm:$0xff]   ;;  %v11892_v20 = vld [vmem:[%s16937_s1 + $0x444] ss:$16 sps:$4 sm:$0xff]  }
 0x160   :  { %4136 = vmatprep.subr.bf16.mxu0 %v11832_v26  ;;  %4340 = vmatprep.subr.bf16.mxu1 %v11835_v28  ;;  %v11887_v26 = vld [vmem:[%s16937_s1 + $0x428] ss:$16 sps:$4 sm:$0xff]   ;;  %v2769_v28 = vcombine.high %v14142_v1, %v14142_v1  ;;  %v11901_v1 = vld [vmem:[%s16937_s1 + $0x46c] ss:$16 sps:$4 sm:$0xff]  }
 0x163   :  { %4137 = vmatpush1.bf16.msra.mxu0 %v11830_v29  ;;  %4341 = vmatpush1.bf16.msra.mxu1 %v11833_v47  ;;  %v11890_v29 = vld [vmem:[%s16937_s1 + $0x440] ss:$16 sps:$4 sm:$0xff]   ;;  %v11893_v47 = vld [vmem:[%s16937_s1 + $0x448] ss:$16 sps:$4 sm:$0xff]  }
 0x164   :  { %4138 = vmatprep.subr.bf16.mxu0 %v11838_v46  ;;  %4342 = vmatprep.subr.bf16.mxu1 %v11841_v15  ;;  %v11898_v46 = vld [vmem:[%s16937_s1 + $0x464] ss:$16 sps:$4 sm:$0xff]   ;;  %v2722_v15 = vcombine.low %v2687_v14, %v2715_v22  ;;  %v11956_v14 = vld [vmem:[%s16937_s1 + $0x5a0] ss:$16 sps:$4 sm:$0xff]   ;;  %v11959_v22 = vld [vmem:[%s16937_s1 + $0x5a8] ss:$16 sps:$4 sm:$0xff]  }
 0x167   :  { %4139 = vmatpush1.bf16.msra.mxu0 %v11836_v32  ;;  %4343 = vmatpush1.bf16.msra.mxu1 %v11839_v33  ;;  %v11896_v32 = vld [vmem:[%s16937_s1 + $0x460] ss:$16 sps:$4 sm:$0xff]   ;;  %v11899_v33 = vld [vmem:[%s16937_s1 + $0x468] ss:$16 sps:$4 sm:$0xff]  }
 0x168   :  { %4140 = vmatprep.subr.bf16.mxu0 %v11844_v36  ;;  %4344 = vmatprep.subr.bf16.mxu1 %v11847_v53  ;;  %v11904_v36 = vld [vmem:[%s16937_s1 + $0x484] ss:$16 sps:$4 sm:$0xff]   ;;  %v11907_v53 = vld [vmem:[%s16937_s1 + $0x48c] ss:$16 sps:$4 sm:$0xff]  }
 0x16b   :  { %4141 = vmatpush1.bf16.msra.mxu0 %v11842_v51  ;;  %4345 = vmatpush1.bf16.msra.mxu1 %v11845_v52  ;;  %v11902_v51 = vld [vmem:[%s16937_s1 + $0x480] ss:$16 sps:$4 sm:$0xff]   ;;  %v11905_v52 = vld [vmem:[%s16937_s1 + $0x488] ss:$16 sps:$4 sm:$0xff]  }
 0x16c   :  { %4142 = vmatprep.subr.bf16.mxu0 %v11850_v23  ;;  %4346 = vmatprep.subr.bf16.mxu1 %v11853_v31  ;;  %v11910_v23 = vld [vmem:[%s16937_s1 + $0x4a4] ss:$16 sps:$4 sm:$0xff]   ;;  %v11913_v31 = vld [vmem:[%s16937_s1 + $0x4ac] ss:$16 sps:$4 sm:$0xff]  }
 0x16f   :  { %4143 = vmatpush1.bf16.msra.mxu0 %v11848_v39  ;;  %4347 = vmatpush1.bf16.msra.mxu1 %v11851_v60  ;;  %v11908_v39 = vld [vmem:[%s16937_s1 + $0x4a0] ss:$16 sps:$4 sm:$0xff]   ;;  %v11911_v60 = vld [vmem:[%s16937_s1 + $0x4a8] ss:$16 sps:$4 sm:$0xff]  }
 0x170   :  { %4144 = vmatprep.subr.bf16.mxu0 %v11856_v63  ;;  %4348 = vmatprep.subr.bf16.mxu1 %v11859_v6  ;;  %v11916_v63 = vld [vmem:[%s16937_s1 + $0x4c4] ss:$16 sps:$4 sm:$0xff]   ;;  %v11919_v6 = vld [vmem:[%s16937_s1 + $0x4cc] ss:$16 sps:$4 sm:$0xff]  }
 0x173   :  { %4145 = vmatpush1.bf16.msra.mxu0 %v11854_v12  ;;  %4349 = vmatpush1.bf16.msra.mxu1 %v11857_v18  ;;  %v11914_v12 = vld [vmem:[%s16937_s1 + $0x4c0] ss:$16 sps:$4 sm:$0xff]   ;;  %v11917_v18 = vld [vmem:[%s16937_s1 + $0x4c8] ss:$16 sps:$4 sm:$0xff]  }
 0x174   :  { %4146 = vmatprep.subr.bf16.mxu0 %v11862_v44  ;;  %4350 = vmatprep.subr.bf16.mxu1 %v11865_v54  ;;  %v11922_v44 = vld [vmem:[%s16937_s1 + $0x4e4] ss:$16 sps:$4 sm:$0xff]   ;;  %v11925_v54 = vld [vmem:[%s16937_s1 + $0x4ec] ss:$16 sps:$4 sm:$0xff]  }
 0x177   :  { %4147 = vmatpush1.bf16.msra.mxu0 %v11860_v61  ;;  %4351 = vmatpush1.bf16.msra.mxu1 %v11863_v62  ;;  %v11926_v61 = vld [vmem:[%s16937_s1 + $0x500] ss:$16 sps:$4 sm:$0xff]   ;;  %v11929_v62 = vld [vmem:[%s16937_s1 + $0x508] ss:$16 sps:$4 sm:$0xff]  }
 0x178   :  { %4148 = vmatprep.subr.bf16.mxu0 %v11868_v59  ;;  %4352 = vmatprep.subr.bf16.mxu1 %v11871_v5  ;;  %v11934_v59 = vld [vmem:[%s16937_s1 + $0x524] ss:$16 sps:$4 sm:$0xff]   ;;  %v11937_v5 = vld [vmem:[%s16937_s1 + $0x52c] ss:$16 sps:$4 sm:$0xff]  }
 0x17b   :  { %4149 = vmatpush1.bf16.msra.mxu0 %v11866_v45  ;;  %4353 = vmatpush1.bf16.msra.mxu1 %v11869_v49  ;;  %v11938_v45 = vld [vmem:[%s16937_s1 + $0x540] ss:$16 sps:$4 sm:$0xff]   ;;  %v11941_v49 = vld [vmem:[%s16937_s1 + $0x548] ss:$16 sps:$4 sm:$0xff]  }
 0x17c   :  { %4150 = vmatprep.subr.bf16.mxu0 %v11874_v2  ;;  %4354 = vmatprep.subr.bf16.mxu1 %v11877_v3  ;;  %v11946_v2 = vld [vmem:[%s16937_s1 + $0x564] ss:$16 sps:$4 sm:$0xff]   ;;  %v11949_v3 = vld [vmem:[%s16937_s1 + $0x56c] ss:$16 sps:$4 sm:$0xff]  }
 0x17f   :  { %4151 = vmatpush1.bf16.msra.mxu0 %v11872_v10  ;;  %4355 = vmatpush1.bf16.msra.mxu1 %v11875_v58  ;;  %v11950_v10 = vld [vmem:[%s16937_s1 + $0x580] ss:$16 sps:$4 sm:$0xff]   ;;  %v11953_v58 = vld [vmem:[%s16937_s1 + $0x588] ss:$16 sps:$4 sm:$0xff]  }
 0x180   :  { %4171 = vmatprep.subr.bf16.mxu0 %v11880_v11  ;;  %4375 = vmatprep.subr.bf16.mxu1 %v11883_v13  ;;  %v11958_v11 = vld [vmem:[%s16937_s1 + $0x5a4] ss:$16 sps:$4 sm:$0xff]   ;;  %v11961_v13 = vld [vmem:[%s16937_s1 + $0x5ac] ss:$16 sps:$4 sm:$0xff]  }
 0x182   :  { %4153 = vmatmul.mubr.bf16.vlgmr.msra.gmra.mrb[0].mxu0 %v13915_v27  ;;  %4357 = vmatmul.mubr.bf16.vlgmr.msra.gmra.mrb[0].mxu1 %v13915_v27  ;;  %v11895_v27 = vld [vmem:[%s16937_s1 + $0x44c] ss:$16 sps:$4 sm:$0xff]  }
 0x183   :  { %4172 = vmatpush1.bf16.msra.mxu0 %v11878_v41  ;;  %4376 = vmatpush1.bf16.msra.mxu1 %v11881_v35  ;;  %v11964_v41 = vld [vmem:[%s16937_s1 + $0x5c4] ss:$16 sps:$4 sm:$0xff]   ;;  %v11967_v35 = vld [vmem:[%s16937_s1 + $0x5cc] ss:$16 sps:$4 sm:$0xff]  }
 0x184   :  { %4173 = vmatprep.subr.bf16.mxu0 %v11886_v38  ;;  %4377 = vmatprep.subr.bf16.mxu1 %v11889_v40  ;;  %v2724_v38 = vcombine.high %v14082_v42, %v14082_v42  ;;  %v11962_v40 = vld [vmem:[%s16937_s1 + $0x5c0] ss:$16 sps:$4 sm:$0xff]   ;;  %v11973_v42 = vld [vmem:[%s16937_s1 + $0x5ec] ss:$16 sps:$4 sm:$0xff]  }
 0x185   :  { %4162 = vmatprep.mubr.bf16.mxu0 %v2771_v21  ;;  %4366 = vmatprep.mubr.bf16.mxu1 %v2771_v21  ;;  %v11965_v21 = vld [vmem:[%s16937_s1 + $0x5c8] ss:$16 sps:$4 sm:$0xff]  }
 0x187   :  { %4174 = vmatpush1.bf16.msra.mxu0 %v11884_v25  ;;  %4378 = vmatpush1.bf16.msra.mxu1 %v11887_v26  ;;  %v11970_v25 = vld [vmem:[%s16937_s1 + $0x5e4] ss:$16 sps:$4 sm:$0xff]   ;;  %v2738_v26 = vrot.slane %v2724_v38, %v13089_v0  ;;  %v10500_v38 = vld.sshfl [vmem:[%s16938_s0 + $0x38] sm:$0xff pattern:$0x75316420] }
 0x188   :  { %4175 = vmatprep.subr.bf16.mxu0 %v11892_v20  ;;  %4379 = vmatprep.subr.bf16.mxu1 %v11895_v27  ;;  %v11968_v20 = vld [vmem:[%s16937_s1 + $0x5e0] ss:$16 sps:$4 sm:$0xff]   ;;  %v11971_v27 = vld [vmem:[%s16937_s1 + $0x5e8] ss:$16 sps:$4 sm:$0xff]  }
 0x18a   :  { %4163 = vmatmul.mubr.bf16.gmra.mrb[4].mxu0 %v2769_v28  ;;  %4367 = vmatmul.mubr.bf16.gmra.mrb[4].mxu1 %v2769_v28  ;;  %v11976_v28 = vld [vmem:[%s16937_s1 + $0x604] ss:$16 sps:$4 sm:$0xff]  }
 0x18b   :  { %4176 = vmatpush1.bf16.msra.mxu0 %v11890_v29  ;;  %4380 = vmatpush1.bf16.msra.mxu1 %v11893_v47  ;;  %v11979_v29 = vld [vmem:[%s16937_s1 + $0x60c] ss:$16 sps:$4 sm:$0xff]   ;;  %v2740_v47 = vcombine.high %v2738_v26, %v2738_v26 }
 0x18c   :  { %4177 = vmatprep.subr.bf16.mxu0 %v11898_v46  ;;  %4381 = vmatprep.subr.bf16.mxu1 %v11901_v1  ;;  %v2718_v46 = vcombine.low %v14331_v16, %v14334_v37  ;;  %v11974_v1 = vld [vmem:[%s16937_s1 + $0x600] ss:$16 sps:$4 sm:$0xff]   ;;  %v11985_v16 = vld [vmem:[%s16937_s1 + $0x62c] ss:$16 sps:$4 sm:$0xff]  }
 0x18d   :  { %4203 = vmatprep.mubr.bf16.mxu0 %v2722_v15  ;;  %4407 = vmatprep.mubr.bf16.mxu1 %v2722_v15  ;;  %v11977_v15 = vld [vmem:[%s16937_s1 + $0x608] ss:$16 sps:$4 sm:$0xff]   ;;  %v14558_v37 = vrot.slane %v2740_v47, %v13089_v0  ;;  %v12045_v47 = vld [vmem:[%s16937_s1 + $0x76c] ss:$16 sps:$4 sm:$0xff]  }
 0x18f   :  { %4178 = vmatpush1.bf16.msra.mxu0 %v11896_v32  ;;  %4382 = vmatpush1.bf16.msra.mxu1 %v11899_v33  ;;  %v11982_v32 = vld [vmem:[%s16937_s1 + $0x624] ss:$16 sps:$4 sm:$0xff]   ;;  %v11980_v33 = vld [vmem:[%s16937_s1 + $0x620] ss:$16 sps:$4 sm:$0xff]  }
 0x190   :  { %4179 = vmatprep.subr.bf16.mxu0 %v11904_v36  ;;  %4383 = vmatprep.subr.bf16.mxu1 %v11907_v53  ;;  %v11983_v36 = vld [vmem:[%s16937_s1 + $0x628] ss:$16 sps:$4 sm:$0xff]   ;;  %v11988_v53 = vld [vmem:[%s16937_s1 + $0x644] ss:$16 sps:$4 sm:$0xff]  }
 0x193   :  { %4180 = vmatpush1.bf16.msra.mxu0 %v11902_v51  ;;  %4384 = vmatpush1.bf16.msra.mxu1 %v11905_v52  ;;  %v11991_v51 = vld [vmem:[%s16937_s1 + $0x64c] ss:$16 sps:$4 sm:$0xff]   ;;  %v14575_v52 = vrot.slane %v2738_v26, %v13089_v0 }
 0x194   :  { %4181 = vmatprep.subr.bf16.mxu0 %v11910_v23  ;;  %4385 = vmatprep.subr.bf16.mxu1 %v11913_v31  ;;  %v11986_v23 = vld [vmem:[%s16937_s1 + $0x640] ss:$16 sps:$4 sm:$0xff]   ;;  %v11989_v31 = vld [vmem:[%s16937_s1 + $0x648] ss:$16 sps:$4 sm:$0xff]  }
 0x197   :  { %4182 = vmatpush1.bf16.msra.mxu0 %v11908_v39  ;;  %4386 = vmatpush1.bf16.msra.mxu1 %v11911_v60  ;;  %v11994_v39 = vld [vmem:[%s16937_s1 + $0x664] ss:$16 sps:$4 sm:$0xff]   ;;  %v11997_v60 = vld [vmem:[%s16937_s1 + $0x66c] ss:$16 sps:$4 sm:$0xff]  }
 0x198   :  { %4183 = vmatprep.subr.bf16.mxu0 %v11916_v63  ;;  %4387 = vmatprep.subr.bf16.mxu1 %v11919_v6  ;;  %v11992_v63 = vld [vmem:[%s16937_s1 + $0x660] ss:$16 sps:$4 sm:$0xff]   ;;  %v11995_v6 = vld [vmem:[%s16937_s1 + $0x668] ss:$16 sps:$4 sm:$0xff]  }
 0x19b   :  { %4184 = vmatpush1.bf16.msra.mxu0 %v11914_v12  ;;  %4388 = vmatpush1.bf16.msra.mxu1 %v11917_v18  ;;  %v12000_v12 = vld [vmem:[%s16937_s1 + $0x684] ss:$16 sps:$4 sm:$0xff]   ;;  %v12003_v18 = vld [vmem:[%s16937_s1 + $0x68c] ss:$16 sps:$4 sm:$0xff]  }
 0x19c   :  { %4185 = vmatprep.subr.bf16.mxu0 %v11922_v44  ;;  %4389 = vmatprep.subr.bf16.mxu1 %v11925_v54  ;;  %v11998_v44 = vld [vmem:[%s16937_s1 + $0x680] ss:$16 sps:$4 sm:$0xff]   ;;  %v12001_v54 = vld [vmem:[%s16937_s1 + $0x688] ss:$16 sps:$4 sm:$0xff]  }
 0x19f   :  { %4186 = vmatpush1.bf16.msra.mxu0 %v11920_v55  ;;  %4390 = vmatpush1.bf16.msra.mxu1 %v11923_v19  ;;  %v12006_v55 = vld [vmem:[%s16937_s1 + $0x6a4] ss:$16 sps:$4 sm:$0xff]   ;;  %v12004_v19 = vld [vmem:[%s16937_s1 + $0x6a0] ss:$16 sps:$4 sm:$0xff]  }
 0x1a0   :  { %4187 = vmatprep.subr.bf16.mxu0 %v11928_v56  ;;  %4391 = vmatprep.subr.bf16.mxu1 %v11931_v57  ;;  %v12007_v56 = vld [vmem:[%s16937_s1 + $0x6a8] ss:$16 sps:$4 sm:$0xff]   ;;  %v12012_v57 = vld [vmem:[%s16937_s1 + $0x6c4] ss:$16 sps:$4 sm:$0xff]  }
 0x1a3   :  { %4188 = vmatpush1.bf16.msra.mxu0 %v11926_v61  ;;  %4392 = vmatpush1.bf16.msra.mxu1 %v11929_v62  ;;  %v12015_v61 = vld [vmem:[%s16937_s1 + $0x6cc] ss:$16 sps:$4 sm:$0xff]   ;;  %v12010_v62 = vld [vmem:[%s16937_s1 + $0x6c0] ss:$16 sps:$4 sm:$0xff]  }
 0x1a4   :  { %4189 = vmatprep.subr.bf16.mxu0 %v11934_v59  ;;  %4393 = vmatprep.subr.bf16.mxu1 %v11937_v5  ;;  %v12013_v59 = vld [vmem:[%s16937_s1 + $0x6c8] ss:$16 sps:$4 sm:$0xff]   ;;  %v12018_v5 = vld [vmem:[%s16937_s1 + $0x6e4] ss:$16 sps:$4 sm:$0xff]  }
 0x1a7   :  { %4190 = vmatpush1.bf16.msra.mxu0 %v11932_v17  ;;  %4394 = vmatpush1.bf16.msra.mxu1 %v11935_v30  ;;  %v12021_v17 = vld [vmem:[%s16937_s1 + $0x6ec] ss:$16 sps:$4 sm:$0xff]   ;;  %v12016_v30 = vld [vmem:[%s16937_s1 + $0x6e0] ss:$16 sps:$4 sm:$0xff]  }
 0x1a8   :  { %4191 = vmatprep.subr.bf16.mxu0 %v11940_v34  ;;  %4395 = vmatprep.subr.bf16.mxu1 %v11943_v43  ;;  %v12019_v34 = vld [vmem:[%s16937_s1 + $0x6e8] ss:$16 sps:$4 sm:$0xff]   ;;  %v12024_v43 = vld [vmem:[%s16937_s1 + $0x704] ss:$16 sps:$4 sm:$0xff]  }
 0x1ab   :  { %4192 = vmatpush1.bf16.msra.mxu0 %v11938_v45  ;;  %4396 = vmatpush1.bf16.msra.mxu1 %v11941_v49  ;;  %v12027_v45 = vld [vmem:[%s16937_s1 + $0x70c] ss:$16 sps:$4 sm:$0xff]   ;;  %v12022_v49 = vld [vmem:[%s16937_s1 + $0x700] ss:$16 sps:$4 sm:$0xff]  }
 0x1ac   :  { %4193 = vmatprep.subr.bf16.mxu0 %v11946_v2  ;;  %4397 = vmatprep.subr.bf16.mxu1 %v11949_v3  ;;  %v12025_v2 = vld [vmem:[%s16937_s1 + $0x708] ss:$16 sps:$4 sm:$0xff]   ;;  %v12030_v3 = vld [vmem:[%s16937_s1 + $0x724] ss:$16 sps:$4 sm:$0xff]  }
 0x1af   :  { %4194 = vmatpush1.bf16.msra.mxu0 %v11944_v7  ;;  %4398 = vmatpush1.bf16.msra.mxu1 %v11947_v8  ;;  %v10497_v7 = vld.sshfl [vmem:[%s16938_s0 + $0x20] sm:$0xff pattern:$0x75316420]  ;;  %v10498_v8 = vld.sshfl [vmem:[%s16938_s0 + $0x28] sm:$0xff pattern:$0x75316420] }
 0x1b0   :  { %4195 = vmatprep.subr.bf16.mxu0 %v11952_v4  ;;  %4399 = vmatprep.subr.bf16.mxu1 %v11955_v9  ;;  %v10501_v4 = vld.sshfl [vmem:[%s16938_s0 + $0x50] sm:$0xff pattern:$0x75316420]  ;;  %v12033_v9 = vld [vmem:[%s16937_s1 + $0x72c] ss:$16 sps:$4 sm:$0xff]   ;;  %v4532_v26 = vcombine.low %v10497_v7, %v10498_v8 }
 0x1b3   :  { %4196 = vmatpush1.bf16.msra.mxu0 %v11950_v10  ;;  %4400 = vmatpush1.bf16.msra.mxu1 %v11953_v58  ;;  %v10502_v10 = vld.sshfl [vmem:[%s16938_s0 + $0x58] sm:$0xff pattern:$0x75316420]  ;;  %v12028_v58 = vld [vmem:[%s16937_s1 + $0x720] ss:$16 sps:$4 sm:$0xff]  }
 0x1b4   :  { %4197 = vmatprep.subr.bf16.mxu0 %v11958_v11  ;;  %4401 = vmatprep.subr.bf16.mxu1 %v11961_v13  ;;  %v12031_v11 = vld [vmem:[%s16937_s1 + $0x728] ss:$16 sps:$4 sm:$0xff]   ;;  %v12036_v13 = vld [vmem:[%s16937_s1 + $0x744] ss:$16 sps:$4 sm:$0xff]  }
 0x1b7   :  { %4198 = vmatpush1.bf16.msra.mxu0 %v11956_v14  ;;  %4402 = vmatpush1.bf16.msra.mxu1 %v11959_v22  ;;  %v12039_v14 = vld [vmem:[%s16937_s1 + $0x74c] ss:$16 sps:$4 sm:$0xff]   ;;  %v10495_v22 = vld.sshfl [vmem:[%s16938_s0 + $0x10] sm:$0xff pattern:$0x75316420] }
 0x1b8   :  { %4199 = vmatprep.subr.bf16.mxu0 %v11964_v41  ;;  %4403 = vmatprep.subr.bf16.mxu1 %v11967_v35  ;;  %v10496_v41 = vld.sshfl [vmem:[%s16938_s0 + $0x18] sm:$0xff pattern:$0x75316420]  ;;  %v10499_v35 = vld.sshfl [vmem:[%s16938_s0 + $0x30] sm:$0xff pattern:$0x75316420] }
 0x1bb   :  { %4200 = vmatpush1.bf16.msra.mxu0 %v11962_v40  ;;  %4404 = vmatpush1.bf16.msra.mxu1 %v11965_v21  ;;  %v10503_v40 = vld.sshfl [vmem:[%s16938_s0 + $0x60] sm:$0xff pattern:$0x75316420]  ;;  %v10504_v21 = vld.sshfl [vmem:[%s16938_s0 + $0x68] sm:$0xff pattern:$0x75316420] }
 0x1bc   :  { %4201 = vmatprep.subr.bf16.mxu0 %v11970_v25  ;;  %4405 = vmatprep.subr.bf16.mxu1 %v11973_v42  ;;  %v14710_v25 = vld.sshfl [vmem:[%s16938_s0 + $0x70] sm:$0xff pattern:$0x75316420]  ;;  %v14715_v42 = vld.sshfl [vmem:[%s16938_s0 + $0x78] sm:$0xff pattern:$0x75316420] }
 0x1bf   :  { %4202 = vmatpush1.bf16.msra.mxu0 %v11968_v20  ;;  %4406 = vmatpush1.bf16.msra.mxu1 %v11971_v27  ;;  %v4564_v20 = vcombine.low %v10501_v4, %v10502_v10  ;;  %v12034_v27 = vld [vmem:[%s16937_s1 + $0x740] ss:$16 sps:$4 sm:$0xff]  }
 0x1c0   :  { %4222 = vmatprep.subr.bf16.mxu0 %v11976_v28  ;;  %4426 = vmatprep.subr.bf16.mxu1 %v11979_v29  ;;  %v12037_v28 = vld [vmem:[%s16937_s1 + $0x748] ss:$16 sps:$4 sm:$0xff]   ;;  %v12042_v29 = vld [vmem:[%s16937_s1 + $0x764] ss:$16 sps:$4 sm:$0xff]  }
 0x1c2   :  { %4204 = vmatmul.mubr.bf16.vlgmr.msra.gmra.mrb[0].mxu0 %v2718_v46  ;;  %4408 = vmatmul.mubr.bf16.vlgmr.msra.gmra.mrb[0].mxu1 %v2718_v46  ;;  %v4533_v46 = vcombine.high %v10497_v7, %v10498_v8  ;;  %v12069_v7 = vld [vmem:[%s16937_s1 + $0x7ec] ss:$16 sps:$4 sm:$0xff]  }
 0x1c3   :  { %4223 = vmatpush1.bf16.msra.mxu0 %v11974_v1  ;;  %4427 = vmatpush1.bf16.msra.mxu1 %v11977_v15  ;;  %v4565_v1 = vcombine.high %v10501_v4, %v10502_v10  ;;  %v4602_v15 = vunpack.i.h.s16 %v4532_v26 }
 0x1c4   :  { %4224 = vmatprep.subr.bf16.mxu0 %v11982_v32  ;;  %4428 = vmatprep.subr.bf16.mxu1 %v11985_v16  ;;  %v4608_v32 = vunpack.i.h.s16 %v4564_v20  ;;  %v4517_v16 = vcombine.high %v10495_v22, %v10496_v41 }
 0x1c5   :  { %4213 = vmatprep.mubr.bf16.mxu0 %v14558_v37  ;;  %4417 = vmatprep.mubr.bf16.mxu1 %v14558_v37 }
 0x1c7   :  { %4225 = vmatpush1.bf16.msra.mxu0 %v11980_v33  ;;  %4429 = vmatpush1.bf16.msra.mxu1 %v11983_v36  ;;  %v4549_v33 = vcombine.high %v10499_v35, %v10500_v38  ;;  %v4581_v36 = vcombine.high %v10503_v40, %v10504_v21  ;;  %v12073_v21 = vld [vmem:[%s16937_s1 + $0x1008] ss:$16 sps:$4 sm:$0xff]  }
 0x1c8   :  { %4226 = vmatprep.subr.bf16.mxu0 %v11988_v53  ;;  %4430 = vmatprep.subr.bf16.mxu1 %v11991_v51  ;;  %v14731_v53 = vcombine.low %v14710_v25, %v14715_v42  ;;  %v12040_v51 = vld [vmem:[%s16937_s1 + $0x760] ss:$16 sps:$4 sm:$0xff]  }
 0x1ca   :  { %4214 = vmatmul.mubr.bf16.gmra.mrb[4].mxu0 %v14575_v52  ;;  %4418 = vmatmul.mubr.bf16.gmra.mrb[4].mxu1 %v14575_v52 }
 0x1cb   :  { %4227 = vmatpush1.bf16.msra.mxu0 %v11986_v23  ;;  %4431 = vmatpush1.bf16.msra.mxu1 %v11989_v31  ;;  %v12043_v23 = vld [vmem:[%s16937_s1 + $0x768] ss:$16 sps:$4 sm:$0xff]   ;;  %v12048_v31 = vld [vmem:[%s16937_s1 + $0x784] ss:$16 sps:$4 sm:$0xff]  }
 0x1cc   :  { %4228 = vmatprep.subr.bf16.mxu0 %v11994_v39  ;;  %4432 = vmatprep.subr.bf16.mxu1 %v11997_v60  ;;  %v12051_v39 = vld [vmem:[%s16937_s1 + $0x78c] ss:$16 sps:$4 sm:$0xff]   ;;  %v14745_v60 = vpack.i.b16 %v4533_v46, %v4602_v15  ;;  %v12079_v46 = vld [vmem:[%s16937_s1 + $0x1028] ss:$16 sps:$4 sm:$0xff]   ;;  %v12082_v15 = vld [vmem:[%s16937_s1 + $0x1040] ss:$16 sps:$4 sm:$0xff]  }
 0x1cd   :  { %4254 = vmatprep.mubr.bf16.mxu0 %v14342_v24  ;;  %4458 = vmatprep.mubr.bf16.mxu1 %v14342_v24  ;;  %v12009_v24 = vld [vmem:[%s16937_s1 + $0x6ac] ss:$16 sps:$4 sm:$0xff]  }
 0x1cf   :  { %4229 = vmatpush1.bf16.msra.mxu0 %v11992_v63  ;;  %4433 = vmatpush1.bf16.msra.mxu1 %v11995_v6  ;;  %v14747_v63 = vpack.i.b16 %v4532_v26, %v4517_v16  ;;  %v14749_v6 = vpack.i.b16 %v4564_v20, %v4549_v33  ;;  %v12078_v20 = vld [vmem:[%s16937_s1 + $0x1024] ss:$16 sps:$4 sm:$0xff]  }
 0x1d0   :  { %4230 = vmatprep.subr.bf16.mxu0 %v12000_v12  ;;  %4434 = vmatprep.subr.bf16.mxu1 %v12003_v18  ;;  %v14751_v12 = vpack.i.b16 %v4565_v1, %v4608_v32  ;;  %v14754_v18 = vpack.i.b16 %v14731_v53, %v4581_v36  ;;  %v2770_v1 = vcombine.high %v14575_v52, %v14575_v52  ;;  %v12085_v32 = vld [vmem:[%s16937_s1 + $0x1048] ss:$16 sps:$4 sm:$0xff]   ;;  %v12090_v16 = vld [vmem:[%s16937_s1 + $0x1064] ss:$16 sps:$4 sm:$0xff]   ;;  %v12093_v52 = vld [vmem:[%s16937_s1 + $0x106c] ss:$16 sps:$4 sm:$0xff]  }
 0x1d1   :  { %v12088_v36 = vld [vmem:[%s16937_s1 + $0x1060] ss:$16 sps:$4 sm:$0xff]  }
 0x1d3   :  { %4231 = vmatpush1.bf16.msra.mxu0 %v11998_v44  ;;  %4435 = vmatpush1.bf16.msra.mxu1 %v12001_v54  ;;  %v12046_v44 = vld [vmem:[%s16937_s1 + $0x780] ss:$16 sps:$4 sm:$0xff]   ;;  %v12049_v54 = vld [vmem:[%s16937_s1 + $0x788] ss:$16 sps:$4 sm:$0xff]  }
 0x1d4   :  { %4232 = vmatprep.subr.bf16.mxu0 %v12006_v55  ;;  %4436 = vmatprep.subr.bf16.mxu1 %v12009_v24  ;;  %v12054_v55 = vld [vmem:[%s16937_s1 + $0x7a4] ss:$16 sps:$4 sm:$0xff]   ;;  %v12057_v24 = vld [vmem:[%s16937_s1 + $0x7ac] ss:$16 sps:$4 sm:$0xff]  }
 0x1d7   :  { %4233 = vmatpush1.bf16.msra.mxu0 %v12004_v19  ;;  %4437 = vmatpush1.bf16.msra.mxu1 %v12007_v56  ;;  %v10513_v19 = vcombine.low %v10495_v22, %v14747_v63  ;;  %v10514_v56 = vcombine.low %v14745_v60, %v10499_v35 }
 0x1d8   :  { %4234 = vmatprep.subr.bf16.mxu0 %v12012_v57  ;;  %4438 = vmatprep.subr.bf16.mxu1 %v12015_v61  ;;  %v4885_v57 = vcombine.low %v14749_v6, %v14751_v12  ;;  %v10515_v61 = vcombine.low %v10503_v40, %v14754_v18  ;;  %v12070_v40 = vld [vmem:[%s16937_s1 + $0x1000] ss:$16 sps:$4 sm:$0xff]  }
 0x1db   :  { %4235 = vmatpush1.bf16.msra.mxu0 %v12010_v62  ;;  %4439 = vmatpush1.bf16.msra.mxu1 %v12013_v59  ;;  %v12052_v62 = vld [vmem:[%s16937_s1 + $0x7a0] ss:$16 sps:$4 sm:$0xff]   ;;  %v12055_v59 = vld [vmem:[%s16937_s1 + $0x7a8] ss:$16 sps:$4 sm:$0xff]  }
 0x1dc   :  { %4236 = vmatprep.subr.bf16.mxu0 %v12018_v5  ;;  %4440 = vmatprep.subr.bf16.mxu1 %v12021_v17  ;;  %v12060_v5 = vld [vmem:[%s16937_s1 + $0x7c4] ss:$16 sps:$4 sm:$0xff]   ;;  %v12063_v17 = vld [vmem:[%s16937_s1 + $0x7cc] ss:$16 sps:$4 sm:$0xff]  }
 0x1df   :  { %4237 = vmatpush1.bf16.msra.mxu0 %v12016_v30  ;;  %4441 = vmatpush1.bf16.msra.mxu1 %v12019_v34  ;;  %v4895_v30 = vrot.slane %v10513_v19, %v13089_v0  ;;  %v4909_v34 = vrot.slane %v10514_v56, %v13089_v0  ;;  %v12103_v19 = vld [vmem:[%s16937_s1 + $0x10a8] ss:$16 sps:$4 sm:$0xff]   ;;  %v12108_v56 = vld [vmem:[%s16937_s1 + $0x10c4] ss:$16 sps:$4 sm:$0xff]  }
 0x1e0   :  { %4238 = vmatprep.subr.bf16.mxu0 %v12024_v43  ;;  %4442 = vmatprep.subr.bf16.mxu1 %v12027_v45  ;;  %v4923_v43 = vrot.slane %v4885_v57, %v13089_v0  ;;  %v4937_v45 = vrot.slane %v10515_v61, %v13089_v0  ;;  %v12111_v57 = vld [vmem:[%s16937_s1 + $0x10cc] ss:$16 sps:$4 sm:$0xff]   ;;  %v12106_v61 = vld [vmem:[%s16937_s1 + $0x10c0] ss:$16 sps:$4 sm:$0xff]  }
 0x1e1   :  { %v4946_v8 = vcombine.high %v4895_v30, %v4909_v34 }
 0x1e2   :  { %v4950_v4 = vcombine.high %v4923_v43, %v4937_v45  ;;  %v4949_v10 = vcombine.low %v4923_v43, %v4937_v45  ;;  %v12123_v43 = vld [vmem:[%s16937_s1 + $0x110c] ss:$16 sps:$4 sm:$0xff]   ;;  %v12118_v45 = vld [vmem:[%s16937_s1 + $0x1100] ss:$16 sps:$4 sm:$0xff]  }
 0x1e3   :  { %4239 = vmatpush1.bf16.msra.mxu0 %v12022_v49  ;;  %4443 = vmatpush1.bf16.msra.mxu1 %v12025_v2  ;;  %v12058_v49 = vld [vmem:[%s16937_s1 + $0x7c0] ss:$16 sps:$4 sm:$0xff]   ;;  %v12061_v2 = vld [vmem:[%s16937_s1 + $0x7c8] ss:$16 sps:$4 sm:$0xff]   ;;  %v4973_v22 = vrot.slane %v4946_v8, %v13089_v0 }
 0x1e4   :  { %4240 = vmatprep.subr.bf16.mxu0 %v12030_v3  ;;  %4444 = vmatprep.subr.bf16.mxu1 %v12033_v9  ;;  %v12066_v3 = vld [vmem:[%s16937_s1 + $0x7e4] ss:$16 sps:$4 sm:$0xff]   ;;  %v4945_v9 = vcombine.low %v4895_v30, %v4909_v34  ;;  %v5001_v41 = vrot.slane %v4950_v4, %v13089_v0  ;;  %v14819_v38 = vrot.slane %v4949_v10, %v13089_v0  ;;  %v12115_v30 = vld [vmem:[%s16937_s1 + $0x10e8] ss:$16 sps:$4 sm:$0xff]   ;;  %v12130_v10 = vld [vmem:[%s16937_s1 + $0x1140] ss:$16 sps:$4 sm:$0xff]  }
 0x1e5   :  { %v12120_v34 = vld [vmem:[%s16937_s1 + $0x1104] ss:$16 sps:$4 sm:$0xff]   ;;  %v12127_v8 = vld [vmem:[%s16937_s1 + $0x1128] ss:$16 sps:$4 sm:$0xff]  }
 0x1e6   :  { %v14816_v35 = vrot.slane %v4945_v9, %v13089_v0  ;;  %v14827_v26 = vcombine.high %v4973_v22, %v5001_v41  ;;  %v5013_v33 = vcombine.low %v4973_v22, %v5001_v41  ;;  %v12132_v4 = vld [vmem:[%s16937_s1 + $0x1144] ss:$16 sps:$4 sm:$0xff]   ;;  %v12135_v9 = vld [vmem:[%s16937_s1 + $0x114c] ss:$16 sps:$4 sm:$0xff]   ;;  %v12139_v22 = vld [vmem:[%s16937_s1 + $0x1168] ss:$16 sps:$4 sm:$0xff]  }
 0x1e7   :  { %4241 = vmatpush1.bf16.msra.mxu0 %v12028_v58  ;;  %4445 = vmatpush1.bf16.msra.mxu1 %v12031_v11  ;;  %v12064_v58 = vld [vmem:[%s16937_s1 + $0x7e0] ss:$16 sps:$4 sm:$0xff]   ;;  %v12067_v11 = vld [vmem:[%s16937_s1 + $0x7e8] ss:$16 sps:$4 sm:$0xff]   ;;  %v12144_v41 = vld [vmem:[%s16937_s1 + $0x1184] ss:$16 sps:$4 sm:$0xff]  }
 0x1e8   :  { %4242 = vmatprep.subr.bf16.mxu0 %v12036_v13  ;;  %4446 = vmatprep.subr.bf16.mxu1 %v12039_v14  ;;  %v12072_v13 = vld [vmem:[%s16937_s1 + $0x1004] ss:$16 sps:$4 sm:$0xff]   ;;  %v12075_v14 = vld [vmem:[%s16937_s1 + $0x100c] ss:$16 sps:$4 sm:$0xff]  }
 0x1eb   :  { %4243 = vmatpush1.bf16.msra.mxu0 %v12034_v27  ;;  %4447 = vmatpush1.bf16.msra.mxu1 %v12037_v28  ;;  %v12081_v27 = vld [vmem:[%s16937_s1 + $0x102c] ss:$16 sps:$4 sm:$0xff]   ;;  %v14837_v28 = vcombine.high %v14816_v35, %v14819_v38 }
 0x1ec   :  { %4244 = vmatprep.subr.bf16.mxu0 %v12042_v29  ;;  %4448 = vmatprep.subr.bf16.mxu1 %v12045_v47  ;;  %v2772_v29 = vcombine.high %v14558_v37, %v14558_v37  ;;  %v12076_v47 = vld [vmem:[%s16937_s1 + $0x1020] ss:$16 sps:$4 sm:$0xff]   ;;  %v12084_v37 = vld [vmem:[%s16937_s1 + $0x1044] ss:$16 sps:$4 sm:$0xff]  }
 0x1ef   :  { %4245 = vmatpush1.bf16.msra.mxu0 %v12040_v51  ;;  %4449 = vmatpush1.bf16.msra.mxu1 %v12043_v23  ;;  %v12091_v51 = vld [vmem:[%s16937_s1 + $0x1068] ss:$16 sps:$4 sm:$0xff]   ;;  %v12096_v23 = vld [vmem:[%s16937_s1 + $0x1084] ss:$16 sps:$4 sm:$0xff]  }
 0x1f0   :  { %4246 = vmatprep.subr.bf16.mxu0 %v12048_v31  ;;  %4450 = vmatprep.subr.bf16.mxu1 %v12051_v39  ;;  %v12099_v31 = vld [vmem:[%s16937_s1 + $0x108c] ss:$16 sps:$4 sm:$0xff]   ;;  %v12094_v39 = vld [vmem:[%s16937_s1 + $0x1080] ss:$16 sps:$4 sm:$0xff]  }
 0x1f3   :  { %4247 = vmatpush1.bf16.msra.mxu0 %v12046_v44  ;;  %4451 = vmatpush1.bf16.msra.mxu1 %v12049_v54  ;;  %v12097_v44 = vld [vmem:[%s16937_s1 + $0x1088] ss:$16 sps:$4 sm:$0xff]   ;;  %v12102_v54 = vld [vmem:[%s16937_s1 + $0x10a4] ss:$16 sps:$4 sm:$0xff]  }
 0x1f4   :  { %4248 = vmatprep.subr.bf16.mxu0 %v12054_v55  ;;  %4452 = vmatprep.subr.bf16.mxu1 %v12057_v24  ;;  %v12105_v55 = vld [vmem:[%s16937_s1 + $0x10ac] ss:$16 sps:$4 sm:$0xff]   ;;  %v12100_v24 = vld [vmem:[%s16937_s1 + $0x10a0] ss:$16 sps:$4 sm:$0xff]  }
 0x1f7   :  { %4249 = vmatpush1.bf16.msra.mxu0 %v12052_v62  ;;  %4453 = vmatpush1.bf16.msra.mxu1 %v12055_v59  ;;  %v12109_v62 = vld [vmem:[%s16937_s1 + $0x10c8] ss:$16 sps:$4 sm:$0xff]   ;;  %v12114_v59 = vld [vmem:[%s16937_s1 + $0x10e4] ss:$16 sps:$4 sm:$0xff]  }
 0x1f8   :  { %4250 = vmatprep.subr.bf16.mxu0 %v12060_v5  ;;  %4454 = vmatprep.subr.bf16.mxu1 %v12063_v17  ;;  %v12117_v5 = vld [vmem:[%s16937_s1 + $0x10ec] ss:$16 sps:$4 sm:$0xff]   ;;  %v12112_v17 = vld [vmem:[%s16937_s1 + $0x10e0] ss:$16 sps:$4 sm:$0xff]  }
 0x1fb   :  { %4251 = vmatpush1.bf16.msra.mxu0 %v12058_v49  ;;  %4455 = vmatpush1.bf16.msra.mxu1 %v12061_v2  ;;  %v12121_v49 = vld [vmem:[%s16937_s1 + $0x1108] ss:$16 sps:$4 sm:$0xff]   ;;  %v12126_v2 = vld [vmem:[%s16937_s1 + $0x1124] ss:$16 sps:$4 sm:$0xff]  }
 0x1fc   :  { %4252 = vmatprep.subr.bf16.mxu0 %v12066_v3  ;;  %4456 = vmatprep.subr.bf16.mxu1 %v12069_v7  ;;  %v12129_v3 = vld [vmem:[%s16937_s1 + $0x112c] ss:$16 sps:$4 sm:$0xff]   ;;  %v12124_v7 = vld [vmem:[%s16937_s1 + $0x1120] ss:$16 sps:$4 sm:$0xff]  }
 0x1ff   :  { %4253 = vmatpush1.bf16.msra.mxu0 %v12064_v58  ;;  %4457 = vmatpush1.bf16.msra.mxu1 %v12067_v11  ;;  %v12133_v58 = vld [vmem:[%s16937_s1 + $0x1148] ss:$16 sps:$4 sm:$0xff]   ;;  %v12138_v11 = vld [vmem:[%s16937_s1 + $0x1164] ss:$16 sps:$4 sm:$0xff]  }
 0x200   :  { %6362 = vmatprep.subr.bf16.mxu0 %v12072_v13  ;;  %6566 = vmatprep.subr.bf16.mxu1 %v12075_v14  ;;  %v12141_v13 = vld [vmem:[%s16937_s1 + $0x116c] ss:$16 sps:$4 sm:$0xff]   ;;  %v12136_v14 = vld [vmem:[%s16937_s1 + $0x1160] ss:$16 sps:$4 sm:$0xff]  }
 0x202   :  { %4255 = vmatmul.mubr.bf16.vlgmr.msra.gmra.mrb[0].mxu0 %v14352_v48  ;;  %4459 = vmatmul.mubr.bf16.vlgmr.msra.gmra.mrb[0].mxu1 %v14352_v48  ;;  %v12087_v48 = vld [vmem:[%s16937_s1 + $0x104c] ss:$16 sps:$4 sm:$0xff]  }
 0x203   :  { %6363 = vmatpush1.bf16.msra.mxu0 %v12070_v40  ;;  %6567 = vmatpush1.bf16.msra.mxu1 %v12073_v21  ;;  %v12147_v40 = vld [vmem:[%s16937_s1 + $0x118c] ss:$16 sps:$4 sm:$0xff]   ;;  %v12142_v21 = vld [vmem:[%s16937_s1 + $0x1180] ss:$16 sps:$4 sm:$0xff]  }
 0x204   :  { %6364 = vmatprep.subr.bf16.mxu0 %v12078_v20  ;;  %6568 = vmatprep.subr.bf16.mxu1 %v12081_v27  ;;  %v12145_v20 = vld [vmem:[%s16937_s1 + $0x1188] ss:$16 sps:$4 sm:$0xff]   ;;  %v12150_v27 = vld [vmem:[%s16937_s1 + $0x11a4] ss:$16 sps:$4 sm:$0xff]  }
 0x205   :  { %4264 = vmatprep.mubr.bf16.mxu0 %v2772_v29  ;;  %4468 = vmatprep.mubr.bf16.mxu1 %v2772_v29  ;;  %v12153_v29 = vld [vmem:[%s16937_s1 + $0x11ac] ss:$16 sps:$4 sm:$0xff]  }
 0x207   :  { %6365 = vmatpush1.bf16.msra.mxu0 %v12076_v47  ;;  %6569 = vmatpush1.bf16.msra.mxu1 %v12079_v46  ;;  %v4597_v47 = vcombine.high %v14710_v25, %v14715_v42  ;;  %v4614_v46 = vunpack.i.h.s16 %v14731_v53  ;;  %v12159_v25 = vld [vmem:[%s16937_s1 + $0x11cc] ss:$16 sps:$4 sm:$0xff]   ;;  %v12154_v53 = vld [vmem:[%s16937_s1 + $0x11c0] ss:$16 sps:$4 sm:$0xff]  }
 0x208   :  { %6366 = vmatprep.subr.bf16.mxu0 %v12084_v37  ;;  %6570 = vmatprep.subr.bf16.mxu1 %v12087_v48  ;;  %v12148_v37 = vld [vmem:[%s16937_s1 + $0x11a0] ss:$16 sps:$4 sm:$0xff]   ;;  %v12151_v48 = vld [vmem:[%s16937_s1 + $0x11a8] ss:$16 sps:$4 sm:$0xff]  }
 0x209   :  { %v15004_v42 = vpack.i.b16 %v4597_v47, %v4614_v46  ;;  %v12220_v47 = vld [vmem:[%s16937_s1 + $0x1320] ss:$16 sps:$4 sm:$0xff]   ;;  %v12223_v46 = vld [vmem:[%s16937_s1 + $0x1328] ss:$16 sps:$4 sm:$0xff]  }
 0x20a   :  { %4265 = vmatmul.mubr.bf16.gmra.mrb[4].mxu0 %v2770_v1  ;;  %4469 = vmatmul.mubr.bf16.gmra.mrb[4].mxu1 %v2770_v1  ;;  %v12156_v1 = vld [vmem:[%s16937_s1 + $0x11c4] ss:$16 sps:$4 sm:$0xff]  }
 0x20b   :  { %6367 = vmatpush1.bf16.msra.mxu0 %v12082_v15  ;;  %6571 = vmatpush1.bf16.msra.mxu1 %v12085_v32  ;;  %v12157_v15 = vld [vmem:[%s16937_s1 + $0x11c8] ss:$16 sps:$4 sm:$0xff]   ;;  %v12162_v32 = vld [vmem:[%s16937_s1 + $0x11e4] ss:$16 sps:$4 sm:$0xff]  }
 0x20c   :  { %6368 = vmatprep.subr.bf16.mxu0 %v12090_v16  ;;  %6572 = vmatprep.subr.bf16.mxu1 %v12093_v52  ;;  %v12165_v16 = vld [vmem:[%s16937_s1 + $0x11ec] ss:$16 sps:$4 sm:$0xff]   ;;  %v5024_v52 = vrot.slane %v15004_v42, %v13089_v0 }
 0x20d   :  { %6394 = vmatprep.mubr.bf16.mxu0 %v5013_v33  ;;  %6598 = vmatprep.mubr.bf16.mxu1 %v5013_v33  ;;  %v12160_v33 = vld [vmem:[%s16937_s1 + $0x11e0] ss:$16 sps:$4 sm:$0xff]  }
 0x20f   :  { %6369 = vmatpush1.bf16.msra.mxu0 %v12088_v36  ;;  %6573 = vmatpush1.bf16.msra.mxu1 %v12091_v51  ;;  %v12163_v36 = vld [vmem:[%s16937_s1 + $0x11e8] ss:$16 sps:$4 sm:$0xff]   ;;  %v12168_v51 = vld [vmem:[%s16937_s1 + $0x1204] ss:$16 sps:$4 sm:$0xff]  }
 0x210   :  { %6370 = vmatprep.subr.bf16.mxu0 %v12096_v23  ;;  %6574 = vmatprep.subr.bf16.mxu1 %v12099_v31  ;;  %v12171_v23 = vld [vmem:[%s16937_s1 + $0x120c] ss:$16 sps:$4 sm:$0xff]   ;;  %v5032_v31 = vcombine.high %v5024_v52, %v5024_v52 }
 0x213   :  { %6371 = vmatpush1.bf16.msra.mxu0 %v12094_v39  ;;  %6575 = vmatpush1.bf16.msra.mxu1 %v12097_v44  ;;  %v5009_v39 = vcombine.low %v14816_v35, %v14819_v38  ;;  %v12166_v44 = vld [vmem:[%s16937_s1 + $0x1200] ss:$16 sps:$4 sm:$0xff]   ;;  %v12177_v35 = vld [vmem:[%s16937_s1 + $0x122c] ss:$16 sps:$4 sm:$0xff]   ;;  %v15047_v38 = vrot.slane %v5032_v31, %v13089_v0 }
 0x214   :  { %6372 = vmatprep.subr.bf16.mxu0 %v12102_v54  ;;  %6576 = vmatprep.subr.bf16.mxu1 %v12105_v55  ;;  %v12169_v54 = vld [vmem:[%s16937_s1 + $0x1208] ss:$16 sps:$4 sm:$0xff]   ;;  %v12174_v55 = vld [vmem:[%s16937_s1 + $0x1224] ss:$16 sps:$4 sm:$0xff]  }
 0x215   :  { %v12868_v31 = vld.sshfl [vmem:[%s16938_s0 + $0x30] sm:$0xff pattern:$0x75316420] }
 0x217   :  { %6373 = vmatpush1.bf16.msra.mxu0 %v12100_v24  ;;  %6577 = vmatpush1.bf16.msra.mxu1 %v12103_v19  ;;  %v12172_v24 = vld [vmem:[%s16937_s1 + $0x1220] ss:$16 sps:$4 sm:$0xff]   ;;  %v12175_v19 = vld [vmem:[%s16937_s1 + $0x1228] ss:$16 sps:$4 sm:$0xff]  }
 0x218   :  { %6374 = vmatprep.subr.bf16.mxu0 %v12108_v56  ;;  %6578 = vmatprep.subr.bf16.mxu1 %v12111_v57  ;;  %v12180_v56 = vld [vmem:[%s16937_s1 + $0x1244] ss:$16 sps:$4 sm:$0xff]   ;;  %v12183_v57 = vld [vmem:[%s16937_s1 + $0x124c] ss:$16 sps:$4 sm:$0xff]  }
 0x21b   :  { %6375 = vmatpush1.bf16.msra.mxu0 %v12106_v61  ;;  %6579 = vmatpush1.bf16.msra.mxu1 %v12109_v62  ;;  %v15064_v61 = vrot.slane %v5024_v52, %v13089_v0  ;;  %v12178_v62 = vld [vmem:[%s16937_s1 + $0x1240] ss:$16 sps:$4 sm:$0xff]   ;;  %v12240_v52 = vld [vmem:[%s16937_s1 + $0x1384] ss:$16 sps:$4 sm:$0xff]  }
 0x21c   :  { %6376 = vmatprep.subr.bf16.mxu0 %v12114_v59  ;;  %6580 = vmatprep.subr.bf16.mxu1 %v12117_v5  ;;  %v12181_v59 = vld [vmem:[%s16937_s1 + $0x1248] ss:$16 sps:$4 sm:$0xff]   ;;  %v12186_v5 = vld [vmem:[%s16937_s1 + $0x1264] ss:$16 sps:$4 sm:$0xff]  }
 0x21f   :  { %6377 = vmatpush1.bf16.msra.mxu0 %v12112_v17  ;;  %6581 = vmatpush1.bf16.msra.mxu1 %v12115_v30  ;;  %v12189_v17 = vld [vmem:[%s16937_s1 + $0x126c] ss:$16 sps:$4 sm:$0xff]   ;;  %v12184_v30 = vld [vmem:[%s16937_s1 + $0x1260] ss:$16 sps:$4 sm:$0xff]  }
 0x220   :  { %6378 = vmatprep.subr.bf16.mxu0 %v12120_v34  ;;  %6582 = vmatprep.subr.bf16.mxu1 %v12123_v43  ;;  %v12187_v34 = vld [vmem:[%s16937_s1 + $0x1268] ss:$16 sps:$4 sm:$0xff]   ;;  %v12192_v43 = vld [vmem:[%s16937_s1 + $0x1284] ss:$16 sps:$4 sm:$0xff]  }
 0x223   :  { %6379 = vmatpush1.bf16.msra.mxu0 %v12118_v45  ;;  %6583 = vmatpush1.bf16.msra.mxu1 %v12121_v49  ;;  %v12195_v45 = vld [vmem:[%s16937_s1 + $0x128c] ss:$16 sps:$4 sm:$0xff]   ;;  %v12190_v49 = vld [vmem:[%s16937_s1 + $0x1280] ss:$16 sps:$4 sm:$0xff]  }
 0x224   :  { %6380 = vmatprep.subr.bf16.mxu0 %v12126_v2  ;;  %6584 = vmatprep.subr.bf16.mxu1 %v12129_v3  ;;  %v12193_v2 = vld [vmem:[%s16937_s1 + $0x1288] ss:$16 sps:$4 sm:$0xff]   ;;  %v12198_v3 = vld [vmem:[%s16937_s1 + $0x12a4] ss:$16 sps:$4 sm:$0xff]  }
 0x227   :  { %6381 = vmatpush1.bf16.msra.mxu0 %v12124_v7  ;;  %6585 = vmatpush1.bf16.msra.mxu1 %v12127_v8  ;;  %v12196_v7 = vld [vmem:[%s16937_s1 + $0x12a0] ss:$16 sps:$4 sm:$0xff]   ;;  %v12199_v8 = vld [vmem:[%s16937_s1 + $0x12a8] ss:$16 sps:$4 sm:$0xff]  }
 0x228   :  { %6382 = vmatprep.subr.bf16.mxu0 %v12132_v4  ;;  %6586 = vmatprep.subr.bf16.mxu1 %v12135_v9  ;;  %v12204_v4 = vld [vmem:[%s16937_s1 + $0x12c4] ss:$16 sps:$4 sm:$0xff]   ;;  %v12207_v9 = vld [vmem:[%s16937_s1 + $0x12cc] ss:$16 sps:$4 sm:$0xff]  }
 0x22b   :  { %6383 = vmatpush1.bf16.msra.mxu0 %v12130_v10  ;;  %6587 = vmatpush1.bf16.msra.mxu1 %v12133_v58  ;;  %v12202_v10 = vld [vmem:[%s16937_s1 + $0x12c0] ss:$16 sps:$4 sm:$0xff]   ;;  %v12205_v58 = vld [vmem:[%s16937_s1 + $0x12c8] ss:$16 sps:$4 sm:$0xff]  }
 0x22c   :  { %6384 = vmatprep.subr.bf16.mxu0 %v12138_v11  ;;  %6588 = vmatprep.subr.bf16.mxu1 %v12141_v13  ;;  %v12210_v11 = vld [vmem:[%s16937_s1 + $0x12e4] ss:$16 sps:$4 sm:$0xff]   ;;  %v12213_v13 = vld [vmem:[%s16937_s1 + $0x12ec] ss:$16 sps:$4 sm:$0xff]  }
 0x22f   :  { %6385 = vmatpush1.bf16.msra.mxu0 %v12136_v14  ;;  %6589 = vmatpush1.bf16.msra.mxu1 %v12139_v22  ;;  %v12208_v14 = vld [vmem:[%s16937_s1 + $0x12e0] ss:$16 sps:$4 sm:$0xff]   ;;  %v12211_v22 = vld [vmem:[%s16937_s1 + $0x12e8] ss:$16 sps:$4 sm:$0xff]  }
 0x230   :  { %6386 = vmatprep.subr.bf16.mxu0 %v12144_v41  ;;  %6590 = vmatprep.subr.bf16.mxu1 %v12147_v40  ;;  %v12216_v41 = vld [vmem:[%s16937_s1 + $0x1304] ss:$16 sps:$4 sm:$0xff]   ;;  %v12219_v40 = vld [vmem:[%s16937_s1 + $0x130c] ss:$16 sps:$4 sm:$0xff]  }
 0x233   :  { %6387 = vmatpush1.bf16.msra.mxu0 %v12142_v21  ;;  %6591 = vmatpush1.bf16.msra.mxu1 %v12145_v20  ;;  %v12214_v21 = vld [vmem:[%s16937_s1 + $0x1300] ss:$16 sps:$4 sm:$0xff]   ;;  %v12217_v20 = vld [vmem:[%s16937_s1 + $0x1308] ss:$16 sps:$4 sm:$0xff]  }
 0x234   :  { %6388 = vmatprep.subr.bf16.mxu0 %v12150_v27  ;;  %6592 = vmatprep.subr.bf16.mxu1 %v12153_v29  ;;  %v12222_v27 = vld [vmem:[%s16937_s1 + $0x1324] ss:$16 sps:$4 sm:$0xff]   ;;  %v12225_v29 = vld [vmem:[%s16937_s1 + $0x132c] ss:$16 sps:$4 sm:$0xff]  }
 0x237   :  { %6389 = vmatpush1.bf16.msra.mxu0 %v12148_v37  ;;  %6593 = vmatpush1.bf16.msra.mxu1 %v12151_v48  ;;  %v12228_v37 = vld [vmem:[%s16937_s1 + $0x1344] ss:$16 sps:$4 sm:$0xff]   ;;  %v12231_v48 = vld [vmem:[%s16937_s1 + $0x134c] ss:$16 sps:$4 sm:$0xff]  }
 0x238   :  { %6390 = vmatprep.subr.bf16.mxu0 %v12156_v1  ;;  %6594 = vmatprep.subr.bf16.mxu1 %v12159_v25  ;;  %v12226_v1 = vld [vmem:[%s16937_s1 + $0x1340] ss:$16 sps:$4 sm:$0xff]   ;;  %v12229_v25 = vld [vmem:[%s16937_s1 + $0x1348] ss:$16 sps:$4 sm:$0xff]  }
 0x23b   :  { %6391 = vmatpush1.bf16.msra.mxu0 %v12154_v53  ;;  %6595 = vmatpush1.bf16.msra.mxu1 %v12157_v15  ;;  %v12234_v53 = vld [vmem:[%s16937_s1 + $0x1364] ss:$16 sps:$4 sm:$0xff]   ;;  %v12237_v15 = vld [vmem:[%s16937_s1 + $0x136c] ss:$16 sps:$4 sm:$0xff]  }
 0x23c   :  { %6392 = vmatprep.subr.bf16.mxu0 %v12162_v32  ;;  %6596 = vmatprep.subr.bf16.mxu1 %v12165_v16  ;;  %v12232_v32 = vld [vmem:[%s16937_s1 + $0x1360] ss:$16 sps:$4 sm:$0xff]   ;;  %v12235_v16 = vld [vmem:[%s16937_s1 + $0x1368] ss:$16 sps:$4 sm:$0xff]  }
 0x23f   :  { %6393 = vmatpush1.bf16.msra.mxu0 %v12160_v33  ;;  %6597 = vmatpush1.bf16.msra.mxu1 %v12163_v36  ;;  %v12243_v33 = vld [vmem:[%s16937_s1 + $0x138c] ss:$16 sps:$4 sm:$0xff]   ;;  %v12866_v36 = vld.sshfl [vmem:[%s16938_s0 + $0x10] sm:$0xff pattern:$0x75316420] }
 0x240   :  { %6413 = vmatprep.subr.bf16.mxu0 %v12168_v51  ;;  %6617 = vmatprep.subr.bf16.mxu1 %v12171_v23  ;;  %v12867_v51 = vld.sshfl [vmem:[%s16938_s0 + $0x18] sm:$0xff pattern:$0x75316420] }
 0x241   :  { %v4516_v23 = vcombine.low %v12866_v36, %v12867_v51  ;;  %v12291_v36 = vld [vmem:[%s16937_s1 + $0x148c] ss:$16 sps:$4 sm:$0xff]   ;;  %v12286_v51 = vld [vmem:[%s16937_s1 + $0x1480] ss:$16 sps:$4 sm:$0xff]  }
 0x242   :  { %6395 = vmatmul.mubr.bf16.vlgmr.msra.gmra.mrb[0].mxu0 %v5009_v39  ;;  %6599 = vmatmul.mubr.bf16.vlgmr.msra.gmra.mrb[0].mxu1 %v5009_v39  ;;  %v12869_v39 = vld.sshfl [vmem:[%s16938_s0 + $0x38] sm:$0xff pattern:$0x75316420] }
 0x243   :  { %6414 = vmatpush1.bf16.msra.mxu0 %v12166_v44  ;;  %6618 = vmatpush1.bf16.msra.mxu1 %v12169_v54  ;;  %v4548_v44 = vcombine.low %v12868_v31, %v12869_v39  ;;  %v12870_v54 = vld.sshfl [vmem:[%s16938_s0 + $0x60] sm:$0xff pattern:$0x75316420]  ;;  %v12297_v39 = vld [vmem:[%s16937_s1 + $0x14ac] ss:$16 sps:$4 sm:$0xff]  }
 0x244   :  { %6415 = vmatprep.subr.bf16.mxu0 %v12174_v55  ;;  %6619 = vmatprep.subr.bf16.mxu1 %v12177_v35  ;;  %v12871_v55 = vld.sshfl [vmem:[%s16938_s0 + $0x68] sm:$0xff pattern:$0x75316420]  ;;  %v12294_v31 = vld [vmem:[%s16937_s1 + $0x14a4] ss:$16 sps:$4 sm:$0xff]  }
 0x245   :  { %6404 = vmatprep.mubr.bf16.mxu0 %v15047_v38  ;;  %6608 = vmatprep.mubr.bf16.mxu1 %v15047_v38  ;;  %v4580_v35 = vcombine.low %v12870_v54, %v12871_v55  ;;  %v12295_v54 = vld [vmem:[%s16937_s1 + $0x14a8] ss:$16 sps:$4 sm:$0xff]   ;;  %v12300_v55 = vld [vmem:[%s16937_s1 + $0x14c4] ss:$16 sps:$4 sm:$0xff]  }
 0x247   :  { %6416 = vmatpush1.bf16.msra.mxu0 %v12172_v24  ;;  %6620 = vmatpush1.bf16.msra.mxu1 %v12175_v19  ;;  %v12238_v24 = vld [vmem:[%s16937_s1 + $0x1380] ss:$16 sps:$4 sm:$0xff]   ;;  %v12241_v19 = vld [vmem:[%s16937_s1 + $0x1388] ss:$16 sps:$4 sm:$0xff]  }
 0x248   :  { %6417 = vmatprep.subr.bf16.mxu0 %v12180_v56  ;;  %6621 = vmatprep.subr.bf16.mxu1 %v12183_v57  ;;  %v12246_v56 = vld [vmem:[%s16937_s1 + $0x13a4] ss:$16 sps:$4 sm:$0xff]   ;;  %v12249_v57 = vld [vmem:[%s16937_s1 + $0x13ac] ss:$16 sps:$4 sm:$0xff]  }
 0x24a   :  { %6405 = vmatmul.mubr.bf16.gmra.mrb[4].mxu0 %v15064_v61  ;;  %6609 = vmatmul.mubr.bf16.gmra.mrb[4].mxu1 %v15064_v61 }
 0x24b   :  { %6418 = vmatpush1.bf16.msra.mxu0 %v12178_v62  ;;  %6622 = vmatpush1.bf16.msra.mxu1 %v12181_v59  ;;  %v4882_v62 = vcombine.high %v4516_v23, %v14747_v63  ;;  %v4884_v59 = vcombine.high %v14745_v60, %v4548_v44  ;;  %v12252_v60 = vld [vmem:[%s16937_s1 + $0x13c4] ss:$16 sps:$4 sm:$0xff]   ;;  %v12255_v63 = vld [vmem:[%s16937_s1 + $0x13cc] ss:$16 sps:$4 sm:$0xff]   ;;  %v12289_v23 = vld [vmem:[%s16937_s1 + $0x1488] ss:$16 sps:$4 sm:$0xff]  }
 0x24c   :  { %6419 = vmatprep.subr.bf16.mxu0 %v12186_v5  ;;  %6623 = vmatprep.subr.bf16.mxu1 %v12189_v17  ;;  %v4886_v5 = vcombine.high %v14749_v6, %v14751_v12  ;;  %v4888_v17 = vcombine.high %v4580_v35, %v14754_v18  ;;  %v12292_v44 = vld [vmem:[%s16937_s1 + $0x14a0] ss:$16 sps:$4 sm:$0xff]   ;;  %v12303_v35 = vld [vmem:[%s16937_s1 + $0x14cc] ss:$16 sps:$4 sm:$0xff]  }
 0x24d   :  { %6445 = vmatprep.mubr.bf16.mxu0 %v14827_v26  ;;  %6649 = vmatprep.mubr.bf16.mxu1 %v14827_v26  ;;  %v12201_v26 = vld [vmem:[%s16937_s1 + $0x12ac] ss:$16 sps:$4 sm:$0xff]   ;;  %v4902_v6 = vrot.slane %v4882_v62, %v13089_v0  ;;  %v4916_v12 = vrot.slane %v4884_v59, %v13089_v0  ;;  %v12304_v62 = vld [vmem:[%s16937_s1 + $0x14e0] ss:$16 sps:$4 sm:$0xff]   ;;  %v12307_v59 = vld [vmem:[%s16937_s1 + $0x14e8] ss:$16 sps:$4 sm:$0xff]  }
 0x24e   :  { %v4930_v18 = vrot.slane %v4886_v5, %v13089_v0  ;;  %v12312_v5 = vld [vmem:[%s16937_s1 + $0x1504] ss:$16 sps:$4 sm:$0xff]  }
 0x24f   :  { %6420 = vmatpush1.bf16.msra.mxu0 %v12184_v30  ;;  %6624 = vmatpush1.bf16.msra.mxu1 %v12187_v34  ;;  %v12244_v30 = vld [vmem:[%s16937_s1 + $0x13a0] ss:$16 sps:$4 sm:$0xff]   ;;  %v12247_v34 = vld [vmem:[%s16937_s1 + $0x13a8] ss:$16 sps:$4 sm:$0xff]  }
 0x250   :  { %6421 = vmatprep.subr.bf16.mxu0 %v12192_v43  ;;  %6625 = vmatprep.subr.bf16.mxu1 %v12195_v45  ;;  %v4944_v43 = vrot.slane %v4888_v17, %v13089_v0  ;;  %v12250_v45 = vld [vmem:[%s16937_s1 + $0x13c0] ss:$16 sps:$4 sm:$0xff]   ;;  %v12315_v17 = vld [vmem:[%s16937_s1 + $0x150c] ss:$16 sps:$4 sm:$0xff]  }
 0x253   :  { %6422 = vmatpush1.bf16.msra.mxu0 %v12190_v49  ;;  %6626 = vmatpush1.bf16.msra.mxu1 %v12193_v2  ;;  %v12253_v49 = vld [vmem:[%s16937_s1 + $0x13c8] ss:$16 sps:$4 sm:$0xff]   ;;  %v12258_v2 = vld [vmem:[%s16937_s1 + $0x13e4] ss:$16 sps:$4 sm:$0xff]  }
 0x254   :  { %6423 = vmatprep.subr.bf16.mxu0 %v12198_v3  ;;  %6627 = vmatprep.subr.bf16.mxu1 %v12201_v26  ;;  %v12261_v3 = vld [vmem:[%s16937_s1 + $0x13ec] ss:$16 sps:$4 sm:$0xff]   ;;  %v4948_v26 = vcombine.high %v4902_v6, %v4916_v12 }
 0x257   :  { %6424 = vmatpush1.bf16.msra.mxu0 %v12196_v7  ;;  %6628 = vmatpush1.bf16.msra.mxu1 %v12199_v8  ;;  %v4952_v7 = vcombine.high %v4930_v18, %v4944_v43  ;;  %v4947_v8 = vcombine.low %v4902_v6, %v4916_v12  ;;  %v12316_v6 = vld [vmem:[%s16937_s1 + $0x1520] ss:$16 sps:$4 sm:$0xff]   ;;  %v12319_v12 = vld [vmem:[%s16937_s1 + $0x1528] ss:$16 sps:$4 sm:$0xff]  }
 0x258   :  { %6425 = vmatprep.subr.bf16.mxu0 %v12204_v4  ;;  %6629 = vmatprep.subr.bf16.mxu1 %v12207_v9  ;;  %v4951_v4 = vcombine.low %v4930_v18, %v4944_v43  ;;  %v12256_v9 = vld [vmem:[%s16937_s1 + $0x13e0] ss:$16 sps:$4 sm:$0xff]   ;;  %v12324_v18 = vld [vmem:[%s16937_s1 + $0x1544] ss:$16 sps:$4 sm:$0xff]   ;;  %v12327_v43 = vld [vmem:[%s16937_s1 + $0x154c] ss:$16 sps:$4 sm:$0xff]  }
 0x25b   :  { %6426 = vmatpush1.bf16.msra.mxu0 %v12202_v10  ;;  %6630 = vmatpush1.bf16.msra.mxu1 %v12205_v58  ;;  %v12259_v10 = vld [vmem:[%s16937_s1 + $0x13e8] ss:$16 sps:$4 sm:$0xff]   ;;  %v12264_v58 = vld [vmem:[%s16937_s1 + $0x1404] ss:$16 sps:$4 sm:$0xff]  }
 0x25c   :  { %6427 = vmatprep.subr.bf16.mxu0 %v12210_v11  ;;  %6631 = vmatprep.subr.bf16.mxu1 %v12213_v13  ;;  %v12267_v11 = vld [vmem:[%s16937_s1 + $0x140c] ss:$16 sps:$4 sm:$0xff]   ;;  %v4980_v13 = vrot.slane %v4948_v26, %v13089_v0  ;;  %v12328_v26 = vld [vmem:[%s16937_s1 + $0x1560] ss:$16 sps:$4 sm:$0xff]  }
 0x25f   :  { %6428 = vmatpush1.bf16.msra.mxu0 %v12208_v14  ;;  %6632 = vmatpush1.bf16.msra.mxu1 %v12211_v22  ;;  %v5008_v14 = vrot.slane %v4952_v7, %v13089_v0  ;;  %v15268_v22 = vrot.slane %v4947_v8, %v13089_v0  ;;  %v12331_v7 = vld [vmem:[%s16937_s1 + $0x1568] ss:$16 sps:$4 sm:$0xff]   ;;  %v12336_v8 = vld [vmem:[%s16937_s1 + $0x1584] ss:$16 sps:$4 sm:$0xff]  }
 0x260   :  { %6429 = vmatprep.subr.bf16.mxu0 %v12216_v41  ;;  %6633 = vmatprep.subr.bf16.mxu1 %v12219_v40  ;;  %v15271_v41 = vrot.slane %v4951_v4, %v13089_v0  ;;  %v12262_v40 = vld [vmem:[%s16937_s1 + $0x1400] ss:$16 sps:$4 sm:$0xff]   ;;  %v12339_v4 = vld [vmem:[%s16937_s1 + $0x158c] ss:$16 sps:$4 sm:$0xff]  }
 0x263   :  { %6430 = vmatpush1.bf16.msra.mxu0 %v12214_v21  ;;  %6634 = vmatpush1.bf16.msra.mxu1 %v12217_v20  ;;  %v12265_v21 = vld [vmem:[%s16937_s1 + $0x1408] ss:$16 sps:$4 sm:$0xff]   ;;  %v15279_v20 = vcombine.high %v4980_v13, %v5008_v14 }
 0x264   :  { %6431 = vmatprep.subr.bf16.mxu0 %v12222_v27  ;;  %6635 = vmatprep.subr.bf16.mxu1 %v12225_v29  ;;  %v12270_v27 = vld [vmem:[%s16937_s1 + $0x1424] ss:$16 sps:$4 sm:$0xff]   ;;  %v12273_v29 = vld [vmem:[%s16937_s1 + $0x142c] ss:$16 sps:$4 sm:$0xff]  }
 0x267   :  { %6432 = vmatpush1.bf16.msra.mxu0 %v12220_v47  ;;  %6636 = vmatpush1.bf16.msra.mxu1 %v12223_v46  ;;  %v15289_v47 = vcombine.high %v15268_v22, %v15271_v41  ;;  %v5064_v46 = vcombine.high %v15047_v38, %v15047_v38  ;;  %v12276_v38 = vld [vmem:[%s16937_s1 + $0x1444] ss:$16 sps:$4 sm:$0xff]  }
 0x268   :  { %6433 = vmatprep.subr.bf16.mxu0 %v12228_v37  ;;  %6637 = vmatprep.subr.bf16.mxu1 %v12231_v48  ;;  %v12268_v37 = vld [vmem:[%s16937_s1 + $0x1420] ss:$16 sps:$4 sm:$0xff]   ;;  %v12271_v48 = vld [vmem:[%s16937_s1 + $0x1428] ss:$16 sps:$4 sm:$0xff]  }
 0x26b   :  { %6434 = vmatpush1.bf16.msra.mxu0 %v12226_v1  ;;  %6638 = vmatpush1.bf16.msra.mxu1 %v12229_v25  ;;  %v5062_v1 = vcombine.high %v15064_v61, %v15064_v61  ;;  %v12274_v25 = vld [vmem:[%s16937_s1 + $0x1440] ss:$16 sps:$4 sm:$0xff]   ;;  %v12285_v61 = vld [vmem:[%s16937_s1 + $0x146c] ss:$16 sps:$4 sm:$0xff]  }
 0x26c   :  { %6435 = vmatprep.subr.bf16.mxu0 %v12234_v53  ;;  %6639 = vmatprep.subr.bf16.mxu1 %v12237_v15  ;;  %v12277_v53 = vld [vmem:[%s16937_s1 + $0x1448] ss:$16 sps:$4 sm:$0xff]   ;;  %v12282_v15 = vld [vmem:[%s16937_s1 + $0x1464] ss:$16 sps:$4 sm:$0xff]  }
 0x26f   :  { %6436 = vmatpush1.bf16.msra.mxu0 %v12232_v32  ;;  %6640 = vmatpush1.bf16.msra.mxu1 %v12235_v16  ;;  %v5015_v32 = vcombine.low %v4980_v13, %v5008_v14  ;;  %v12280_v16 = vld [vmem:[%s16937_s1 + $0x1460] ss:$16 sps:$4 sm:$0xff]   ;;  %v12343_v14 = vld [vmem:[%s16937_s1 + $0x15a8] ss:$16 sps:$4 sm:$0xff]  }
 0x270   :  { %6437 = vmatprep.subr.bf16.mxu0 %v12240_v52  ;;  %6641 = vmatprep.subr.bf16.mxu1 %v12243_v33  ;;  %v12283_v52 = vld [vmem:[%s16937_s1 + $0x1468] ss:$16 sps:$4 sm:$0xff]   ;;  %v12288_v33 = vld [vmem:[%s16937_s1 + $0x1484] ss:$16 sps:$4 sm:$0xff]   ;;  %v12340_v13 = vld [vmem:[%s16937_s1 + $0x15a0] ss:$16 sps:$4 sm:$0xff]  }
 0x273   :  { %6438 = vmatpush1.bf16.msra.mxu0 %v12238_v24  ;;  %6642 = vmatpush1.bf16.msra.mxu1 %v12241_v19  ;;  %v12298_v24 = vld [vmem:[%s16937_s1 + $0x14c0] ss:$16 sps:$4 sm:$0xff]   ;;  %v12301_v19 = vld [vmem:[%s16937_s1 + $0x14c8] ss:$16 sps:$4 sm:$0xff]  }
 0x274   :  { %6439 = vmatprep.subr.bf16.mxu0 %v12246_v56  ;;  %6643 = vmatprep.subr.bf16.mxu1 %v12249_v57  ;;  %v12306_v56 = vld [vmem:[%s16937_s1 + $0x14e4] ss:$16 sps:$4 sm:$0xff]   ;;  %v12309_v57 = vld [vmem:[%s16937_s1 + $0x14ec] ss:$16 sps:$4 sm:$0xff]  }
 0x277   :  { %6440 = vmatpush1.bf16.msra.mxu0 %v12244_v30  ;;  %6644 = vmatpush1.bf16.msra.mxu1 %v12247_v34  ;;  %v12310_v30 = vld [vmem:[%s16937_s1 + $0x1500] ss:$16 sps:$4 sm:$0xff]   ;;  %v12313_v34 = vld [vmem:[%s16937_s1 + $0x1508] ss:$16 sps:$4 sm:$0xff]  }
 0x278   :  { %6441 = vmatprep.subr.bf16.mxu0 %v12252_v60  ;;  %6645 = vmatprep.subr.bf16.mxu1 %v12255_v63  ;;  %v12318_v60 = vld [vmem:[%s16937_s1 + $0x1524] ss:$16 sps:$4 sm:$0xff]   ;;  %v12321_v63 = vld [vmem:[%s16937_s1 + $0x152c] ss:$16 sps:$4 sm:$0xff]  }
 0x27b   :  { %6442 = vmatpush1.bf16.msra.mxu0 %v12250_v45  ;;  %6646 = vmatpush1.bf16.msra.mxu1 %v12253_v49  ;;  %v12322_v45 = vld [vmem:[%s16937_s1 + $0x1540] ss:$16 sps:$4 sm:$0xff]   ;;  %v12325_v49 = vld [vmem:[%s16937_s1 + $0x1548] ss:$16 sps:$4 sm:$0xff]  }
 0x27c   :  { %6443 = vmatprep.subr.bf16.mxu0 %v12258_v2  ;;  %6647 = vmatprep.subr.bf16.mxu1 %v12261_v3  ;;  %v12330_v2 = vld [vmem:[%s16937_s1 + $0x1564] ss:$16 sps:$4 sm:$0xff]   ;;  %v12333_v3 = vld [vmem:[%s16937_s1 + $0x156c] ss:$16 sps:$4 sm:$0xff]  }
 0x27f   :  { %6444 = vmatpush1.bf16.msra.mxu0 %v12256_v9  ;;  %6648 = vmatpush1.bf16.msra.mxu1 %v12259_v10  ;;  %v12334_v9 = vld [vmem:[%s16937_s1 + $0x1580] ss:$16 sps:$4 sm:$0xff]   ;;  %v12337_v10 = vld [vmem:[%s16937_s1 + $0x1588] ss:$16 sps:$4 sm:$0xff]  }
 0x280   :  { %6464 = vmatprep.subr.bf16.mxu0 %v12264_v58  ;;  %6668 = vmatprep.subr.bf16.mxu1 %v12267_v11  ;;  %v12342_v58 = vld [vmem:[%s16937_s1 + $0x15a4] ss:$16 sps:$4 sm:$0xff]   ;;  %v12345_v11 = vld [vmem:[%s16937_s1 + $0x15ac] ss:$16 sps:$4 sm:$0xff]  }
 0x282   :  { %6446 = vmatmul.mubr.bf16.vlgmr.msra.gmra.mrb[0].mxu0 %v14837_v28  ;;  %6650 = vmatmul.mubr.bf16.vlgmr.msra.gmra.mrb[0].mxu1 %v14837_v28  ;;  %v12279_v28 = vld [vmem:[%s16937_s1 + $0x144c] ss:$16 sps:$4 sm:$0xff]  }
 0x283   :  { %6465 = vmatpush1.bf16.msra.mxu0 %v12262_v40  ;;  %6669 = vmatpush1.bf16.msra.mxu1 %v12265_v21  ;;  %v12348_v40 = vld [vmem:[%s16937_s1 + $0x15c4] ss:$16 sps:$4 sm:$0xff]   ;;  %v12351_v21 = vld [vmem:[%s16937_s1 + $0x15cc] ss:$16 sps:$4 sm:$0xff]  }
 0x284   :  { %6466 = vmatprep.subr.bf16.mxu0 %v12270_v27  ;;  %6670 = vmatprep.subr.bf16.mxu1 %v12273_v29  ;;  %v5017_v27 = vcombine.high %v15004_v42, %v15004_v42  ;;  %v12346_v29 = vld [vmem:[%s16937_s1 + $0x15c0] ss:$16 sps:$4 sm:$0xff]   ;;  %v12357_v42 = vld [vmem:[%s16937_s1 + $0x15ec] ss:$16 sps:$4 sm:$0xff]  }
 0x285   :  { %6455 = vmatprep.mubr.bf16.mxu0 %v5064_v46  ;;  %6659 = vmatprep.mubr.bf16.mxu1 %v5064_v46  ;;  %v12349_v46 = vld [vmem:[%s16937_s1 + $0x15c8] ss:$16 sps:$4 sm:$0xff]  }
 0x287   :  { %6467 = vmatpush1.bf16.msra.mxu0 %v12268_v37  ;;  %6671 = vmatpush1.bf16.msra.mxu1 %v12271_v48  ;;  %v12354_v37 = vld [vmem:[%s16937_s1 + $0x15e4] ss:$16 sps:$4 sm:$0xff]   ;;  %v5031_v48 = vrot.slane %v5017_v27, %v13089_v0  ;;  %v15648_v27 = vld.sshfl [vmem:[%s16938_s0 + $0x78] sm:$0xff pattern:$0x75316420] }
 0x288   :  { %6468 = vmatprep.subr.bf16.mxu0 %v12276_v38  ;;  %6672 = vmatprep.subr.bf16.mxu1 %v12279_v28  ;;  %v12352_v38 = vld [vmem:[%s16937_s1 + $0x15e0] ss:$16 sps:$4 sm:$0xff]   ;;  %v12355_v28 = vld [vmem:[%s16937_s1 + $0x15e8] ss:$16 sps:$4 sm:$0xff]  }
 0x28a   :  { %6456 = vmatmul.mubr.bf16.gmra.mrb[4].mxu0 %v5062_v1  ;;  %6660 = vmatmul.mubr.bf16.gmra.mrb[4].mxu1 %v5062_v1  ;;  %v12360_v1 = vld [vmem:[%s16937_s1 + $0x1604] ss:$16 sps:$4 sm:$0xff]  }
 0x28b   :  { %6469 = vmatpush1.bf16.msra.mxu0 %v12274_v25  ;;  %6673 = vmatpush1.bf16.msra.mxu1 %v12277_v53  ;;  %v12363_v25 = vld [vmem:[%s16937_s1 + $0x160c] ss:$16 sps:$4 sm:$0xff]   ;;  %v5033_v53 = vcombine.high %v5031_v48, %v5031_v48 }
 0x28c   :  { %6470 = vmatprep.subr.bf16.mxu0 %v12282_v15  ;;  %6674 = vmatprep.subr.bf16.mxu1 %v12285_v61  ;;  %v5011_v15 = vcombine.low %v15268_v22, %v15271_v41  ;;  %v12358_v61 = vld [vmem:[%s16937_s1 + $0x1600] ss:$16 sps:$4 sm:$0xff]   ;;  %v12369_v22 = vld [vmem:[%s16937_s1 + $0x162c] ss:$16 sps:$4 sm:$0xff]  }
 0x28d   :  { %6496 = vmatprep.mubr.bf16.mxu0 %v5015_v32  ;;  %6700 = vmatprep.mubr.bf16.mxu1 %v5015_v32  ;;  %v12361_v32 = vld [vmem:[%s16937_s1 + $0x1608] ss:$16 sps:$4 sm:$0xff]   ;;  %v15495_v41 = vrot.slane %v5033_v53, %v13089_v0 }
 0x28f   :  { %6471 = vmatpush1.bf16.msra.mxu0 %v12280_v16  ;;  %6675 = vmatpush1.bf16.msra.mxu1 %v12283_v52  ;;  %v12366_v16 = vld [vmem:[%s16937_s1 + $0x1624] ss:$16 sps:$4 sm:$0xff]   ;;  %v12364_v52 = vld [vmem:[%s16937_s1 + $0x1620] ss:$16 sps:$4 sm:$0xff]  }
 0x290   :  { %6472 = vmatprep.subr.bf16.mxu0 %v12288_v33  ;;  %6676 = vmatprep.subr.bf16.mxu1 %v12291_v36  ;;  %v12367_v33 = vld [vmem:[%s16937_s1 + $0x1628] ss:$16 sps:$4 sm:$0xff]   ;;  %v12372_v36 = vld [vmem:[%s16937_s1 + $0x1644] ss:$16 sps:$4 sm:$0xff]  }
 0x293   :  { %6473 = vmatpush1.bf16.msra.mxu0 %v12286_v51  ;;  %6677 = vmatpush1.bf16.msra.mxu1 %v12289_v23  ;;  %v12375_v51 = vld [vmem:[%s16937_s1 + $0x164c] ss:$16 sps:$4 sm:$0xff]   ;;  %v15512_v23 = vrot.slane %v5031_v48, %v13089_v0  ;;  %v12420_v48 = vld [vmem:[%s16937_s1 + $0x1744] ss:$16 sps:$4 sm:$0xff]  }
 0x294   :  { %6474 = vmatprep.subr.bf16.mxu0 %v12294_v31  ;;  %6678 = vmatprep.subr.bf16.mxu1 %v12297_v39  ;;  %v12370_v31 = vld [vmem:[%s16937_s1 + $0x1640] ss:$16 sps:$4 sm:$0xff]   ;;  %v12373_v39 = vld [vmem:[%s16937_s1 + $0x1648] ss:$16 sps:$4 sm:$0xff]  }
 0x297   :  { %6475 = vmatpush1.bf16.msra.mxu0 %v12292_v44  ;;  %6679 = vmatpush1.bf16.msra.mxu1 %v12295_v54  ;;  %v12378_v44 = vld [vmem:[%s16937_s1 + $0x1664] ss:$16 sps:$4 sm:$0xff]   ;;  %v12381_v54 = vld [vmem:[%s16937_s1 + $0x166c] ss:$16 sps:$4 sm:$0xff]  }
 0x298   :  { %6476 = vmatprep.subr.bf16.mxu0 %v12300_v55  ;;  %6680 = vmatprep.subr.bf16.mxu1 %v12303_v35  ;;  %v12376_v55 = vld [vmem:[%s16937_s1 + $0x1660] ss:$16 sps:$4 sm:$0xff]   ;;  %v12379_v35 = vld [vmem:[%s16937_s1 + $0x1668] ss:$16 sps:$4 sm:$0xff]  }
 0x29b   :  { %6477 = vmatpush1.bf16.msra.mxu0 %v12298_v24  ;;  %6681 = vmatpush1.bf16.msra.mxu1 %v12301_v19  ;;  %v12384_v24 = vld [vmem:[%s16937_s1 + $0x1684] ss:$16 sps:$4 sm:$0xff]   ;;  %v12387_v19 = vld [vmem:[%s16937_s1 + $0x168c] ss:$16 sps:$4 sm:$0xff]  }
 0x29c   :  { %6478 = vmatprep.subr.bf16.mxu0 %v12306_v56  ;;  %6682 = vmatprep.subr.bf16.mxu1 %v12309_v57  ;;  %v12382_v56 = vld [vmem:[%s16937_s1 + $0x1680] ss:$16 sps:$4 sm:$0xff]   ;;  %v12385_v57 = vld [vmem:[%s16937_s1 + $0x1688] ss:$16 sps:$4 sm:$0xff]  }
 0x29f   :  { %6479 = vmatpush1.bf16.msra.mxu0 %v12304_v62  ;;  %6683 = vmatpush1.bf16.msra.mxu1 %v12307_v59  ;;  %v12390_v62 = vld [vmem:[%s16937_s1 + $0x16a4] ss:$16 sps:$4 sm:$0xff]   ;;  %v12388_v59 = vld [vmem:[%s16937_s1 + $0x16a0] ss:$16 sps:$4 sm:$0xff]  }
 0x2a0   :  { %6480 = vmatprep.subr.bf16.mxu0 %v12312_v5  ;;  %6684 = vmatprep.subr.bf16.mxu1 %v12315_v17  ;;  %v12391_v5 = vld [vmem:[%s16937_s1 + $0x16a8] ss:$16 sps:$4 sm:$0xff]   ;;  %v12396_v17 = vld [vmem:[%s16937_s1 + $0x16c4] ss:$16 sps:$4 sm:$0xff]  }
 0x2a3   :  { %6481 = vmatpush1.bf16.msra.mxu0 %v12310_v30  ;;  %6685 = vmatpush1.bf16.msra.mxu1 %v12313_v34  ;;  %v12399_v30 = vld [vmem:[%s16937_s1 + $0x16cc] ss:$16 sps:$4 sm:$0xff]   ;;  %v12394_v34 = vld [vmem:[%s16937_s1 + $0x16c0] ss:$16 sps:$4 sm:$0xff]  }
 0x2a4   :  { %6482 = vmatprep.subr.bf16.mxu0 %v12318_v60  ;;  %6686 = vmatprep.subr.bf16.mxu1 %v12321_v63  ;;  %v12397_v60 = vld [vmem:[%s16937_s1 + $0x16c8] ss:$16 sps:$4 sm:$0xff]   ;;  %v12402_v63 = vld [vmem:[%s16937_s1 + $0x16e4] ss:$16 sps:$4 sm:$0xff]  }
 0x2a7   :  { %6483 = vmatpush1.bf16.msra.mxu0 %v12316_v6  ;;  %6687 = vmatpush1.bf16.msra.mxu1 %v12319_v12  ;;  %v12405_v6 = vld [vmem:[%s16937_s1 + $0x16ec] ss:$16 sps:$4 sm:$0xff]   ;;  %v12400_v12 = vld [vmem:[%s16937_s1 + $0x16e0] ss:$16 sps:$4 sm:$0xff]  }
 0x2a8   :  { %6484 = vmatprep.subr.bf16.mxu0 %v12324_v18  ;;  %6688 = vmatprep.subr.bf16.mxu1 %v12327_v43  ;;  %v12403_v18 = vld [vmem:[%s16937_s1 + $0x16e8] ss:$16 sps:$4 sm:$0xff]   ;;  %v12408_v43 = vld [vmem:[%s16937_s1 + $0x1704] ss:$16 sps:$4 sm:$0xff]  }
 0x2ab   :  { %6485 = vmatpush1.bf16.msra.mxu0 %v12322_v45  ;;  %6689 = vmatpush1.bf16.msra.mxu1 %v12325_v49  ;;  %v12411_v45 = vld [vmem:[%s16937_s1 + $0x170c] ss:$16 sps:$4 sm:$0xff]   ;;  %v12406_v49 = vld [vmem:[%s16937_s1 + $0x1700] ss:$16 sps:$4 sm:$0xff]  }
 0x2ac   :  { %6486 = vmatprep.subr.bf16.mxu0 %v12330_v2  ;;  %6690 = vmatprep.subr.bf16.mxu1 %v12333_v3  ;;  %v12409_v2 = vld [vmem:[%s16937_s1 + $0x1708] ss:$16 sps:$4 sm:$0xff]   ;;  %v12414_v3 = vld [vmem:[%s16937_s1 + $0x1724] ss:$16 sps:$4 sm:$0xff]  }
 0x2af   :  { %6487 = vmatpush1.bf16.msra.mxu0 %v12328_v26  ;;  %6691 = vmatpush1.bf16.msra.mxu1 %v12331_v7  ;;  %v12417_v26 = vld [vmem:[%s16937_s1 + $0x172c] ss:$16 sps:$4 sm:$0xff]   ;;  %v10784_v7 = vld.sshfl [vmem:[%s16938_s0 + $0x10] sm:$0xff pattern:$0x75316420] }
 0x2b0   :  { %6488 = vmatprep.subr.bf16.mxu0 %v12336_v8  ;;  %6692 = vmatprep.subr.bf16.mxu1 %v12339_v4  ;;  %v10785_v8 = vld.sshfl [vmem:[%s16938_s0 + $0x18] sm:$0xff pattern:$0x75316420]  ;;  %v15611_v4 = vld.sshfl [vmem:[%s16938_s0 + $0x20] sm:$0xff pattern:$0x75316420] }
 0x2b3   :  { %6489 = vmatpush1.bf16.msra.mxu0 %v12334_v9  ;;  %6693 = vmatpush1.bf16.msra.mxu1 %v12337_v10  ;;  %v15616_v9 = vld.sshfl [vmem:[%s16938_s0 + $0x28] sm:$0xff pattern:$0x75316420]  ;;  %v10788_v10 = vld.sshfl [vmem:[%s16938_s0 + $0x30] sm:$0xff pattern:$0x75316420] }
 0x2b4   :  { %6490 = vmatprep.subr.bf16.mxu0 %v12342_v58  ;;  %6694 = vmatprep.subr.bf16.mxu1 %v12345_v11  ;;  %v10789_v58 = vld.sshfl [vmem:[%s16938_s0 + $0x38] sm:$0xff pattern:$0x75316420]  ;;  %v15627_v11 = vld.sshfl [vmem:[%s16938_s0 + $0x50] sm:$0xff pattern:$0x75316420] }
 0x2b7   :  { %6491 = vmatpush1.bf16.msra.mxu0 %v12340_v13  ;;  %6695 = vmatpush1.bf16.msra.mxu1 %v12343_v14  ;;  %v15632_v13 = vld.sshfl [vmem:[%s16938_s0 + $0x58] sm:$0xff pattern:$0x75316420]  ;;  %v10792_v14 = vld.sshfl [vmem:[%s16938_s0 + $0x60] sm:$0xff pattern:$0x75316420] }
 0x2b8   :  { %6492 = vmatprep.subr.bf16.mxu0 %v12348_v40  ;;  %6696 = vmatprep.subr.bf16.mxu1 %v12351_v21  ;;  %v10793_v40 = vld.sshfl [vmem:[%s16938_s0 + $0x68] sm:$0xff pattern:$0x75316420]  ;;  %v15643_v21 = vld.sshfl [vmem:[%s16938_s0 + $0x70] sm:$0xff pattern:$0x75316420]  ;;  %v6868_v53 = vcombine.low %v15627_v11, %v15632_v13 }
 0x2bb   :  { %6493 = vmatpush1.bf16.msra.mxu0 %v12346_v29  ;;  %6697 = vmatpush1.bf16.msra.mxu1 %v12349_v46  ;;  %v12412_v29 = vld [vmem:[%s16937_s1 + $0x1720] ss:$16 sps:$4 sm:$0xff]   ;;  %v12415_v46 = vld [vmem:[%s16937_s1 + $0x1728] ss:$16 sps:$4 sm:$0xff]  }
 0x2bc   :  { %6494 = vmatprep.subr.bf16.mxu0 %v12354_v37  ;;  %6698 = vmatprep.subr.bf16.mxu1 %v12357_v42  ;;  %v6820_v37 = vcombine.low %v10784_v7, %v10785_v8  ;;  %v6821_v42 = vcombine.high %v10784_v7, %v10785_v8  ;;  %v12439_v7 = vld [vmem:[%s16937_s1 + $0x17a8] ss:$16 sps:$4 sm:$0xff]   ;;  %v12444_v8 = vld [vmem:[%s16937_s1 + $0x17c4] ss:$16 sps:$4 sm:$0xff]  }
 0x2bf   :  { %6495 = vmatpush1.bf16.msra.mxu0 %v12352_v38  ;;  %6699 = vmatpush1.bf16.msra.mxu1 %v12355_v28  ;;  %v12423_v38 = vld [vmem:[%s16937_s1 + $0x174c] ss:$16 sps:$4 sm:$0xff]   ;;  %v6836_v28 = vcombine.low %v15611_v4, %v15616_v9 }
 0x2c0   :  { %6515 = vmatprep.subr.bf16.mxu0 %v12360_v1  ;;  %6719 = vmatprep.subr.bf16.mxu1 %v12363_v25  ;;  %v6852_v1 = vcombine.low %v10788_v10, %v10789_v58  ;;  %v6853_v25 = vcombine.high %v10788_v10, %v10789_v58 }
 0x2c2   :  { %6497 = vmatmul.mubr.bf16.vlgmr.msra.gmra.mrb[0].mxu0 %v5011_v15  ;;  %6701 = vmatmul.mubr.bf16.vlgmr.msra.gmra.mrb[0].mxu1 %v5011_v15  ;;  %v6884_v15 = vcombine.low %v10792_v14, %v10793_v40 }
 0x2c3   :  { %6516 = vmatpush1.bf16.msra.mxu0 %v12358_v61  ;;  %6720 = vmatpush1.bf16.msra.mxu1 %v12361_v32  ;;  %v6885_v61 = vcombine.high %v10792_v14, %v10793_v40  ;;  %v6900_v32 = vcombine.low %v15643_v21, %v15648_v27  ;;  %v12442_v40 = vld [vmem:[%s16937_s1 + $0x17c0] ss:$16 sps:$4 sm:$0xff]  }
 0x2c4   :  { %6517 = vmatprep.subr.bf16.mxu0 %v12366_v16  ;;  %6721 = vmatprep.subr.bf16.mxu1 %v12369_v22  ;;  %v12418_v16 = vld [vmem:[%s16937_s1 + $0x1740] ss:$16 sps:$4 sm:$0xff]   ;;  %v12421_v22 = vld [vmem:[%s16937_s1 + $0x1748] ss:$16 sps:$4 sm:$0xff]  }
 0x2c5   :  { %6506 = vmatprep.mubr.bf16.mxu0 %v15495_v41  ;;  %6710 = vmatprep.mubr.bf16.mxu1 %v15495_v41 }
 0x2c7   :  { %6518 = vmatpush1.bf16.msra.mxu0 %v12364_v52  ;;  %6722 = vmatpush1.bf16.msra.mxu1 %v12367_v33  ;;  %v6902_v52 = vunpack.i.h.s16 %v6820_v37  ;;  %v12426_v33 = vld [vmem:[%s16937_s1 + $0x1764] ss:$16 sps:$4 sm:$0xff]   ;;  %v12453_v37 = vld [vmem:[%s16937_s1 + $0x17ec] ss:$16 sps:$4 sm:$0xff]  }
 0x2c8   :  { %6519 = vmatprep.subr.bf16.mxu0 %v12372_v36  ;;  %6723 = vmatprep.subr.bf16.mxu1 %v12375_v51  ;;  %v12429_v36 = vld [vmem:[%s16937_s1 + $0x176c] ss:$16 sps:$4 sm:$0xff]   ;;  %v6904_v51 = vunpack.i.h.s16 %v6821_v42 }
 0x2ca   :  { %6507 = vmatmul.mubr.bf16.gmra.mrb[4].mxu0 %v15512_v23  ;;  %6711 = vmatmul.mubr.bf16.gmra.mrb[4].mxu1 %v15512_v23 }
 0x2cb   :  { %6520 = vmatpush1.bf16.msra.mxu0 %v12370_v31  ;;  %6724 = vmatpush1.bf16.msra.mxu1 %v12373_v39  ;;  %v6905_v31 = vunpack.i.h.s16 %v6836_v28  ;;  %v6908_v39 = vunpack.i.h.s16 %v6852_v1  ;;  %v12448_v1 = vld [vmem:[%s16937_s1 + $0x17e0] ss:$16 sps:$4 sm:$0xff]  }
 0x2cc   :  { %6521 = vmatprep.subr.bf16.mxu0 %v12378_v44  ;;  %6725 = vmatprep.subr.bf16.mxu1 %v12381_v54  ;;  %v6910_v44 = vunpack.i.h.s16 %v6853_v25  ;;  %v6911_v54 = vunpack.i.h.s16 %v6868_v53  ;;  %v12456_v53 = vld [vmem:[%s16937_s1 + $0x1804] ss:$16 sps:$4 sm:$0xff]  }
 0x2cd   :  { %6547 = vmatprep.mubr.bf16.mxu0 %v15279_v20  ;;  %6751 = vmatprep.mubr.bf16.mxu1 %v15279_v20  ;;  %v12393_v20 = vld [vmem:[%s16937_s1 + $0x16ac] ss:$16 sps:$4 sm:$0xff]  }
 0x2cf   :  { %6522 = vmatpush1.bf16.msra.mxu0 %v12376_v55  ;;  %6726 = vmatpush1.bf16.msra.mxu1 %v12379_v35  ;;  %v6914_v55 = vunpack.i.h.s16 %v6884_v15  ;;  %v6916_v35 = vunpack.i.h.s16 %v6885_v61  ;;  %v12459_v15 = vld [vmem:[%s16937_s1 + $0x180c] ss:$16 sps:$4 sm:$0xff]  }
 0x2d0   :  { %6523 = vmatprep.subr.bf16.mxu0 %v12384_v24  ;;  %6727 = vmatprep.subr.bf16.mxu1 %v12387_v19  ;;  %v6917_v24 = vunpack.i.h.s16 %v6900_v32  ;;  %v12424_v19 = vld [vmem:[%s16937_s1 + $0x1760] ss:$16 sps:$4 sm:$0xff]  }
 0x2d3   :  { %6524 = vmatpush1.bf16.msra.mxu0 %v12382_v56  ;;  %6728 = vmatpush1.bf16.msra.mxu1 %v12385_v57  ;;  %v12427_v56 = vld [vmem:[%s16937_s1 + $0x1768] ss:$16 sps:$4 sm:$0xff]   ;;  %v6837_v57 = vcombine.high %v15611_v4, %v15616_v9  ;;  %v12447_v4 = vld [vmem:[%s16937_s1 + $0x17cc] ss:$16 sps:$4 sm:$0xff]  }
 0x2d4   :  { %6525 = vmatprep.subr.bf16.mxu0 %v12390_v62  ;;  %6729 = vmatprep.subr.bf16.mxu1 %v12393_v20  ;;  %v12432_v62 = vld [vmem:[%s16937_s1 + $0x1784] ss:$16 sps:$4 sm:$0xff]   ;;  %v12435_v20 = vld [vmem:[%s16937_s1 + $0x178c] ss:$16 sps:$4 sm:$0xff]  }
 0x2d7   :  { %6526 = vmatpush1.bf16.msra.mxu0 %v12388_v59  ;;  %6730 = vmatpush1.bf16.msra.mxu1 %v12391_v5  ;;  %v6869_v59 = vcombine.high %v15627_v11, %v15632_v13  ;;  %v15696_v5 = vpack.i.b16 %v6821_v42, %v6902_v52  ;;  %v12454_v52 = vld [vmem:[%s16937_s1 + $0x1800] ss:$16 sps:$4 sm:$0xff]  }
 0x2d8   :  { %6527 = vmatprep.subr.bf16.mxu0 %v12396_v17  ;;  %6731 = vmatprep.subr.bf16.mxu1 %v12399_v30  ;;  %v15698_v17 = vpack.i.b16 %v6905_v31, %v6904_v51  ;;  %v15700_v30 = vpack.i.b16 %v6853_v25, %v6908_v39  ;;  %v12451_v25 = vld [vmem:[%s16937_s1 + $0x17e8] ss:$16 sps:$4 sm:$0xff]   ;;  %v12462_v51 = vld [vmem:[%s16937_s1 + $0x1824] ss:$16 sps:$4 sm:$0xff]   ;;  %v12465_v31 = vld [vmem:[%s16937_s1 + $0x182c] ss:$16 sps:$4 sm:$0xff]  }
 0x2db   :  { %6528 = vmatpush1.bf16.msra.mxu0 %v12394_v34  ;;  %6732 = vmatpush1.bf16.msra.mxu1 %v12397_v60  ;;  %v15702_v34 = vpack.i.b16 %v6911_v54, %v6910_v44  ;;  %v15704_v60 = vpack.i.b16 %v6885_v61, %v6914_v55  ;;  %v5065_v44 = vcombine.high %v15495_v41, %v15495_v41  ;;  %v12460_v54 = vld [vmem:[%s16937_s1 + $0x1820] ss:$16 sps:$4 sm:$0xff]   ;;  %v12463_v55 = vld [vmem:[%s16937_s1 + $0x1828] ss:$16 sps:$4 sm:$0xff]   ;;  %v12468_v41 = vld [vmem:[%s16937_s1 + $0x1844] ss:$16 sps:$4 sm:$0xff]  }
 0x2dc   :  { %6529 = vmatprep.subr.bf16.mxu0 %v12402_v63  ;;  %6733 = vmatprep.subr.bf16.mxu1 %v12405_v6  ;;  %v15706_v63 = vpack.i.b16 %v6917_v24, %v6916_v35  ;;  %v12430_v6 = vld [vmem:[%s16937_s1 + $0x1780] ss:$16 sps:$4 sm:$0xff]   ;;  %v5063_v35 = vcombine.high %v15512_v23, %v15512_v23  ;;  %v12477_v23 = vld [vmem:[%s16937_s1 + $0x186c] ss:$16 sps:$4 sm:$0xff]  }
 0x2dd   :  { %v12466_v24 = vld [vmem:[%s16937_s1 + $0x1840] ss:$16 sps:$4 sm:$0xff]  }
 0x2df   :  { %6530 = vmatpush1.bf16.msra.mxu0 %v12400_v12  ;;  %6734 = vmatpush1.bf16.msra.mxu1 %v12403_v18  ;;  %v12433_v12 = vld [vmem:[%s16937_s1 + $0x1788] ss:$16 sps:$4 sm:$0xff]   ;;  %v12438_v18 = vld [vmem:[%s16937_s1 + $0x17a4] ss:$16 sps:$4 sm:$0xff]  }
 0x2e0   :  { %6531 = vmatprep.subr.bf16.mxu0 %v12408_v43  ;;  %6735 = vmatprep.subr.bf16.mxu1 %v12411_v45  ;;  %v12441_v43 = vld [vmem:[%s16937_s1 + $0x17ac] ss:$16 sps:$4 sm:$0xff]   ;;  %v7185_v45 = vcombine.low %v15696_v5, %v15698_v17 }
 0x2e2   :  { %v7199_v10 = vrot.slane %v7185_v45, %v13089_v0  ;;  %v12489_v45 = vld [vmem:[%s16937_s1 + $0x18ac] ss:$16 sps:$4 sm:$0xff]  }
 0x2e3   :  { %6532 = vmatpush1.bf16.msra.mxu0 %v12406_v49  ;;  %6736 = vmatpush1.bf16.msra.mxu1 %v12409_v2  ;;  %v7187_v49 = vcombine.low %v6837_v57, %v15700_v30  ;;  %v7189_v2 = vcombine.low %v15702_v34, %v6869_v59  ;;  %v12480_v59 = vld [vmem:[%s16937_s1 + $0x1884] ss:$16 sps:$4 sm:$0xff]  }
 0x2e4   :  { %6533 = vmatprep.subr.bf16.mxu0 %v12414_v3  ;;  %6737 = vmatprep.subr.bf16.mxu1 %v12417_v26  ;;  %v7191_v3 = vcombine.low %v15704_v60, %v15706_v63  ;;  %v12436_v26 = vld [vmem:[%s16937_s1 + $0x17a0] ss:$16 sps:$4 sm:$0xff]  }
 0x2e5   :  { %v7213_v58 = vrot.slane %v7187_v49, %v13089_v0  ;;  %v7227_v11 = vrot.slane %v7189_v2, %v13089_v0  ;;  %v12484_v49 = vld [vmem:[%s16937_s1 + $0x18a0] ss:$16 sps:$4 sm:$0xff]   ;;  %v12487_v2 = vld [vmem:[%s16937_s1 + $0x18a8] ss:$16 sps:$4 sm:$0xff]  }
 0x2e6   :  { %v7241_v14 = vrot.slane %v7191_v3, %v13089_v0  ;;  %v12492_v3 = vld [vmem:[%s16937_s1 + $0x18c4] ss:$16 sps:$4 sm:$0xff]  }
 0x2e7   :  { %6534 = vmatpush1.bf16.msra.mxu0 %v12412_v29  ;;  %6738 = vmatpush1.bf16.msra.mxu1 %v12415_v46  ;;  %v12445_v29 = vld [vmem:[%s16937_s1 + $0x17c8] ss:$16 sps:$4 sm:$0xff]   ;;  %v12450_v46 = vld [vmem:[%s16937_s1 + $0x17e4] ss:$16 sps:$4 sm:$0xff]   ;;  %v7250_v42 = vcombine.high %v7199_v10, %v7213_v58 }
 0x2e8   :  { %6535 = vmatprep.subr.bf16.mxu0 %v12420_v48  ;;  %6739 = vmatprep.subr.bf16.mxu1 %v12423_v38  ;;  %v7254_v48 = vcombine.high %v7227_v11, %v7241_v14  ;;  %v7249_v38 = vcombine.low %v7199_v10, %v7213_v58  ;;  %v7253_v28 = vcombine.low %v7227_v11, %v7241_v14  ;;  %v12501_v10 = vld [vmem:[%s16937_s1 + $0x18ec] ss:$16 sps:$4 sm:$0xff]   ;;  %v12496_v58 = vld [vmem:[%s16937_s1 + $0x18e0] ss:$16 sps:$4 sm:$0xff]   ;;  %v12499_v11 = vld [vmem:[%s16937_s1 + $0x18e8] ss:$16 sps:$4 sm:$0xff]  }
 0x2e9   :  { %v7277_v61 = vrot.slane %v7250_v42, %v13089_v0  ;;  %v12504_v14 = vld [vmem:[%s16937_s1 + $0x1904] ss:$16 sps:$4 sm:$0xff]   ;;  %v12513_v42 = vld [vmem:[%s16937_s1 + $0x192c] ss:$16 sps:$4 sm:$0xff]  }
 0x2ea   :  { %v7305_v32 = vrot.slane %v7254_v48, %v13089_v0  ;;  %v12508_v48 = vld [vmem:[%s16937_s1 + $0x1920] ss:$16 sps:$4 sm:$0xff]  }
 0x2eb   :  { %6536 = vmatpush1.bf16.msra.mxu0 %v12418_v16  ;;  %6740 = vmatpush1.bf16.msra.mxu1 %v12421_v22  ;;  %v15769_v16 = vrot.slane %v7249_v38, %v13089_v0  ;;  %v15772_v22 = vrot.slane %v7253_v28, %v13089_v0  ;;  %v12511_v38 = vld [vmem:[%s16937_s1 + $0x1928] ss:$16 sps:$4 sm:$0xff]   ;;  %v12516_v28 = vld [vmem:[%s16937_s1 + $0x1944] ss:$16 sps:$4 sm:$0xff]  }
 0x2ec   :  { %6537 = vmatprep.subr.bf16.mxu0 %v12426_v33  ;;  %6741 = vmatprep.subr.bf16.mxu1 %v12429_v36  ;;  %v12457_v33 = vld [vmem:[%s16937_s1 + $0x1808] ss:$16 sps:$4 sm:$0xff]   ;;  %v15780_v36 = vcombine.high %v7277_v61, %v7305_v32  ;;  %v7317_v57 = vcombine.low %v7277_v61, %v7305_v32  ;;  %v12525_v61 = vld [vmem:[%s16937_s1 + $0x196c] ss:$16 sps:$4 sm:$0xff]   ;;  %v12520_v32 = vld [vmem:[%s16937_s1 + $0x1960] ss:$16 sps:$4 sm:$0xff]  }
 0x2ed   :  { %v15790_v39 = vcombine.high %v15769_v16, %v15772_v22 }
 0x2ef   :  { %6538 = vmatpush1.bf16.msra.mxu0 %v12424_v19  ;;  %6742 = vmatpush1.bf16.msra.mxu1 %v12427_v56  ;;  %v12469_v19 = vld [vmem:[%s16937_s1 + $0x1848] ss:$16 sps:$4 sm:$0xff]   ;;  %v12474_v56 = vld [vmem:[%s16937_s1 + $0x1864] ss:$16 sps:$4 sm:$0xff]  }
 0x2f0   :  { %6539 = vmatprep.subr.bf16.mxu0 %v12432_v62  ;;  %6743 = vmatprep.subr.bf16.mxu1 %v12435_v20  ;;  %v12472_v62 = vld [vmem:[%s16937_s1 + $0x1860] ss:$16 sps:$4 sm:$0xff]   ;;  %v12475_v20 = vld [vmem:[%s16937_s1 + $0x1868] ss:$16 sps:$4 sm:$0xff]  }
 0x2f3   :  { %6540 = vmatpush1.bf16.msra.mxu0 %v12430_v6  ;;  %6744 = vmatpush1.bf16.msra.mxu1 %v12433_v12  ;;  %v12483_v6 = vld [vmem:[%s16937_s1 + $0x188c] ss:$16 sps:$4 sm:$0xff]   ;;  %v12478_v12 = vld [vmem:[%s16937_s1 + $0x1880] ss:$16 sps:$4 sm:$0xff]  }
 0x2f4   :  { %6541 = vmatprep.subr.bf16.mxu0 %v12438_v18  ;;  %6745 = vmatprep.subr.bf16.mxu1 %v12441_v43  ;;  %v12481_v18 = vld [vmem:[%s16937_s1 + $0x1888] ss:$16 sps:$4 sm:$0xff]   ;;  %v12486_v43 = vld [vmem:[%s16937_s1 + $0x18a4] ss:$16 sps:$4 sm:$0xff]  }
 0x2f7   :  { %6542 = vmatpush1.bf16.msra.mxu0 %v12436_v26  ;;  %6746 = vmatpush1.bf16.msra.mxu1 %v12439_v7  ;;  %v12495_v26 = vld [vmem:[%s16937_s1 + $0x18cc] ss:$16 sps:$4 sm:$0xff]   ;;  %v12490_v7 = vld [vmem:[%s16937_s1 + $0x18c0] ss:$16 sps:$4 sm:$0xff]  }
 0x2f8   :  { %6543 = vmatprep.subr.bf16.mxu0 %v12444_v8  ;;  %6747 = vmatprep.subr.bf16.mxu1 %v12447_v4  ;;  %v12493_v8 = vld [vmem:[%s16937_s1 + $0x18c8] ss:$16 sps:$4 sm:$0xff]   ;;  %v12498_v4 = vld [vmem:[%s16937_s1 + $0x18e4] ss:$16 sps:$4 sm:$0xff]  }
 0x2fb   :  { %6544 = vmatpush1.bf16.msra.mxu0 %v12442_v40  ;;  %6748 = vmatpush1.bf16.msra.mxu1 %v12445_v29  ;;  %v12507_v40 = vld [vmem:[%s16937_s1 + $0x190c] ss:$16 sps:$4 sm:$0xff]   ;;  %v12502_v29 = vld [vmem:[%s16937_s1 + $0x1900] ss:$16 sps:$4 sm:$0xff]  }
 0x2fc   :  { %6545 = vmatprep.subr.bf16.mxu0 %v12450_v46  ;;  %6749 = vmatprep.subr.bf16.mxu1 %v12453_v37  ;;  %v12505_v46 = vld [vmem:[%s16937_s1 + $0x1908] ss:$16 sps:$4 sm:$0xff]   ;;  %v12510_v37 = vld [vmem:[%s16937_s1 + $0x1924] ss:$16 sps:$4 sm:$0xff]  }
 0x2ff   :  { %6546 = vmatpush1.bf16.msra.mxu0 %v12448_v1  ;;  %6750 = vmatpush1.bf16.msra.mxu1 %v12451_v25  ;;  %v12519_v1 = vld [vmem:[%s16937_s1 + $0x194c] ss:$16 sps:$4 sm:$0xff]   ;;  %v12514_v25 = vld [vmem:[%s16937_s1 + $0x1940] ss:$16 sps:$4 sm:$0xff]  }
 0x300   :  { %8666 = vmatprep.subr.bf16.mxu0 %v12456_v53  ;;  %8870 = vmatprep.subr.bf16.mxu1 %v12459_v15  ;;  %v12517_v53 = vld [vmem:[%s16937_s1 + $0x1948] ss:$16 sps:$4 sm:$0xff]   ;;  %v12522_v15 = vld [vmem:[%s16937_s1 + $0x1964] ss:$16 sps:$4 sm:$0xff]  }
 0x302   :  { %6548 = vmatmul.mubr.bf16.vlgmr.msra.gmra.mrb[0].mxu0 %v15289_v47  ;;  %6752 = vmatmul.mubr.bf16.vlgmr.msra.gmra.mrb[0].mxu1 %v15289_v47  ;;  %v12471_v47 = vld [vmem:[%s16937_s1 + $0x184c] ss:$16 sps:$4 sm:$0xff]  }
 0x303   :  { %8667 = vmatpush1.bf16.msra.mxu0 %v12454_v52  ;;  %8871 = vmatpush1.bf16.msra.mxu1 %v12457_v33  ;;  %v12523_v52 = vld [vmem:[%s16937_s1 + $0x1968] ss:$16 sps:$4 sm:$0xff]   ;;  %v12528_v33 = vld [vmem:[%s16937_s1 + $0x1984] ss:$16 sps:$4 sm:$0xff]  }
 0x304   :  { %8668 = vmatprep.subr.bf16.mxu0 %v12462_v51  ;;  %8872 = vmatprep.subr.bf16.mxu1 %v12465_v31  ;;  %v12531_v51 = vld [vmem:[%s16937_s1 + $0x198c] ss:$16 sps:$4 sm:$0xff]   ;;  %v12526_v31 = vld [vmem:[%s16937_s1 + $0x1980] ss:$16 sps:$4 sm:$0xff]  }
 0x305   :  { %6557 = vmatprep.mubr.bf16.mxu0 %v5065_v44  ;;  %6761 = vmatprep.mubr.bf16.mxu1 %v5065_v44  ;;  %v12529_v44 = vld [vmem:[%s16937_s1 + $0x1988] ss:$16 sps:$4 sm:$0xff]  }
 0x307   :  { %8669 = vmatpush1.bf16.msra.mxu0 %v12460_v54  ;;  %8873 = vmatpush1.bf16.msra.mxu1 %v12463_v55  ;;  %v12534_v54 = vld [vmem:[%s16937_s1 + $0x19a4] ss:$16 sps:$4 sm:$0xff]   ;;  %v12537_v55 = vld [vmem:[%s16937_s1 + $0x19ac] ss:$16 sps:$4 sm:$0xff]  }
 0x308   :  { %8670 = vmatprep.subr.bf16.mxu0 %v12468_v41  ;;  %8874 = vmatprep.subr.bf16.mxu1 %v12471_v47  ;;  %v12532_v41 = vld [vmem:[%s16937_s1 + $0x19a0] ss:$16 sps:$4 sm:$0xff]   ;;  %v12535_v47 = vld [vmem:[%s16937_s1 + $0x19a8] ss:$16 sps:$4 sm:$0xff]  }
 0x30a   :  { %6558 = vmatmul.mubr.bf16.gmra.mrb[4].mxu0 %v5063_v35  ;;  %6762 = vmatmul.mubr.bf16.gmra.mrb[4].mxu1 %v5063_v35  ;;  %v12540_v35 = vld [vmem:[%s16937_s1 + $0x19c4] ss:$16 sps:$4 sm:$0xff]  }
 0x30b   :  { %8671 = vmatpush1.bf16.msra.mxu0 %v12466_v24  ;;  %8875 = vmatpush1.bf16.msra.mxu1 %v12469_v19  ;;  %v12543_v24 = vld [vmem:[%s16937_s1 + $0x19cc] ss:$16 sps:$4 sm:$0xff]   ;;  %v6901_v19 = vcombine.high %v15643_v21, %v15648_v27 }
 0x30c   :  { %8672 = vmatprep.subr.bf16.mxu0 %v12474_v56  ;;  %8876 = vmatprep.subr.bf16.mxu1 %v12477_v23  ;;  %v12538_v56 = vld [vmem:[%s16937_s1 + $0x19c0] ss:$16 sps:$4 sm:$0xff]   ;;  %v12541_v23 = vld [vmem:[%s16937_s1 + $0x19c8] ss:$16 sps:$4 sm:$0xff]   ;;  %v12549_v21 = vld [vmem:[%s16937_s1 + $0x19ec] ss:$16 sps:$4 sm:$0xff]  }
 0x30d   :  { %8698 = vmatprep.mubr.bf16.mxu0 %v7317_v57  ;;  %8902 = vmatprep.mubr.bf16.mxu1 %v7317_v57  ;;  %v12546_v57 = vld [vmem:[%s16937_s1 + $0x19e4] ss:$16 sps:$4 sm:$0xff]   ;;  %v7328_v27 = vrot.slane %v6901_v19, %v13089_v0  ;;  %v12615_v19 = vld [vmem:[%s16937_s1 + $0x1b4c] ss:$16 sps:$4 sm:$0xff]  }
 0x30f   :  { %8673 = vmatpush1.bf16.msra.mxu0 %v12472_v62  ;;  %8877 = vmatpush1.bf16.msra.mxu1 %v12475_v20  ;;  %v12544_v62 = vld [vmem:[%s16937_s1 + $0x19e0] ss:$16 sps:$4 sm:$0xff]   ;;  %v12547_v20 = vld [vmem:[%s16937_s1 + $0x19e8] ss:$16 sps:$4 sm:$0xff]  }
 0x310   :  { %8674 = vmatprep.subr.bf16.mxu0 %v12480_v59  ;;  %8878 = vmatprep.subr.bf16.mxu1 %v12483_v6  ;;  %v12552_v59 = vld [vmem:[%s16937_s1 + $0x1a04] ss:$16 sps:$4 sm:$0xff]   ;;  %v12555_v6 = vld [vmem:[%s16937_s1 + $0x1a0c] ss:$16 sps:$4 sm:$0xff]  }
 0x313   :  { %8675 = vmatpush1.bf16.msra.mxu0 %v12478_v12  ;;  %8879 = vmatpush1.bf16.msra.mxu1 %v12481_v18  ;;  %v7336_v12 = vcombine.high %v7328_v27, %v7328_v27  ;;  %v7313_v18 = vcombine.low %v15769_v16, %v15772_v22  ;;  %v12561_v16 = vld [vmem:[%s16937_s1 + $0x1a2c] ss:$16 sps:$4 sm:$0xff]  }
 0x314   :  { %8676 = vmatprep.subr.bf16.mxu0 %v12486_v43  ;;  %8880 = vmatprep.subr.bf16.mxu1 %v12489_v45  ;;  %v12550_v43 = vld [vmem:[%s16937_s1 + $0x1a00] ss:$16 sps:$4 sm:$0xff]   ;;  %v12553_v45 = vld [vmem:[%s16937_s1 + $0x1a08] ss:$16 sps:$4 sm:$0xff]  }
 0x315   :  { %v15996_v22 = vrot.slane %v7336_v12, %v13089_v0  ;;  %v12625_v12 = vld [vmem:[%s16937_s1 + $0x1b88] ss:$16 sps:$4 sm:$0xff]  }
 0x317   :  { %8677 = vmatpush1.bf16.msra.mxu0 %v12484_v49  ;;  %8881 = vmatpush1.bf16.msra.mxu1 %v12487_v2  ;;  %v12558_v49 = vld [vmem:[%s16937_s1 + $0x1a24] ss:$16 sps:$4 sm:$0xff]   ;;  %v12556_v2 = vld [vmem:[%s16937_s1 + $0x1a20] ss:$16 sps:$4 sm:$0xff]  }
 0x318   :  { %8678 = vmatprep.subr.bf16.mxu0 %v12492_v3  ;;  %8882 = vmatprep.subr.bf16.mxu1 %v12495_v26  ;;  %v12559_v3 = vld [vmem:[%s16937_s1 + $0x1a28] ss:$16 sps:$4 sm:$0xff]   ;;  %v12564_v26 = vld [vmem:[%s16937_s1 + $0x1a44] ss:$16 sps:$4 sm:$0xff]  }
 0x31b   :  { %8679 = vmatpush1.bf16.msra.mxu0 %v12490_v7  ;;  %8883 = vmatpush1.bf16.msra.mxu1 %v12493_v8  ;;  %v12567_v7 = vld [vmem:[%s16937_s1 + $0x1a4c] ss:$16 sps:$4 sm:$0xff]   ;;  %v16013_v8 = vrot.slane %v7328_v27, %v13089_v0  ;;  %v12616_v27 = vld [vmem:[%s16937_s1 + $0x1b60] ss:$16 sps:$4 sm:$0xff]  }
 0x31c   :  { %8680 = vmatprep.subr.bf16.mxu0 %v12498_v4  ;;  %8884 = vmatprep.subr.bf16.mxu1 %v12501_v10  ;;  %v12562_v4 = vld [vmem:[%s16937_s1 + $0x1a40] ss:$16 sps:$4 sm:$0xff]   ;;  %v12565_v10 = vld [vmem:[%s16937_s1 + $0x1a48] ss:$16 sps:$4 sm:$0xff]  }
 0x31f   :  { %8681 = vmatpush1.bf16.msra.mxu0 %v12496_v58  ;;  %8885 = vmatpush1.bf16.msra.mxu1 %v12499_v11  ;;  %v12570_v58 = vld [vmem:[%s16937_s1 + $0x1a64] ss:$16 sps:$4 sm:$0xff]   ;;  %v12573_v11 = vld [vmem:[%s16937_s1 + $0x1a6c] ss:$16 sps:$4 sm:$0xff]  }
 0x320   :  { %8682 = vmatprep.subr.bf16.mxu0 %v12504_v14  ;;  %8886 = vmatprep.subr.bf16.mxu1 %v12507_v40  ;;  %v12568_v14 = vld [vmem:[%s16937_s1 + $0x1a60] ss:$16 sps:$4 sm:$0xff]   ;;  %v12571_v40 = vld [vmem:[%s16937_s1 + $0x1a68] ss:$16 sps:$4 sm:$0xff]  }
 0x323   :  { %8683 = vmatpush1.bf16.msra.mxu0 %v12502_v29  ;;  %8887 = vmatpush1.bf16.msra.mxu1 %v12505_v46  ;;  %v12576_v29 = vld [vmem:[%s16937_s1 + $0x1a84] ss:$16 sps:$4 sm:$0xff]   ;;  %v12579_v46 = vld [vmem:[%s16937_s1 + $0x1a8c] ss:$16 sps:$4 sm:$0xff]  }
 0x324   :  { %8684 = vmatprep.subr.bf16.mxu0 %v12510_v37  ;;  %8888 = vmatprep.subr.bf16.mxu1 %v12513_v42  ;;  %v12574_v37 = vld [vmem:[%s16937_s1 + $0x1a80] ss:$16 sps:$4 sm:$0xff]   ;;  %v12577_v42 = vld [vmem:[%s16937_s1 + $0x1a88] ss:$16 sps:$4 sm:$0xff]  }
 0x327   :  { %8685 = vmatpush1.bf16.msra.mxu0 %v12508_v48  ;;  %8889 = vmatpush1.bf16.msra.mxu1 %v12511_v38  ;;  %v12582_v48 = vld [vmem:[%s16937_s1 + $0x1aa4] ss:$16 sps:$4 sm:$0xff]   ;;  %v12580_v38 = vld [vmem:[%s16937_s1 + $0x1aa0] ss:$16 sps:$4 sm:$0xff]  }
 0x328   :  { %8686 = vmatprep.subr.bf16.mxu0 %v12516_v28  ;;  %8890 = vmatprep.subr.bf16.mxu1 %v12519_v1  ;;  %v12583_v28 = vld [vmem:[%s16937_s1 + $0x1aa8] ss:$16 sps:$4 sm:$0xff]   ;;  %v12588_v1 = vld [vmem:[%s16937_s1 + $0x1ac4] ss:$16 sps:$4 sm:$0xff]  }
 0x32b   :  { %8687 = vmatpush1.bf16.msra.mxu0 %v12514_v25  ;;  %8891 = vmatpush1.bf16.msra.mxu1 %v12517_v53  ;;  %v12591_v25 = vld [vmem:[%s16937_s1 + $0x1acc] ss:$16 sps:$4 sm:$0xff]   ;;  %v12586_v53 = vld [vmem:[%s16937_s1 + $0x1ac0] ss:$16 sps:$4 sm:$0xff]  }
 0x32c   :  { %8688 = vmatprep.subr.bf16.mxu0 %v12522_v15  ;;  %8892 = vmatprep.subr.bf16.mxu1 %v12525_v61  ;;  %v12589_v15 = vld [vmem:[%s16937_s1 + $0x1ac8] ss:$16 sps:$4 sm:$0xff]   ;;  %v12594_v61 = vld [vmem:[%s16937_s1 + $0x1ae4] ss:$16 sps:$4 sm:$0xff]  }
 0x32f   :  { %8689 = vmatpush1.bf16.msra.mxu0 %v12520_v32  ;;  %8893 = vmatpush1.bf16.msra.mxu1 %v12523_v52  ;;  %v12597_v32 = vld [vmem:[%s16937_s1 + $0x1aec] ss:$16 sps:$4 sm:$0xff]   ;;  %v12592_v52 = vld [vmem:[%s16937_s1 + $0x1ae0] ss:$16 sps:$4 sm:$0xff]  }
 0x330   :  { %8690 = vmatprep.subr.bf16.mxu0 %v12528_v33  ;;  %8894 = vmatprep.subr.bf16.mxu1 %v12531_v51  ;;  %v12595_v33 = vld [vmem:[%s16937_s1 + $0x1ae8] ss:$16 sps:$4 sm:$0xff]   ;;  %v12600_v51 = vld [vmem:[%s16937_s1 + $0x1b04] ss:$16 sps:$4 sm:$0xff]  }
 0x333   :  { %8691 = vmatpush1.bf16.msra.mxu0 %v12526_v31  ;;  %8895 = vmatpush1.bf16.msra.mxu1 %v12529_v44  ;;  %v12603_v31 = vld [vmem:[%s16937_s1 + $0x1b0c] ss:$16 sps:$4 sm:$0xff]   ;;  %v12598_v44 = vld [vmem:[%s16937_s1 + $0x1b00] ss:$16 sps:$4 sm:$0xff]  }
 0x334   :  { %8692 = vmatprep.subr.bf16.mxu0 %v12534_v54  ;;  %8896 = vmatprep.subr.bf16.mxu1 %v12537_v55  ;;  %v12601_v54 = vld [vmem:[%s16937_s1 + $0x1b08] ss:$16 sps:$4 sm:$0xff]   ;;  %v12606_v55 = vld [vmem:[%s16937_s1 + $0x1b24] ss:$16 sps:$4 sm:$0xff]  }
 0x337   :  { %8693 = vmatpush1.bf16.msra.mxu0 %v12532_v41  ;;  %8897 = vmatpush1.bf16.msra.mxu1 %v12535_v47  ;;  %v12609_v41 = vld [vmem:[%s16937_s1 + $0x1b2c] ss:$16 sps:$4 sm:$0xff]   ;;  %v12604_v47 = vld [vmem:[%s16937_s1 + $0x1b20] ss:$16 sps:$4 sm:$0xff]  }
 0x338   :  { %8694 = vmatprep.subr.bf16.mxu0 %v12540_v35  ;;  %8898 = vmatprep.subr.bf16.mxu1 %v12543_v24  ;;  %v12607_v35 = vld [vmem:[%s16937_s1 + $0x1b28] ss:$16 sps:$4 sm:$0xff]   ;;  %v12612_v24 = vld [vmem:[%s16937_s1 + $0x1b44] ss:$16 sps:$4 sm:$0xff]  }
 0x33b   :  { %8695 = vmatpush1.bf16.msra.mxu0 %v12538_v56  ;;  %8899 = vmatpush1.bf16.msra.mxu1 %v12541_v23  ;;  %v12610_v56 = vld [vmem:[%s16937_s1 + $0x1b40] ss:$16 sps:$4 sm:$0xff]   ;;  %v12613_v23 = vld [vmem:[%s16937_s1 + $0x1b48] ss:$16 sps:$4 sm:$0xff]  }
 0x33c   :  { %8696 = vmatprep.subr.bf16.mxu0 %v12546_v57  ;;  %8900 = vmatprep.subr.bf16.mxu1 %v12549_v21  ;;  %v12618_v57 = vld [vmem:[%s16937_s1 + $0x1b64] ss:$16 sps:$4 sm:$0xff]   ;;  %v12621_v21 = vld [vmem:[%s16937_s1 + $0x1b6c] ss:$16 sps:$4 sm:$0xff]  }
 0x33f   :  { %8697 = vmatpush1.bf16.msra.mxu0 %v12544_v62  ;;  %8901 = vmatpush1.bf16.msra.mxu1 %v12547_v20  ;;  %v12619_v62 = vld [vmem:[%s16937_s1 + $0x1b68] ss:$16 sps:$4 sm:$0xff]   ;;  %v12624_v20 = vld [vmem:[%s16937_s1 + $0x1b84] ss:$16 sps:$4 sm:$0xff]  }
 0x340   :  { %8717 = vmatprep.subr.bf16.mxu0 %v12552_v59  ;;  %8921 = vmatprep.subr.bf16.mxu1 %v12555_v6  ;;  %v12627_v59 = vld [vmem:[%s16937_s1 + $0x1b8c] ss:$16 sps:$4 sm:$0xff]   ;;  %v12622_v6 = vld [vmem:[%s16937_s1 + $0x1b80] ss:$16 sps:$4 sm:$0xff]  }
 0x342   :  { %8699 = vmatmul.mubr.bf16.vlgmr.msra.gmra.mrb[0].mxu0 %v7313_v18  ;;  %8903 = vmatmul.mubr.bf16.vlgmr.msra.gmra.mrb[0].mxu1 %v7313_v18  ;;  %v12630_v18 = vld [vmem:[%s16937_s1 + $0x1ba4] ss:$16 sps:$4 sm:$0xff]  }
 0x343   :  { %8718 = vmatpush1.bf16.msra.mxu0 %v12550_v43  ;;  %8922 = vmatpush1.bf16.msra.mxu1 %v12553_v45  ;;  %v12633_v43 = vld [vmem:[%s16937_s1 + $0x1bac] ss:$16 sps:$4 sm:$0xff]   ;;  %v7186_v45 = vcombine.high %v15696_v5, %v15698_v17 }
 0x344   :  { %8719 = vmatprep.subr.bf16.mxu0 %v12558_v49  ;;  %8923 = vmatprep.subr.bf16.mxu1 %v12561_v16  ;;  %v10799_v49 = vcombine.high %v15616_v9, %v15700_v30  ;;  %v10800_v16 = vcombine.high %v15702_v34, %v15632_v13  ;;  %v12636_v9 = vld [vmem:[%s16937_s1 + $0x1bc4] ss:$16 sps:$4 sm:$0xff]   ;;  %v12639_v13 = vld [vmem:[%s16937_s1 + $0x1bcc] ss:$16 sps:$4 sm:$0xff]  }
 0x345   :  { %8708 = vmatprep.mubr.bf16.mxu0 %v15996_v22  ;;  %8912 = vmatprep.mubr.bf16.mxu1 %v15996_v22  ;;  %v7206_v5 = vrot.slane %v7186_v45, %v13089_v0  ;;  %v12691_v45 = vld [vmem:[%s16937_s1 + $0x1ce8] ss:$16 sps:$4 sm:$0xff]  }
 0x346   :  { %v7220_v17 = vrot.slane %v10799_v49, %v13089_v0  ;;  %v7234_v30 = vrot.slane %v10800_v16, %v13089_v0  ;;  %v12696_v49 = vld [vmem:[%s16937_s1 + $0x1d04] ss:$16 sps:$4 sm:$0xff]   ;;  %v12699_v16 = vld [vmem:[%s16937_s1 + $0x1d0c] ss:$16 sps:$4 sm:$0xff]  }
 0x347   :  { %8720 = vmatpush1.bf16.msra.mxu0 %v12556_v2  ;;  %8924 = vmatpush1.bf16.msra.mxu1 %v12559_v3  ;;  %v7192_v2 = vcombine.high %v15704_v60, %v15706_v63  ;;  %v12628_v3 = vld [vmem:[%s16937_s1 + $0x1ba0] ss:$16 sps:$4 sm:$0xff]   ;;  %v12637_v63 = vld [vmem:[%s16937_s1 + $0x1bc8] ss:$16 sps:$4 sm:$0xff]  }
 0x348   :  { %8721 = vmatprep.subr.bf16.mxu0 %v12564_v26  ;;  %8925 = vmatprep.subr.bf16.mxu1 %v12567_v7  ;;  %v12631_v26 = vld [vmem:[%s16937_s1 + $0x1ba8] ss:$16 sps:$4 sm:$0xff]   ;;  %v12634_v60 = vld [vmem:[%s16937_s1 + $0x1bc0] ss:$16 sps:$4 sm:$0xff]   ;;  %v12642_v7 = vld [vmem:[%s16937_s1 + $0x1be4] ss:$16 sps:$4 sm:$0xff]  }
 0x349   :  { %v7248_v34 = vrot.slane %v7192_v2, %v13089_v0  ;;  %v12694_v2 = vld [vmem:[%s16937_s1 + $0x1d00] ss:$16 sps:$4 sm:$0xff]  }
 0x34a   :  { %8709 = vmatmul.mubr.bf16.gmra.mrb[4].mxu0 %v16013_v8  ;;  %8913 = vmatmul.mubr.bf16.gmra.mrb[4].mxu1 %v16013_v8 }
 0x34b   :  { %8722 = vmatpush1.bf16.msra.mxu0 %v12562_v4  ;;  %8926 = vmatpush1.bf16.msra.mxu1 %v12565_v10  ;;  %v12645_v4 = vld [vmem:[%s16937_s1 + $0x1bec] ss:$16 sps:$4 sm:$0xff]   ;;  %v7251_v10 = vcombine.low %v7206_v5, %v7220_v17 }
 0x34c   :  { %8723 = vmatprep.subr.bf16.mxu0 %v12570_v58  ;;  %8927 = vmatprep.subr.bf16.mxu1 %v12573_v11  ;;  %v7252_v58 = vcombine.high %v7206_v5, %v7220_v17  ;;  %v7255_v11 = vcombine.low %v7234_v30, %v7248_v34  ;;  %v12703_v5 = vld [vmem:[%s16937_s1 + $0x1d28] ss:$16 sps:$4 sm:$0xff]   ;;  %v12708_v17 = vld [vmem:[%s16937_s1 + $0x1d44] ss:$16 sps:$4 sm:$0xff]  }
 0x34d   :  { %8749 = vmatprep.mubr.bf16.mxu0 %v15780_v36  ;;  %8953 = vmatprep.mubr.bf16.mxu1 %v15780_v36  ;;  %v12585_v36 = vld [vmem:[%s16937_s1 + $0x1aac] ss:$16 sps:$4 sm:$0xff]  }
 0x34f   :  { %8724 = vmatpush1.bf16.msra.mxu0 %v12568_v14  ;;  %8928 = vmatpush1.bf16.msra.mxu1 %v12571_v40  ;;  %v7256_v14 = vcombine.high %v7234_v30, %v7248_v34  ;;  %v12640_v40 = vld [vmem:[%s16937_s1 + $0x1be0] ss:$16 sps:$4 sm:$0xff]   ;;  %v12711_v30 = vld [vmem:[%s16937_s1 + $0x1d4c] ss:$16 sps:$4 sm:$0xff]  }
 0x350   :  { %8725 = vmatprep.subr.bf16.mxu0 %v12576_v29  ;;  %8929 = vmatprep.subr.bf16.mxu1 %v12579_v46  ;;  %v12643_v29 = vld [vmem:[%s16937_s1 + $0x1be8] ss:$16 sps:$4 sm:$0xff]   ;;  %v12648_v46 = vld [vmem:[%s16937_s1 + $0x1c04] ss:$16 sps:$4 sm:$0xff]   ;;  %v12706_v34 = vld [vmem:[%s16937_s1 + $0x1d40] ss:$16 sps:$4 sm:$0xff]  }
 0x353   :  { %8726 = vmatpush1.bf16.msra.mxu0 %v12574_v37  ;;  %8930 = vmatpush1.bf16.msra.mxu1 %v12577_v42  ;;  %v12651_v37 = vld [vmem:[%s16937_s1 + $0x1c0c] ss:$16 sps:$4 sm:$0xff]   ;;  %v7284_v42 = vrot.slane %v7252_v58, %v13089_v0  ;;  %v12720_v58 = vld [vmem:[%s16937_s1 + $0x1d84] ss:$16 sps:$4 sm:$0xff]  }
 0x354   :  { %8727 = vmatprep.subr.bf16.mxu0 %v12582_v48  ;;  %8931 = vmatprep.subr.bf16.mxu1 %v12585_v36  ;;  %v7312_v48 = vrot.slane %v7256_v14, %v13089_v0  ;;  %v16202_v36 = vrot.slane %v7251_v10, %v13089_v0  ;;  %v12715_v10 = vld [vmem:[%s16937_s1 + $0x1d68] ss:$16 sps:$4 sm:$0xff]   ;;  %v12718_v14 = vld [vmem:[%s16937_s1 + $0x1d80] ss:$16 sps:$4 sm:$0xff]  }
 0x357   :  { %8728 = vmatpush1.bf16.msra.mxu0 %v12580_v38  ;;  %8932 = vmatpush1.bf16.msra.mxu1 %v12583_v28  ;;  %v16205_v38 = vrot.slane %v7255_v11, %v13089_v0  ;;  %v12646_v28 = vld [vmem:[%s16937_s1 + $0x1c00] ss:$16 sps:$4 sm:$0xff]   ;;  %v12723_v11 = vld [vmem:[%s16937_s1 + $0x1d8c] ss:$16 sps:$4 sm:$0xff]  }
 0x358   :  { %8729 = vmatprep.subr.bf16.mxu0 %v12588_v1  ;;  %8933 = vmatprep.subr.bf16.mxu1 %v12591_v25  ;;  %v12649_v1 = vld [vmem:[%s16937_s1 + $0x1c08] ss:$16 sps:$4 sm:$0xff]   ;;  %v16213_v25 = vcombine.high %v7284_v42, %v7312_v48 }
 0x35b   :  { %8730 = vmatpush1.bf16.msra.mxu0 %v12586_v53  ;;  %8934 = vmatpush1.bf16.msra.mxu1 %v12589_v15  ;;  %v16217_v53 = vcombine.high %v16202_v36, %v16205_v38  ;;  %v12654_v15 = vld [vmem:[%s16937_s1 + $0x1c24] ss:$16 sps:$4 sm:$0xff]  }
 0x35c   :  { %8731 = vmatprep.subr.bf16.mxu0 %v12594_v61  ;;  %8935 = vmatprep.subr.bf16.mxu1 %v12597_v32  ;;  %v12657_v61 = vld [vmem:[%s16937_s1 + $0x1c2c] ss:$16 sps:$4 sm:$0xff]   ;;  %v7368_v32 = vcombine.high %v15996_v22, %v15996_v22  ;;  %v12660_v22 = vld [vmem:[%s16937_s1 + $0x1c44] ss:$16 sps:$4 sm:$0xff]  }
 0x35f   :  { %8732 = vmatpush1.bf16.msra.mxu0 %v12592_v52  ;;  %8936 = vmatpush1.bf16.msra.mxu1 %v12595_v33  ;;  %v12652_v52 = vld [vmem:[%s16937_s1 + $0x1c20] ss:$16 sps:$4 sm:$0xff]   ;;  %v12655_v33 = vld [vmem:[%s16937_s1 + $0x1c28] ss:$16 sps:$4 sm:$0xff]  }
 0x360   :  { %8733 = vmatprep.subr.bf16.mxu0 %v12600_v51  ;;  %8937 = vmatprep.subr.bf16.mxu1 %v12603_v31  ;;  %v7366_v51 = vcombine.high %v16013_v8, %v16013_v8  ;;  %v12658_v31 = vld [vmem:[%s16937_s1 + $0x1c40] ss:$16 sps:$4 sm:$0xff]   ;;  %v12669_v8 = vld [vmem:[%s16937_s1 + $0x1c6c] ss:$16 sps:$4 sm:$0xff]  }
 0x363   :  { %8734 = vmatpush1.bf16.msra.mxu0 %v12598_v44  ;;  %8938 = vmatpush1.bf16.msra.mxu1 %v12601_v54  ;;  %v12661_v44 = vld [vmem:[%s16937_s1 + $0x1c48] ss:$16 sps:$4 sm:$0xff]   ;;  %v12666_v54 = vld [vmem:[%s16937_s1 + $0x1c64] ss:$16 sps:$4 sm:$0xff]  }
 0x364   :  { %8735 = vmatprep.subr.bf16.mxu0 %v12606_v55  ;;  %8939 = vmatprep.subr.bf16.mxu1 %v12609_v41  ;;  %v7319_v55 = vcombine.low %v7284_v42, %v7312_v48  ;;  %v12664_v41 = vld [vmem:[%s16937_s1 + $0x1c60] ss:$16 sps:$4 sm:$0xff]   ;;  %v12727_v42 = vld [vmem:[%s16937_s1 + $0x1da8] ss:$16 sps:$4 sm:$0xff]   ;;  %v12732_v48 = vld [vmem:[%s16937_s1 + $0x1dc4] ss:$16 sps:$4 sm:$0xff]  }
 0x367   :  { %8736 = vmatpush1.bf16.msra.mxu0 %v12604_v47  ;;  %8940 = vmatpush1.bf16.msra.mxu1 %v12607_v35  ;;  %v12667_v47 = vld [vmem:[%s16937_s1 + $0x1c68] ss:$16 sps:$4 sm:$0xff]   ;;  %v12672_v35 = vld [vmem:[%s16937_s1 + $0x1c84] ss:$16 sps:$4 sm:$0xff]  }
 0x368   :  { %8737 = vmatprep.subr.bf16.mxu0 %v12612_v24  ;;  %8941 = vmatprep.subr.bf16.mxu1 %v12615_v19  ;;  %v12675_v24 = vld [vmem:[%s16937_s1 + $0x1c8c] ss:$16 sps:$4 sm:$0xff]   ;;  %v12670_v19 = vld [vmem:[%s16937_s1 + $0x1c80] ss:$16 sps:$4 sm:$0xff]  }
 0x36b   :  { %8738 = vmatpush1.bf16.msra.mxu0 %v12610_v56  ;;  %8942 = vmatpush1.bf16.msra.mxu1 %v12613_v23  ;;  %v12673_v56 = vld [vmem:[%s16937_s1 + $0x1c88] ss:$16 sps:$4 sm:$0xff]   ;;  %v12678_v23 = vld [vmem:[%s16937_s1 + $0x1ca4] ss:$16 sps:$4 sm:$0xff]  }
 0x36c   :  { %8739 = vmatprep.subr.bf16.mxu0 %v12618_v57  ;;  %8943 = vmatprep.subr.bf16.mxu1 %v12621_v21  ;;  %v12681_v57 = vld [vmem:[%s16937_s1 + $0x1cac] ss:$16 sps:$4 sm:$0xff]   ;;  %v12676_v21 = vld [vmem:[%s16937_s1 + $0x1ca0] ss:$16 sps:$4 sm:$0xff]  }
 0x36f   :  { %8740 = vmatpush1.bf16.msra.mxu0 %v12616_v27  ;;  %8944 = vmatpush1.bf16.msra.mxu1 %v12619_v62  ;;  %v12679_v27 = vld [vmem:[%s16937_s1 + $0x1ca8] ss:$16 sps:$4 sm:$0xff]   ;;  %v12684_v62 = vld [vmem:[%s16937_s1 + $0x1cc4] ss:$16 sps:$4 sm:$0xff]  }
 0x370   :  { %8741 = vmatprep.subr.bf16.mxu0 %v12624_v20  ;;  %8945 = vmatprep.subr.bf16.mxu1 %v12627_v59  ;;  %v12687_v20 = vld [vmem:[%s16937_s1 + $0x1ccc] ss:$16 sps:$4 sm:$0xff]   ;;  %v12682_v59 = vld [vmem:[%s16937_s1 + $0x1cc0] ss:$16 sps:$4 sm:$0xff]  }
 0x373   :  { %8742 = vmatpush1.bf16.msra.mxu0 %v12622_v6  ;;  %8946 = vmatpush1.bf16.msra.mxu1 %v12625_v12  ;;  %v12685_v6 = vld [vmem:[%s16937_s1 + $0x1cc8] ss:$16 sps:$4 sm:$0xff]   ;;  %v12690_v12 = vld [vmem:[%s16937_s1 + $0x1ce4] ss:$16 sps:$4 sm:$0xff]  }
 0x374   :  { %8743 = vmatprep.subr.bf16.mxu0 %v12630_v18  ;;  %8947 = vmatprep.subr.bf16.mxu1 %v12633_v43  ;;  %v12693_v18 = vld [vmem:[%s16937_s1 + $0x1cec] ss:$16 sps:$4 sm:$0xff]   ;;  %v12688_v43 = vld [vmem:[%s16937_s1 + $0x1ce0] ss:$16 sps:$4 sm:$0xff]  }
 0x377   :  { %8744 = vmatpush1.bf16.msra.mxu0 %v12628_v3  ;;  %8948 = vmatpush1.bf16.msra.mxu1 %v12631_v26  ;;  %v12697_v3 = vld [vmem:[%s16937_s1 + $0x1d08] ss:$16 sps:$4 sm:$0xff]   ;;  %v12702_v26 = vld [vmem:[%s16937_s1 + $0x1d24] ss:$16 sps:$4 sm:$0xff]  }
 0x378   :  { %8745 = vmatprep.subr.bf16.mxu0 %v12636_v9  ;;  %8949 = vmatprep.subr.bf16.mxu1 %v12639_v13  ;;  %v12705_v9 = vld [vmem:[%s16937_s1 + $0x1d2c] ss:$16 sps:$4 sm:$0xff]   ;;  %v12700_v13 = vld [vmem:[%s16937_s1 + $0x1d20] ss:$16 sps:$4 sm:$0xff]  }
 0x37b   :  { %8746 = vmatpush1.bf16.msra.mxu0 %v12634_v60  ;;  %8950 = vmatpush1.bf16.msra.mxu1 %v12637_v63  ;;  %v12709_v60 = vld [vmem:[%s16937_s1 + $0x1d48] ss:$16 sps:$4 sm:$0xff]   ;;  %v12714_v63 = vld [vmem:[%s16937_s1 + $0x1d64] ss:$16 sps:$4 sm:$0xff]  }
 0x37c   :  { %8747 = vmatprep.subr.bf16.mxu0 %v12642_v7  ;;  %8951 = vmatprep.subr.bf16.mxu1 %v12645_v4  ;;  %v12717_v7 = vld [vmem:[%s16937_s1 + $0x1d6c] ss:$16 sps:$4 sm:$0xff]   ;;  %v12712_v4 = vld [vmem:[%s16937_s1 + $0x1d60] ss:$16 sps:$4 sm:$0xff]  }
 0x37f   :  { %8748 = vmatpush1.bf16.msra.mxu0 %v12640_v40  ;;  %8952 = vmatpush1.bf16.msra.mxu1 %v12643_v29  ;;  %v12721_v40 = vld [vmem:[%s16937_s1 + $0x1d88] ss:$16 sps:$4 sm:$0xff]   ;;  %v12726_v29 = vld [vmem:[%s16937_s1 + $0x1da4] ss:$16 sps:$4 sm:$0xff]  }
 0x380   :  { %8768 = vmatprep.subr.bf16.mxu0 %v12648_v46  ;;  %8972 = vmatprep.subr.bf16.mxu1 %v12651_v37  ;;  %v12729_v46 = vld [vmem:[%s16937_s1 + $0x1dac] ss:$16 sps:$4 sm:$0xff]   ;;  %v12724_v37 = vld [vmem:[%s16937_s1 + $0x1da0] ss:$16 sps:$4 sm:$0xff]  }
 0x382   :  { %8750 = vmatmul.mubr.bf16.vlgmr.msra.gmra.mrb[0].mxu0 %v15790_v39  ;;  %8954 = vmatmul.mubr.bf16.vlgmr.msra.gmra.mrb[0].mxu1 %v15790_v39  ;;  %v12663_v39 = vld [vmem:[%s16937_s1 + $0x1c4c] ss:$16 sps:$4 sm:$0xff]  }
 0x383   :  { %8769 = vmatpush1.bf16.msra.mxu0 %v12646_v28  ;;  %8973 = vmatpush1.bf16.msra.mxu1 %v12649_v1  ;;  %v12735_v28 = vld [vmem:[%s16937_s1 + $0x1dcc] ss:$16 sps:$4 sm:$0xff]  }
 0x384   :  { %8770 = vmatprep.subr.bf16.mxu0 %v12654_v15  ;;  %8974 = vmatprep.subr.bf16.mxu1 %v12657_v61  ;;  %v12872_v1 = vld.sshfl [vmem:[%s16938_s0 + $0x78] sm:$0xff pattern:$0x75316420]  ;;  %v12730_v61 = vld [vmem:[%s16937_s1 + $0x1dc0] ss:$16 sps:$4 sm:$0xff]  }
 0x385   :  { %8759 = vmatprep.mubr.bf16.mxu0 %v7368_v32  ;;  %8963 = vmatprep.mubr.bf16.mxu1 %v7368_v32  ;;  %v10801_v15 = vcombine.high %v12872_v1, %v12872_v1  ;;  %v12733_v32 = vld [vmem:[%s16937_s1 + $0x1dc8] ss:$16 sps:$4 sm:$0xff]   ;;  %v12816_v1 = vld [vmem:[%s16937_s1 + $0x1f84] ss:$16 sps:$4 sm:$0xff]  }
 0x387   :  { %8771 = vmatpush1.bf16.msra.mxu0 %v12652_v52  ;;  %8975 = vmatpush1.bf16.msra.mxu1 %v12655_v33  ;;  %v12738_v52 = vld [vmem:[%s16937_s1 + $0x1de4] ss:$16 sps:$4 sm:$0xff]   ;;  %v12741_v33 = vld [vmem:[%s16937_s1 + $0x1dec] ss:$16 sps:$4 sm:$0xff]  }
 0x388   :  { %8772 = vmatprep.subr.bf16.mxu0 %v12660_v22  ;;  %8976 = vmatprep.subr.bf16.mxu1 %v12663_v39  ;;  %v7335_v22 = vrot.slane %v10801_v15, %v13089_v0  ;;  %v12736_v39 = vld [vmem:[%s16937_s1 + $0x1de0] ss:$16 sps:$4 sm:$0xff]   ;;  %v12819_v15 = vld [vmem:[%s16937_s1 + $0x1f8c] ss:$16 sps:$4 sm:$0xff]  }
 0x38a   :  { %8760 = vmatmul.mubr.bf16.gmra.mrb[4].mxu0 %v7366_v51  ;;  %8964 = vmatmul.mubr.bf16.gmra.mrb[4].mxu1 %v7366_v51  ;;  %v12739_v51 = vld [vmem:[%s16937_s1 + $0x1de8] ss:$16 sps:$4 sm:$0xff]  }
 0x38b   :  { %8773 = vmatpush1.bf16.msra.mxu0 %v12658_v31  ;;  %8977 = vmatpush1.bf16.msra.mxu1 %v12661_v44  ;;  %v12744_v31 = vld [vmem:[%s16937_s1 + $0x1e04] ss:$16 sps:$4 sm:$0xff]   ;;  %v12747_v44 = vld [vmem:[%s16937_s1 + $0x1e0c] ss:$16 sps:$4 sm:$0xff]  }
 0x38c   :  { %8774 = vmatprep.subr.bf16.mxu0 %v12666_v54  ;;  %8978 = vmatprep.subr.bf16.mxu1 %v12669_v8  ;;  %v7337_v54 = vcombine.high %v7335_v22, %v7335_v22  ;;  %v7315_v8 = vcombine.low %v16202_v36, %v16205_v38  ;;  %v12753_v36 = vld [vmem:[%s16937_s1 + $0x1e2c] ss:$16 sps:$4 sm:$0xff]  }
 0x38d   :  { %8800 = vmatprep.mubr.bf16.mxu0 %v7319_v55  ;;  %9004 = vmatprep.mubr.bf16.mxu1 %v7319_v55  ;;  %v12742_v55 = vld [vmem:[%s16937_s1 + $0x1e00] ss:$16 sps:$4 sm:$0xff]  }
 0x38e   :  { %v16430_v38 = vrot.slane %v7337_v54, %v13089_v0  ;;  %v12829_v54 = vld [vmem:[%s16937_s1 + $0x1fc8] ss:$16 sps:$4 sm:$0xff]  }
 0x38f   :  { %8775 = vmatpush1.bf16.msra.mxu0 %v12664_v41  ;;  %8979 = vmatpush1.bf16.msra.mxu1 %v12667_v47  ;;  %v12745_v41 = vld [vmem:[%s16937_s1 + $0x1e08] ss:$16 sps:$4 sm:$0xff]   ;;  %v12750_v47 = vld [vmem:[%s16937_s1 + $0x1e24] ss:$16 sps:$4 sm:$0xff]  }
 0x390   :  { %8776 = vmatprep.subr.bf16.mxu0 %v12672_v35  ;;  %8980 = vmatprep.subr.bf16.mxu1 %v12675_v24  ;;  %v12748_v35 = vld [vmem:[%s16937_s1 + $0x1e20] ss:$16 sps:$4 sm:$0xff]   ;;  %v12751_v24 = vld [vmem:[%s16937_s1 + $0x1e28] ss:$16 sps:$4 sm:$0xff]  }
 0x393   :  { %8777 = vmatpush1.bf16.msra.mxu0 %v12670_v19  ;;  %8981 = vmatpush1.bf16.msra.mxu1 %v12673_v56  ;;  %v12756_v19 = vld [vmem:[%s16937_s1 + $0x1e44] ss:$16 sps:$4 sm:$0xff]   ;;  %v12759_v56 = vld [vmem:[%s16937_s1 + $0x1e4c] ss:$16 sps:$4 sm:$0xff]  }
 0x394   :  { %8778 = vmatprep.subr.bf16.mxu0 %v12678_v23  ;;  %8982 = vmatprep.subr.bf16.mxu1 %v12681_v57  ;;  %v16447_v23 = vrot.slane %v7335_v22, %v13089_v0  ;;  %v12754_v57 = vld [vmem:[%s16937_s1 + $0x1e40] ss:$16 sps:$4 sm:$0xff]  }
 0x395   :  { %v12820_v22 = vld [vmem:[%s16937_s1 + $0x1fa0] ss:$16 sps:$4 sm:$0xff]  }
 0x397   :  { %8779 = vmatpush1.bf16.msra.mxu0 %v12676_v21  ;;  %8983 = vmatpush1.bf16.msra.mxu1 %v12679_v27  ;;  %v12757_v21 = vld [vmem:[%s16937_s1 + $0x1e48] ss:$16 sps:$4 sm:$0xff]   ;;  %v12762_v27 = vld [vmem:[%s16937_s1 + $0x1e64] ss:$16 sps:$4 sm:$0xff]  }
 0x398   :  { %8780 = vmatprep.subr.bf16.mxu0 %v12684_v62  ;;  %8984 = vmatprep.subr.bf16.mxu1 %v12687_v20  ;;  %v12765_v62 = vld [vmem:[%s16937_s1 + $0x1e6c] ss:$16 sps:$4 sm:$0xff]   ;;  %v12760_v20 = vld [vmem:[%s16937_s1 + $0x1e60] ss:$16 sps:$4 sm:$0xff]  }
 0x39b   :  { %8781 = vmatpush1.bf16.msra.mxu0 %v12682_v59  ;;  %8985 = vmatpush1.bf16.msra.mxu1 %v12685_v6  ;;  %v12763_v59 = vld [vmem:[%s16937_s1 + $0x1e68] ss:$16 sps:$4 sm:$0xff]   ;;  %v12768_v6 = vld [vmem:[%s16937_s1 + $0x1e84] ss:$16 sps:$4 sm:$0xff]  }
 0x39c   :  { %8782 = vmatprep.subr.bf16.mxu0 %v12690_v12  ;;  %8986 = vmatprep.subr.bf16.mxu1 %v12693_v18  ;;  %v12771_v12 = vld [vmem:[%s16937_s1 + $0x1e8c] ss:$16 sps:$4 sm:$0xff]   ;;  %v12766_v18 = vld [vmem:[%s16937_s1 + $0x1e80] ss:$16 sps:$4 sm:$0xff]  }
 0x39f   :  { %8783 = vmatpush1.bf16.msra.mxu0 %v12688_v43  ;;  %8987 = vmatpush1.bf16.msra.mxu1 %v12691_v45  ;;  %v12769_v43 = vld [vmem:[%s16937_s1 + $0x1e88] ss:$16 sps:$4 sm:$0xff]   ;;  %v12774_v45 = vld [vmem:[%s16937_s1 + $0x1ea4] ss:$16 sps:$4 sm:$0xff]  }
 0x3a0   :  { %8784 = vmatprep.subr.bf16.mxu0 %v12696_v49  ;;  %8988 = vmatprep.subr.bf16.mxu1 %v12699_v16  ;;  %v12772_v49 = vld [vmem:[%s16937_s1 + $0x1ea0] ss:$16 sps:$4 sm:$0xff]   ;;  %v12775_v16 = vld [vmem:[%s16937_s1 + $0x1ea8] ss:$16 sps:$4 sm:$0xff]  }
 0x3a3   :  { %8785 = vmatpush1.bf16.msra.mxu0 %v12694_v2  ;;  %8989 = vmatpush1.bf16.msra.mxu1 %v12697_v3  ;;  %v12780_v2 = vld [vmem:[%s16937_s1 + $0x1ec4] ss:$16 sps:$4 sm:$0xff]   ;;  %v12783_v3 = vld [vmem:[%s16937_s1 + $0x1ecc] ss:$16 sps:$4 sm:$0xff]  }
 0x3a4   :  { %8786 = vmatprep.subr.bf16.mxu0 %v12702_v26  ;;  %8990 = vmatprep.subr.bf16.mxu1 %v12705_v9  ;;  %v12778_v26 = vld [vmem:[%s16937_s1 + $0x1ec0] ss:$16 sps:$4 sm:$0xff]   ;;  %v12781_v9 = vld [vmem:[%s16937_s1 + $0x1ec8] ss:$16 sps:$4 sm:$0xff]  }
 0x3a7   :  { %8787 = vmatpush1.bf16.msra.mxu0 %v12700_v13  ;;  %8991 = vmatpush1.bf16.msra.mxu1 %v12703_v5  ;;  %v12786_v13 = vld [vmem:[%s16937_s1 + $0x1ee4] ss:$16 sps:$4 sm:$0xff]   ;;  %v12789_v5 = vld [vmem:[%s16937_s1 + $0x1eec] ss:$16 sps:$4 sm:$0xff]  }
 0x3a8   :  { %8788 = vmatprep.subr.bf16.mxu0 %v12708_v17  ;;  %8992 = vmatprep.subr.bf16.mxu1 %v12711_v30  ;;  %v12784_v17 = vld [vmem:[%s16937_s1 + $0x1ee0] ss:$16 sps:$4 sm:$0xff]   ;;  %v12787_v30 = vld [vmem:[%s16937_s1 + $0x1ee8] ss:$16 sps:$4 sm:$0xff]  }
 0x3ab   :  { %8789 = vmatpush1.bf16.msra.mxu0 %v12706_v34  ;;  %8993 = vmatpush1.bf16.msra.mxu1 %v12709_v60  ;;  %v12792_v34 = vld [vmem:[%s16937_s1 + $0x1f04] ss:$16 sps:$4 sm:$0xff]   ;;  %v12795_v60 = vld [vmem:[%s16937_s1 + $0x1f0c] ss:$16 sps:$4 sm:$0xff]  }
 0x3ac   :  { %8790 = vmatprep.subr.bf16.mxu0 %v12714_v63  ;;  %8994 = vmatprep.subr.bf16.mxu1 %v12717_v7  ;;  %v12790_v63 = vld [vmem:[%s16937_s1 + $0x1f00] ss:$16 sps:$4 sm:$0xff]   ;;  %v12793_v7 = vld [vmem:[%s16937_s1 + $0x1f08] ss:$16 sps:$4 sm:$0xff]  }
 0x3af   :  { %8791 = vmatpush1.bf16.msra.mxu0 %v12712_v4  ;;  %8995 = vmatpush1.bf16.msra.mxu1 %v12715_v10  ;;  %v12798_v4 = vld [vmem:[%s16937_s1 + $0x1f24] ss:$16 sps:$4 sm:$0xff]   ;;  %v12801_v10 = vld [vmem:[%s16937_s1 + $0x1f2c] ss:$16 sps:$4 sm:$0xff]  }
 0x3b0   :  { %8792 = vmatprep.subr.bf16.mxu0 %v12720_v58  ;;  %8996 = vmatprep.subr.bf16.mxu1 %v12723_v11  ;;  %v12796_v58 = vld [vmem:[%s16937_s1 + $0x1f20] ss:$16 sps:$4 sm:$0xff]   ;;  %v12799_v11 = vld [vmem:[%s16937_s1 + $0x1f28] ss:$16 sps:$4 sm:$0xff]  }
 0x3b3   :  { %8793 = vmatpush1.bf16.msra.mxu0 %v12718_v14  ;;  %8997 = vmatpush1.bf16.msra.mxu1 %v12721_v40  ;;  %v12804_v14 = vld [vmem:[%s16937_s1 + $0x1f44] ss:$16 sps:$4 sm:$0xff]   ;;  %v12807_v40 = vld [vmem:[%s16937_s1 + $0x1f4c] ss:$16 sps:$4 sm:$0xff]  }
 0x3b4   :  { %8794 = vmatprep.subr.bf16.mxu0 %v12726_v29  ;;  %8998 = vmatprep.subr.bf16.mxu1 %v12729_v46  ;;  %v12802_v29 = vld [vmem:[%s16937_s1 + $0x1f40] ss:$16 sps:$4 sm:$0xff]   ;;  %v12805_v46 = vld [vmem:[%s16937_s1 + $0x1f48] ss:$16 sps:$4 sm:$0xff]  }
 0x3b7   :  { %8795 = vmatpush1.bf16.msra.mxu0 %v12724_v37  ;;  %8999 = vmatpush1.bf16.msra.mxu1 %v12727_v42  ;;  %v12810_v37 = vld [vmem:[%s16937_s1 + $0x1f64] ss:$16 sps:$4 sm:$0xff]   ;;  %v12813_v42 = vld [vmem:[%s16937_s1 + $0x1f6c] ss:$16 sps:$4 sm:$0xff]  }
 0x3b8   :  { %8796 = vmatprep.subr.bf16.mxu0 %v12732_v48  ;;  %9000 = vmatprep.subr.bf16.mxu1 %v12735_v28  ;;  %v12808_v48 = vld [vmem:[%s16937_s1 + $0x1f60] ss:$16 sps:$4 sm:$0xff]   ;;  %v12811_v28 = vld [vmem:[%s16937_s1 + $0x1f68] ss:$16 sps:$4 sm:$0xff]  }
 0x3bb   :  { %8797 = vmatpush1.bf16.msra.mxu0 %v12730_v61  ;;  %9001 = vmatpush1.bf16.msra.mxu1 %v12733_v32  ;;  %v12814_v61 = vld [vmem:[%s16937_s1 + $0x1f80] ss:$16 sps:$4 sm:$0xff]   ;;  %v12817_v32 = vld [vmem:[%s16937_s1 + $0x1f88] ss:$16 sps:$4 sm:$0xff]  }
 0x3bc   :  { %8798 = vmatprep.subr.bf16.mxu0 %v12738_v52  ;;  %9002 = vmatprep.subr.bf16.mxu1 %v12741_v33  ;;  %v12822_v52 = vld [vmem:[%s16937_s1 + $0x1fa4] ss:$16 sps:$4 sm:$0xff]   ;;  %v12825_v33 = vld [vmem:[%s16937_s1 + $0x1fac] ss:$16 sps:$4 sm:$0xff]  }
 0x3bf   :  { %8799 = vmatpush1.bf16.msra.mxu0 %v12736_v39  ;;  %9003 = vmatpush1.bf16.msra.mxu1 %v12739_v51  ;;  %v12823_v39 = vld [vmem:[%s16937_s1 + $0x1fa8] ss:$16 sps:$4 sm:$0xff]   ;;  %v12828_v51 = vld [vmem:[%s16937_s1 + $0x1fc4] ss:$16 sps:$4 sm:$0xff]  }
 0x3c0   :  { %8819 = vmatprep.subr.bf16.mxu0 %v12744_v31  ;;  %9023 = vmatprep.subr.bf16.mxu1 %v12747_v44  ;;  %v12831_v31 = vld [vmem:[%s16937_s1 + $0x1fcc] ss:$16 sps:$4 sm:$0xff]   ;;  %v12826_v44 = vld [vmem:[%s16937_s1 + $0x1fc0] ss:$16 sps:$4 sm:$0xff]  }
 0x3c2   :  { %8801 = vmatmul.mubr.bf16.vlgmr.msra.gmra.mrb[0].mxu0 %v7315_v8  ;;  %9005 = vmatmul.mubr.bf16.vlgmr.msra.gmra.mrb[0].mxu1 %v7315_v8  ;;  %v12834_v8 = vld [vmem:[%s16937_s1 + $0x1fe4] ss:$16 sps:$4 sm:$0xff]  }
 0x3c3   :  { %8820 = vmatpush1.bf16.msra.mxu0 %v12742_v55  ;;  %9024 = vmatpush1.bf16.msra.mxu1 %v12745_v41  ;;  %v12837_v55 = vld [vmem:[%s16937_s1 + $0x1fec] ss:$16 sps:$4 sm:$0xff]   ;;  %v12832_v41 = vld [vmem:[%s16937_s1 + $0x1fe0] ss:$16 sps:$4 sm:$0xff]  }
 0x3c4   :  { %8821 = vmatprep.subr.bf16.mxu0 %v12750_v47  ;;  %9025 = vmatprep.subr.bf16.mxu1 %v12753_v36  ;;  %v12835_v47 = vld [vmem:[%s16937_s1 + $0x1fe8] ss:$16 sps:$4 sm:$0xff]   ;;  %v7369_v36 = vcombine.high %v16430_v38, %v16430_v38 }
 0x3c5   :  { %8810 = vmatprep.mubr.bf16.mxu0 %v16430_v38  ;;  %9014 = vmatprep.mubr.bf16.mxu1 %v16430_v38 }
 0x3c7   :  { %8822 = vmatpush1.bf16.msra.mxu0 %v12748_v35  ;;  %9026 = vmatpush1.bf16.msra.mxu1 %v12751_v24  ;;  %v7367_v35 = vcombine.high %v16447_v23, %v16447_v23 }
 0x3c8   :  { %8823 = vmatprep.subr.bf16.mxu0 %v12756_v19  ;;  %9027 = vmatprep.subr.bf16.mxu1 %v12759_v56 }
 0x3ca   :  { %8811 = vmatmul.mubr.bf16.gmra.mrb[4].mxu0 %v16447_v23  ;;  %9015 = vmatmul.mubr.bf16.gmra.mrb[4].mxu1 %v16447_v23 }
 0x3cb   :  { %8824 = vmatpush1.bf16.msra.mxu0 %v12754_v57  ;;  %9028 = vmatpush1.bf16.msra.mxu1 %v12757_v21 }
 0x3cc   :  { %8825 = vmatprep.subr.bf16.mxu0 %v12762_v27  ;;  %9029 = vmatprep.subr.bf16.mxu1 %v12765_v62 }
 0x3cd   :  { %8851 = vmatprep.mubr.bf16.mxu0 %v16213_v25  ;;  %9055 = vmatprep.mubr.bf16.mxu1 %v16213_v25  ;;  %v12777_v25 = vld [vmem:[%s16937_s1 + $0x1eac] ss:$16 sps:$4 sm:$0xff]  }
 0x3cf   :  { %8826 = vmatpush1.bf16.msra.mxu0 %v12760_v20  ;;  %9030 = vmatpush1.bf16.msra.mxu1 %v12763_v59 }
 0x3d0   :  { %8827 = vmatprep.subr.bf16.mxu0 %v12768_v6  ;;  %9031 = vmatprep.subr.bf16.mxu1 %v12771_v12 }
 0x3d3   :  { %8828 = vmatpush1.bf16.msra.mxu0 %v12766_v18  ;;  %9032 = vmatpush1.bf16.msra.mxu1 %v12769_v43 }
 0x3d4   :  { %8829 = vmatprep.subr.bf16.mxu0 %v12774_v45  ;;  %9033 = vmatprep.subr.bf16.mxu1 %v12777_v25 }
 0x3d7   :  { %8830 = vmatpush1.bf16.msra.mxu0 %v12772_v49  ;;  %9034 = vmatpush1.bf16.msra.mxu1 %v12775_v16 }
 0x3d8   :  { %8831 = vmatprep.subr.bf16.mxu0 %v12780_v2  ;;  %9035 = vmatprep.subr.bf16.mxu1 %v12783_v3 }
 0x3db   :  { %8832 = vmatpush1.bf16.msra.mxu0 %v12778_v26  ;;  %9036 = vmatpush1.bf16.msra.mxu1 %v12781_v9 }
 0x3dc   :  { %8833 = vmatprep.subr.bf16.mxu0 %v12786_v13  ;;  %9037 = vmatprep.subr.bf16.mxu1 %v12789_v5 }
 0x3df   :  { %8834 = vmatpush1.bf16.msra.mxu0 %v12784_v17  ;;  %9038 = vmatpush1.bf16.msra.mxu1 %v12787_v30 }
 0x3e0   :  { %8835 = vmatprep.subr.bf16.mxu0 %v12792_v34  ;;  %9039 = vmatprep.subr.bf16.mxu1 %v12795_v60 }
 0x3e3   :  { %8836 = vmatpush1.bf16.msra.mxu0 %v12790_v63  ;;  %9040 = vmatpush1.bf16.msra.mxu1 %v12793_v7 }
 0x3e4   :  { %8837 = vmatprep.subr.bf16.mxu0 %v12798_v4  ;;  %9041 = vmatprep.subr.bf16.mxu1 %v12801_v10 }
 0x3e7   :  { %8838 = vmatpush1.bf16.msra.mxu0 %v12796_v58  ;;  %9042 = vmatpush1.bf16.msra.mxu1 %v12799_v11 }
 0x3e8   :  { %8839 = vmatprep.subr.bf16.mxu0 %v12804_v14  ;;  %9043 = vmatprep.subr.bf16.mxu1 %v12807_v40 }
 0x3eb   :  { %8840 = vmatpush1.bf16.msra.mxu0 %v12802_v29  ;;  %9044 = vmatpush1.bf16.msra.mxu1 %v12805_v46 }
 0x3ec   :  { %8841 = vmatprep.subr.bf16.mxu0 %v12810_v37  ;;  %9045 = vmatprep.subr.bf16.mxu1 %v12813_v42 }
 0x3ef   :  { %8842 = vmatpush1.bf16.msra.mxu0 %v12808_v48  ;;  %9046 = vmatpush1.bf16.msra.mxu1 %v12811_v28 }
 0x3f0   :  { %8843 = vmatprep.subr.bf16.mxu0 %v12816_v1  ;;  %9047 = vmatprep.subr.bf16.mxu1 %v12819_v15 }
 0x3f3   :  { %8844 = vmatpush1.bf16.msra.mxu0 %v12814_v61  ;;  %9048 = vmatpush1.bf16.msra.mxu1 %v12817_v32 }
 0x3f4   :  { %8845 = vmatprep.subr.bf16.mxu0 %v12822_v52  ;;  %9049 = vmatprep.subr.bf16.mxu1 %v12825_v33 }
 0x3f7   :  { %8846 = vmatpush1.bf16.msra.mxu0 %v12820_v22  ;;  %9050 = vmatpush1.bf16.msra.mxu1 %v12823_v39 }
 0x3f8   :  { %8847 = vmatprep.subr.bf16.mxu0 %v12828_v51  ;;  %9051 = vmatprep.subr.bf16.mxu1 %v12831_v31 }
 0x3fb   :  { %8848 = vmatpush1.bf16.msra.mxu0 %v12826_v44  ;;  %9052 = vmatpush1.bf16.msra.mxu1 %v12829_v54 }
 0x3fc   :  { %8849 = vmatprep.subr.bf16.mxu0 %v12834_v8  ;;  %9053 = vmatprep.subr.bf16.mxu1 %v12837_v55 }
 0x3ff   :  { %8850 = vmatpush1.bf16.msra.mxu0 %v12832_v41  ;;  %9054 = vmatpush1.bf16.msra.mxu1 %v12835_v47 }
 0x402   :  { %8852 = vmatmul.mubr.bf16.vlgmr.msra.gmra.mrb[0].mxu0 %v16217_v53  ;;  %9056 = vmatmul.mubr.bf16.vlgmr.msra.gmra.mrb[0].mxu1 %v16217_v53 }
 0x403   :  { %8861 = vmatprep.mubr.bf16.mxu0 %v7369_v36  ;;  %9065 = vmatprep.mubr.bf16.mxu1 %v7369_v36 }
 0x40a   :  { %8862 = vmatmul.mubr.bf16.gmra.mrb[4].mxu0 %v7367_v35  ;;  %9066 = vmatmul.mubr.bf16.gmra.mrb[4].mxu1 %v7367_v35 }
 0x4d5   :  { %v16621_v24 = vpop.f32.mrb[0].mxu0  ;;  %v16623_v19 = vpop.f32.mrb[0].mxu1 }
 0x4d6   :  { %v16625_v56 = vpop.f32.mrb[1].mxu0  ;;  %v16627_v57 = vpop.f32.mrb[1].mxu1  ;;  %v9129_v38 = vmul.f32 %v16621_v24, %v16621_v24  ;;  %v9131_v53 = vmul.f32 %v16623_v19, %v16623_v19 }
 0x4d7   :  { %v9130_v21 = vmul.f32 %v16625_v56, %v16625_v56  ;;  %v9132_v23 = vmul.f32 %v16627_v57, %v16627_v57  ;;  %v16637_v27 = vpop.f32.mrb[2].mxu0  ;;  %v16639_v62 = vpop.f32.mrb[2].mxu1 }
 0x4d8   :  { %v9088_v20 = vadd.f32 %v16637_v27, %v16621_v24  ;;  %v9133_v59 = vmul.f32 %v16637_v27, %v16637_v27  ;;  %v9107_v6 = vadd.f32 %v16639_v62, %v16623_v19  ;;  %v9135_v12 = vmul.f32 %v16639_v62, %v16639_v62  ;;  %v16649_v18 = vpop.f32.mrb[3].mxu0  ;;  %v16651_v43 = vpop.f32.mrb[3].mxu1 }
 0x4d9   :  { %v9098_v45 = vadd.f32 %v16649_v18, %v16625_v56  ;;  %v9134_v25 = vmul.f32 %v16649_v18, %v16649_v18  ;;  %v9116_v49 = vadd.f32 %v16651_v43, %v16627_v57  ;;  %v9136_v16 = vmul.f32 %v16651_v43, %v16651_v43 }
 0x4da   :  { %v9141_v2 = vadd.f32 %v9133_v59, %v9129_v38  ;;  %v9159_v3 = vadd.f32 %v9135_v12, %v9131_v53 }
 0x4db   :  { %v9150_v26 = vadd.f32 %v9134_v25, %v9130_v21  ;;  %v9168_v9 = vadd.f32 %v9136_v16, %v9132_v23 }
 0x4dd   :  { %v16661_v13 = vpop.f32.mrb[4].mxu0  ;;  %v16663_v5 = vpop.f32.mrb[4].mxu1 }
 0x4de   :  { %v9090_v17 = vsel %vm9089_vm0, %v16661_v13, 0.0  ;;  %v9137_v30 = vmul.f32 %v16661_v13, %v16661_v13  ;;  %v9108_v34 = vsel %vm9089_vm0, %v16663_v5, 0.0  ;;  %v9139_v60 = vmul.f32 %v16663_v5, %v16663_v5  ;;  %v16673_v63 = vpop.f32.mrb[5].mxu0  ;;  %v16675_v7 = vpop.f32.mrb[5].mxu1 }
 0x4df   :  { %v9091_v4 = vadd.f32 %v9090_v17, %v9088_v20  ;;  %v9109_v10 = vadd.f32 %v9108_v34, %v9107_v6  ;;  %v9099_v58 = vsel %vm9089_vm0, %v16673_v63, 0.0  ;;  %v9138_v11 = vmul.f32 %v16673_v63, %v16673_v63  ;;  %v8867_v14 = vpop.f32.mrb[6].mxu0  ;;  %v9071_v40 = vpop.f32.mrb[6].mxu1 }
 0x4e0   :  { %v9142_v29 = vsel %vm9089_vm0, %v9137_v30, 0.0  ;;  %v9160_v46 = vsel %vm9089_vm0, %v9139_v60, 0.0  ;;  %v9100_v37 = vadd.f32 %v9099_v58, %v9098_v45  ;;  %v9117_v42 = vsel %vm9089_vm0, %v16675_v7, 0.0  ;;  %v8868_v48 = vpop.f32.mrb[7].mxu0  ;;  %v9072_v28 = vpop.f32.mrb[7].mxu1 }
 0x4e1   :  { %v9092_v1 = vrot.slane %v9091_v4, 4  ;;  %v9143_v15 = vadd.f32 %v9142_v29, %v9141_v2  ;;  %v9110_v61 = vrot.slane %v9109_v10, 4  ;;  %v9161_v32 = vadd.f32 %v9160_v46, %v9159_v3 }
 0x4e2   :  { %v9101_v52 = vrot.slane %v9100_v37, 4  ;;  %v9151_v33 = vsel %vm9089_vm0, %v9138_v11, 0.0  ;;  %v9118_v22 = vadd.f32 %v9117_v42, %v9116_v49  ;;  %v9140_v39 = vmul.f32 %v16675_v7, %v16675_v7 }
 0x4e3   :  { %v9093_v51 = vadd.f32 %v9092_v1, %v9091_v4  ;;  %v9144_v31 = vrot.slane %v9143_v15, 4  ;;  %v9111_v44 = vadd.f32 %v9110_v61, %v9109_v10  ;;  %v9162_v54 = vrot.slane %v9161_v32, 4 }
 0x4e4   :  { %v9102_v8 = vadd.f32 %v9101_v52, %v9100_v37  ;;  %v9152_v55 = vadd.f32 %v9151_v33, %v9150_v26  ;;  %v9119_v41 = vrot.slane %v9118_v22, 4  ;;  %v9169_v47 = vsel %vm9089_vm0, %v9140_v39, 0.0 }
 0x4e5   :  { %v9094_v36 = vrot.slane %v9093_v51, 2  ;;  %v9145_v35 = vadd.f32 %v9144_v31, %v9143_v15  ;;  %v9112_v38 = vrot.slane %v9111_v44, 2  ;;  %v9163_v53 = vadd.f32 %v9162_v54, %v9161_v32 }
 0x4e6   :  { %v9103_v21 = vrot.slane %v9102_v8, 2  ;;  %v9153_v23 = vrot.slane %v9152_v55, 4  ;;  %v9120_v20 = vadd.f32 %v9119_v41, %v9118_v22  ;;  %v9170_v59 = vadd.f32 %v9169_v47, %v9168_v9 }
 0x4e7   :  { %v9095_v6 = vadd.f32 %v9094_v36, %v9093_v51  ;;  %v9146_v12 = vrot.slane %v9145_v35, 2  ;;  %v9113_v45 = vadd.f32 %v9112_v38, %v9111_v44  ;;  %v9164_v25 = vrot.slane %v9163_v53, 2 }
 0x4e8   :  { %v9104_v49 = vadd.f32 %v9103_v21, %v9102_v8  ;;  %v9154_v16 = vadd.f32 %v9153_v23, %v9152_v55  ;;  %v9121_v2 = vrot.slane %v9120_v20, 2  ;;  %v9171_v3 = vrot.slane %v9170_v59, 4 }
 0x4e9   :  { %v9096_v26 = vrot.slane %v9095_v6, 1  ;;  %v9147_v17 = vadd.f32 %v9146_v12, %v9145_v35  ;;  %v9114_v30 = vrot.slane %v9113_v45, 1  ;;  %v9165_v34 = vadd.f32 %v9164_v25, %v9163_v53 }
 0x4ea   :  { %v9105_v60 = vrot.slane %v9104_v49, 1  ;;  %v9155_v4 = vrot.slane %v9154_v16, 2  ;;  %v9122_v10 = vadd.f32 %v9121_v2, %v9120_v20  ;;  %v9172_v58 = vadd.f32 %v9171_v3, %v9170_v59 }
 0x4eb   :  { %v9097_v11 = vadd.f32 %v9096_v26, %v9095_v6  ;;  %v9148_v14 = vrot.slane %v9147_v17, 1  ;;  %v9115_v40 = vadd.f32 %v9114_v30, %v9113_v45  ;;  %v9166_v9 = vrot.slane %v9165_v34, 1 }
 0x4ec   :  { %v9106_v29 = vadd.f32 %v9105_v60, %v9104_v49  ;;  %v9156_v46 = vadd.f32 %v9155_v4, %v9154_v16  ;;  %v9123_v37 = vrot.slane %v9122_v10, 1  ;;  %v9173_v42 = vrot.slane %v9172_v58, 2 }
 0x4ed   :  { %v16689_v48 = vmul.f32 0.055555556, %v9097_v11  ;;  %v9149_v28 = vadd.f32 %v9148_v14, %v9147_v17  ;;  %v16691_v1 = vmul.f32 0.055555556, %v9115_v40  ;;  %v9167_v15 = vadd.f32 %v9166_v9, %v9165_v34  ;;  %v9086_v40 = vld [vmem:[%s16940_s2] sm:$0xf] }
 0x4ee   :  { %v16693_v61 = vmul.f32 0.055555556, %v9106_v29  ;;  %v9157_v32 = vrot.slane %v9156_v46, 1  ;;  %v9124_v52 = vadd.f32 %v9123_v37, %v9122_v10  ;;  %v9174_v33 = vadd.f32 %v9173_v42, %v9172_v58  ;;  %v12838_v10 = vld [vmem:[%s16939_s4 + $0x20] ss:$8 sps:$4 sm:$0x11]  }
 0x4ef   :  { %v9177_v22 = vmul.f32 0.055555556, %v9149_v28  ;;  %v9181_v39 = vmul.f32 %v16689_v48, %v16689_v48  ;;  %v9193_v51 = vsub.f32 %v16621_v24, %v16689_v48  ;;  %v9197_v31 = vsub.f32 %v16637_v27, %v16689_v48  ;;  %v12839_v11 = vld [vmem:[%s16939_s4 + $0x30] ss:$8 sps:$4 sm:$0x11]  }
 0x4f0   :  { %v9201_v44 = vsub.f32 %v16661_v13, %v16689_v48  ;;  %v9179_v54 = vmul.f32 0.055555556, %v9167_v15  ;;  %v9183_v8 = vmul.f32 %v16691_v1, %v16691_v1  ;;  %v9195_v55 = vsub.f32 %v16623_v19, %v16691_v1  ;;  %v9087_v9 = vld [vmem:[%s16941_s3] sm:$0xf]  ;;  %v12843_v15 = vld [vmem:[%s16939_s4 + $0x10] ss:$8 sps:$4 sm:$0xff]  }
 0x4f1   :  { %v9185_v41 = vsub.f32 %v9177_v22, %v9181_v39  ;;  %v9199_v47 = vsub.f32 %v16639_v62, %v16691_v1  ;;  %v9203_v36 = vsub.f32 %v16663_v5, %v16691_v1  ;;  %v9158_v35 = vadd.f32 %v9157_v32, %v9156_v46  ;;  %v12840_v28 = vld [vmem:[%s16939_s4] ss:$8 sps:$4 sm:$0xff]   ;;  %v12842_v22 = vld [vmem:[%s16939_s4 + $0x4] ss:$8 sps:$4 sm:$0xff]  }
 0x4f2   :  { %v9187_v38 = vsub.f32 %v9179_v54, %v9183_v8  ;;  %v9182_v53 = vmul.f32 %v16693_v61, %v16693_v61  ;;  %v9194_v21 = vsub.f32 %v16625_v56, %v16693_v61  ;;  %v9198_v23 = vsub.f32 %v16649_v18, %v16693_v61  ;;  %v12845_v54 = vld [vmem:[%s16939_s4 + $0x14] ss:$8 sps:$4 sm:$0xff]  }
 0x4f3   :  { %v9189_v20 = vmax.f32 %v9185_v41, 0.0  ;;  %v9178_v59 = vmul.f32 0.055555556, %v9158_v35  ;;  %v9202_v6 = vsub.f32 %v16673_v63, %v16693_v61  ;;  %v16719_v12 = vmul.f32 0.055555556, %v9124_v52 }
 0x4f4   :  { %v9191_v45 = vmax.f32 %v9187_v38, 0.0  ;;  %v9175_v25 = vrot.slane %v9174_v33, 1  ;;  %v9228_v29 = vsub.s32 0, %v13047_v50  ;;  %v9236_v46 = vsub.s32 2, %v13047_v50 }
 0x4f5   :  { %v9205_v49 = vadd.f32 1e-05, %v9189_v20  ;;  %v9186_v16 = vsub.f32 %v9178_v59, %v9182_v53  ;;  %v9184_v2 = vmul.f32 %v16719_v12, %v16719_v12  ;;  %v9196_v3 = vsub.f32 %v16627_v57, %v16719_v12 }
 0x4f6   :  { %v9207_v26 = vadd.f32 1e-05, %v9191_v45  ;;  %v9176_v17 = vadd.f32 %v9175_v25, %v9174_v33  ;;  %v9200_v30 = vsub.f32 %v16651_v43, %v16719_v12  ;;  %v9204_v34 = vsub.f32 %v16675_v7, %v16719_v12 }
 0x4f7   :  { %12846 = vrsqrt.f32 %v9205_v49  ;;  %v9190_v60 = vmax.f32 %v9186_v16, 0.0  ;;  %v9232_v37 = vsub.s32 1, %v13047_v50  ;;  %v9240_v32 = vsub.s32 3, %v13047_v50 }
 0x4f8   :  { %12848 = vrsqrt.f32 %v9207_v26  ;;  %v9180_v4 = vmul.f32 0.055555556, %v9176_v17  ;;  %v9605_v52 = vrot.slane %v12838_v10, %v13089_v0  ;;  %v9612_v33 = vrot.slane %v12839_v11, %v13089_v0 }
 0x4f9   :  { %v9206_v58 = vadd.f32 1e-05, %v9190_v60  ;;  %v9229_v8 = vrot.slane %v9086_v40, %v9228_v29  ;;  %v9262_v41 = vrot.slane %v9087_v9, %v9228_v29  ;;  %v9237_v35 = vrot.slane %v9086_v40, %v9236_v46 }
 0x4fa   :  { %v9188_v14 = vsub.f32 %v9180_v4, %v9184_v2  ;;  %v9270_v38 = vrot.slane %v9087_v9, %v9236_v46  ;;  %v9233_v53 = vrot.slane %v9086_v40, %v9232_v37  ;;  %v9539_v50 = vrot.slane %v12840_v28, %v13089_v0 }
 0x4fb   :  { %12850 = vrsqrt.f32 %v9206_v58  ;;  %v9553_v20 = vrot.slane %v12843_v15, %v13089_v0  ;;  %v9266_v45 = vrot.slane %v9087_v9, %v9232_v37  ;;  %v9241_v25 = vrot.slane %v9086_v40, %v9240_v32 }
 0x4fc   :  { %v9192_v42 = vmax.f32 %v9188_v14, 0.0  ;;  %v9613_v49 = vcombine.low %v9605_v52, %v9612_v33  ;;  %v16762_v16 = vrot.slane %v12842_v22, %v13089_v0  ;;  %v16774_v4 = vrot.slane %v12845_v54, %v13089_v0 }
 0x4fd   :  { %v9562_v48 = vcombine.high %v9539_v50, %v9553_v20 }
 0x4fe   :  { %v9208_v39 = vadd.f32 1e-05, %v9192_v42  ;;  %v9563_v19 = vcombine.low %v16762_v16, %v16774_v4  ;;  %v9274_v42 = vrot.slane %v9087_v9, %v9240_v32  ;;  %v16799_v28 = vrot.slane %v9613_v49, %v13089_v0 }
 0x4ff   :  { %v9564_v56 = vcombine.high %v16762_v16, %v16774_v4  ;;  %v16810_v63 = vrot.slane %v9562_v48, %v13089_v0 }
 0x500   :  { %12852 = vrsqrt.f32 %v9208_v39  ;;  %v16807_v39 = vrot.slane %v9563_v19, %v13089_v0 }
 0x501   :  { %v12847_v59 = vpop.eup %12846 }
 0x502   :  { %v12849_v2 = vpop.eup %12848  ;;  %v9213_v26 = vmul.f32 %v12847_v59, %v9193_v51  ;;  %v9217_v17 = vmul.f32 %v12847_v59, %v9197_v31  ;;  %v9221_v60 = vmul.f32 %v12847_v59, %v9201_v44  ;;  %v9561_v51 = vcombine.low %v9539_v50, %v9553_v20 }
 0x503   :  { %v9215_v10 = vmul.f32 %v12849_v2, %v9195_v55  ;;  %v9219_v24 = vmul.f32 %v12849_v2, %v9199_v47  ;;  %v9223_v27 = vmul.f32 %v12849_v2, %v9203_v36 }
 0x504   :  { %v9246_v31 = vmul.f32 %v9229_v8, %v9213_v26  ;;  %v9250_v58 = vmul.f32 %v9229_v8, %v9217_v17  ;;  %v9254_v13 = vmul.f32 %v9229_v8, %v9221_v60  ;;  %v16804_v33 = vrot.slane %v9561_v51, %v13089_v0 }
 0x505   :  { %v12851_v44 = vpop.eup %12850  ;;  %v9248_v11 = vmul.f32 %v9237_v35, %v9215_v10  ;;  %v9252_v14 = vmul.f32 %v9237_v35, %v9219_v24  ;;  %v9256_v40 = vmul.f32 %v9237_v35, %v9223_v27 }
 0x506   :  { %v9279_v55 = vadd.f32 %v9262_v41, %v9246_v31  ;;  %v9283_v29 = vadd.f32 %v9262_v41, %v9250_v58  ;;  %v9287_v62 = vadd.f32 %v9262_v41, %v9254_v13  ;;  %v9214_v5 = vmul.f32 %v12851_v44, %v9194_v21 }
 0x507   :  { %v9281_v1 = vadd.f32 %v9270_v38, %v9248_v11  ;;  %v9285_v47 = vadd.f32 %v9270_v38, %v9252_v14  ;;  %v16790_v36 = vadd.f32 %v9270_v38, %v9256_v40  ;;  %v9218_v46 = vmul.f32 %v12851_v44, %v9198_v23 }
 0x508   :  { %v9222_v37 = vmul.f32 %v12851_v44, %v9202_v6  ;;  %v9291_v21 = vmul.f32 0.2, %v9279_v55  ;;  %v9295_v15 = vmul.f32 0.2, %v9283_v29  ;;  %v9247_v52 = vmul.f32 %v9233_v53, %v9214_v5 }
 0x509   :  { %v9299_v18 = vmul.f32 0.2, %v9287_v62  ;;  %v9251_v23 = vmul.f32 %v9233_v53, %v9218_v46  ;;  %v9293_v61 = vmul.f32 0.2, %v9281_v1  ;;  %v9297_v6 = vmul.f32 0.2, %v9285_v47 }
 0x50a   :  { %v12853_v22 = vpop.eup %12852  ;;  %v9301_v9 = vmul.f32 0.2, %v16790_v36  ;;  %v9255_v32 = vmul.f32 %v9233_v53, %v9222_v37  ;;  %v9280_v54 = vadd.f32 %v9266_v45, %v9247_v52  ;;  %v9303_v38 = vmax.f32 %v9279_v55, %v9291_v21 }
 0x50b   :  { %v9284_v8 = vadd.f32 %v9266_v45, %v9251_v23  ;;  %v9216_v41 = vmul.f32 %v12853_v22, %v9196_v3  ;;  %v9220_v35 = vmul.f32 %v12853_v22, %v9200_v30  ;;  %v9307_v50 = vmax.f32 %v9283_v29, %v9295_v15 }
 0x50c   :  { %v9288_v20 = vadd.f32 %v9266_v45, %v9255_v32  ;;  %v9224_v59 = vmul.f32 %v12853_v22, %v9204_v34  ;;  %v9292_v49 = vmul.f32 0.2, %v9280_v54  ;;  %v9311_v26 = vmax.f32 %v9287_v62, %v9299_v18 }
 0x50d   :  { %v9296_v16 = vmul.f32 0.2, %v9284_v8  ;;  %v9249_v53 = vmul.f32 %v9241_v25, %v9216_v41  ;;  %v9253_v2 = vmul.f32 %v9241_v25, %v9220_v35  ;;  %v9305_v17 = vmax.f32 %v9281_v1, %v9293_v61 }
 0x50e   :  { %v9300_v60 = vmul.f32 0.2, %v9288_v20  ;;  %v9257_v57 = vmul.f32 %v9241_v25, %v9224_v59  ;;  %v9304_v3 = vmax.f32 %v9280_v54, %v9292_v49  ;;  %v9309_v30 = vmax.f32 %v9285_v47, %v9297_v6 }
 0x50f   :  { %v9308_v4 = vmax.f32 %v9284_v8, %v9296_v16  ;;  %v9282_v10 = vadd.f32 %v9274_v42, %v9249_v53  ;;  %v9286_v43 = vadd.f32 %v9274_v42, %v9253_v2  ;;  %v9313_v24 = vmax.f32 %v16790_v36, %v9301_v9 }
 0x510   :  { %v9312_v45 = vmax.f32 %v9288_v20, %v9300_v60  ;;  %v9290_v27 = vadd.f32 %v9274_v42, %v9257_v57  ;;  %v9327_v13 = vcombine.low %v9303_v38, %v9304_v3  ;;  %v9328_v48 = vcombine.high %v9303_v38, %v9304_v3 }
 0x511   :  { %v9294_v51 = vmul.f32 0.2, %v9282_v10  ;;  %v9298_v7 = vmul.f32 0.2, %v9286_v43  ;;  %v9395_v12 = vcombine.low %v9307_v50, %v9308_v4  ;;  %v9396_v34 = vcombine.high %v9307_v50, %v9308_v4 }
 0x512   :  { %v9463_v31 = vcombine.low %v9311_v26, %v9312_v45  ;;  %v9302_v58 = vmul.f32 0.2, %v9290_v27  ;;  %v16824_v25 = vrot.slane %v9564_v56, %v13089_v0  ;;  %v16828_v14 = vcombine.high %v16804_v33, %v16804_v33 }
 0x513   :  { %v9306_v44 = vmax.f32 %v9282_v10, %v9294_v51  ;;  %v9310_v11 = vmax.f32 %v9286_v43, %v9298_v7  ;;  %v9405_v19 = vrot.slane %v9395_v12, %v13089_v0  ;;  %v9412_v55 = vrot.slane %v9396_v34, %v13089_v0 }
 0x514   :  { %v9314_v40 = vmax.f32 %v9290_v27, %v9302_v58  ;;  %v16834_v29 = vcombine.high %v16807_v39, %v16807_v39  ;;  %v9471_v36 = vrot.slane %v9463_v31, %v13089_v0  ;;  %v16839_v37 = vcombine.high %v16810_v63, %v16810_v63 }
 0x515   :  { %v9397_v62 = vcombine.low %v9309_v30, %v9310_v11  ;;  %v9398_v5 = vcombine.high %v9309_v30, %v9310_v11  ;;  %v9329_v1 = vcombine.low %v9305_v17, %v9306_v44  ;;  %v9330_v47 = vcombine.high %v9305_v17, %v9306_v44 }
 0x516   :  { %v9464_v46 = vcombine.low %v9313_v24, %v9314_v40  ;;  %v16842_v42 = vrot.slane %v9327_v13, %v13089_v0  ;;  %v16848_v15 = vcombine.high %v16824_v25, %v16824_v25  ;;  %v16855_v18 = vrot.slane %v9328_v48, %v13089_v0 }
 0x517   :  { %v9419_v56 = vrot.slane %v9397_v62, %v13089_v0  ;;  %v9426_v21 = vrot.slane %v9398_v5, %v13089_v0  ;;  %v16851_v52 = vrot.slane %v9329_v1, %v13089_v0  ;;  %v16858_v23 = vrot.slane %v9330_v47, %v13089_v0 }
 0x518   :  { %v9478_v22 = vrot.slane %v9464_v46, %v13089_v0 }
 0x519   :  { %v9427_v61 = vcombine.low %v9405_v19, %v9419_v56  ;;  %v9428_v6 = vcombine.high %v9405_v19, %v9419_v56  ;;  %v9429_v9 = vcombine.low %v9412_v55, %v9426_v21  ;;  %v9430_v32 = vcombine.high %v9412_v55, %v9426_v21 }
 0x51a   :  { %v9480_v54 = vcombine.high %v9471_v36, %v9478_v22  ;;  %v9479_v8 = vcombine.low %v9471_v36, %v9478_v22  ;;  %v9359_v41 = vcombine.low %v16842_v42, %v16851_v52  ;;  %v9360_v35 = vcombine.high %v16842_v42, %v16851_v52 }
 0x51b   :  { %v9437_v38 = vrot.slane %v9427_v61, %v13089_v0  ;;  %v9444_v50 = vrot.slane %v9429_v9, %v13089_v0  ;;  %v9451_v20 = vrot.slane %v9428_v6, %v13089_v0  ;;  %v9458_v59 = vrot.slane %v9430_v32, %v13089_v0 }
 0x51c   :  { %v9494_v49 = vrot.slane %v9480_v54, %v13089_v0  ;;  %v9487_v16 = vrot.slane %v9479_v8, %v13089_v0  ;;  %v9361_v53 = vcombine.low %v16855_v18, %v16858_v23  ;;  %v9362_v2 = vcombine.high %v16855_v18, %v16858_v23 }
 0x51d   :  { %v9638_v26 = vmul.f32 %v16799_v28, %v9437_v38  ;;  %v9459_v17 = vcombine.high %v9437_v38, %v9437_v38  ;;  %v9460_v60 = vcombine.high %v9444_v50, %v9444_v50  ;;  %v9461_v57 = vcombine.high %v9451_v20, %v9451_v20 }
 0x51e   :  { %v9647_v3 = vmul.f32 %v16799_v28, %v9494_v49  ;;  %v9462_v4 = vcombine.high %v9458_v59, %v9458_v59  ;;  %v9639_v10 = vmul.f32 %v16804_v33, %v9451_v20  ;;  %v9642_v43 = vmul.f32 %v16839_v37, %v9444_v50 }
 0x51f   :  { %v9740_v30 = vrot.slane %v9638_v26, %v13089_v0  ;;  %v9640_v24 = vmul.f32 %v16810_v63, %v9459_v17  ;;  %v9641_v45 = vmul.f32 %v16828_v14, %v9461_v57  ;;  %v9643_v27 = vmul.f32 %v16807_v39, %v9458_v59 }
 0x520   :  { %v9832_v51 = vrot.slane %v9647_v3, %v13089_v0  ;;  %v9644_v7 = vmul.f32 %v16824_v25, %v9460_v60  ;;  %v9645_v12 = vmul.f32 %v16834_v29, %v9462_v4  ;;  %v9646_v28 = vmul.f32 %v16848_v15, %v9487_v16 }
 0x521   :  { %v9741_v34 = vcombine.high %v9740_v30, %v9740_v30  ;;  %v9748_v31 = vrot.slane %v9740_v30, %v13089_v0  ;;  %v9758_v58 = vcombine.low %v9639_v10, %v9640_v24  ;;  %v9759_v13 = vcombine.low %v9641_v45, %v9642_v43 }
 0x522   :  { %v9833_v48 = vcombine.high %v9832_v51, %v9832_v51  ;;  %v9840_v44 = vrot.slane %v9832_v51, %v13089_v0  ;;  %v9760_v11 = vcombine.low %v9643_v27, %v9644_v7  ;;  %v9761_v40 = vcombine.low %v9645_v12, %v9646_v28 }
 0x523   :  { %v9755_v19 = vrot.slane %v9741_v34, %v13089_v0  ;;  %v9756_v55 = vcombine.high %v9748_v31, %v9748_v31  ;;  %v9872_v62 = vsel %vm9871_vm1, %v9748_v31, 0.0  ;;  %v9768_v5 = vrot.slane %v9758_v58, %v13089_v0 }
 0x524   :  { %v9847_v1 = vrot.slane %v9833_v48, %v13089_v0  ;;  %v9848_v47 = vcombine.high %v9840_v44, %v9840_v44  ;;  %v9886_v36 = vsel %vm9871_vm1, %v9840_v44, 0.0  ;;  %v9775_v46 = vrot.slane %v9759_v13, %v13089_v0 }
 0x525   :  { %v9757_v56 = vcombine.high %v9755_v19, %v9755_v19  ;;  %v9873_v21 = vsel %vm9871_vm1, %v9755_v19, 0.0  ;;  %v9875_v22 = vsel %vm9871_vm1, %v9756_v55, 0.0  ;;  %v9782_v18 = vrot.slane %v9760_v11, %v13089_v0 }
 0x526   :  { %v9849_v23 = vcombine.high %v9847_v1, %v9847_v1  ;;  %v9887_v61 = vsel %vm9871_vm1, %v9847_v1, 0.0  ;;  %v9889_v6 = vsel %vm9871_vm1, %v9848_v47, 0.0  ;;  %v9874_v9 = vadd.f32 %v9873_v21, %v9872_v62 }
 0x527   :  { %v9888_v32 = vadd.f32 %v9887_v61, %v9886_v36  ;;  %v9877_v54 = vsel %vm9871_vm1, %v9757_v56, 0.0  ;;  %v9789_v8 = vrot.slane %v9761_v40, %v13089_v0  ;;  %v9790_v38 = vcombine.low %v9768_v5, %v9775_v46 }
 0x528   :  { %v9891_v50 = vsel %vm9871_vm1, %v9849_v23, 0.0  ;;  %v9876_v20 = vadd.f32 %v9875_v22, %v9874_v9  ;;  %v9791_v59 = vcombine.high %v9768_v5, %v9775_v46  ;;  %v9369_v49 = vrot.slane %v9359_v41, %v13089_v0 }
 0x529   :  { %v9890_v16 = vadd.f32 %v9889_v6, %v9888_v32  ;;  %v9792_v26 = vcombine.low %v9782_v18, %v9789_v8  ;;  %v9793_v17 = vcombine.high %v9782_v18, %v9789_v8  ;;  %v9800_v60 = vrot.slane %v9790_v38, %v13089_v0 }
 0x52a   :  { %v9878_v57 = vadd.f32 %v9877_v54, %v9876_v20  ;;  %v9807_v3 = vrot.slane %v9791_v59, %v13089_v0  ;;  %v9376_v4 = vrot.slane %v9361_v53, %v13089_v0  ;;  %v9383_v10 = vrot.slane %v9360_v35, %v13089_v0 }
 0x52b   :  { %v9892_v43 = vadd.f32 %v9891_v50, %v9890_v16  ;;  %v9814_v30 = vrot.slane %v9792_v26, %v13089_v0  ;;  %v9821_v41 = vrot.slane %v9793_v17, %v13089_v0  ;;  %v9390_v24 = vrot.slane %v9362_v2, %v13089_v0 }
 0x52c   :  { %9879 = vadd.xlane.f32.xlu1 %v9878_v57  ;;  %v9391_v45 = vcombine.high %v9369_v49, %v9369_v49  ;;  %v9392_v27 = vcombine.high %v9376_v4, %v9376_v4  ;;  %v9393_v51 = vcombine.high %v9383_v10, %v9383_v10  ;;  %v9630_v7 = vmul.f32 %v16804_v33, %v9369_v49 }
 0x52d   :  { %9893 = vadd.xlane.f32.xlu0 %v9892_v43  ;;  %v9822_v53 = vcombine.low %v9800_v60, %v9814_v30  ;;  %v9823_v12 = vcombine.high %v9800_v60, %v9814_v30  ;;  %v9824_v28 = vcombine.low %v9807_v3, %v9821_v41  ;;  %v9825_v34 = vcombine.high %v9807_v3, %v9821_v41 }
 0x52e   :  { %v9394_v42 = vcombine.high %v9390_v24, %v9390_v24  ;;  %v9631_v52 = vmul.f32 %v16810_v63, %v9383_v10  ;;  %v9632_v35 = vmul.f32 %v16828_v14, %v9391_v45  ;;  %v9633_v31 = vmul.f32 %v16839_v37, %v9393_v51 }
 0x52f   :  { %v9881_v58 = vadd.f32 %v9824_v28, %v9822_v53  ;;  %v9634_v2 = vmul.f32 %v16807_v39, %v9376_v4  ;;  %v9635_v13 = vmul.f32 %v16824_v25, %v9390_v24  ;;  %v9636_v48 = vmul.f32 %v16834_v29, %v9392_v27 }
 0x530   :  { %v9637_v33 = vmul.f32 %v16848_v15, %v9394_v42  ;;  %v9666_v44 = vcombine.low %v9630_v7, %v9631_v52  ;;  %v9667_v11 = vcombine.low %v9632_v35, %v9633_v31  ;;  %v11_v61 = vstv %s16942_s5 }
 0x531   :  { %v9882_v40 = vadd.f32 %v9881_v58, %v9823_v12  ;;  %v9668_v19 = vcombine.low %v9634_v2, %v9635_v13  ;;  %12 = vst [vmem:[#allocation2] sm:$0x1] %v11_v61 }
 0x532   :  { %v9669_v55 = vcombine.low %v9636_v48, %v9637_v33  ;;  %v9676_v63 = vrot.slane %v9666_v44, %v13089_v0  ;;  %v9683_v14 = vrot.slane %v9667_v11, %v13089_v0 }
 0x533   :  { %v9883_v62 = vadd.f32 %v9882_v40, %v9825_v34  ;;  %v9690_v37 = vrot.slane %v9668_v19, %v13089_v0 }
 0x534   :  { %v9697_v39 = vrot.slane %v9669_v55, %v13089_v0  ;;  %v9698_v5 = vcombine.low %v9676_v63, %v9683_v14  ;;  %v9699_v25 = vcombine.high %v9676_v63, %v9683_v14 }
 0x535   :  { %9884 = vadd.xlane.f32.xlu0 %v9883_v62 }
 0x536   :  { %v9700_v29 = vcombine.low %v9690_v37, %v9697_v39  ;;  %v9701_v1 = vcombine.high %v9690_v37, %v9697_v39  ;;  %v9708_v15 = vrot.slane %v9698_v5, %v13089_v0  ;;  %v9715_v47 = vrot.slane %v9699_v25, %v13089_v0 }
 0x538   :  { %v9722_v36 = vrot.slane %v9700_v29, %v13089_v0  ;;  %v9729_v46 = vrot.slane %v9701_v1, %v13089_v0  ;;  %v11058_v26 = vld [vmem:[#allocation2] ss:$0 sm:$0xff] }
 0x53a   :  { %v9730_v56 = vcombine.low %v9708_v15, %v9722_v36  ;;  %v9731_v21 = vcombine.high %v9708_v15, %v9722_v36  ;;  %v9732_v22 = vcombine.low %v9715_v47, %v9729_v46  ;;  %v9733_v18 = vcombine.high %v9715_v47, %v9729_v46 }
 0x53c   :  { %v9866_v23 = vadd.f32 %v9732_v22, %v9730_v56 }
 0x53e   :  { %v9867_v6 = vadd.f32 %v9866_v23, %v9731_v21 }
 0x540   :  { %v9868_v9 = vadd.f32 %v9867_v6, %v9733_v18 }
 0x542   :  { %9869 = vadd.xlane.f32.xlu1 %v9868_v9 }
 0x5b9   :  { %v9880_v20 = vpop.xlane.xlu1 %9879 }
 0x5ba   :  { %v9894_v32 = vpop.xlane.xlu0 %9893  ;;  %v9895_v17 = vsel %vm9871_vm1, %v9880_v20, 0.0 }
 0x5bb   :  { %v9903_v54 = vsel %vm9871_vm1, %v9894_v32, 0.0 }
 0x5c2   :  { %v9885_v8 = vpop.xlane.xlu0 %9884 }
 0x5c3   :  { %v9904_v38 = vadd.f32 %v9903_v54, %v9885_v8 }
 0x5c5   :  { %v9905_v50 = vrot.slane %v9904_v38, 4 }
 0x5c7   :  { %v9906_v0 = vadd.f32 %v9905_v50, %v9904_v38 }
 0x5c9   :  { %v9907_v59 = vrot.slane %v9906_v0, 2 }
 0x5cb   :  { %v9908_v49 = vadd.f32 %v9907_v59, %v9906_v0 }
 0x5cd   :  { %v9909_v16 = vrot.slane %v9908_v49, 1 }
 0x5cf   :  { %v9910_v60 = vadd.f32 %v9909_v16, %v9908_v49  ;;  %v9870_v57 = vpop.xlane.xlu1 %9869 }
 0x5d0   :  { %v9896_v3 = vadd.f32 %v9895_v17, %v9870_v57 }
 0x5d1   :  { %v9919_v4 = vadd.f32 %v11058_v26, %v9910_v60 }
 0x5d2   :  { %v9897_v10 = vrot.slane %v9896_v3, 4 }
 0x5d3   :  { %v11060_v30 = vmul.f32 -1.442695, %v9919_v4 }
 0x5d4   :  { %v9898_v43 = vadd.f32 %v9897_v10, %v9896_v3 }
 0x5d5   :  { %12854 = vpow2.f32 %v11060_v30 }
 0x5d6   :  { %v9899_v41 = vrot.slane %v9898_v43, 2 }
 0x5d8   :  { %v9900_v24 = vadd.f32 %v9899_v41, %v9898_v43 }
 0x5da   :  { %v9901_v45 = vrot.slane %v9900_v24, 1 }
 0x5dc   :  { %v9902_v27 = vadd.f32 %v9901_v45, %v9900_v24 }
 0x5de   :  { %v9918_v51 = vadd.f32 %v11058_v26, %v9902_v27 }
 0x5df   :  { %v12855_v53 = vpop.eup %12854 }
 0x5e0   :  { %v11059_v7 = vmul.f32 -1.442695, %v9918_v51  ;;  %v9927_v12 = vadd.f32 1.0, %v12855_v53 }
 0x5e2   :  { %12856 = vpow2.f32 %v11059_v7 }
 0x5e3   :  { %12858 = vrcp.f32 %v9927_v12 }
 0x5ec   :  { %v12857_v28 = vpop.eup %12856 }
 0x5ed   :  { %v9926_v34 = vadd.f32 1.0, %v12857_v28  ;;  %v12859_v42 = vpop.eup %12858 }
 0x5ee   :  { %v9934_v52 = vrot.slane %v12859_v42, 7 }
 0x5ef   :  { %12860 = vrcp.f32 %v9926_v34 }
 0x5f9   :  { %v12861_v35 = vpop.eup %12860 }
 0x5fa   :  { %v9936_v31 = vsel %vm9935_vm2, %v9934_v52, %v12861_v35 }
 0x5fb   :  { %9939 = vst.msk [vmem:[%s16943_s6] sm:$0x3] %vm9938_vm3, %v9936_v31 }

</bundles_post_ra>
